<compile_context>
chip_gen: v6e
topology: v6e:2x2x1
jax: 0.10.0
libtpu: 0.0.40
codegen_flags: <defaults>
</compile_context>

<pallas_src>
import functools

import numpy as np
import jax
import jax.numpy as jnp
from jax import lax
from jax.experimental import pallas as pl
from jax.experimental.pallas import tpu as pltpu


HEAD_LANES = 128  # lane-dense padded width of the merged V|A head output


# ----------------------------------------------------------------------------
# Offline parameter prep (done once, outside the hot path)
# ----------------------------------------------------------------------------
def expand_conv_weight(w_hwio, in_w):
    """(KH, KW, Cin, Cout) -> (KH, in_w*Cin, OW*Cout) block-Toeplitz matrices.

    With the activation row-flattened as x2[n, h, w*Cin + ci], the conv output
    row-flattened as y2[n, oh, ow*Cout + co] is
        y2[n, oh] = sum_kh  x2[n, oh + kh, :] @ Wbig[kh]
    where Wbig[kh][(ow+kw)*Cin + ci, ow*Cout + co] = w[kh, kw, ci, co].
    """
    KH, KW, Cin, Cout = w_hwio.shape
    OW = in_w - KW + 1
    w = np.asarray(w_hwio)
    big = np.zeros((KH, in_w * Cin, OW * Cout), np.float32)
    for kh in range(KH):
        for kw in range(KW):
            for ow in range(OW):
                big[kh,
                    (ow + kw) * Cin:(ow + kw + 1) * Cin,
                    ow * Cout:(ow + 1) * Cout] = w[kh, kw]
    return jnp.asarray(big)


def reorder_fc1_weight(wf1, C, OH, OW):
    """fc1 rows are in PyTorch NCHW flatten order (c, h, w); produce
    (OH, OW*C, F) chunks so the kernel can consume the NHWC-ordered activation
    rows directly:  wf1_r[oh, ow*C + c, f] == wf1[c*OH*OW + oh*OW + ow, f]."""
    F = wf1.shape[1]
    w4 = wf1.reshape(C, OH, OW, F)           # [c, oh, ow, f]
    w4 = jnp.transpose(w4, (1, 2, 0, 3))     # [oh, ow, c, f]
    return w4.reshape(OH, OW * C, F)


def prep_kernel_params(params, input_hw, n_actions):
    """Repack PyTorch-layout parameters into the fused-kernel layout."""
    H, W = input_hw
    w1, w2, w3 = params['w1'], params['w2'], params['w3']
    ow1 = W - w1.shape[1] + 1
    ow2 = ow1 - w2.shape[1] + 1
    ow3 = ow2 - w3.shape[1] + 1
    oh3 = (H - w1.shape[0] + 1 - w2.shape[0] + 1) - w3.shape[0] + 1
    c3 = w3.shape[3]

    head_w = 1 + n_actions
    assert head_w <= HEAD_LANES
    wva = jnp.concatenate([params['wV'], params['wA']], axis=1)   # (120, 1+A)
    bva = jnp.concatenate([params['bV'], params['bA']], axis=1)   # (1, 1+A)

    kp = {
        'w1': expand_conv_weight(w1, W),
        'b1': jnp.tile(params['b1'], (1, ow1)),
        'w2': expand_conv_weight(w2, ow1),
        'b2': jnp.tile(params['b2'], (1, ow2)),
        'w3': expand_conv_weight(w3, ow2),
        'b3': jnp.tile(params['b3'], (1, ow3)),
        'wf1': reorder_fc1_weight(params['wf1'], c3, oh3, ow3),
        'bf1': params['bf1'],
        'wf2': params['wf2'],
        'bf2': params['bf2'],
        'wva': jnp.pad(wva, ((0, 0), (0, HEAD_LANES - head_w))),
        'bva': jnp.pad(bva, ((0, 0), (0, HEAD_LANES - head_w))),
        'n_actions': n_actions,          # python int, stays static
    }
    return kp


# ----------------------------------------------------------------------------
# The single fused Pallas kernel: everything resident in VMEM.
# ----------------------------------------------------------------------------
def _dqn_fused_kernel(x_ref, w1_ref, b1_ref, w2_ref, b2_ref, w3_ref, b3_ref,
                      wf1_ref, bf1_ref, wf2_ref, bf2_ref, wva_ref, bva_ref,
                      out_ref, act1_ref, act2_ref, act3_ref):
    n_batch = x_ref.shape[0]

    def conv_relu(in_ref, w_ref, b_ref, out_act_ref):
        kh_taps = w_ref.shape[0]          # KH
        oh = out_act_ref.shape[1]         # output height
        bias = b_ref[...]                 # (1, OW*Cout), hoisted out of loops
        for n in range(n_batch):
            acc = jnp.dot(in_ref[n, 0:oh, :], w_ref[0],
                          preferred_element_type=jnp.float32)
            for kh in range(1, kh_taps):
                acc += jnp.dot(in_ref[n, kh:kh + oh, :], w_ref[kh],
                               preferred_element_type=jnp.float32)
            out_act_ref[n, :, :] = jnp.maximum(acc + bias, 0.0)

    conv_relu(x_ref, w1_ref, b1_ref, act1_ref)        # (N, 12, 12*20)
    conv_relu(act1_ref, w2_ref, b2_ref, act2_ref)     # (N, 10, 10*30)
    conv_relu(act2_ref, w3_ref, b3_ref, act3_ref)     # (N,  8,  8*30)

    # fc1: accumulate over conv3 output rows; NHWC flatten order is already
    # folded into wf1_ref offline, so no transpose/reshape of the activation.
    oh3 = act3_ref.shape[1]
    h = jnp.dot(act3_ref[:, 0, :], wf1_ref[0], preferred_element_type=jnp.float32)
    for r in range(1, oh3):
        h += jnp.dot(act3_ref[:, r, :], wf1_ref[r],
                     preferred_element_type=jnp.float32)
    h = jnp.maximum(h + bf1_ref[...], 0.0)

    # fc2
    h = jnp.maximum(jnp.dot(h, wf2_ref[...], preferred_element_type=jnp.float32)
                    + bf2_ref[...], 0.0)

    # merged (V | A) head, padded to a lane-dense 128-wide store
    out_ref[...] = (jnp.dot(h, wva_ref[...], preferred_element_type=jnp.float32)
                    + bva_ref[...]).astype(out_ref.dtype)


def dqn_forward(kp, state_nchw):
    """Fused DeepQNetwork forward.  Returns (V, A) like the PyTorch module."""
    N, C, H, W = state_nchw.shape
    # NCHW -> NHWC -> row-flattened (N, H, W*C): cheap glue on the tiny input.
    x2 = jnp.transpose(state_nchw, (0, 2, 3, 1)).reshape(N, H, W * C)

    kh1, kh2, kh3 = kp['w1'].shape[0], kp['w2'].shape[0], kp['w3'].shape[0]
    oh1 = H - kh1 + 1
    oh2 = oh1 - kh2 + 1
    oh3 = oh2 - kh3 + 1

    n_in = 13
    out = pl.pallas_call(
        _dqn_fused_kernel,
        out_shape=jax.ShapeDtypeStruct((N, HEAD_LANES), jnp.float32),
        in_specs=[pl.BlockSpec(memory_space=pltpu.MemorySpace.VMEM)] * n_in,
        out_specs=pl.BlockSpec(memory_space=pltpu.MemorySpace.VMEM),
        scratch_shapes=[
            pltpu.VMEM((N, oh1, kp['w1'].shape[2]), jnp.float32),   # conv1 act
            pltpu.VMEM((N, oh2, kp['w2'].shape[2]), jnp.float32),   # conv2 act
            pltpu.VMEM((N, oh3, kp['w3'].shape[2]), jnp.float32),   # conv3 act
        ],
    )(x2, kp['w1'], kp['b1'], kp['w2'], kp['b2'], kp['w3'], kp['b3'],
      kp['wf1'], kp['bf1'], kp['wf2'], kp['bf2'], kp['wva'], kp['bva'])

    V = out[:, :1]
    A = out[:, 1:1 + kp['n_actions']]
    return V, A


# ----------------------------------------------------------------------------
# Pure-JAX reference (PyTorch-equivalent semantics) for the correctness check.
# ----------------------------------------------------------------------------
def ref_forward(params, state_nchw):
    x = jnp.transpose(state_nchw, (0, 2, 3, 1))
    for wk, bk in (('w1', 'b1'), ('w2', 'b2'), ('w3', 'b3')):
        x = lax.conv_general_dilated(
            x, params[wk], window_strides=(1, 1), padding='VALID',
            dimension_numbers=('NHWC', 'HWIO', 'NHWC'))
        x = jnp.maximum(x + params[bk].reshape(1, 1, 1, -1), 0.0)
    N = x.shape[0]
    flat = jnp.transpose(x, (0, 3, 1, 2)).reshape(N, -1)   # PyTorch NCHW flatten
    h = jnp.maximum(flat @ params['wf1'] + params['bf1'], 0.0)
    h = jnp.maximum(h @ params['wf2'] + params['bf2'], 0.0)
    return h @ params['wV'] + params['bV'], h @ params['wA'] + params['bA']


if __name__ == "__main__":
    # Shapes consistent with the module: input_dims = (4, 16, 16), n_actions = 6,
    # batch = 2.  Spatial: 16 ->(5x5) 12 ->(3x3) 10 ->(3x3) 8;  fc_in = 30*8*8.
    N, C, H, W = 2, 4, 16, 16
    n_actions = 6
    fc_in = 30 * 8 * 8

    key = jax.random.PRNGKey(0)
    ks = jax.random.split(key, 14)

    def rnd(k, shape, scale=0.05):
        return jax.random.normal(k, shape, jnp.float32) * scale

    # Parameters in PyTorch-equivalent layout (HWIO convs, (in, out) linears).
    params = {
        'w1': rnd(ks[0], (5, 5, C, 20)),     'b1': rnd(ks[1], (1, 20)),
        'w2': rnd(ks[2], (3, 3, 20, 30)),    'b2': rnd(ks[3], (1, 30)),
        'w3': rnd(ks[4], (3, 3, 30, 30)),    'b3': rnd(ks[5], (1, 30)),
        'wf1': rnd(ks[6], (fc_in, 120)),     'bf1': rnd(ks[7], (1, 120)),
        'wf2': rnd(ks[8], (120, 120)),       'bf2': rnd(ks[9], (1, 120)),
        'wV': rnd(ks[10], (120, 1)),         'bV': rnd(ks[11], (1, 1)),
        'wA': rnd(ks[12], (120, n_actions)), 'bA': rnd(ks[13], (1, n_actions)),
    }

    x = jax.random.normal(jax.random.PRNGKey(1), (N, C, H, W), jnp.float32)

    # One-time parameter repack for the fused kernel, then a single-launch forward.
    kparams = prep_kernel_params(params, input_hw=(H, W), n_actions=n_actions)
    fwd = jax.jit(lambda s: dqn_forward(kparams, s))

    V, A = fwd(x)
    (V, A) = jax.block_until_ready((V, A))

    assert V.shape == (N, 1) and A.shape == (N, n_actions)
    Vr, Ar = ref_forward(params, x)
    np.testing.assert_allclose(np.asarray(V), np.asarray(Vr), rtol=1e-2, atol=1e-3)
    np.testing.assert_allclose(np.asarray(A), np.asarray(Ar), rtol=1e-2, atol=1e-3)

    # TODO(synk): optimizer (Adam), MSELoss and checkpoint save/load are training
    # utilities, not part of the forward pass; intentionally not kernelized.
    print("KERNEL_OK")
</pallas_src>

<mosaic_0001>
module attributes {stable_mosaic.version = 11 : i64} {
  func.func @_dqn_fused_kernel(%arg0: memref<2x16x64xf32, #tpu.memory_space<vmem>>, %arg1: memref<5x64x240xf32, #tpu.memory_space<vmem>>, %arg2: memref<1x240xf32, #tpu.memory_space<vmem>>, %arg3: memref<3x240x300xf32, #tpu.memory_space<vmem>>, %arg4: memref<1x300xf32, #tpu.memory_space<vmem>>, %arg5: memref<3x300x240xf32, #tpu.memory_space<vmem>>, %arg6: memref<1x240xf32, #tpu.memory_space<vmem>>, %arg7: memref<8x240x120xf32, #tpu.memory_space<vmem>>, %arg8: memref<1x120xf32, #tpu.memory_space<vmem>>, %arg9: memref<120x120xf32, #tpu.memory_space<vmem>>, %arg10: memref<1x120xf32, #tpu.memory_space<vmem>>, %arg11: memref<120x128xf32, #tpu.memory_space<vmem>>, %arg12: memref<1x128xf32, #tpu.memory_space<vmem>>, %arg13: memref<2x128xf32, #tpu.memory_space<vmem>>, %arg14: memref<2x12x240xf32, #tpu.memory_space<vmem>>, %arg15: memref<2x10x300xf32, #tpu.memory_space<vmem>>, %arg16: memref<2x8x240xf32, #tpu.memory_space<vmem>>) attributes {dimension_semantics = [], scalar_prefetch = 0 : i64, scratch_operands = 3 : i64, tpu.core_type = #tpu.core_type<tc>} {
    %c0 = arith.constant 0 : index
    %c0_0 = arith.constant 0 : index
    %0 = vector.load %arg2[%c0, %c0_0] : memref<1x240xf32, #tpu.memory_space<vmem>>, vector<1x240xf32>
    %c0_1 = arith.constant 0 : index
    %c0_2 = arith.constant 0 : index
    %c0_3 = arith.constant 0 : index
    %1 = vector.load %arg0[%c0_1, %c0_2, %c0_3] : memref<2x16x64xf32, #tpu.memory_space<vmem>>, vector<1x12x64xf32>
    %2 = vector.shape_cast %1 : vector<1x12x64xf32> to vector<12x64xf32>
    %c0_4 = arith.constant 0 : index
    %c0_5 = arith.constant 0 : index
    %c0_6 = arith.constant 0 : index
    %3 = vector.load %arg1[%c0_4, %c0_5, %c0_6] : memref<5x64x240xf32, #tpu.memory_space<vmem>>, vector<1x64x240xf32>
    %4 = vector.shape_cast %3 : vector<1x64x240xf32> to vector<64x240xf32>
    %cst = arith.constant dense<0.000000e+00> : vector<12x240xf32>
    %5 = tpu.matmul %2, %4, %cst {dimension_numbers = #tpu.dot_dimension_numbers<[1], [0], [0], [1], [0, 0, 1, 1], [], []>} : vector<12x64xf32>, vector<64x240xf32>, vector<12x240xf32> -> vector<12x240xf32>
    %c0_7 = arith.constant 0 : index
    %c1 = arith.constant 1 : index
    %c0_8 = arith.constant 0 : index
    %6 = vector.load %arg0[%c0_7, %c1, %c0_8] : memref<2x16x64xf32, #tpu.memory_space<vmem>>, vector<1x12x64xf32>
    %7 = vector.shape_cast %6 : vector<1x12x64xf32> to vector<12x64xf32>
    %c1_9 = arith.constant 1 : index
    %c0_10 = arith.constant 0 : index
    %c0_11 = arith.constant 0 : index
    %8 = vector.load %arg1[%c1_9, %c0_10, %c0_11] : memref<5x64x240xf32, #tpu.memory_space<vmem>>, vector<1x64x240xf32>
    %9 = vector.shape_cast %8 : vector<1x64x240xf32> to vector<64x240xf32>
    %cst_12 = arith.constant dense<0.000000e+00> : vector<12x240xf32>
    %10 = tpu.matmul %7, %9, %cst_12 {dimension_numbers = #tpu.dot_dimension_numbers<[1], [0], [0], [1], [0, 0, 1, 1], [], []>} : vector<12x64xf32>, vector<64x240xf32>, vector<12x240xf32> -> vector<12x240xf32>
    %11 = arith.addf %5, %10 : vector<12x240xf32>
    %c0_13 = arith.constant 0 : index
    %c2 = arith.constant 2 : index
    %c0_14 = arith.constant 0 : index
    %12 = vector.load %arg0[%c0_13, %c2, %c0_14] : memref<2x16x64xf32, #tpu.memory_space<vmem>>, vector<1x12x64xf32>
    %13 = vector.shape_cast %12 : vector<1x12x64xf32> to vector<12x64xf32>
    %c2_15 = arith.constant 2 : index
    %c0_16 = arith.constant 0 : index
    %c0_17 = arith.constant 0 : index
    %14 = vector.load %arg1[%c2_15, %c0_16, %c0_17] : memref<5x64x240xf32, #tpu.memory_space<vmem>>, vector<1x64x240xf32>
    %15 = vector.shape_cast %14 : vector<1x64x240xf32> to vector<64x240xf32>
    %cst_18 = arith.constant dense<0.000000e+00> : vector<12x240xf32>
    %16 = tpu.matmul %13, %15, %cst_18 {dimension_numbers = #tpu.dot_dimension_numbers<[1], [0], [0], [1], [0, 0, 1, 1], [], []>} : vector<12x64xf32>, vector<64x240xf32>, vector<12x240xf32> -> vector<12x240xf32>
    %17 = arith.addf %11, %16 : vector<12x240xf32>
    %c0_19 = arith.constant 0 : index
    %c3 = arith.constant 3 : index
    %c0_20 = arith.constant 0 : index
    %18 = vector.load %arg0[%c0_19, %c3, %c0_20] : memref<2x16x64xf32, #tpu.memory_space<vmem>>, vector<1x12x64xf32>
    %19 = vector.shape_cast %18 : vector<1x12x64xf32> to vector<12x64xf32>
    %c3_21 = arith.constant 3 : index
    %c0_22 = arith.constant 0 : index
    %c0_23 = arith.constant 0 : index
    %20 = vector.load %arg1[%c3_21, %c0_22, %c0_23] : memref<5x64x240xf32, #tpu.memory_space<vmem>>, vector<1x64x240xf32>
    %21 = vector.shape_cast %20 : vector<1x64x240xf32> to vector<64x240xf32>
    %cst_24 = arith.constant dense<0.000000e+00> : vector<12x240xf32>
    %22 = tpu.matmul %19, %21, %cst_24 {dimension_numbers = #tpu.dot_dimension_numbers<[1], [0], [0], [1], [0, 0, 1, 1], [], []>} : vector<12x64xf32>, vector<64x240xf32>, vector<12x240xf32> -> vector<12x240xf32>
    %23 = arith.addf %17, %22 : vector<12x240xf32>
    %c0_25 = arith.constant 0 : index
    %c4 = arith.constant 4 : index
    %c0_26 = arith.constant 0 : index
    %24 = vector.load %arg0[%c0_25, %c4, %c0_26] : memref<2x16x64xf32, #tpu.memory_space<vmem>>, vector<1x12x64xf32>
    %25 = vector.shape_cast %24 : vector<1x12x64xf32> to vector<12x64xf32>
    %c4_27 = arith.constant 4 : index
    %c0_28 = arith.constant 0 : index
    %c0_29 = arith.constant 0 : index
    %26 = vector.load %arg1[%c4_27, %c0_28, %c0_29] : memref<5x64x240xf32, #tpu.memory_space<vmem>>, vector<1x64x240xf32>
    %27 = vector.shape_cast %26 : vector<1x64x240xf32> to vector<64x240xf32>
    %cst_30 = arith.constant dense<0.000000e+00> : vector<12x240xf32>
    %28 = tpu.matmul %25, %27, %cst_30 {dimension_numbers = #tpu.dot_dimension_numbers<[1], [0], [0], [1], [0, 0, 1, 1], [], []>} : vector<12x64xf32>, vector<64x240xf32>, vector<12x240xf32> -> vector<12x240xf32>
    %29 = arith.addf %23, %28 : vector<12x240xf32>
    %30 = vector.broadcast %0 : vector<1x240xf32> to vector<12x240xf32>
    %31 = arith.addf %29, %30 : vector<12x240xf32>
    %cst_31 = arith.constant 0.000000e+00 : f32
    %32 = vector.broadcast %cst_31 : f32 to vector<12x240xf32>
    %33 = arith.maximumf %31, %32 : vector<12x240xf32>
    %c0_32 = arith.constant 0 : index
    %c0_33 = arith.constant 0 : index
    %c0_34 = arith.constant 0 : index
    %34 = vector.load %arg14[%c0_32, %c0_33, %c0_34] : memref<2x12x240xf32, #tpu.memory_space<vmem>>, vector<1x12x240xf32>
    %35 = vector.shape_cast %34 : vector<1x12x240xf32> to vector<12x240xf32>
    %36 = vector.shape_cast %33 : vector<12x240xf32> to vector<1x12x240xf32>
    tpu.vector_store %arg14[%c0_32, %c0_33, %c0_34], %36 {strides = array<i32>} : memref<2x12x240xf32, #tpu.memory_space<vmem>>, vector<1x12x240xf32>,
    %c1_35 = arith.constant 1 : index
    %c0_36 = arith.constant 0 : index
    %c0_37 = arith.constant 0 : index
    %37 = vector.load %arg0[%c1_35, %c0_36, %c0_37] : memref<2x16x64xf32, #tpu.memory_space<vmem>>, vector<1x12x64xf32>
    %38 = vector.shape_cast %37 : vector<1x12x64xf32> to vector<12x64xf32>
    %c0_38 = arith.constant 0 : index
    %c0_39 = arith.constant 0 : index
    %c0_40 = arith.constant 0 : index
    %39 = vector.load %arg1[%c0_38, %c0_39, %c0_40] : memref<5x64x240xf32, #tpu.memory_space<vmem>>, vector<1x64x240xf32>
    %40 = vector.shape_cast %39 : vector<1x64x240xf32> to vector<64x240xf32>
    %cst_41 = arith.constant dense<0.000000e+00> : vector<12x240xf32>
    %41 = tpu.matmul %38, %40, %cst_41 {dimension_numbers = #tpu.dot_dimension_numbers<[1], [0], [0], [1], [0, 0, 1, 1], [], []>} : vector<12x64xf32>, vector<64x240xf32>, vector<12x240xf32> -> vector<12x240xf32>
    %c1_42 = arith.constant 1 : index
    %c1_43 = arith.constant 1 : index
    %c0_44 = arith.constant 0 : index
    %42 = vector.load %arg0[%c1_42, %c1_43, %c0_44] : memref<2x16x64xf32, #tpu.memory_space<vmem>>, vector<1x12x64xf32>
    %43 = vector.shape_cast %42 : vector<1x12x64xf32> to vector<12x64xf32>
    %c1_45 = arith.constant 1 : index
    %c0_46 = arith.constant 0 : index
    %c0_47 = arith.constant 0 : index
    %44 = vector.load %arg1[%c1_45, %c0_46, %c0_47] : memref<5x64x240xf32, #tpu.memory_space<vmem>>, vector<1x64x240xf32>
    %45 = vector.shape_cast %44 : vector<1x64x240xf32> to vector<64x240xf32>
    %cst_48 = arith.constant dense<0.000000e+00> : vector<12x240xf32>
    %46 = tpu.matmul %43, %45, %cst_48 {dimension_numbers = #tpu.dot_dimension_numbers<[1], [0], [0], [1], [0, 0, 1, 1], [], []>} : vector<12x64xf32>, vector<64x240xf32>, vector<12x240xf32> -> vector<12x240xf32>
    %47 = arith.addf %41, %46 : vector<12x240xf32>
    %c1_49 = arith.constant 1 : index
    %c2_50 = arith.constant 2 : index
    %c0_51 = arith.constant 0 : index
    %48 = vector.load %arg0[%c1_49, %c2_50, %c0_51] : memref<2x16x64xf32, #tpu.memory_space<vmem>>, vector<1x12x64xf32>
    %49 = vector.shape_cast %48 : vector<1x12x64xf32> to vector<12x64xf32>
    %c2_52 = arith.constant 2 : index
    %c0_53 = arith.constant 0 : index
    %c0_54 = arith.constant 0 : index
    %50 = vector.load %arg1[%c2_52, %c0_53, %c0_54] : memref<5x64x240xf32, #tpu.memory_space<vmem>>, vector<1x64x240xf32>
    %51 = vector.shape_cast %50 : vector<1x64x240xf32> to vector<64x240xf32>
    %cst_55 = arith.constant dense<0.000000e+00> : vector<12x240xf32>
    %52 = tpu.matmul %49, %51, %cst_55 {dimension_numbers = #tpu.dot_dimension_numbers<[1], [0], [0], [1], [0, 0, 1, 1], [], []>} : vector<12x64xf32>, vector<64x240xf32>, vector<12x240xf32> -> vector<12x240xf32>
    %53 = arith.addf %47, %52 : vector<12x240xf32>
    %c1_56 = arith.constant 1 : index
    %c3_57 = arith.constant 3 : index
    %c0_58 = arith.constant 0 : index
    %54 = vector.load %arg0[%c1_56, %c3_57, %c0_58] : memref<2x16x64xf32, #tpu.memory_space<vmem>>, vector<1x12x64xf32>
    %55 = vector.shape_cast %54 : vector<1x12x64xf32> to vector<12x64xf32>
    %c3_59 = arith.constant 3 : index
    %c0_60 = arith.constant 0 : index
    %c0_61 = arith.constant 0 : index
    %56 = vector.load %arg1[%c3_59, %c0_60, %c0_61] : memref<5x64x240xf32, #tpu.memory_space<vmem>>, vector<1x64x240xf32>
    %57 = vector.shape_cast %56 : vector<1x64x240xf32> to vector<64x240xf32>
    %cst_62 = arith.constant dense<0.000000e+00> : vector<12x240xf32>
    %58 = tpu.matmul %55, %57, %cst_62 {dimension_numbers = #tpu.dot_dimension_numbers<[1], [0], [0], [1], [0, 0, 1, 1], [], []>} : vector<12x64xf32>, vector<64x240xf32>, vector<12x240xf32> -> vector<12x240xf32>
    %59 = arith.addf %53, %58 : vector<12x240xf32>
    %c1_63 = arith.constant 1 : index
    %c4_64 = arith.constant 4 : index
    %c0_65 = arith.constant 0 : index
    %60 = vector.load %arg0[%c1_63, %c4_64, %c0_65] : memref<2x16x64xf32, #tpu.memory_space<vmem>>, vector<1x12x64xf32>
    %61 = vector.shape_cast %60 : vector<1x12x64xf32> to vector<12x64xf32>
    %c4_66 = arith.constant 4 : index
    %c0_67 = arith.constant 0 : index
    %c0_68 = arith.constant 0 : index
    %62 = vector.load %arg1[%c4_66, %c0_67, %c0_68] : memref<5x64x240xf32, #tpu.memory_space<vmem>>, vector<1x64x240xf32>
    %63 = vector.shape_cast %62 : vector<1x64x240xf32> to vector<64x240xf32>
    %cst_69 = arith.constant dense<0.000000e+00> : vector<12x240xf32>
    %64 = tpu.matmul %61, %63, %cst_69 {dimension_numbers = #tpu.dot_dimension_numbers<[1], [0], [0], [1], [0, 0, 1, 1], [], []>} : vector<12x64xf32>, vector<64x240xf32>, vector<12x240xf32> -> vector<12x240xf32>
    %65 = arith.addf %59, %64 : vector<12x240xf32>
    %66 = vector.broadcast %0 : vector<1x240xf32> to vector<12x240xf32>
    %67 = arith.addf %65, %66 : vector<12x240xf32>
    %cst_70 = arith.constant 0.000000e+00 : f32
    %68 = vector.broadcast %cst_70 : f32 to vector<12x240xf32>
    %69 = arith.maximumf %67, %68 : vector<12x240xf32>
    %c1_71 = arith.constant 1 : index
    %c0_72 = arith.constant 0 : index
    %c0_73 = arith.constant 0 : index
    %70 = vector.load %arg14[%c1_71, %c0_72, %c0_73] : memref<2x12x240xf32, #tpu.memory_space<vmem>>, vector<1x12x240xf32>
    %71 = vector.shape_cast %70 : vector<1x12x240xf32> to vector<12x240xf32>
    %72 = vector.shape_cast %69 : vector<12x240xf32> to vector<1x12x240xf32>
    tpu.vector_store %arg14[%c1_71, %c0_72, %c0_73], %72 {strides = array<i32>} : memref<2x12x240xf32, #tpu.memory_space<vmem>>, vector<1x12x240xf32>,
    %c0_74 = arith.constant 0 : index
    %c0_75 = arith.constant 0 : index
    %73 = vector.load %arg4[%c0_74, %c0_75] : memref<1x300xf32, #tpu.memory_space<vmem>>, vector<1x300xf32>
    %c0_76 = arith.constant 0 : index
    %c0_77 = arith.constant 0 : index
    %c0_78 = arith.constant 0 : index
    %74 = vector.load %arg14[%c0_76, %c0_77, %c0_78] : memref<2x12x240xf32, #tpu.memory_space<vmem>>, vector<1x10x240xf32>
    %75 = vector.shape_cast %74 : vector<1x10x240xf32> to vector<10x240xf32>
    %c0_79 = arith.constant 0 : index
    %c0_80 = arith.constant 0 : index
    %c0_81 = arith.constant 0 : index
    %76 = vector.load %arg3[%c0_79, %c0_80, %c0_81] : memref<3x240x300xf32, #tpu.memory_space<vmem>>, vector<1x240x300xf32>
    %77 = vector.shape_cast %76 : vector<1x240x300xf32> to vector<240x300xf32>
    %cst_82 = arith.constant dense<0.000000e+00> : vector<10x300xf32>
    %78 = tpu.matmul %75, %77, %cst_82 {dimension_numbers = #tpu.dot_dimension_numbers<[1], [0], [0], [1], [0, 0, 1, 1], [], []>} : vector<10x240xf32>, vector<240x300xf32>, vector<10x300xf32> -> vector<10x300xf32>
    %c0_83 = arith.constant 0 : index
    %c1_84 = arith.constant 1 : index
    %c0_85 = arith.constant 0 : index
    %79 = vector.load %arg14[%c0_83, %c1_84, %c0_85] : memref<2x12x240xf32, #tpu.memory_space<vmem>>, vector<1x10x240xf32>
    %80 = vector.shape_cast %79 : vector<1x10x240xf32> to vector<10x240xf32>
    %c1_86 = arith.constant 1 : index
    %c0_87 = arith.constant 0 : index
    %c0_88 = arith.constant 0 : index
    %81 = vector.load %arg3[%c1_86, %c0_87, %c0_88] : memref<3x240x300xf32, #tpu.memory_space<vmem>>, vector<1x240x300xf32>
    %82 = vector.shape_cast %81 : vector<1x240x300xf32> to vector<240x300xf32>
    %cst_89 = arith.constant dense<0.000000e+00> : vector<10x300xf32>
    %83 = tpu.matmul %80, %82, %cst_89 {dimension_numbers = #tpu.dot_dimension_numbers<[1], [0], [0], [1], [0, 0, 1, 1], [], []>} : vector<10x240xf32>, vector<240x300xf32>, vector<10x300xf32> -> vector<10x300xf32>
    %84 = arith.addf %78, %83 : vector<10x300xf32>
    %c0_90 = arith.constant 0 : index
    %c2_91 = arith.constant 2 : index
    %c0_92 = arith.constant 0 : index
    %85 = vector.load %arg14[%c0_90, %c2_91, %c0_92] : memref<2x12x240xf32, #tpu.memory_space<vmem>>, vector<1x10x240xf32>
    %86 = vector.shape_cast %85 : vector<1x10x240xf32> to vector<10x240xf32>
    %c2_93 = arith.constant 2 : index
    %c0_94 = arith.constant 0 : index
    %c0_95 = arith.constant 0 : index
    %87 = vector.load %arg3[%c2_93, %c0_94, %c0_95] : memref<3x240x300xf32, #tpu.memory_space<vmem>>, vector<1x240x300xf32>
    %88 = vector.shape_cast %87 : vector<1x240x300xf32> to vector<240x300xf32>
    %cst_96 = arith.constant dense<0.000000e+00> : vector<10x300xf32>
    %89 = tpu.matmul %86, %88, %cst_96 {dimension_numbers = #tpu.dot_dimension_numbers<[1], [0], [0], [1], [0, 0, 1, 1], [], []>} : vector<10x240xf32>, vector<240x300xf32>, vector<10x300xf32> -> vector<10x300xf32>
    %90 = arith.addf %84, %89 : vector<10x300xf32>
    %91 = vector.broadcast %73 : vector<1x300xf32> to vector<10x300xf32>
    %92 = arith.addf %90, %91 : vector<10x300xf32>
    %cst_97 = arith.constant 0.000000e+00 : f32
    %93 = vector.broadcast %cst_97 : f32 to vector<10x300xf32>
    %94 = arith.maximumf %92, %93 : vector<10x300xf32>
    %c0_98 = arith.constant 0 : index
    %c0_99 = arith.constant 0 : index
    %c0_100 = arith.constant 0 : index
    %95 = vector.load %arg15[%c0_98, %c0_99, %c0_100] : memref<2x10x300xf32, #tpu.memory_space<vmem>>, vector<1x10x300xf32>
    %96 = vector.shape_cast %95 : vector<1x10x300xf32> to vector<10x300xf32>
    %97 = vector.shape_cast %94 : vector<10x300xf32> to vector<1x10x300xf32>
    tpu.vector_store %arg15[%c0_98, %c0_99, %c0_100], %97 {strides = array<i32>} : memref<2x10x300xf32, #tpu.memory_space<vmem>>, vector<1x10x300xf32>,
    %c1_101 = arith.constant 1 : index
    %c0_102 = arith.constant 0 : index
    %c0_103 = arith.constant 0 : index
    %98 = vector.load %arg14[%c1_101, %c0_102, %c0_103] : memref<2x12x240xf32, #tpu.memory_space<vmem>>, vector<1x10x240xf32>
    %99 = vector.shape_cast %98 : vector<1x10x240xf32> to vector<10x240xf32>
    %c0_104 = arith.constant 0 : index
    %c0_105 = arith.constant 0 : index
    %c0_106 = arith.constant 0 : index
    %100 = vector.load %arg3[%c0_104, %c0_105, %c0_106] : memref<3x240x300xf32, #tpu.memory_space<vmem>>, vector<1x240x300xf32>
    %101 = vector.shape_cast %100 : vector<1x240x300xf32> to vector<240x300xf32>
    %cst_107 = arith.constant dense<0.000000e+00> : vector<10x300xf32>
    %102 = tpu.matmul %99, %101, %cst_107 {dimension_numbers = #tpu.dot_dimension_numbers<[1], [0], [0], [1], [0, 0, 1, 1], [], []>} : vector<10x240xf32>, vector<240x300xf32>, vector<10x300xf32> -> vector<10x300xf32>
    %c1_108 = arith.constant 1 : index
    %c1_109 = arith.constant 1 : index
    %c0_110 = arith.constant 0 : index
    %103 = vector.load %arg14[%c1_108, %c1_109, %c0_110] : memref<2x12x240xf32, #tpu.memory_space<vmem>>, vector<1x10x240xf32>
    %104 = vector.shape_cast %103 : vector<1x10x240xf32> to vector<10x240xf32>
    %c1_111 = arith.constant 1 : index
    %c0_112 = arith.constant 0 : index
    %c0_113 = arith.constant 0 : index
    %105 = vector.load %arg3[%c1_111, %c0_112, %c0_113] : memref<3x240x300xf32, #tpu.memory_space<vmem>>, vector<1x240x300xf32>
    %106 = vector.shape_cast %105 : vector<1x240x300xf32> to vector<240x300xf32>
    %cst_114 = arith.constant dense<0.000000e+00> : vector<10x300xf32>
    %107 = tpu.matmul %104, %106, %cst_114 {dimension_numbers = #tpu.dot_dimension_numbers<[1], [0], [0], [1], [0, 0, 1, 1], [], []>} : vector<10x240xf32>, vector<240x300xf32>, vector<10x300xf32> -> vector<10x300xf32>
    %108 = arith.addf %102, %107 : vector<10x300xf32>
    %c1_115 = arith.constant 1 : index
    %c2_116 = arith.constant 2 : index
    %c0_117 = arith.constant 0 : index
    %109 = vector.load %arg14[%c1_115, %c2_116, %c0_117] : memref<2x12x240xf32, #tpu.memory_space<vmem>>, vector<1x10x240xf32>
    %110 = vector.shape_cast %109 : vector<1x10x240xf32> to vector<10x240xf32>
    %c2_118 = arith.constant 2 : index
    %c0_119 = arith.constant 0 : index
    %c0_120 = arith.constant 0 : index
    %111 = vector.load %arg3[%c2_118, %c0_119, %c0_120] : memref<3x240x300xf32, #tpu.memory_space<vmem>>, vector<1x240x300xf32>
    %112 = vector.shape_cast %111 : vector<1x240x300xf32> to vector<240x300xf32>
    %cst_121 = arith.constant dense<0.000000e+00> : vector<10x300xf32>
    %113 = tpu.matmul %110, %112, %cst_121 {dimension_numbers = #tpu.dot_dimension_numbers<[1], [0], [0], [1], [0, 0, 1, 1], [], []>} : vector<10x240xf32>, vector<240x300xf32>, vector<10x300xf32> -> vector<10x300xf32>
    %114 = arith.addf %108, %113 : vector<10x300xf32>
    %115 = vector.broadcast %73 : vector<1x300xf32> to vector<10x300xf32>
    %116 = arith.addf %114, %115 : vector<10x300xf32>
    %cst_122 = arith.constant 0.000000e+00 : f32
    %117 = vector.broadcast %cst_122 : f32 to vector<10x300xf32>
    %118 = arith.maximumf %116, %117 : vector<10x300xf32>
    %c1_123 = arith.constant 1 : index
    %c0_124 = arith.constant 0 : index
    %c0_125 = arith.constant 0 : index
    %119 = vector.load %arg15[%c1_123, %c0_124, %c0_125] : memref<2x10x300xf32, #tpu.memory_space<vmem>>, vector<1x10x300xf32>
    %120 = vector.shape_cast %119 : vector<1x10x300xf32> to vector<10x300xf32>
    %121 = vector.shape_cast %118 : vector<10x300xf32> to vector<1x10x300xf32>
    tpu.vector_store %arg15[%c1_123, %c0_124, %c0_125], %121 {strides = array<i32>} : memref<2x10x300xf32, #tpu.memory_space<vmem>>, vector<1x10x300xf32>,
    %c0_126 = arith.constant 0 : index
    %c0_127 = arith.constant 0 : index
    %122 = vector.load %arg6[%c0_126, %c0_127] : memref<1x240xf32, #tpu.memory_space<vmem>>, vector<1x240xf32>
    %c0_128 = arith.constant 0 : index
    %c0_129 = arith.constant 0 : index
    %c0_130 = arith.constant 0 : index
    %123 = vector.load %arg15[%c0_128, %c0_129, %c0_130] : memref<2x10x300xf32, #tpu.memory_space<vmem>>, vector<1x8x300xf32>
    %124 = vector.shape_cast %123 : vector<1x8x300xf32> to vector<8x300xf32>
    %c0_131 = arith.constant 0 : index
    %c0_132 = arith.constant 0 : index
    %c0_133 = arith.constant 0 : index
    %125 = vector.load %arg5[%c0_131, %c0_132, %c0_133] : memref<3x300x240xf32, #tpu.memory_space<vmem>>, vector<1x300x240xf32>
    %126 = vector.shape_cast %125 : vector<1x300x240xf32> to vector<300x240xf32>
    %cst_134 = arith.constant dense<0.000000e+00> : vector<8x240xf32>
    %127 = tpu.matmul %124, %126, %cst_134 {dimension_numbers = #tpu.dot_dimension_numbers<[1], [0], [0], [1], [0, 0, 1, 1], [], []>} : vector<8x300xf32>, vector<300x240xf32>, vector<8x240xf32> -> vector<8x240xf32>
    %c0_135 = arith.constant 0 : index
    %c1_136 = arith.constant 1 : index
    %c0_137 = arith.constant 0 : index
    %128 = vector.load %arg15[%c0_135, %c1_136, %c0_137] : memref<2x10x300xf32, #tpu.memory_space<vmem>>, vector<1x8x300xf32>
    %129 = vector.shape_cast %128 : vector<1x8x300xf32> to vector<8x300xf32>
    %c1_138 = arith.constant 1 : index
    %c0_139 = arith.constant 0 : index
    %c0_140 = arith.constant 0 : index
    %130 = vector.load %arg5[%c1_138, %c0_139, %c0_140] : memref<3x300x240xf32, #tpu.memory_space<vmem>>, vector<1x300x240xf32>
    %131 = vector.shape_cast %130 : vector<1x300x240xf32> to vector<300x240xf32>
    %cst_141 = arith.constant dense<0.000000e+00> : vector<8x240xf32>
    %132 = tpu.matmul %129, %131, %cst_141 {dimension_numbers = #tpu.dot_dimension_numbers<[1], [0], [0], [1], [0, 0, 1, 1], [], []>} : vector<8x300xf32>, vector<300x240xf32>, vector<8x240xf32> -> vector<8x240xf32>
    %133 = arith.addf %127, %132 : vector<8x240xf32>
    %c0_142 = arith.constant 0 : index
    %c2_143 = arith.constant 2 : index
    %c0_144 = arith.constant 0 : index
    %134 = vector.load %arg15[%c0_142, %c2_143, %c0_144] : memref<2x10x300xf32, #tpu.memory_space<vmem>>, vector<1x8x300xf32>
    %135 = vector.shape_cast %134 : vector<1x8x300xf32> to vector<8x300xf32>
    %c2_145 = arith.constant 2 : index
    %c0_146 = arith.constant 0 : index
    %c0_147 = arith.constant 0 : index
    %136 = vector.load %arg5[%c2_145, %c0_146, %c0_147] : memref<3x300x240xf32, #tpu.memory_space<vmem>>, vector<1x300x240xf32>
    %137 = vector.shape_cast %136 : vector<1x300x240xf32> to vector<300x240xf32>
    %cst_148 = arith.constant dense<0.000000e+00> : vector<8x240xf32>
    %138 = tpu.matmul %135, %137, %cst_148 {dimension_numbers = #tpu.dot_dimension_numbers<[1], [0], [0], [1], [0, 0, 1, 1], [], []>} : vector<8x300xf32>, vector<300x240xf32>, vector<8x240xf32> -> vector<8x240xf32>
    %139 = arith.addf %133, %138 : vector<8x240xf32>
    %140 = vector.broadcast %122 : vector<1x240xf32> to vector<8x240xf32>
    %141 = arith.addf %139, %140 : vector<8x240xf32>
    %cst_149 = arith.constant 0.000000e+00 : f32
    %142 = vector.broadcast %cst_149 : f32 to vector<8x240xf32>
    %143 = arith.maximumf %141, %142 : vector<8x240xf32>
    %c0_150 = arith.constant 0 : index
    %c0_151 = arith.constant 0 : index
    %c0_152 = arith.constant 0 : index
    %144 = vector.load %arg16[%c0_150, %c0_151, %c0_152] : memref<2x8x240xf32, #tpu.memory_space<vmem>>, vector<1x8x240xf32>
    %145 = vector.shape_cast %144 : vector<1x8x240xf32> to vector<8x240xf32>
    %146 = vector.shape_cast %143 : vector<8x240xf32> to vector<1x8x240xf32>
    tpu.vector_store %arg16[%c0_150, %c0_151, %c0_152], %146 {strides = array<i32>} : memref<2x8x240xf32, #tpu.memory_space<vmem>>, vector<1x8x240xf32>,
    %c1_153 = arith.constant 1 : index
    %c0_154 = arith.constant 0 : index
    %c0_155 = arith.constant 0 : index
    %147 = vector.load %arg15[%c1_153, %c0_154, %c0_155] : memref<2x10x300xf32, #tpu.memory_space<vmem>>, vector<1x8x300xf32>
    %148 = vector.shape_cast %147 : vector<1x8x300xf32> to vector<8x300xf32>
    %c0_156 = arith.constant 0 : index
    %c0_157 = arith.constant 0 : index
    %c0_158 = arith.constant 0 : index
    %149 = vector.load %arg5[%c0_156, %c0_157, %c0_158] : memref<3x300x240xf32, #tpu.memory_space<vmem>>, vector<1x300x240xf32>
    %150 = vector.shape_cast %149 : vector<1x300x240xf32> to vector<300x240xf32>
    %cst_159 = arith.constant dense<0.000000e+00> : vector<8x240xf32>
    %151 = tpu.matmul %148, %150, %cst_159 {dimension_numbers = #tpu.dot_dimension_numbers<[1], [0], [0], [1], [0, 0, 1, 1], [], []>} : vector<8x300xf32>, vector<300x240xf32>, vector<8x240xf32> -> vector<8x240xf32>
    %c1_160 = arith.constant 1 : index
    %c1_161 = arith.constant 1 : index
    %c0_162 = arith.constant 0 : index
    %152 = vector.load %arg15[%c1_160, %c1_161, %c0_162] : memref<2x10x300xf32, #tpu.memory_space<vmem>>, vector<1x8x300xf32>
    %153 = vector.shape_cast %152 : vector<1x8x300xf32> to vector<8x300xf32>
    %c1_163 = arith.constant 1 : index
    %c0_164 = arith.constant 0 : index
    %c0_165 = arith.constant 0 : index
    %154 = vector.load %arg5[%c1_163, %c0_164, %c0_165] : memref<3x300x240xf32, #tpu.memory_space<vmem>>, vector<1x300x240xf32>
    %155 = vector.shape_cast %154 : vector<1x300x240xf32> to vector<300x240xf32>
    %cst_166 = arith.constant dense<0.000000e+00> : vector<8x240xf32>
    %156 = tpu.matmul %153, %155, %cst_166 {dimension_numbers = #tpu.dot_dimension_numbers<[1], [0], [0], [1], [0, 0, 1, 1], [], []>} : vector<8x300xf32>, vector<300x240xf32>, vector<8x240xf32> -> vector<8x240xf32>
    %157 = arith.addf %151, %156 : vector<8x240xf32>
    %c1_167 = arith.constant 1 : index
    %c2_168 = arith.constant 2 : index
    %c0_169 = arith.constant 0 : index
    %158 = vector.load %arg15[%c1_167, %c2_168, %c0_169] : memref<2x10x300xf32, #tpu.memory_space<vmem>>, vector<1x8x300xf32>
    %159 = vector.shape_cast %158 : vector<1x8x300xf32> to vector<8x300xf32>
    %c2_170 = arith.constant 2 : index
    %c0_171 = arith.constant 0 : index
    %c0_172 = arith.constant 0 : index
    %160 = vector.load %arg5[%c2_170, %c0_171, %c0_172] : memref<3x300x240xf32, #tpu.memory_space<vmem>>, vector<1x300x240xf32>
    %161 = vector.shape_cast %160 : vector<1x300x240xf32> to vector<300x240xf32>
    %cst_173 = arith.constant dense<0.000000e+00> : vector<8x240xf32>
    %162 = tpu.matmul %159, %161, %cst_173 {dimension_numbers = #tpu.dot_dimension_numbers<[1], [0], [0], [1], [0, 0, 1, 1], [], []>} : vector<8x300xf32>, vector<300x240xf32>, vector<8x240xf32> -> vector<8x240xf32>
    %163 = arith.addf %157, %162 : vector<8x240xf32>
    %164 = vector.broadcast %122 : vector<1x240xf32> to vector<8x240xf32>
    %165 = arith.addf %163, %164 : vector<8x240xf32>
    %cst_174 = arith.constant 0.000000e+00 : f32
    %166 = vector.broadcast %cst_174 : f32 to vector<8x240xf32>
    %167 = arith.maximumf %165, %166 : vector<8x240xf32>
    %c1_175 = arith.constant 1 : index
    %c0_176 = arith.constant 0 : index
    %c0_177 = arith.constant 0 : index
    %168 = vector.load %arg16[%c1_175, %c0_176, %c0_177] : memref<2x8x240xf32, #tpu.memory_space<vmem>>, vector<1x8x240xf32>
    %169 = vector.shape_cast %168 : vector<1x8x240xf32> to vector<8x240xf32>
    %170 = vector.shape_cast %167 : vector<8x240xf32> to vector<1x8x240xf32>
    tpu.vector_store %arg16[%c1_175, %c0_176, %c0_177], %170 {strides = array<i32>} : memref<2x8x240xf32, #tpu.memory_space<vmem>>, vector<1x8x240xf32>,
    %c0_178 = arith.constant 0 : index
    %c0_179 = arith.constant 0 : index
    %c0_180 = arith.constant 0 : index
    %171 = vector.load %arg16[%c0_178, %c0_179, %c0_180] : memref<2x8x240xf32, #tpu.memory_space<vmem>>, vector<2x1x240xf32>
    %172 = vector.shape_cast %171 : vector<2x1x240xf32> to vector<2x240xf32>
    %c0_181 = arith.constant 0 : index
    %c0_182 = arith.constant 0 : index
    %c0_183 = arith.constant 0 : index
    %173 = vector.load %arg7[%c0_181, %c0_182, %c0_183] : memref<8x240x120xf32, #tpu.memory_space<vmem>>, vector<1x240x120xf32>
    %174 = vector.shape_cast %173 : vector<1x240x120xf32> to vector<240x120xf32>
    %cst_184 = arith.constant dense<0.000000e+00> : vector<2x120xf32>
    %175 = tpu.matmul %172, %174, %cst_184 {dimension_numbers = #tpu.dot_dimension_numbers<[1], [0], [0], [1], [0, 0, 1, 1], [], []>} : vector<2x240xf32>, vector<240x120xf32>, vector<2x120xf32> -> vector<2x120xf32>
    %c0_185 = arith.constant 0 : index
    %c1_186 = arith.constant 1 : index
    %c0_187 = arith.constant 0 : index
    %176 = vector.load %arg16[%c0_185, %c1_186, %c0_187] : memref<2x8x240xf32, #tpu.memory_space<vmem>>, vector<2x1x240xf32>
    %177 = vector.shape_cast %176 : vector<2x1x240xf32> to vector<2x240xf32>
    %c1_188 = arith.constant 1 : index
    %c0_189 = arith.constant 0 : index
    %c0_190 = arith.constant 0 : index
    %178 = vector.load %arg7[%c1_188, %c0_189, %c0_190] : memref<8x240x120xf32, #tpu.memory_space<vmem>>, vector<1x240x120xf32>
    %179 = vector.shape_cast %178 : vector<1x240x120xf32> to vector<240x120xf32>
    %cst_191 = arith.constant dense<0.000000e+00> : vector<2x120xf32>
    %180 = tpu.matmul %177, %179, %cst_191 {dimension_numbers = #tpu.dot_dimension_numbers<[1], [0], [0], [1], [0, 0, 1, 1], [], []>} : vector<2x240xf32>, vector<240x120xf32>, vector<2x120xf32> -> vector<2x120xf32>
    %181 = arith.addf %175, %180 : vector<2x120xf32>
    %c0_192 = arith.constant 0 : index
    %c2_193 = arith.constant 2 : index
    %c0_194 = arith.constant 0 : index
    %182 = vector.load %arg16[%c0_192, %c2_193, %c0_194] : memref<2x8x240xf32, #tpu.memory_space<vmem>>, vector<2x1x240xf32>
    %183 = vector.shape_cast %182 : vector<2x1x240xf32> to vector<2x240xf32>
    %c2_195 = arith.constant 2 : index
    %c0_196 = arith.constant 0 : index
    %c0_197 = arith.constant 0 : index
    %184 = vector.load %arg7[%c2_195, %c0_196, %c0_197] : memref<8x240x120xf32, #tpu.memory_space<vmem>>, vector<1x240x120xf32>
    %185 = vector.shape_cast %184 : vector<1x240x120xf32> to vector<240x120xf32>
    %cst_198 = arith.constant dense<0.000000e+00> : vector<2x120xf32>
    %186 = tpu.matmul %183, %185, %cst_198 {dimension_numbers = #tpu.dot_dimension_numbers<[1], [0], [0], [1], [0, 0, 1, 1], [], []>} : vector<2x240xf32>, vector<240x120xf32>, vector<2x120xf32> -> vector<2x120xf32>
    %187 = arith.addf %181, %186 : vector<2x120xf32>
    %c0_199 = arith.constant 0 : index
    %c3_200 = arith.constant 3 : index
    %c0_201 = arith.constant 0 : index
    %188 = vector.load %arg16[%c0_199, %c3_200, %c0_201] : memref<2x8x240xf32, #tpu.memory_space<vmem>>, vector<2x1x240xf32>
    %189 = vector.shape_cast %188 : vector<2x1x240xf32> to vector<2x240xf32>
    %c3_202 = arith.constant 3 : index
    %c0_203 = arith.constant 0 : index
    %c0_204 = arith.constant 0 : index
    %190 = vector.load %arg7[%c3_202, %c0_203, %c0_204] : memref<8x240x120xf32, #tpu.memory_space<vmem>>, vector<1x240x120xf32>
    %191 = vector.shape_cast %190 : vector<1x240x120xf32> to vector<240x120xf32>
    %cst_205 = arith.constant dense<0.000000e+00> : vector<2x120xf32>
    %192 = tpu.matmul %189, %191, %cst_205 {dimension_numbers = #tpu.dot_dimension_numbers<[1], [0], [0], [1], [0, 0, 1, 1], [], []>} : vector<2x240xf32>, vector<240x120xf32>, vector<2x120xf32> -> vector<2x120xf32>
    %193 = arith.addf %187, %192 : vector<2x120xf32>
    %c0_206 = arith.constant 0 : index
    %c4_207 = arith.constant 4 : index
    %c0_208 = arith.constant 0 : index
    %194 = vector.load %arg16[%c0_206, %c4_207, %c0_208] : memref<2x8x240xf32, #tpu.memory_space<vmem>>, vector<2x1x240xf32>
    %195 = vector.shape_cast %194 : vector<2x1x240xf32> to vector<2x240xf32>
    %c4_209 = arith.constant 4 : index
    %c0_210 = arith.constant 0 : index
    %c0_211 = arith.constant 0 : index
    %196 = vector.load %arg7[%c4_209, %c0_210, %c0_211] : memref<8x240x120xf32, #tpu.memory_space<vmem>>, vector<1x240x120xf32>
    %197 = vector.shape_cast %196 : vector<1x240x120xf32> to vector<240x120xf32>
    %cst_212 = arith.constant dense<0.000000e+00> : vector<2x120xf32>
    %198 = tpu.matmul %195, %197, %cst_212 {dimension_numbers = #tpu.dot_dimension_numbers<[1], [0], [0], [1], [0, 0, 1, 1], [], []>} : vector<2x240xf32>, vector<240x120xf32>, vector<2x120xf32> -> vector<2x120xf32>
    %199 = arith.addf %193, %198 : vector<2x120xf32>
    %c0_213 = arith.constant 0 : index
    %c5 = arith.constant 5 : index
    %c0_214 = arith.constant 0 : index
    %200 = vector.load %arg16[%c0_213, %c5, %c0_214] : memref<2x8x240xf32, #tpu.memory_space<vmem>>, vector<2x1x240xf32>
    %201 = vector.shape_cast %200 : vector<2x1x240xf32> to vector<2x240xf32>
    %c5_215 = arith.constant 5 : index
    %c0_216 = arith.constant 0 : index
    %c0_217 = arith.constant 0 : index
    %202 = vector.load %arg7[%c5_215, %c0_216, %c0_217] : memref<8x240x120xf32, #tpu.memory_space<vmem>>, vector<1x240x120xf32>
    %203 = vector.shape_cast %202 : vector<1x240x120xf32> to vector<240x120xf32>
    %cst_218 = arith.constant dense<0.000000e+00> : vector<2x120xf32>
    %204 = tpu.matmul %201, %203, %cst_218 {dimension_numbers = #tpu.dot_dimension_numbers<[1], [0], [0], [1], [0, 0, 1, 1], [], []>} : vector<2x240xf32>, vector<240x120xf32>, vector<2x120xf32> -> vector<2x120xf32>
    %205 = arith.addf %199, %204 : vector<2x120xf32>
    %c0_219 = arith.constant 0 : index
    %c6 = arith.constant 6 : index
    %c0_220 = arith.constant 0 : index
    %206 = vector.load %arg16[%c0_219, %c6, %c0_220] : memref<2x8x240xf32, #tpu.memory_space<vmem>>, vector<2x1x240xf32>
    %207 = vector.shape_cast %206 : vector<2x1x240xf32> to vector<2x240xf32>
    %c6_221 = arith.constant 6 : index
    %c0_222 = arith.constant 0 : index
    %c0_223 = arith.constant 0 : index
    %208 = vector.load %arg7[%c6_221, %c0_222, %c0_223] : memref<8x240x120xf32, #tpu.memory_space<vmem>>, vector<1x240x120xf32>
    %209 = vector.shape_cast %208 : vector<1x240x120xf32> to vector<240x120xf32>
    %cst_224 = arith.constant dense<0.000000e+00> : vector<2x120xf32>
    %210 = tpu.matmul %207, %209, %cst_224 {dimension_numbers = #tpu.dot_dimension_numbers<[1], [0], [0], [1], [0, 0, 1, 1], [], []>} : vector<2x240xf32>, vector<240x120xf32>, vector<2x120xf32> -> vector<2x120xf32>
    %211 = arith.addf %205, %210 : vector<2x120xf32>
    %c0_225 = arith.constant 0 : index
    %c7 = arith.constant 7 : index
    %c0_226 = arith.constant 0 : index
    %212 = vector.load %arg16[%c0_225, %c7, %c0_226] : memref<2x8x240xf32, #tpu.memory_space<vmem>>, vector<2x1x240xf32>
    %213 = vector.shape_cast %212 : vector<2x1x240xf32> to vector<2x240xf32>
    %c7_227 = arith.constant 7 : index
    %c0_228 = arith.constant 0 : index
    %c0_229 = arith.constant 0 : index
    %214 = vector.load %arg7[%c7_227, %c0_228, %c0_229] : memref<8x240x120xf32, #tpu.memory_space<vmem>>, vector<1x240x120xf32>
    %215 = vector.shape_cast %214 : vector<1x240x120xf32> to vector<240x120xf32>
    %cst_230 = arith.constant dense<0.000000e+00> : vector<2x120xf32>
    %216 = tpu.matmul %213, %215, %cst_230 {dimension_numbers = #tpu.dot_dimension_numbers<[1], [0], [0], [1], [0, 0, 1, 1], [], []>} : vector<2x240xf32>, vector<240x120xf32>, vector<2x120xf32> -> vector<2x120xf32>
    %217 = arith.addf %211, %216 : vector<2x120xf32>
    %c0_231 = arith.constant 0 : index
    %c0_232 = arith.constant 0 : index
    %218 = vector.load %arg8[%c0_231, %c0_232] : memref<1x120xf32, #tpu.memory_space<vmem>>, vector<1x120xf32>
    %219 = vector.broadcast %218 : vector<1x120xf32> to vector<2x120xf32>
    %220 = arith.addf %217, %219 : vector<2x120xf32>
    %cst_233 = arith.constant 0.000000e+00 : f32
    %221 = vector.broadcast %cst_233 : f32 to vector<2x120xf32>
    %222 = arith.maximumf %220, %221 : vector<2x120xf32>
    %c0_234 = arith.constant 0 : index
    %c0_235 = arith.constant 0 : index
    %223 = vector.load %arg9[%c0_234, %c0_235] : memref<120x120xf32, #tpu.memory_space<vmem>>, vector<120x120xf32>
    %cst_236 = arith.constant dense<0.000000e+00> : vector<2x120xf32>
    %224 = tpu.matmul %222, %223, %cst_236 {dimension_numbers = #tpu.dot_dimension_numbers<[1], [0], [0], [1], [0, 0, 1, 1], [], []>} : vector<2x120xf32>, vector<120x120xf32>, vector<2x120xf32> -> vector<2x120xf32>
    %c0_237 = arith.constant 0 : index
    %c0_238 = arith.constant 0 : index
    %225 = vector.load %arg10[%c0_237, %c0_238] : memref<1x120xf32, #tpu.memory_space<vmem>>, vector<1x120xf32>
    %226 = vector.broadcast %225 : vector<1x120xf32> to vector<2x120xf32>
    %227 = arith.addf %224, %226 : vector<2x120xf32>
    %cst_239 = arith.constant 0.000000e+00 : f32
    %228 = vector.broadcast %cst_239 : f32 to vector<2x120xf32>
    %229 = arith.maximumf %227, %228 : vector<2x120xf32>
    %c0_240 = arith.constant 0 : index
    %c0_241 = arith.constant 0 : index
    %230 = vector.load %arg11[%c0_240, %c0_241] : memref<120x128xf32, #tpu.memory_space<vmem>>, vector<120x128xf32>
    %cst_242 = arith.constant dense<0.000000e+00> : vector<2x128xf32>
    %231 = tpu.matmul %229, %230, %cst_242 {dimension_numbers = #tpu.dot_dimension_numbers<[1], [0], [0], [1], [0, 0, 1, 1], [], []>} : vector<2x120xf32>, vector<120x128xf32>, vector<2x128xf32> -> vector<2x128xf32>
    %c0_243 = arith.constant 0 : index
    %c0_244 = arith.constant 0 : index
    %232 = vector.load %arg12[%c0_243, %c0_244] : memref<1x128xf32, #tpu.memory_space<vmem>>, vector<1x128xf32>
    %233 = vector.broadcast %232 : vector<1x128xf32> to vector<2x128xf32>
    %234 = arith.addf %231, %233 : vector<2x128xf32>
    %c0_245 = arith.constant 0 : index
    %c0_246 = arith.constant 0 : index
    %235 = vector.load %arg13[%c0_245, %c0_246] : memref<2x128xf32, #tpu.memory_space<vmem>>, vector<2x128xf32>
    tpu.vector_store %arg13[%c0_245, %c0_246], %234 {strides = array<i32>} : memref<2x128xf32, #tpu.memory_space<vmem>>, vector<2x128xf32>,
    return
  }
}

</mosaic_0001>

<bundles_post_ra>
// kernel: _lambda_.1
= control target key start
LH: loop header
LB: loop body
LE: loop exit
PB: predicated region body
PF: predicated region fallthrough
CT: control target
= control target key end

     0   :  { %18 = vsyncpa [#allocation6], 0  ;;  %s7772_s0 = inlined_call_operand.vmem [shape: f32[2,16,64], index: 0, kind: input, shape index: {}]   ;;  %s7773_s1 = inlined_call_operand.hbm [shape: f32[5,64,240], index: 1, kind: input, shape index: {}]   ;;  %s7774_s2 = inlined_call_operand.hbm [shape: f32[1,240], index: 2, kind: input, shape index: {}]   ;;  %s7775_s3 = inlined_call_operand.hbm [shape: f32[3,240,300], index: 3, kind: input, shape index: {}]   ;;  %s7776_s4 = inlined_call_operand.hbm [shape: f32[1,300], index: 4, kind: input, shape index: {}]   ;;  %s7777_s5 = inlined_call_operand.hbm [shape: f32[3,300,240], index: 5, kind: input, shape index: {}]   ;;  %s7778_s6 = inlined_call_operand.hbm [shape: f32[1,240], index: 6, kind: input, shape index: {}]   ;;  %s7779_s7 = inlined_call_operand.hbm [shape: f32[8,240,120], index: 7, kind: input, shape index: {}]   ;;  %s7780_s8 = inlined_call_operand.hbm [shape: f32[1,120], index: 8, kind: input, shape index: {}]   ;;  %s7781_s9 = inlined_call_operand.hbm [shape: f32[120,120], index: 9, kind: input, shape index: {}]   ;;  %s7782_s10 = inlined_call_operand.hbm [shape: f32[1,120], index: 10, kind: input, shape index: {}]   ;;  %s7783_s11 = inlined_call_operand.hbm [shape: f32[120,128], index: 11, kind: input, shape index: {}]   ;;  %s7784_s12 = inlined_call_operand.hbm [shape: f32[1,128], index: 12, kind: input, shape index: {}]   ;;  %s7785_s13 = inlined_call_operand.vmem [shape: f32[2,128], index: 13, kind: output, shape index: {}]  }
   0x1   :  { %19 = vsyncpa [#allocation8], 0 }
   0x2   :  { %20 = vsyncpa [#allocation11], 0 }
   0x3   :  { %21 = vsyncpa [#allocation14], 0 }
   0x4   :  { %22 = vsyncpa [#allocation17], 0 }
   0x5   :  { %23 = vsyncpa [#allocation20], 0 }
   0x6   :  { %24 = vsyncpa [#allocation23], 0  ;;  %s6125_s25 = smov [#allocation7]   ;;  %s6126_s27 = smov [#allocation10]  }
   0x7   :  { %s45_s26 = sshll.u32 %s6125_s25, 4  ;;  %s67_s28 = sshll.u32 %s6126_s27, 4  ;;  %s46_s26 = int_to_ptr.vmem [resolvable:$true] %s45_s26  ;;  %s68_s28 = int_to_ptr.vmem [resolvable:$true] %s67_s28 }
   0x8   :  { %s5879_s29 = scalar_lea.vmem %s46_s26, 32  ;;  %p5884_p1 = scmp.lt.s32.totalorder %s46_s26, %s46_s26 }
   0x9   :  { %p5880_p0 = scmp.ne.s32.totalorder %s46_s26, %s5879_s29  ;;  %p5885_p2 = scmp.lt.s32.totalorder %s5879_s29, %s5879_s29 }
   0xb   :  { %p5886_p3 = por %p5885_p2, %p5884_p1 }
   0xd   :  { %p5887_p4 = pnand %p5886_p3, %p5880_p0 }
   0xf   :  { %5890 = shalt.err (!%p5887_p4)
}
  0x10   :  { %48 = dma.hbm_to_vmem [thread:$0]  %s7774_s2, 32, %s46_s26, [#allocation8]  }
  0x11   :  { %s5899_s15 = scalar_lea.vmem %s68_s28, 48  ;;  %s5903_s16 = scalar_lea.vmem %s68_s28, 64 }
  0x12   :  { %p5900_p5 = scmp.ne.s32.totalorder %s68_s28, %s5899_s15  ;;  %p5904_p6 = scmp.lt.s32.totalorder %s68_s28, %s68_s28 }
  0x13   :  { %p5905_p7 = scmp.lt.s32.totalorder %s5903_s16, %s5899_s15 }
  0x15   :  { %p5906_p8 = por %p5905_p7, %p5904_p6 }
  0x17   :  { %p5907_p9 = pnand %p5906_p8, %p5900_p5 }
  0x19   :  { %5910 = shalt.err (!%p5907_p9)
}
  0x1a   :  { %70 = dma.hbm_to_vmem [thread:$0]  %s7776_s4, 48, %s68_s28, [#allocation11]  }
  0x1b   :  { %s6127_s19 = smov [#allocation13]   ;;  %s6128_s21 = smov [#allocation16]  }
  0x1c   :  { %s89_s20 = sshll.u32 %s6127_s19, 4  ;;  %s111_s22 = sshll.u32 %s6128_s21, 4  ;;  %s90_s20 = int_to_ptr.vmem [resolvable:$true] %s89_s20  ;;  %s112_s22 = int_to_ptr.vmem [resolvable:$true] %s111_s22 }
  0x1d   :  { %s5919_s23 = scalar_lea.vmem %s90_s20, 32  ;;  %p5924_p11 = scmp.lt.s32.totalorder %s90_s20, %s90_s20 }
  0x1e   :  { %p5920_p10 = scmp.ne.s32.totalorder %s90_s20, %s5919_s23  ;;  %p5925_p12 = scmp.lt.s32.totalorder %s5919_s23, %s5919_s23 }
  0x20   :  { %p5926_p13 = por %p5925_p12, %p5924_p11 }
  0x22   :  { %p5927_p0 = pnand %p5926_p13, %p5920_p10 }
  0x24   :  { %5930 = shalt.err (!%p5927_p0)
}
  0x25   :  { %92 = dma.hbm_to_vmem [thread:$0]  %s7778_s6, 32, %s90_s20, [#allocation14]  }
  0x26   :  { %s5939_s25 = scalar_lea.vmem %s112_s22, 16  ;;  %s5943_s4 = scalar_lea.vmem %s112_s22, 32 }
  0x27   :  { %p5940_p1 = scmp.ne.s32.totalorder %s112_s22, %s5939_s25  ;;  %p5944_p2 = scmp.lt.s32.totalorder %s112_s22, %s112_s22 }
  0x28   :  { %p5945_p3 = scmp.lt.s32.totalorder %s5943_s4, %s5939_s25 }
  0x2a   :  { %p5946_p4 = por %p5945_p3, %p5944_p2 }
  0x2c   :  { %p5947_p5 = pnand %p5946_p4, %p5940_p1 }
  0x2e   :  { %5950 = shalt.err (!%p5947_p5)
}
  0x2f   :  { %114 = dma.hbm_to_vmem [thread:$0]  %s7780_s8, 16, %s112_s22, [#allocation17]  }
  0x30   :  { %s6129_s28 = smov [#allocation19]   ;;  %s6130_s30 = smov [#allocation5]  }
  0x31   :  { %s133_s29 = sshll.u32 %s6129_s28, 4  ;;  %s32_s14 = sshll.u32 %s6130_s30, 4  ;;  %s134_s29 = int_to_ptr.vmem [resolvable:$true] %s133_s29  ;;  %s33_s14 = int_to_ptr.vmem [resolvable:$true] %s32_s14 }
  0x32   :  { %s5959_s15 = scalar_lea.vmem %s134_s29, 16  ;;  %s5963_s6 = scalar_lea.vmem %s134_s29, 32 }
  0x33   :  { %p5960_p6 = scmp.ne.s32.totalorder %s134_s29, %s5959_s15  ;;  %p5964_p7 = scmp.lt.s32.totalorder %s134_s29, %s134_s29 }
  0x34   :  { %p5965_p8 = scmp.lt.s32.totalorder %s5963_s6, %s5959_s15 }
  0x36   :  { %p5966_p9 = por %p5965_p8, %p5964_p7 }
  0x38   :  { %p5967_p10 = pnand %p5966_p9, %p5960_p6 }
  0x3a   :  { %5970 = shalt.err (!%p5967_p10)
}
  0x3b   :  { %136 = dma.hbm_to_vmem [thread:$0]  %s7782_s10, 16, %s134_s29, [#allocation20]  }
  0x3c   :  { %s5979_s18 = scalar_lea.vmem %s33_s14, 10240  ;;  %p5984_p12 = scmp.lt.s32.totalorder %s33_s14, %s33_s14 }
  0x3d   :  { %p5980_p11 = scmp.ne.s32.totalorder %s33_s14, %s5979_s18  ;;  %p5985_p13 = scmp.lt.s32.totalorder %s5979_s18, %s5979_s18 }
  0x3f   :  { %p5986_p0 = por %p5985_p13, %p5984_p12 }
  0x41   :  { %p5987_p1 = pnand %p5986_p0, %p5980_p11 }
  0x43   :  { %5990 = shalt.err (!%p5987_p1)
}
  0x44   :  { %s6131_s8 = smov 256   ;;  %s6132_s19 = smov 16  }
  0x45   :  { %38 = dma.hbm_to_vmem [thread:$0]  %s7773_s1, 10240, %s33_s14, [#allocation6], %s6131_s8, %s6131_s8, %s6132_s19  }
  0x46   :  { %s6133_s22 = smov [#allocation9]  }
  0x47   :  { %s54_s23 = sshll.u32 %s6133_s22, 4  ;;  %s55_s23 = int_to_ptr.vmem [resolvable:$true] %s54_s23 }
  0x48   :  { %s5999_s10 = scalar_lea.vmem %s55_s23, 34560  ;;  %p6004_p3 = scmp.lt.s32.totalorder %s55_s23, %s55_s23 }
  0x49   :  { %p6000_p2 = scmp.ne.s32.totalorder %s55_s23, %s5999_s10  ;;  %p6005_p4 = scmp.lt.s32.totalorder %s5999_s10, %s5999_s10 }
  0x4b   :  { %p6006_p5 = por %p6005_p4, %p6004_p3 }
  0x4d   :  { %p6007_p6 = pnand %p6006_p5, %p6000_p2 }
  0x4f   :  { %6010 = shalt.err (!%p6007_p6)
}
  0x50   :  { %s6134_s2 = smov 384   ;;  %s6135_s24 = smov 24  }
  0x51   :  { %60 = dma.hbm_to_vmem [thread:$0]  %s7775_s3, 34560, %s55_s23, [#allocation8], %s6134_s2, %s6134_s2, %s6135_s24  }
  0x52   :  { %s6136_s26 = smov [#allocation12]   ;;  %s6137_s1 = smov [#allocation15]  }
  0x53   :  { %s76_s27 = sshll.u32 %s6136_s26, 4  ;;  %s98_s28 = sshll.u32 %s6137_s1, 4  ;;  %s77_s27 = int_to_ptr.vmem [resolvable:$true] %s76_s27  ;;  %s99_s28 = int_to_ptr.vmem [resolvable:$true] %s98_s28 }
  0x54   :  { %s6019_s29 = scalar_lea.vmem %s77_s27, 29184  ;;  %p6024_p8 = scmp.lt.s32.totalorder %s77_s27, %s77_s27 }
  0x55   :  { %p6020_p7 = scmp.ne.s32.totalorder %s77_s27, %s6019_s29  ;;  %p6025_p9 = scmp.lt.s32.totalorder %s6019_s29, %s6019_s29 }
  0x57   :  { %p6026_p10 = por %p6025_p9, %p6024_p8 }
  0x59   :  { %p6027_p11 = pnand %p6026_p10, %p6020_p7 }
  0x5b   :  { %6030 = shalt.err (!%p6027_p11)
}
  0x5c   :  { %82 = dma.hbm_to_vmem [thread:$0]  %s7777_s5, 29184, %s77_s27, [#allocation11], %s6131_s8, %s6131_s8, %s6132_s19  }
  0x5d   :  { %s6039_s3 = scalar_lea.vmem %s99_s28, 30720  ;;  %p6044_p13 = scmp.lt.s32.totalorder %s99_s28, %s99_s28 }
  0x5e   :  { %p6040_p12 = scmp.ne.s32.totalorder %s99_s28, %s6039_s3  ;;  %p6045_p0 = scmp.lt.s32.totalorder %s6039_s3, %s6039_s3 }
  0x60   :  { %p6046_p1 = por %p6045_p0, %p6044_p13 }
  0x62   :  { %p6047_p2 = pnand %p6046_p1, %p6040_p12 }
  0x64   :  { %6050 = shalt.err (!%p6047_p2)
}
  0x65   :  { %s6138_s15 = smov 128   ;;  %s6139_s6 = smov 8  }
  0x66   :  { %104 = dma.hbm_to_vmem [thread:$0]  %s7779_s7, 30720, %s99_s28, [#allocation14], %s6138_s15, %s6138_s15, %s6139_s6  }
  0x67   :  { %s6140_s18 = smov [#allocation18]   ;;  %s6141_s21 = smov [#allocation21]  }
  0x68   :  { %s120_s20 = sshll.u32 %s6140_s18, 4  ;;  %s142_s22 = sshll.u32 %s6141_s21, 4  ;;  %s121_s20 = int_to_ptr.vmem [resolvable:$true] %s120_s20  ;;  %s143_s22 = int_to_ptr.vmem [resolvable:$true] %s142_s22 }
  0x69   :  { %s6059_s5 = scalar_lea.vmem %s121_s20, 1920  ;;  %p6064_p4 = scmp.lt.s32.totalorder %s121_s20, %s121_s20 }
  0x6a   :  { %p6060_p3 = scmp.ne.s32.totalorder %s121_s20, %s6059_s5  ;;  %p6065_p5 = scmp.lt.s32.totalorder %s6059_s5, %s6059_s5 }
  0x6c   :  { %p6066_p6 = por %p6065_p5, %p6064_p4 }
  0x6e   :  { %p6067_p7 = pnand %p6066_p6, %p6060_p3 }
  0x70   :  { %6070 = shalt.err (!%p6067_p7)
}
  0x71   :  { %126 = dma.hbm_to_vmem [thread:$0]  %s7781_s9, 1920, %s121_s20, [#allocation17], %s6138_s15, %s6138_s15, %s6139_s6  }
  0x72   :  { %s6079_s23 = scalar_lea.vmem %s143_s22, 1920  ;;  %p6084_p9 = scmp.lt.s32.totalorder %s143_s22, %s143_s22 }
  0x73   :  { %p6080_p8 = scmp.ne.s32.totalorder %s143_s22, %s6079_s23  ;;  %p6085_p10 = scmp.lt.s32.totalorder %s6079_s23, %s6079_s23 }
  0x75   :  { %p6086_p11 = por %p6085_p10, %p6084_p9 }
  0x77   :  { %p6087_p12 = pnand %p6086_p11, %p6080_p8 }
  0x79   :  { %6090 = shalt.err (!%p6087_p12)
}
  0x7a   :  { %148 = dma.hbm_to_vmem [thread:$0]  %s7783_s11, 1920, %s143_s22, [#allocation20], %s6138_s15, %s6138_s15, %s6139_s6  }
  0x7b   :  { %s6142_s2 = smov [#allocation22]  }
  0x7c   :  { %s155_s24 = sshll.u32 %s6142_s2, 4  ;;  %s156_s24 = int_to_ptr.vmem [resolvable:$true] %s155_s24 }
  0x7d   :  { %s6099_s25 = scalar_lea.vmem %s156_s24, 16  ;;  %s6103_s4 = scalar_lea.vmem %s156_s24, 32 }
  0x7e   :  { %p6100_p13 = scmp.ne.s32.totalorder %s156_s24, %s6099_s25  ;;  %p6104_p0 = scmp.lt.s32.totalorder %s156_s24, %s156_s24 }
  0x7f   :  { %p6105_p1 = scmp.lt.s32.totalorder %s6103_s4, %s6099_s25 }
  0x81   :  { %p6106_p2 = por %p6105_p1, %p6104_p0 }
  0x83   :  { %p6107_p3 = pnand %p6106_p2, %p6100_p13 }
  0x85   :  { %6110 = shalt.err (!%p6107_p3)
}
  0x86   :  { %158 = dma.hbm_to_vmem [thread:$0]  %s7784_s12, 16, %s156_s24, [#allocation23]  }
  0x87   :  { %6111 = dma.done.wait [#allocation6], 10240  }
  0x88   :  { %6112 = vsyncadd [#allocation6], 4294957056 }
  0x89   :  { %6113 = dma.done.wait [#allocation8], 34592  }
  0x8a   :  { %6114 = vsyncadd [#allocation8], 4294932704 }
  0x8b   :  { %6115 = dma.done.wait [#allocation11], 29232  }
  0x8c   :  { %6116 = vsyncadd [#allocation11], 4294938064 }
  0x8d   :  { %6117 = dma.done.wait [#allocation14], 30752  }
  0x8e   :  { %6118 = vsyncadd [#allocation14], 4294936544 }
  0x8f   :  { %6119 = dma.done.wait [#allocation17], 1936  }
  0x90   :  { %6120 = vsyncadd [#allocation17], 4294965360 }
  0x91   :  { %6121 = dma.done.wait [#allocation20], 1936  }
  0x92   :  { %6122 = vsyncadd [#allocation20], 4294965360 }
  0x93   :  { %6123 = dma.done.wait [#allocation23], 16  }
  0x94   :  { %6124 = vsyncadd [#allocation23], 4294967280  ;;  %v7786_v0 = vmov 0.0   ;;  %v6260_v1 = vld [vmem:[#allocation5 + $0xf8] sm:$0xff]  ;;  %v6264_v3 = vld [vmem:[#allocation5 + $0xf0] sm:$0xff]  ;;  %vm233_vm0 = vcmask 523264  }
  0x95   :  { %304 = vmatprep.mubr.f32.mxu0 %v7786_v0  ;;  %387 = vmatprep.mubr.f32.mxu1 %v7786_v0  ;;  %v6262_v2 = vld [vmem:[#allocation5 + $0x78] sm:$0xff]  ;;  %v6268_v4 = vld [vmem:[#allocation5 + $0x70] sm:$0xff]  ;;  %v6270_v5 = vld [vmem:[#allocation5 + $0xe8] sm:$0xff]  ;;  %vm738_vm1 = vcmask 916480   ;;  %vm741_vm2 = vcmask 912384   ;;  %vm1468_vm3 = vcmask 1046528  }
  0x96   :  { %256 = vmatprep.subr.mxu0 %v6260_v1  ;;  %339 = vmatprep.subr.mxu1 %v6262_v2  ;;  %v6272_v6 = vld [vmem:[#allocation5 + $0x68] sm:$0xff]  ;;  %v6276_v7 = vld [vmem:[#allocation5 + $0xe0] sm:$0xff]  ;;  %v6280_v9 = vld [vmem:[#allocation5 + $0xd8] sm:$0xff]  ;;  %vm1890_vm4 = vcmask 1045504   ;;  %vm3080_vm5 = vcmask 1043456   ;;  %vm2091_vm6 = vcmask 359424  }
  0x97   :  { %257 = vmatpush1.msra.mxu0 %v6264_v3  ;;  %340 = vmatpush1.msra.mxu1 %v6268_v4  ;;  %v6278_v8 = vld [vmem:[#allocation5 + $0x60] sm:$0xff]  ;;  %v6284_v10 = vld [vmem:[#allocation5 + $0x58] sm:$0xff]  ;;  %v6286_v11 = vld [vmem:[#allocation5 + $0xd0] sm:$0xff]  ;;  %vm2095_vm7 = vcmask 353280   ;;  %vm6145_vm8 = vmmov 0   ;;  %vm5485_vm9 = vcmask 982016  }
  0x98   :  { %258 = vmatprep.subr.mxu0 %v6270_v5  ;;  %341 = vmatprep.subr.mxu1 %v6272_v6  ;;  %v6288_v12 = vld [vmem:[#allocation5 + $0x50] sm:$0xff]  ;;  %v6292_v13 = vld [vmem:[#allocation5 + $0xc8] sm:$0xff]  ;;  %v6298_v15 = vld [vmem:[#allocation5 + $0xc0] sm:$0xff] }
  0x99   :  { %259 = vmatpush1.msra.mxu0 %v6276_v7  ;;  %342 = vmatpush1.msra.mxu1 %v6278_v8  ;;  %v6294_v14 = vld [vmem:[#allocation5 + $0x48] sm:$0xff]  ;;  %v6300_v16 = vld [vmem:[#allocation5 + $0x40] sm:$0xff]  ;;  %v6304_v17 = vld [vmem:[#allocation5 + $0xb8] sm:$0xff] }
  0x9a   :  { %260 = vmatprep.subr.mxu0 %v6280_v9  ;;  %343 = vmatprep.subr.mxu1 %v6284_v10  ;;  %v6306_v18 = vld [vmem:[#allocation5 + $0x38] sm:$0xff]  ;;  %v6310_v19 = vld [vmem:[#allocation5 + $0xb0] sm:$0xff]  ;;  %v6316_v21 = vld [vmem:[#allocation5 + $0xa8] sm:$0xff] }
  0x9b   :  { %261 = vmatpush1.msra.mxu0 %v6286_v11  ;;  %344 = vmatpush1.msra.mxu1 %v6288_v12  ;;  %v6312_v20 = vld [vmem:[#allocation5 + $0x30] sm:$0xff]  ;;  %v6318_v22 = vld [vmem:[#allocation5 + $0x28] sm:$0xff]  ;;  %v6322_v23 = vld [vmem:[#allocation5 + $0xa0] sm:$0xff] }
  0x9c   :  { %262 = vmatprep.subr.mxu0 %v6292_v13  ;;  %345 = vmatprep.subr.mxu1 %v6294_v14  ;;  %v6324_v24 = vld [vmem:[#allocation5 + $0x20] sm:$0xff]  ;;  %v6328_v25 = vld [vmem:[#allocation5 + $0x98] sm:$0xff]  ;;  %v6334_v27 = vld [vmem:[#allocation5 + $0x90] sm:$0xff] }
  0x9d   :  { %263 = vmatpush1.msra.mxu0 %v6298_v15  ;;  %346 = vmatpush1.msra.mxu1 %v6300_v16  ;;  %v6330_v26 = vld [vmem:[#allocation5 + $0x18] sm:$0xff]  ;;  %v6336_v28 = vld [vmem:[#allocation5 + $0x10] sm:$0xff]  ;;  %v6340_v29 = vld [vmem:[#allocation5 + $0x88] sm:$0xff] }
  0x9e   :  { %264 = vmatprep.subr.mxu0 %v6304_v17  ;;  %347 = vmatprep.subr.mxu1 %v6306_v18  ;;  %v6342_v30 = vld [vmem:[#allocation5 + $0x8] sm:$0xff]  ;;  %v6346_v31 = vld [vmem:[#allocation5 + $0x80] sm:$0xff]  ;;  %v6360_v35 = vld [vmem:[#allocation5 + $0x178] sm:$0xff] }
  0x9f   :  { %265 = vmatpush1.msra.mxu0 %v6310_v19  ;;  %348 = vmatpush1.msra.mxu1 %v6312_v20  ;;  %v6348_v32 = vld [vmem:[#allocation5] sm:$0xff]  ;;  %v6362_v36 = vld [vmem:[#allocation5 + $0x1f8] sm:$0xff]  ;;  %v6366_v37 = vld [vmem:[#allocation5 + $0x170] sm:$0xff] }
  0xa0   :  { %266 = vmatprep.subr.mxu0 %v6316_v21  ;;  %349 = vmatprep.subr.mxu1 %v6318_v22  ;;  %v214_v33 = vld [vmem:[%s7772_s0 + $0x1] sm:$0xff]  ;;  %v6368_v38 = vld [vmem:[#allocation5 + $0x1f0] sm:$0xff]  ;;  %v6384_v43 = vld [vmem:[#allocation5 + $0x158] sm:$0xff] }
  0xa1   :  { %267 = vmatpush1.msra.mxu0 %v6322_v23  ;;  %350 = vmatpush1.msra.mxu1 %v6324_v24  ;;  %v196_v34 = vld [vmem:[%s7772_s0] sm:$0xff]  ;;  %v6372_v39 = vld [vmem:[#allocation5 + $0x168] sm:$0xff]  ;;  %v6386_v44 = vld [vmem:[#allocation5 + $0x1d8] sm:$0xff] }
  0xa2   :  { %268 = vmatprep.subr.mxu0 %v6328_v25  ;;  %351 = vmatprep.subr.mxu1 %v6330_v26  ;;  %v6374_v40 = vld [vmem:[#allocation5 + $0x1e8] sm:$0xff]  ;;  %v6378_v41 = vld [vmem:[#allocation5 + $0x160] sm:$0xff]  ;;  %7858 = vst [vmem:[#allocation31_spill] sm:$0xff] %v6386_v44  ;;  %v6390_v45 = vld [vmem:[#allocation5 + $0x150] sm:$0xff] }
  0xa3   :  { %269 = vmatpush1.msra.mxu0 %v6334_v27  ;;  %352 = vmatpush1.msra.mxu1 %v6336_v28  ;;  %v6380_v42 = vld [vmem:[#allocation5 + $0x1e0] sm:$0xff]  ;;  %v6392_v46 = vld [vmem:[#allocation5 + $0x1d0] sm:$0xff]  ;;  %v6396_v47 = vld [vmem:[#allocation5 + $0x148] sm:$0xff] }
  0xa4   :  { %270 = vmatprep.subr.mxu0 %v6340_v29  ;;  %353 = vmatprep.subr.mxu1 %v6342_v30  ;;  %7859 = vst [vmem:[#allocation32_spill] sm:$0xff] %v6392_v46  ;;  %v6398_v48 = vld [vmem:[#allocation5 + $0x1c8] sm:$0xff]  ;;  %v6402_v49 = vld [vmem:[#allocation5 + $0x140] sm:$0xff]  ;;  %v6408_v51 = vld [vmem:[#allocation5 + $0x138] sm:$0xff] }
  0xa5   :  { %271 = vmatpush1.msra.mxu0 %v6346_v31  ;;  %354 = vmatpush1.msra.mxu1 %v6348_v32  ;;  %7860 = vst [vmem:[#allocation33_spill] sm:$0xff] %v6398_v48  ;;  %v6404_v50 = vld [vmem:[#allocation5 + $0x1c0] sm:$0xff]  ;;  %v6412_v52 = vld [vmem:[#allocation5 + $0x130] sm:$0xff]  ;;  %v6416_v53 = vld [vmem:[#allocation5 + $0x128] sm:$0xff] }
  0xa6   :  { %5667 = vmatmul.mubr.msk.f32.vlgmr.msra.gmra.mxu0 %vm233_vm0, %v214_v33  ;;  %5669 = vmatmul.mubr.msk.f32.vlgmr.msra.gmra.mxu1 %vm233_vm0, %v196_v34  ;;  %7861 = vst [vmem:[#allocation34_spill] sm:$0xff] %v6404_v50  ;;  %v6418_v54 = vld [vmem:[#allocation5 + $0x1b8] sm:$0xff]  ;;  %v215_v55 = vld [vmem:[%s7772_s0 + $0x9] sm:$0xf]  ;;  %v6430_v57 = vld [vmem:[#allocation5 + $0x120] sm:$0xff] }
  0xa7   :  { %441 = vmatprep.subr.mxu0 %v6360_v35  ;;  %547 = vmatprep.subr.mxu1 %v6362_v36  ;;  %7862 = vst [vmem:[#allocation35_spill] sm:$0xff] %v6418_v54  ;;  %v197_v56 = vld [vmem:[%s7772_s0 + $0x8] sm:$0xf]  ;;  %v6432_v58 = vld [vmem:[#allocation5 + $0x1b0] sm:$0xff]  ;;  %v6436_v59 = vld [vmem:[#allocation5 + $0x118] sm:$0xff] }
  0xa8   :  { %442 = vmatpush1.msra.mxu0 %v6366_v37  ;;  %548 = vmatpush1.msra.mxu1 %v6368_v38  ;;  %7863 = vst [vmem:[#allocation36_spill] sm:$0xff] %v6432_v58  ;;  %v6438_v60 = vld [vmem:[#allocation5 + $0x1a8] sm:$0xff]  ;;  %v6442_v61 = vld [vmem:[#allocation5 + $0x110] sm:$0xff]  ;;  %v6444_v62 = vld [vmem:[#allocation5 + $0x1a0] sm:$0xff] }
  0xa9   :  { %443 = vmatprep.subr.mxu0 %v6372_v39  ;;  %549 = vmatprep.subr.mxu1 %v6374_v40  ;;  %7864 = vst [vmem:[#allocation37_spill] sm:$0xff] %v6438_v60  ;;  %7865 = vst [vmem:[#allocation38_spill] sm:$0xff] %v6444_v62  ;;  %v6448_v63 = vld [vmem:[#allocation5 + $0x108] sm:$0xff]  ;;  %v6450_v33 = vld [vmem:[#allocation5 + $0x198] sm:$0xff] }
  0xaa   :  { %444 = vmatpush1.msra.mxu0 %v6378_v41  ;;  %550 = vmatpush1.msra.mxu1 %v6380_v42  ;;  %7866 = vst [vmem:[#allocation39_spill] sm:$0xff] %v6450_v33  ;;  %v6454_v34 = vld [vmem:[#allocation5 + $0x100] sm:$0xff] }
  0xab   :  { %445 = vmatprep.subr.mxu0 %v6384_v43  ;;  %551 = vmatprep.subr.mxu1 %v6386_v44  ;;  %v6515_v44 = vld [vmem:[#allocation5 + $0x230] sm:$0xff] }
  0xac   :  { %446 = vmatpush1.msra.mxu0 %v6390_v45  ;;  %552 = vmatpush1.msra.mxu1 %v6392_v46  ;;  %v6508_v46 = vld [vmem:[#allocation5 + $0x240] sm:$0xff] }
  0xad   :  { %447 = vmatprep.subr.mxu0 %v6396_v47  ;;  %553 = vmatprep.subr.mxu1 %v6398_v48  ;;  %v6486_v48 = vld [vmem:[#allocation5 + $0x260] sm:$0xff] }
  0xae   :  { %448 = vmatpush1.msra.mxu0 %v6402_v49  ;;  %554 = vmatpush1.msra.mxu1 %v6404_v50  ;;  %v6482_v50 = vld [vmem:[#allocation5 + $0x268] sm:$0xff]  ;;  %7872 = vst [vmem:[#allocation44_spill] sm:$0xff] %v6486_v48 }
  0xaf   :  { %449 = vmatprep.subr.mxu0 %v6408_v51  ;;  %310 = vmatprep.mubr.f32.mxu0 %v7786_v0  ;;  %7871 = vst [vmem:[#allocation43_spill] sm:$0xff] %v6482_v50 }
  0xb0   :  { %450 = vmatpush1.msra.mxu0 %v6412_v52  ;;  %393 = vmatprep.mubr.f32.mxu1 %v7786_v0  ;;  %v6465_v0 = vld [vmem:[#allocation5 + $0x188] sm:$0xff] }
  0xb1   :  { %451 = vmatprep.subr.mxu0 %v6416_v53  ;;  %555 = vmatprep.subr.mxu1 %v6418_v54  ;;  %7868 = vst [vmem:[#allocation41_spill] sm:$0xff] %v6465_v0  ;;  %v6471_v54 = vld [vmem:[#allocation5 + $0x180] sm:$0xff] }
  0xb2   :  { %5668 = vmatmul.mubr.msk.f32.gmra.mxu0 %vm233_vm0, %v215_v55  ;;  %5670 = vmatmul.mubr.msk.f32.gmra.mxu1 %vm233_vm0, %v197_v56  ;;  %v6458_v55 = vld [vmem:[#allocation5 + $0x190] sm:$0xff]  ;;  %v400_v56 = vld [vmem:[%s7772_s0 + $0x2] sm:$0xff]  ;;  %7870 = vst [vmem:[#allocation42_spill] sm:$0xff] %v6471_v54 }
  0xb3   :  { %452 = vmatpush1.msra.mxu0 %v6430_v57  ;;  %556 = vmatpush1.msra.mxu1 %v6432_v58  ;;  %7867 = vst [vmem:[#allocation40_spill] sm:$0xff] %v6458_v55  ;;  %v6467_v58 = vld [vmem:[#allocation5 + $0x278] sm:$0xff] }
  0xb4   :  { %453 = vmatprep.subr.mxu0 %v6436_v59  ;;  %557 = vmatprep.subr.mxu1 %v6438_v60  ;;  %v7869_v60 = vmov 0.0  }
  0xb5   :  { %454 = vmatpush1.msra.mxu0 %v6442_v61  ;;  %558 = vmatpush1.msra.mxu1 %v6444_v62  ;;  %v6475_v62 = vld [vmem:[#allocation5 + $0x270] sm:$0xff] }
  0xb6   :  { %455 = vmatprep.subr.mxu0 %v6448_v63  ;;  %559 = vmatprep.subr.mxu1 %v6450_v33  ;;  %v506_v33 = vld [vmem:[%s7772_s0 + $0x3] sm:$0xff] }
  0xb7   :  { %456 = vmatpush1.msra.mxu0 %v6454_v34  ;;  %489 = vmatprep.mubr.f32.mxu0 %v7869_v60 }
  0xb8   :  { %560 = vmatpush1.msra.mxu1 %v6458_v55  ;;  %5671 = vmatmul.mubr.msk.f32.vlgmr.msra.gmra.mxu0 %vm233_vm0, %v400_v56  ;;  %v401_v56 = vld [vmem:[%s7772_s0 + $0xa] sm:$0xf]  ;;  %v6493_v55 = vld [vmem:[#allocation5 + $0x258] sm:$0xff] }
  0xb9   :  { %561 = vmatprep.subr.mxu1 %v6465_v0  ;;  %653 = vmatprep.subr.mxu0 %v6467_v58  ;;  %v6497_v0 = vld [vmem:[#allocation5 + $0x250] sm:$0xff] }
  0xba   :  { %562 = vmatpush1.msra.mxu1 %v6471_v54  ;;  %595 = vmatprep.mubr.f32.mxu1 %v7869_v60  ;;  %v507_v54 = vld [vmem:[%s7772_s0 + $0xb] sm:$0xf] }
  0xbb   :  { %654 = vmatpush1.msra.mxu0 %v6475_v62  ;;  %5673 = vmatmul.mubr.msk.f32.vlgmr.msra.gmra.mxu1 %vm233_vm0, %v506_v33  ;;  %v6504_v33 = vld [vmem:[#allocation5 + $0x248] sm:$0xff] }
  0xbc   :  { %655 = vmatprep.subr.mxu0 %v6482_v50  ;;  %495 = vmatprep.mubr.f32.mxu0 %v7869_v60  ;;  %7873 = vst [vmem:[#allocation45_spill] sm:$0xff] %v6504_v33  ;;  %v6512_v50 = vld [vmem:[#allocation5 + $0x238] sm:$0xff] }
  0xbd   :  { %656 = vmatpush1.msra.mxu0 %v6486_v48  ;;  %601 = vmatprep.mubr.f32.mxu1 %v7869_v60  ;;  %v6519_v48 = vld [vmem:[#allocation5 + $0x228] sm:$0xff] }
  0xbe   :  { %5672 = vmatmul.mubr.msk.f32.gmra.mxu0 %vm233_vm0, %v401_v56  ;;  %657 = vmatprep.subr.mxu0 %v6493_v55  ;;  %v6523_v56 = vld [vmem:[#allocation5 + $0x220] sm:$0xff] }
  0xbf   :  { %658 = vmatpush1.msra.mxu0 %v6497_v0  ;;  %5674 = vmatmul.mubr.msk.f32.gmra.mxu1 %vm233_vm0, %v507_v54  ;;  %v6527_v54 = vld [vmem:[#allocation5 + $0x218] sm:$0xff] }
  0xc0   :  { %659 = vmatprep.subr.mxu0 %v6504_v33  ;;  %701 = vmatprep.mubr.f32.mxu0 %v7869_v60  ;;  %v6531_v33 = vld [vmem:[#allocation5 + $0x210] sm:$0xff] }
  0xc1   :  { %660 = vmatpush1.msra.mxu0 %v6508_v46  ;;  %802 = vmatprep.subr.mxu1 %v6260_v1  ;;  %v6535_v1 = vld [vmem:[#allocation5 + $0x208] sm:$0xff] }
  0xc2   :  { %661 = vmatprep.subr.mxu0 %v6512_v50  ;;  %803 = vmatpush1.msra.mxu1 %v6264_v3  ;;  %v6539_v3 = vld [vmem:[#allocation5 + $0x200] sm:$0xff] }
  0xc3   :  { %662 = vmatpush1.msra.mxu0 %v6515_v44  ;;  %804 = vmatprep.subr.mxu1 %v6270_v5  ;;  %v612_v5 = vld [vmem:[%s7772_s0 + $0x4] sm:$0xff] }
  0xc4   :  { %663 = vmatprep.subr.mxu0 %v6519_v48  ;;  %805 = vmatpush1.msra.mxu1 %v6276_v7  ;;  %v613_v7 = vld [vmem:[%s7772_s0 + $0xc] sm:$0xf] }
  0xc5   :  { %664 = vmatpush1.msra.mxu0 %v6523_v56  ;;  %806 = vmatprep.subr.mxu1 %v6280_v9  ;;  %v5679_v9 = vld [vmem:[%s7772_s0 + $0x11] sm:$0xff] }
  0xc6   :  { %665 = vmatprep.subr.mxu0 %v6527_v54  ;;  %807 = vmatpush1.msra.mxu1 %v6286_v11  ;;  %v7876_v11 = vld [vmem:[#allocation32_spill] sm:$0xff] }
  0xc7   :  { %666 = vmatpush1.msra.mxu0 %v6531_v33  ;;  %808 = vmatprep.subr.mxu1 %v6292_v13  ;;  %v7878_v13 = vld [vmem:[#allocation33_spill] sm:$0xff] }
  0xc8   :  { %667 = vmatprep.subr.mxu0 %v6535_v1  ;;  %809 = vmatpush1.msra.mxu1 %v6298_v15  ;;  %v7880_v15 = vld [vmem:[#allocation35_spill] sm:$0xff] }
  0xc9   :  { %668 = vmatpush1.msra.mxu0 %v6539_v3  ;;  %810 = vmatprep.subr.mxu1 %v6304_v17  ;;  %v7882_v17 = vld [vmem:[#allocation36_spill] sm:$0xff] }
  0xca   :  { %5675 = vmatmul.mubr.msk.f32.vlgmr.msra.gmra.mxu0 %vm233_vm0, %v612_v5  ;;  %811 = vmatpush1.msra.mxu1 %v6310_v19  ;;  %v7883_v19 = vld [vmem:[#allocation37_spill] sm:$0xff] }
  0xcb   :  { %707 = vmatprep.mubr.f32.mxu0 %v7869_v60  ;;  %812 = vmatprep.subr.mxu1 %v6316_v21  ;;  %v5686_v21 = vld [vmem:[%s7772_s0 + $0x1a] sm:$0xf]  ;;  %v1384_v5 = vld [vmem:[#allocation9 + $0x320] sm:$0xff] }
  0xcc   :  { %813 = vmatpush1.msra.mxu1 %v6322_v23  ;;  %885 = vmatprep.subr.mxu0 %v6262_v2  ;;  %v5680_v2 = vld [vmem:[%s7772_s0 + $0x19] sm:$0xf]  ;;  %v7887_v23 = vld [vmem:[#allocation41_spill] sm:$0xff] }
  0xcd   :  { %814 = vmatprep.subr.mxu1 %v6328_v25  ;;  %886 = vmatpush1.msra.mxu0 %v6268_v4  ;;  %v5677_v4 = vld [vmem:[%s7772_s0 + $0x10] sm:$0xff]  ;;  %v7888_v25 = vld [vmem:[#allocation42_spill] sm:$0xff] }
  0xce   :  { %5676 = vmatmul.mubr.msk.f32.gmra.mxu0 %vm233_vm0, %v613_v7  ;;  %815 = vmatpush1.msra.mxu1 %v6334_v27  ;;  %v1420_v27 = vld [vmem:[#allocation9 + $0x440] sm:$0xff]  ;;  %v1383_v7 = vld [vmem:[#allocation9 + $0x318] sm:$0xff] }
  0xcf   :  { %816 = vmatprep.subr.mxu1 %v6340_v29  ;;  %850 = vmatprep.mubr.f32.mxu1 %v7869_v60  ;;  %v1419_v29 = vld [vmem:[#allocation9 + $0x438] sm:$0xff] }
  0xd0   :  { %817 = vmatpush1.msra.mxu1 %v6346_v31  ;;  %887 = vmatprep.subr.mxu0 %v6272_v6  ;;  %v5685_v6 = vld [vmem:[%s7772_s0 + $0x12] sm:$0xff]  ;;  %v1417_v31 = vld [vmem:[#allocation9 + $0x428] sm:$0xff] }
  0xd1   :  { %986 = vmatprep.subr.mxu1 %v6360_v35  ;;  %5681 = vmatmul.mubr.msk.f32.vlgmr.msra.gmra.mxu1 %vm233_vm0, %v5679_v9  ;;  %v1416_v35 = vld [vmem:[#allocation9 + $0x420] sm:$0xff]  ;;  %v1385_v9 = vld [vmem:[#allocation9 + $0x328] sm:$0xff] }
  0xd2   :  { %888 = vmatpush1.msra.mxu0 %v6278_v8  ;;  %987 = vmatpush1.msra.mxu1 %v6366_v37  ;;  %v7874_v8 = vld [vmem:[#allocation31_spill] sm:$0xff] }
  0xd3   :  { %889 = vmatprep.subr.mxu0 %v6284_v10  ;;  %988 = vmatprep.subr.mxu1 %v6372_v39  ;;  %v7875_v10 = vld [vmem:[#allocation43_spill] sm:$0xff]  ;;  %v1415_v39 = vld [vmem:[#allocation9 + $0x418] sm:$0xff] }
  0xd4   :  { %890 = vmatpush1.msra.mxu0 %v6288_v12  ;;  %989 = vmatpush1.msra.mxu1 %v6378_v41  ;;  %v7877_v12 = vld [vmem:[#allocation44_spill] sm:$0xff] }
  0xd5   :  { %891 = vmatprep.subr.mxu0 %v6294_v14  ;;  %990 = vmatprep.subr.mxu1 %v6384_v43  ;;  %v7879_v14 = vld [vmem:[#allocation34_spill] sm:$0xff]  ;;  %v1414_v37 = vld [vmem:[#allocation9 + $0x410] sm:$0xff] }
  0xd6   :  { %892 = vmatpush1.msra.mxu0 %v6300_v16  ;;  %991 = vmatpush1.msra.mxu1 %v6390_v45  ;;  %v7881_v16 = vld [vmem:[#allocation45_spill] sm:$0xff]  ;;  %v1410_v41 = vld [vmem:[#allocation9 + $0x3f0] sm:$0xff]  ;;  %v1409_v45 = vld [vmem:[#allocation9 + $0x3e8] sm:$0xff] }
  0xd7   :  { %893 = vmatprep.subr.mxu0 %v6306_v18  ;;  %992 = vmatprep.subr.mxu1 %v6396_v47  ;;  %v5678_v18 = vld [vmem:[%s7772_s0 + $0x18] sm:$0xf]  ;;  %v1408_v43 = vld [vmem:[#allocation9 + $0x3e0] sm:$0xff] }
  0xd8   :  { %894 = vmatpush1.msra.mxu0 %v6312_v20  ;;  %993 = vmatpush1.msra.mxu1 %v6402_v49  ;;  %v7884_v20 = vld [vmem:[#allocation38_spill] sm:$0xff]  ;;  %v1402_v49 = vld [vmem:[#allocation9 + $0x3b0] sm:$0xff] }
  0xd9   :  { %895 = vmatprep.subr.mxu0 %v6318_v22  ;;  %994 = vmatprep.subr.mxu1 %v6408_v51  ;;  %v7886_v22 = vld [vmem:[#allocation40_spill] sm:$0xff]  ;;  %v1404_v47 = vld [vmem:[#allocation9 + $0x3c0] sm:$0xff] }
  0xda   :  { %896 = vmatpush1.msra.mxu0 %v6324_v24  ;;  %995 = vmatpush1.msra.mxu1 %v6412_v52  ;;  %v5689_v24 = vld [vmem:[%s7772_s0 + $0x13] sm:$0xff] }
  0xdb   :  { %897 = vmatprep.subr.mxu0 %v6330_v26  ;;  %996 = vmatprep.subr.mxu1 %v6416_v53  ;;  %v5693_v26 = vld [vmem:[%s7772_s0 + $0x14] sm:$0xff] }
  0xdc   :  { %898 = vmatpush1.msra.mxu0 %v6336_v28  ;;  %997 = vmatpush1.msra.mxu1 %v6430_v57  ;;  %v5690_v28 = vld [vmem:[%s7772_s0 + $0x1b] sm:$0xf]  ;;  %v1398_v53 = vld [vmem:[#allocation9 + $0x390] sm:$0xff]  ;;  %v1400_v57 = vld [vmem:[#allocation9 + $0x3a0] sm:$0xff] }
  0xdd   :  { %856 = vmatprep.mubr.f32.mxu1 %v7869_v60  ;;  %899 = vmatprep.subr.mxu0 %v6342_v30  ;;  %v1421_v30 = vld [vmem:[#allocation9 + $0x448] sm:$0xff]  ;;  %v1403_v51 = vld [vmem:[#allocation9 + $0x3b8] sm:$0xff] }
  0xde   :  { %998 = vmatprep.subr.mxu1 %v6436_v59  ;;  %5682 = vmatmul.mubr.msk.f32.gmra.mxu1 %vm233_vm0, %v5680_v2  ;;  %v1399_v52 = vld [vmem:[#allocation9 + $0x398] sm:$0xff]  ;;  %v1381_v2 = vld [vmem:[#allocation9 + $0x308] sm:$0xff] }
  0xdf   :  { %900 = vmatpush1.msra.mxu0 %v6348_v32  ;;  %999 = vmatpush1.msra.mxu1 %v6442_v61  ;;  %v5694_v32 = vld [vmem:[%s7772_s0 + $0x1c] sm:$0xf]  ;;  %v1397_v61 = vld [vmem:[#allocation9 + $0x388] sm:$0xff] }
  0xe0   :  { %933 = vmatprep.mubr.f32.mxu0 %v7869_v60  ;;  %1000 = vmatprep.subr.mxu1 %v6448_v63  ;;  %v1395_v59 = vld [vmem:[#allocation9 + $0x378] sm:$0xff]  ;;  %v1392_v63 = vld [vmem:[#allocation9 + $0x360] sm:$0xff] }
  0xe1   :  { %1091 = vmatprep.subr.mxu0 %v6362_v36  ;;  %5683 = vmatmul.mubr.msk.f32.vlgmr.msra.gmra.mxu0 %vm233_vm0, %v5677_v4  ;;  %v1418_v36 = vld [vmem:[#allocation9 + $0x430] sm:$0xff]  ;;  %v1380_v4 = vld [vmem:[#allocation9 + $0x300] sm:$0xff] }
  0xe2   :  { %1001 = vmatpush1.msra.mxu1 %v6454_v34  ;;  %1092 = vmatpush1.msra.mxu0 %v6368_v38  ;;  %v1413_v38 = vld [vmem:[#allocation9 + $0x408] sm:$0xff]  ;;  %v1394_v34 = vld [vmem:[#allocation9 + $0x370] sm:$0xff] }
  0xe3   :  { %1034 = vmatprep.mubr.f32.mxu1 %v7869_v60  ;;  %1093 = vmatprep.subr.mxu0 %v6374_v40  ;;  %v1411_v40 = vld [vmem:[#allocation9 + $0x3f8] sm:$0xff] }
  0xe4   :  { %1196 = vmatprep.subr.mxu1 %v6467_v58  ;;  %5687 = vmatmul.mubr.msk.f32.vlgmr.msra.gmra.mxu1 %vm233_vm0, %v5685_v6  ;;  %v1396_v58 = vld [vmem:[#allocation9 + $0x380] sm:$0xff]  ;;  %v1382_v6 = vld [vmem:[#allocation9 + $0x310] sm:$0xff] }
  0xe5   :  { %1094 = vmatpush1.msra.mxu0 %v6380_v42  ;;  %1197 = vmatpush1.msra.mxu1 %v6475_v62  ;;  %v1412_v42 = vld [vmem:[#allocation9 + $0x400] sm:$0xff]  ;;  %v1393_v62 = vld [vmem:[#allocation9 + $0x368] sm:$0xff] }
  0xe6   :  { %1095 = vmatprep.subr.mxu0 %v7874_v8  ;;  %1198 = vmatprep.subr.mxu1 %v7875_v10  ;;  %v1378_v8 = vld [vmem:[#allocation9 + $0x2f0] sm:$0xff]  ;;  %v1377_v10 = vld [vmem:[#allocation9 + $0x2e8] sm:$0xff] }
  0xe7   :  { %1096 = vmatpush1.msra.mxu0 %v7876_v11  ;;  %1199 = vmatpush1.msra.mxu1 %v7877_v12  ;;  %v1379_v11 = vld [vmem:[#allocation9 + $0x2f8] sm:$0xff] }
  0xe8   :  { %1097 = vmatprep.subr.mxu0 %v7878_v13  ;;  %1200 = vmatprep.subr.mxu1 %v6493_v55  ;;  %v1390_v55 = vld [vmem:[#allocation9 + $0x350] sm:$0xff]  ;;  %v1375_v12 = vld [vmem:[#allocation9 + $0x2d8] sm:$0xff] }
  0xe9   :  { %1098 = vmatpush1.msra.mxu0 %v7879_v14  ;;  %1201 = vmatpush1.msra.mxu1 %v6497_v0  ;;  %v7885_v0 = vld [vmem:[#allocation39_spill] sm:$0xff]  ;;  %v1376_v14 = vld [vmem:[#allocation9 + $0x2e0] sm:$0xff] }
  0xea   :  { %1099 = vmatprep.subr.mxu0 %v7880_v15  ;;  %1202 = vmatprep.subr.mxu1 %v7881_v16  ;;  %v1374_v13 = vld [vmem:[#allocation9 + $0x2d0] sm:$0xff]  ;;  %v1461_v16 = vld [vmem:[#allocation9 + $0x588] sm:$0xff] }
  0xeb   :  { %1100 = vmatpush1.msra.mxu0 %v7882_v17  ;;  %1203 = vmatpush1.msra.mxu1 %v6508_v46  ;;  %v1405_v46 = vld [vmem:[#allocation9 + $0x3c8] sm:$0xff]  ;;  %v1462_v15 = vld [vmem:[#allocation9 + $0x590] sm:$0xff]  ;;  %v1463_v17 = vld [vmem:[#allocation9 + $0x598] sm:$0xff] }
  0xec   :  { %1101 = vmatprep.subr.mxu0 %v7883_v19  ;;  %1204 = vmatprep.subr.mxu1 %v6512_v50  ;;  %v1401_v50 = vld [vmem:[#allocation9 + $0x3a8] sm:$0xff]  ;;  %v1458_v19 = vld [vmem:[#allocation9 + $0x570] sm:$0xff] }
  0xed   :  { %939 = vmatprep.mubr.f32.mxu0 %v7869_v60  ;;  %1102 = vmatpush1.msra.mxu0 %v7884_v20  ;;  %v1460_v20 = vld [vmem:[#allocation9 + $0x580] sm:$0xff] }
  0xee   :  { %1205 = vmatpush1.msra.mxu1 %v6515_v44  ;;  %5684 = vmatmul.mubr.msk.f32.gmra.mxu0 %vm233_vm0, %v5678_v18  ;;  %v1407_v44 = vld [vmem:[#allocation9 + $0x3d8] sm:$0xff] }
  0xef   :  { %1103 = vmatprep.subr.mxu0 %v7885_v0  ;;  %1206 = vmatprep.subr.mxu1 %v6519_v48  ;;  %v1406_v48 = vld [vmem:[#allocation9 + $0x3d0] sm:$0xff]  ;;  %v1459_v18 = vld [vmem:[#allocation9 + $0x578] sm:$0xff]  ;;  %v1456_v0 = vld [vmem:[#allocation9 + $0x560] sm:$0xff] }
  0xf0   :  { %1040 = vmatprep.mubr.f32.mxu1 %v7869_v60  ;;  %1104 = vmatpush1.msra.mxu0 %v7886_v22  ;;  %v1457_v22 = vld [vmem:[#allocation9 + $0x568] sm:$0xff] }
  0xf1   :  { %1207 = vmatpush1.msra.mxu1 %v6523_v56  ;;  %1105 = vmatprep.subr.mxu0 %v7887_v23  ;;  %v1391_v56 = vld [vmem:[#allocation9 + $0x358] sm:$0xff]  ;;  %v1453_v23 = vld [vmem:[#allocation9 + $0x548] sm:$0xff] }
  0xf2   :  { %5688 = vmatmul.mubr.msk.f32.gmra.mxu1 %vm233_vm0, %v5686_v21  ;;  %1208 = vmatprep.subr.mxu1 %v6527_v54  ;;  %v1387_v54 = vld [vmem:[#allocation9 + $0x338] sm:$0xff] }
  0xf3   :  { %1106 = vmatpush1.msra.mxu0 %v7888_v25  ;;  %1139 = vmatprep.mubr.f32.mxu0 %v7869_v60  ;;  %v1455_v21 = vld [vmem:[#allocation9 + $0x558] sm:$0xff]  ;;  %v1454_v25 = vld [vmem:[#allocation9 + $0x550] sm:$0xff] }
  0xf4   :  { %1209 = vmatpush1.msra.mxu1 %v6531_v33  ;;  %5691 = vmatmul.mubr.msk.f32.vlgmr.msra.gmra.mxu0 %vm233_vm0, %v5689_v24  ;;  %v1389_v33 = vld [vmem:[#allocation9 + $0x348] sm:$0xff]  ;;  %v1452_v24 = vld [vmem:[#allocation9 + $0x540] sm:$0xff] }
  0xf5   :  { %1210 = vmatprep.subr.mxu1 %v6535_v1  ;;  %1244 = vmatprep.mubr.f32.mxu1 %v7869_v60  ;;  %v1386_v1 = vld [vmem:[#allocation9 + $0x330] sm:$0xff] }
  0xf6   :  { %1211 = vmatpush1.msra.mxu1 %v6539_v3  ;;  %1145 = vmatprep.mubr.f32.mxu0 %v7869_v60  ;;  %v1388_v3 = vld [vmem:[#allocation9 + $0x340] sm:$0xff] }
  0xf7   :  { %5695 = vmatmul.mubr.msk.f32.vlgmr.msra.gmra.mxu1 %vm233_vm0, %v5693_v26  ;;  %1481 = vmatprep.subr.mxu0 %v1420_v27  ;;  %v1450_v26 = vld [vmem:[#allocation9 + $0x530] sm:$0xff]  ;;  %v1449_v27 = vld [vmem:[#allocation9 + $0x528] sm:$0xff] }
  0xf8   :  { %5692 = vmatmul.mubr.msk.f32.gmra.mxu0 %vm233_vm0, %v5690_v28  ;;  %1250 = vmatprep.mubr.f32.mxu1 %v7869_v60  ;;  %v1451_v28 = vld [vmem:[#allocation9 + $0x538] sm:$0xff] }
  0xf9   :  { %1558 = vmatprep.subr.mxu1 %v7869_v60  ;;  %1482 = vmatpush1.msra.mxu0 %v1419_v29  ;;  %v1447_v29 = vld [vmem:[#allocation9 + $0x518] sm:$0xff] }
  0xfa   :  { %1559 = vmatpush1.msra.mxu1 %v1421_v30  ;;  %1483 = vmatprep.subr.mxu0 %v1417_v31  ;;  %v1446_v30 = vld [vmem:[#allocation9 + $0x510] sm:$0xff]  ;;  %v1448_v31 = vld [vmem:[#allocation9 + $0x520] sm:$0xff] }
  0xfb   :  { %5696 = vmatmul.mubr.msk.f32.gmra.mxu1 %vm233_vm0, %v5694_v32  ;;  %1560 = vmatprep.subr.mxu1 %v7869_v60  ;;  %v1444_v32 = vld [vmem:[#allocation9 + $0x500] sm:$0xff] }
  0xfc   :  { %1484 = vmatpush1.msra.mxu0 %v1416_v35  ;;  %1561 = vmatpush1.msra.mxu1 %v1418_v36  ;;  %v1443_v35 = vld [vmem:[#allocation9 + $0x4f8] sm:$0xff]  ;;  %v1445_v36 = vld [vmem:[#allocation9 + $0x508] sm:$0xff] }
  0xfd   :  { %1485 = vmatprep.subr.mxu0 %v1414_v37  ;;  %1562 = vmatprep.subr.mxu1 %v7869_v60  ;;  %v1441_v37 = vld [vmem:[#allocation9 + $0x4e8] sm:$0xff] }
  0xfe   :  { %1486 = vmatpush1.msra.mxu0 %v1413_v38  ;;  %1563 = vmatpush1.msra.mxu1 %v1415_v39  ;;  %v1440_v38 = vld [vmem:[#allocation9 + $0x4e0] sm:$0xff]  ;;  %v1442_v39 = vld [vmem:[#allocation9 + $0x4f0] sm:$0xff] }
  0xff   :  { %1487 = vmatprep.subr.mxu0 %v1411_v40  ;;  %1564 = vmatprep.subr.mxu1 %v7869_v60  ;;  %v1438_v40 = vld [vmem:[#allocation9 + $0x4d0] sm:$0xff] }
 0x100   :  { %1488 = vmatpush1.msra.mxu0 %v1410_v41  ;;  %1565 = vmatpush1.msra.mxu1 %v1412_v42  ;;  %v1437_v41 = vld [vmem:[#allocation9 + $0x4c8] sm:$0xff]  ;;  %v1439_v42 = vld [vmem:[#allocation9 + $0x4d8] sm:$0xff] }
 0x101   :  { %1489 = vmatprep.subr.mxu0 %v1408_v43  ;;  %1566 = vmatprep.subr.mxu1 %v7869_v60  ;;  %v1435_v43 = vld [vmem:[#allocation9 + $0x4b8] sm:$0xff] }
 0x102   :  { %1490 = vmatpush1.msra.mxu0 %v1407_v44  ;;  %1567 = vmatpush1.msra.mxu1 %v1409_v45  ;;  %v1434_v44 = vld [vmem:[#allocation9 + $0x4b0] sm:$0xff]  ;;  %v1436_v45 = vld [vmem:[#allocation9 + $0x4c0] sm:$0xff] }
 0x103   :  { %1491 = vmatprep.subr.mxu0 %v1405_v46  ;;  %1568 = vmatprep.subr.mxu1 %v7869_v60  ;;  %v1432_v46 = vld [vmem:[#allocation9 + $0x4a0] sm:$0xff] }
 0x104   :  { %1492 = vmatpush1.msra.mxu0 %v1404_v47  ;;  %1569 = vmatpush1.msra.mxu1 %v1406_v48  ;;  %v1431_v47 = vld [vmem:[#allocation9 + $0x498] sm:$0xff]  ;;  %v1433_v48 = vld [vmem:[#allocation9 + $0x4a8] sm:$0xff] }
 0x105   :  { %1493 = vmatprep.subr.mxu0 %v1402_v49  ;;  %1570 = vmatprep.subr.mxu1 %v7869_v60  ;;  %v1429_v49 = vld [vmem:[#allocation9 + $0x488] sm:$0xff] }
 0x106   :  { %1494 = vmatpush1.msra.mxu0 %v1401_v50  ;;  %1571 = vmatpush1.msra.mxu1 %v1403_v51  ;;  %v1428_v50 = vld [vmem:[#allocation9 + $0x480] sm:$0xff]  ;;  %v1430_v51 = vld [vmem:[#allocation9 + $0x490] sm:$0xff] }
 0x107   :  { %1495 = vmatprep.subr.mxu0 %v1399_v52  ;;  %1572 = vmatprep.subr.mxu1 %v7869_v60  ;;  %v1426_v52 = vld [vmem:[#allocation9 + $0x470] sm:$0xff] }
 0x108   :  { %1496 = vmatpush1.msra.mxu0 %v1398_v53  ;;  %1573 = vmatpush1.msra.mxu1 %v1400_v57  ;;  %v1425_v53 = vld [vmem:[#allocation9 + $0x468] sm:$0xff]  ;;  %v1427_v57 = vld [vmem:[#allocation9 + $0x478] sm:$0xff] }
 0x109   :  { %1497 = vmatprep.subr.mxu0 %v1396_v58  ;;  %1574 = vmatprep.subr.mxu1 %v7869_v60  ;;  %v1423_v58 = vld [vmem:[#allocation9 + $0x458] sm:$0xff] }
 0x10a   :  { %1498 = vmatpush1.msra.mxu0 %v1395_v59  ;;  %1575 = vmatpush1.msra.mxu1 %v1397_v61  ;;  %v1422_v59 = vld [vmem:[#allocation9 + $0x450] sm:$0xff]  ;;  %v1424_v61 = vld [vmem:[#allocation9 + $0x460] sm:$0xff] }
 0x10b   :  { %1499 = vmatprep.subr.mxu0 %v1393_v62  ;;  %1576 = vmatprep.subr.mxu1 %v7869_v60  ;;  %v1325_v62 = vld [vmem:[#allocation9 + $0x170] sm:$0xff] }
 0x10c   :  { %1500 = vmatpush1.msra.mxu0 %v1392_v63  ;;  %1577 = vmatpush1.msra.mxu1 %v1394_v34 }
 0x10d   :  { %1501 = vmatprep.subr.mxu0 %v1390_v55  ;;  %1578 = vmatprep.subr.mxu1 %v7869_v60 }
 0x10e   :  { %1502 = vmatpush1.msra.mxu0 %v1389_v33  ;;  %1579 = vmatpush1.msra.mxu1 %v1391_v56 }
 0x10f   :  { %1503 = vmatprep.subr.mxu0 %v1387_v54  ;;  %1580 = vmatprep.subr.mxu1 %v7869_v60 }
 0x110   :  { %1504 = vmatpush1.msra.mxu0 %v1386_v1  ;;  %1581 = vmatpush1.msra.mxu1 %v1388_v3 }
 0x111   :  { %1505 = vmatprep.subr.mxu0 %v1384_v5  ;;  %1582 = vmatprep.subr.mxu1 %v7869_v60  ;;  %v719_v5 = vlaneseq }
 0x112   :  { %1506 = vmatpush1.msra.mxu0 %v1383_v7  ;;  %1583 = vmatpush1.msra.mxu1 %v1385_v9 }
 0x113   :  { %1507 = vmatprep.subr.mxu0 %v1381_v2  ;;  %1584 = vmatprep.subr.mxu1 %v7869_v60 }
 0x114   :  { %1508 = vmatpush1.msra.mxu0 %v1380_v4  ;;  %1585 = vmatpush1.msra.mxu1 %v1382_v6  ;;  %v6709_v4 = vshrl.u32 %v719_v5, 7 }
 0x115   :  { %1509 = vmatprep.subr.mxu0 %v1378_v8  ;;  %1586 = vmatprep.subr.mxu1 %v7869_v60 }
 0x116   :  { %1510 = vmatpush1.msra.mxu0 %v1377_v10  ;;  %1587 = vmatpush1.msra.mxu1 %v1379_v11  ;;  %7889 = vst [vmem:[#allocation31_spill] sm:$0xff] %v6709_v4 }
 0x117   :  { %1511 = vmatprep.subr.mxu0 %v1375_v12  ;;  %1588 = vmatprep.subr.mxu1 %v7869_v60 }
 0x118   :  { %1512 = vmatpush1.msra.mxu0 %v1374_v13  ;;  %1589 = vmatpush1.msra.mxu1 %v1376_v14  ;;  %v6712_v13 = vsub.s32 0, %v6709_v4  ;;  %v195_v14 = vld [vmem:[#allocation7] sm:$0x3] }
 0x119   :  { %1517 = vmatprep.subr.mxu0 %v1462_v15  ;;  %1594 = vmatprep.subr.mxu1 %v7869_v60 }
 0x11a   :  { %1518 = vmatpush2.msra.mxu0 %v1461_v16  ;;  %1595 = vmatpush2.msra.mxu1 %v1463_v17  ;;  %7890 = vst [vmem:[#allocation43_spill] sm:$0xff] %v6712_v13  ;;  %v6715_v17 = vsub.s32 1, %v6709_v4 }
 0x11b   :  { %1519 = vmatprep.subr.mxu0 %v1459_v18  ;;  %1596 = vmatprep.subr.mxu1 %v7869_v60 }
 0x11c   :  { %1520 = vmatpush2.msra.mxu0 %v1458_v19  ;;  %1597 = vmatpush2.msra.mxu1 %v1460_v20  ;;  %7891 = vst [vmem:[#allocation32_spill] sm:$0xff] %v6715_v17 }
 0x11d   :  { %1521 = vmatprep.subr.mxu0 %v1456_v0  ;;  %1598 = vmatprep.subr.mxu1 %v7869_v60 }
 0x11e   :  { %1522 = vmatpush2.msra.mxu0 %v1455_v21  ;;  %1599 = vmatpush2.msra.mxu1 %v1457_v22  ;;  %v6718_v22 = vrot.slane %v195_v14, %v6712_v13 }
 0x11f   :  { %1523 = vmatprep.subr.mxu0 %v1453_v23  ;;  %1600 = vmatprep.subr.mxu1 %v7869_v60 }
 0x120   :  { %1524 = vmatpush2.msra.mxu0 %v1452_v24  ;;  %1601 = vmatpush2.msra.mxu1 %v1454_v25 }
 0x121   :  { %1525 = vmatprep.subr.mxu0 %v1450_v26  ;;  %1602 = vmatprep.subr.mxu1 %v7869_v60 }
 0x122   :  { %1526 = vmatpush2.msra.mxu0 %v1449_v27  ;;  %1603 = vmatpush2.msra.mxu1 %v1451_v28  ;;  %v6721_v27 = vrot.slane %v195_v14, %v6715_v17  ;;  %v1313_v14 = vld [vmem:[#allocation9 + $0x110] sm:$0xff] }
 0x123   :  { %1527 = vmatprep.subr.mxu0 %v1447_v29  ;;  %1604 = vmatprep.subr.mxu1 %v7869_v60 }
 0x124   :  { %1528 = vmatpush2.msra.mxu0 %v1446_v30  ;;  %1605 = vmatpush2.msra.mxu1 %v1448_v31 }
 0x125   :  { %1529 = vmatprep.subr.mxu0 %v1444_v32  ;;  %1606 = vmatprep.subr.mxu1 %v7869_v60 }
 0x126   :  { %1530 = vmatpush2.msra.mxu0 %v1443_v35  ;;  %1607 = vmatpush2.msra.mxu1 %v1445_v36 }
 0x127   :  { %1531 = vmatprep.subr.mxu0 %v1441_v37  ;;  %1608 = vmatprep.subr.mxu1 %v7869_v60 }
 0x128   :  { %1532 = vmatpush2.msra.mxu0 %v1440_v38  ;;  %1609 = vmatpush2.msra.mxu1 %v1442_v39 }
 0x129   :  { %1533 = vmatprep.subr.mxu0 %v1438_v40  ;;  %1610 = vmatprep.subr.mxu1 %v7869_v60 }
 0x12a   :  { %1534 = vmatpush2.msra.mxu0 %v1437_v41  ;;  %1611 = vmatpush2.msra.mxu1 %v1439_v42 }
 0x12b   :  { %1535 = vmatprep.subr.mxu0 %v1435_v43  ;;  %1612 = vmatprep.subr.mxu1 %v7869_v60 }
 0x12c   :  { %1536 = vmatpush2.msra.mxu0 %v1434_v44  ;;  %1613 = vmatpush2.msra.mxu1 %v1436_v45 }
 0x12d   :  { %1537 = vmatprep.subr.mxu0 %v1432_v46  ;;  %1614 = vmatprep.subr.mxu1 %v7869_v60 }
 0x12e   :  { %1538 = vmatpush2.msra.mxu0 %v1431_v47  ;;  %1615 = vmatpush2.msra.mxu1 %v1433_v48 }
 0x12f   :  { %1539 = vmatprep.subr.mxu0 %v1429_v49  ;;  %1616 = vmatprep.subr.mxu1 %v7869_v60 }
 0x130   :  { %1540 = vmatpush2.msra.mxu0 %v1428_v50  ;;  %1617 = vmatpush2.msra.mxu1 %v1430_v51 }
 0x131   :  { %1541 = vmatprep.subr.mxu0 %v1426_v52  ;;  %1618 = vmatprep.subr.mxu1 %v7869_v60 }
 0x132   :  { %1542 = vmatpush2.msra.mxu0 %v1425_v53  ;;  %1619 = vmatpush2.msra.mxu1 %v1427_v57 }
 0x133   :  { %1543 = vmatprep.subr.mxu0 %v1423_v58  ;;  %1620 = vmatprep.subr.mxu1 %v7869_v60 }
 0x134   :  { %1544 = vmatpush2.msra.mxu0 %v1422_v59  ;;  %1621 = vmatpush2.msra.mxu1 %v1424_v61 }
 0x135   :  { %1639 = vmatprep.subr.mxu0 %v1325_v62  ;;  %1716 = vmatprep.subr.mxu1 %v7869_v60  ;;  %v1324_v62 = vld [vmem:[#allocation9 + $0x168] sm:$0xff] }
 0x166   :  { %v306_v63 = vpop.f32.mrf.mxu0  ;;  %v389_v55 = vpop.f32.mrf.mxu1 }
 0x167   :  { %v390_v6 = vadd.f32 %v389_v55, %v306_v63  ;;  %v1326_v63 = vld [vmem:[#allocation9 + $0x178] sm:$0xff] }
 0x168   :  { %v308_v34 = vpop.f32.mrf.mxu0  ;;  %v391_v56 = vpop.f32.mrf.mxu1 }
 0x169   :  { %v392_v11 = vadd.f32 %v391_v56, %v308_v34  ;;  %v1321_v56 = vld [vmem:[#allocation9 + $0x150] sm:$0xff] }
 0x172   :  { %v312_v33 = vpop.f32.mrf.mxu0  ;;  %v395_v1 = vpop.f32.mrf.mxu1 }
 0x173   :  { %v396_v15 = vadd.f32 %v395_v1, %v312_v33  ;;  %v1322_v33 = vld [vmem:[#allocation9 + $0x158] sm:$0xff]  ;;  %v1319_v1 = vld [vmem:[#allocation9 + $0x140] sm:$0xff] }
 0x174   :  { %v314_v54 = vpop.f32.mrf.mxu0  ;;  %v397_v7 = vpop.f32.mrf.mxu1 }
 0x175   :  { %v398_v20 = vadd.f32 %v397_v7, %v314_v54  ;;  %v1323_v54 = vld [vmem:[#allocation9 + $0x160] sm:$0xff]  ;;  %v1318_v7 = vld [vmem:[#allocation9 + $0x138] sm:$0xff] }
 0x178   :  { %v491_v3 = vpop.f32.mrf.mxu0 }
 0x179   :  { %v502_v12 = vadd.f32 %v491_v3, %v390_v6 }
 0x17a   :  { %v493_v9 = vpop.f32.mrf.mxu0 }
 0x17b   :  { %v597_v2 = vpop.f32.mrf.mxu1  ;;  %v503_v16 = vadd.f32 %v493_v9, %v392_v11  ;;  %v1320_v9 = vld [vmem:[#allocation9 + $0x148] sm:$0xff] }
 0x17c   :  { %v608_v0 = vadd.f32 %v597_v2, %v502_v12  ;;  %v1316_v2 = vld [vmem:[#allocation9 + $0x128] sm:$0xff] }
 0x17d   :  { %v599_v10 = vpop.f32.mrf.mxu1 }
 0x17e   :  { %v497_v8 = vpop.f32.mrf.mxu0  ;;  %v609_v24 = vadd.f32 %v599_v10, %v503_v16  ;;  %v1317_v10 = vld [vmem:[#allocation9 + $0x130] sm:$0xff]  ;;  %v1314_v16 = vld [vmem:[#allocation9 + $0x118] sm:$0xff] }
 0x17f   :  { %v603_v19 = vpop.f32.mrf.mxu1  ;;  %v504_v21 = vadd.f32 %v497_v8, %v396_v15  ;;  %v1315_v8 = vld [vmem:[#allocation9 + $0x120] sm:$0xff]  ;;  %v1312_v15 = vld [vmem:[#allocation9 + $0x108] sm:$0xff] }
 0x180   :  { %v499_v18 = vpop.f32.mrf.mxu0 }
 0x181   :  { %v505_v25 = vadd.f32 %v499_v18, %v398_v20  ;;  %v605_v28 = vpop.f32.mrf.mxu1  ;;  %v610_v30 = vadd.f32 %v603_v19, %v504_v21  ;;  %v1310_v18 = vld [vmem:[#allocation9 + $0xf8] sm:$0xff]  ;;  %v1309_v20 = vld [vmem:[#allocation9 + $0xf0] sm:$0xff] }
 0x183   :  { %v611_v36 = vadd.f32 %v605_v28, %v505_v25  ;;  %v1308_v28 = vld [vmem:[#allocation9 + $0xe8] sm:$0xff] }
 0x18a   :  { %v703_v23 = vpop.f32.mrf.mxu0 }
 0x18b   :  { %v714_v26 = vadd.f32 %v703_v23, %v608_v0  ;;  %v1311_v0 = vld [vmem:[#allocation9 + $0x100] sm:$0xff] }
 0x18c   :  { %v705_v29 = vpop.f32.mrf.mxu0 }
 0x18d   :  { %v729_v31 = vadd.f32 %v6718_v22, %v714_v26  ;;  %v715_v32 = vadd.f32 %v705_v29, %v609_v24  ;;  %v1307_v24 = vld [vmem:[#allocation9 + $0xe0] sm:$0xff]  ;;  %v1306_v26 = vld [vmem:[#allocation9 + $0xd8] sm:$0xff] }
 0x18e   :  { %v709_v35 = vpop.f32.mrf.mxu0 }
 0x18f   :  { %v6724_v37 = vmax.f32 %v729_v31, 0.0  ;;  %v730_v38 = vadd.f32 %v6721_v27, %v715_v32  ;;  %v716_v39 = vadd.f32 %v709_v35, %v610_v30  ;;  %v1304_v30 = vld [vmem:[#allocation9 + $0xc8] sm:$0xff]  ;;  %v1303_v35 = vld [vmem:[#allocation9 + $0xc0] sm:$0xff] }
 0x190   :  { %v711_v40 = vpop.f32.mrf.mxu0 }
 0x191   :  { %737 = vst [vmem:[#allocation2] sm:$0xff] %v6724_v37  ;;  %v734_v41 = vmax.f32 %v730_v38, 0.0  ;;  %v731_v42 = vadd.f32 %v6718_v22, %v716_v39  ;;  %v717_v43 = vadd.f32 %v711_v40, %v611_v36  ;;  %v852_v47 = vpop.f32.mrf.mxu1  ;;  %v1305_v36 = vld [vmem:[#allocation9 + $0xd0] sm:$0xff] }
 0x192   :  { %v1301_v39 = vld [vmem:[#allocation9 + $0xb0] sm:$0xff] }
 0x193   :  { %739 = vst.msk [vmem:[#allocation2 + $0x8] sm:$0xff] %vm738_vm1, %v734_v41  ;;  %v735_v44 = vmax.f32 %v731_v42, 0.0  ;;  %v732_v45 = vadd.f32 %v6721_v27, %v717_v43  ;;  %v854_v53 = vpop.f32.mrf.mxu1  ;;  %v1300_v42 = vld [vmem:[#allocation9 + $0xa8] sm:$0xff]  ;;  %v1302_v43 = vld [vmem:[#allocation9 + $0xb8] sm:$0xff] }
 0x195   :  { %740 = vst [vmem:[#allocation2 + $0x10] sm:$0xf] %v735_v44  ;;  %v736_v46 = vmax.f32 %v732_v45, 0.0 }
 0x197   :  { %742 = vst.msk [vmem:[#allocation2 + $0x18] sm:$0xf] %vm741_vm2, %v736_v46  ;;  %v1298_v46 = vld [vmem:[#allocation9 + $0x98] sm:$0xff] }
 0x198   :  { %v1369_v50 = vld [vmem:[#allocation2] sm:$0xfe] }
 0x199   :  { %v1469_v59 = vrot.slane %v1369_v50, 1  ;;  %v1299_v50 = vld [vmem:[#allocation9 + $0xa0] sm:$0xff] }
 0x19a   :  { %v1370_v48 = vld [vmem:[#allocation2 + $0x8] sm:$0xfe] }
 0x19b   :  { %v1472_v57 = vrot.slane %v1370_v48, 1  ;;  %v1276_v6 = vld [vmem:[#allocation2 + $0x8] sm:$0xff] }
 0x19c   :  { %v1371_v49 = vld [vmem:[#allocation2 + $0x10] sm:$0x7] }
 0x19d   :  { %v1470_v52 = vrot.slane %v1371_v49, 1  ;;  %v1297_v49 = vld [vmem:[#allocation9 + $0x90] sm:$0xff] }
 0x19e   :  { %v1372_v51 = vld [vmem:[#allocation2 + $0x18] sm:$0x7]  ;;  %v858_v55 = vpop.f32.mrf.mxu1 }
 0x19f   :  { %v1473_v58 = vrot.slane %v1372_v51, 1  ;;  %v1471_v34 = vsel %vm1468_vm3, %v1469_v59, %v1470_v52  ;;  %v1294_v59 = vld [vmem:[#allocation9 + $0x78] sm:$0xff] }
 0x1a0   :  { %v860_v3 = vpop.f32.mrf.mxu1 }
 0x1a1   :  { %v1474_v61 = vsel %vm1468_vm3, %v1472_v57, %v1473_v58  ;;  %v935_v5 = vpop.f32.mrf.mxu0 }
 0x1a2   :  { %5697 = vmatprep.mubr.msk.f32.mxu0 %vm738_vm1, %v1474_v61  ;;  %5699 = vmatprep.mubr.msk.f32.mxu1 %vm738_vm1, %v1474_v61  ;;  %v936_v19 = vadd.f32 %v935_v5, %v852_v47  ;;  %v1296_v61 = vld [vmem:[#allocation9 + $0x88] sm:$0xff] }
 0x1a3   :  { %1546 = vmatmul.mubr.f32.vlgmr.msra.gmra.mxu0 %v1471_v34  ;;  %1623 = vmatmul.mubr.f32.vlgmr.msra.gmra.mxu1 %v1471_v34  ;;  %v937_v11 = vpop.f32.mrf.mxu0  ;;  %v1292_v34 = vld [vmem:[#allocation9 + $0x68] sm:$0xff] }
 0x1a4   :  { %1640 = vmatpush1.msra.mxu0 %v1324_v62  ;;  %1717 = vmatpush1.msra.mxu1 %v1326_v63  ;;  %v1036_v12 = vpop.f32.mrf.mxu1  ;;  %v938_v25 = vadd.f32 %v937_v11, %v854_v53 }
 0x1a5   :  { %5698 = vmatprep.mubr.msk.f32.mxu0 %vm738_vm1, %v1473_v58  ;;  %5700 = vmatprep.mubr.msk.f32.mxu1 %vm738_vm1, %v1473_v58  ;;  %v1047_v31 = vadd.f32 %v1036_v12, %v936_v19 }
 0x1a6   :  { %1641 = vmatprep.subr.mxu0 %v1322_v33  ;;  %1718 = vmatprep.subr.mxu1 %v7869_v60  ;;  %v1038_v23 = vpop.f32.mrf.mxu1 }
 0x1a7   :  { %1642 = vmatpush1.msra.mxu0 %v1321_v56  ;;  %1719 = vmatpush1.msra.mxu1 %v1323_v54  ;;  %v1048_v40 = vadd.f32 %v1038_v23, %v938_v25  ;;  %v1291_v56 = vld [vmem:[#allocation9 + $0x60] sm:$0xff]  ;;  %v1293_v54 = vld [vmem:[#allocation9 + $0x70] sm:$0xff]  ;;  %v1282_v23 = vld [vmem:[#allocation9 + $0x18] sm:$0xff] }
 0x1a8   :  { %1643 = vmatprep.subr.mxu0 %v1319_v1  ;;  %1720 = vmatprep.subr.mxu1 %v7869_v60 }
 0x1a9   :  { %1552 = vmatmul.mubr.f32.gmra.mxu0 %v1470_v52  ;;  %1628 = vmatmul.mubr.f32.gmra.mxu1 %v1470_v52  ;;  %v1295_v52 = vld [vmem:[#allocation9 + $0x80] sm:$0xff] }
 0x1aa   :  { %1644 = vmatpush1.msra.mxu0 %v1318_v7  ;;  %1721 = vmatpush1.msra.mxu1 %v1320_v9  ;;  %v1289_v7 = vld [vmem:[#allocation9 + $0x50] sm:$0xff] }
 0x1ab   :  { %1645 = vmatprep.subr.mxu0 %v1316_v2  ;;  %5701 = vmatprep.mubr.msk.f32.mxu0 %vm738_vm1, %v1276_v6 }
 0x1ac   :  { %1722 = vmatprep.subr.mxu1 %v7869_v60  ;;  %5703 = vmatprep.mubr.msk.f32.mxu1 %vm738_vm1, %v1276_v6  ;;  %v1288_v6 = vld [vmem:[#allocation9 + $0x48] sm:$0xff] }
 0x1ad   :  { %1646 = vmatpush1.msra.mxu0 %v1315_v8  ;;  %1723 = vmatpush1.msra.mxu1 %v1317_v10  ;;  %v1290_v8 = vld [vmem:[#allocation9 + $0x58] sm:$0xff] }
 0x1ae   :  { %1647 = vmatprep.subr.mxu0 %v1313_v14  ;;  %1724 = vmatprep.subr.mxu1 %v7869_v60  ;;  %v941_v21 = vpop.f32.mrf.mxu0  ;;  %v1286_v14 = vld [vmem:[#allocation9 + $0x38] sm:$0xff] }
 0x1af   :  { %1648 = vmatpush1.msra.mxu0 %v1312_v15  ;;  %1725 = vmatpush1.msra.mxu1 %v1314_v16  ;;  %v942_v32 = vadd.f32 %v941_v21, %v858_v55  ;;  %v1285_v16 = vld [vmem:[#allocation9 + $0x30] sm:$0xff]  ;;  %v1283_v21 = vld [vmem:[#allocation9 + $0x20] sm:$0xff] }
 0x1b0   :  { %1649 = vmatprep.subr.mxu0 %v1310_v18  ;;  %1726 = vmatprep.subr.mxu1 %v7869_v60  ;;  %v943_v29 = vpop.f32.mrf.mxu0  ;;  %v1287_v18 = vld [vmem:[#allocation9 + $0x40] sm:$0xff] }
 0x1b1   :  { %1650 = vmatpush1.msra.mxu0 %v1309_v20  ;;  %1727 = vmatpush1.msra.mxu1 %v1311_v0  ;;  %v944_v41 = vadd.f32 %v943_v29, %v860_v3  ;;  %v1281_v29 = vld [vmem:[#allocation9 + $0x10] sm:$0xff] }
 0x1b2   :  { %1651 = vmatprep.subr.mxu0 %v1307_v24  ;;  %1728 = vmatprep.subr.mxu1 %v7869_v60  ;;  %v1042_v38 = vpop.f32.mrf.mxu1  ;;  %v1284_v24 = vld [vmem:[#allocation9 + $0x28] sm:$0xff] }
 0x1b3   :  { %1652 = vmatpush1.msra.mxu0 %v1306_v26  ;;  %1729 = vmatpush1.msra.mxu1 %v1308_v28  ;;  %v1049_v47 = vadd.f32 %v1042_v38, %v942_v32  ;;  %v1280_v28 = vld [vmem:[#allocation9 + $0x8] sm:$0xff]  ;;  %v1366_v32 = vld [vmem:[#allocation9 + $0x2b8] sm:$0xff]  ;;  %v1365_v38 = vld [vmem:[#allocation9 + $0x2b0] sm:$0xff] }
 0x1b4   :  { %1653 = vmatprep.subr.mxu0 %v1304_v30  ;;  %1730 = vmatprep.subr.mxu1 %v7869_v60  ;;  %v1044_v44 = vpop.f32.mrf.mxu1  ;;  %v1141_v45 = vpop.f32.mrf.mxu0 }
 0x1b5   :  { %1654 = vmatpush1.msra.mxu0 %v1303_v35  ;;  %1731 = vmatpush1.msra.mxu1 %v1305_v36  ;;  %v1152_v48 = vadd.f32 %v1141_v45, %v1047_v31  ;;  %v1050_v53 = vadd.f32 %v1044_v44, %v944_v41  ;;  %v1367_v31 = vld [vmem:[#allocation9 + $0x2c0] sm:$0xff]  ;;  %v1368_v35 = vld [vmem:[#allocation9 + $0x2c8] sm:$0xff]  ;;  %v1362_v41 = vld [vmem:[#allocation9 + $0x298] sm:$0xff] }
 0x1b6   :  { %1655 = vmatprep.subr.mxu0 %v1301_v39  ;;  %1732 = vmatprep.subr.mxu1 %v7869_v60  ;;  %v1143_v51 = vpop.f32.mrf.mxu0  ;;  %v1363_v36 = vld [vmem:[#allocation9 + $0x2a0] sm:$0xff]  ;;  %v1361_v39 = vld [vmem:[#allocation9 + $0x290] sm:$0xff] }
 0x1b7   :  { %1656 = vmatpush1.msra.mxu0 %v1300_v42  ;;  %1733 = vmatpush1.msra.mxu1 %v1302_v43  ;;  %v1153_v57 = vadd.f32 %v1143_v51, %v1048_v40  ;;  %v1246_v58 = vpop.f32.mrf.mxu1  ;;  %v1360_v40 = vld [vmem:[#allocation9 + $0x288] sm:$0xff]  ;;  %v1358_v42 = vld [vmem:[#allocation9 + $0x278] sm:$0xff]  ;;  %v1357_v43 = vld [vmem:[#allocation9 + $0x270] sm:$0xff] }
 0x1b8   :  { %1657 = vmatprep.subr.mxu0 %v1298_v46  ;;  %1734 = vmatprep.subr.mxu1 %v7869_v60  ;;  %v1257_v62 = vadd.f32 %v1246_v58, %v1152_v48  ;;  %v1147_v63 = vpop.f32.mrf.mxu0  ;;  %v1359_v44 = vld [vmem:[#allocation9 + $0x280] sm:$0xff]  ;;  %v1354_v46 = vld [vmem:[#allocation9 + $0x258] sm:$0xff]  ;;  %v1352_v48 = vld [vmem:[#allocation9 + $0x248] sm:$0xff] }
 0x1b9   :  { %1658 = vmatpush1.msra.mxu0 %v1297_v49  ;;  %1735 = vmatpush1.msra.mxu1 %v1299_v50  ;;  %v1154_v55 = vadd.f32 %v1147_v63, %v1049_v47  ;;  %v1248_v33 = vpop.f32.mrf.mxu1  ;;  %v1355_v45 = vld [vmem:[#allocation9 + $0x260] sm:$0xff]  ;;  %v1356_v47 = vld [vmem:[#allocation9 + $0x268] sm:$0xff]  ;;  %v1353_v50 = vld [vmem:[#allocation9 + $0x250] sm:$0xff] }
 0x1ba   :  { %1659 = vmatprep.subr.mxu0 %v1295_v52  ;;  %1736 = vmatprep.subr.mxu1 %v7869_v60  ;;  %v1261_v1 = vadd.f32 %v1257_v62, %v6718_v22  ;;  %v1258_v3 = vadd.f32 %v1248_v33, %v1153_v57  ;;  %v1149_v5 = vpop.f32.mrf.mxu0  ;;  %v1351_v49 = vld [vmem:[#allocation9 + $0x240] sm:$0xff]  ;;  %v1349_v51 = vld [vmem:[#allocation9 + $0x230] sm:$0xff]  ;;  %v1348_v52 = vld [vmem:[#allocation9 + $0x228] sm:$0xff] }
 0x1bb   :  { %1660 = vmatpush1.msra.mxu0 %v1294_v59  ;;  %1737 = vmatpush1.msra.mxu1 %v1296_v61  ;;  %v1155_v9 = vadd.f32 %v1149_v5, %v1050_v53  ;;  %v1252_v2 = vpop.f32.mrf.mxu1  ;;  %v1350_v53 = vld [vmem:[#allocation9 + $0x238] sm:$0xff]  ;;  %v1345_v58 = vld [vmem:[#allocation9 + $0x210] sm:$0xff]  ;;  %v1347_v59 = vld [vmem:[#allocation9 + $0x220] sm:$0xff] }
 0x1bc   :  { %1661 = vmatprep.subr.mxu0 %v1292_v34  ;;  %1738 = vmatprep.subr.mxu1 %v7869_v60  ;;  %v1265_v10 = vmax.f32 %v1261_v1, 0.0  ;;  %v1262_v11 = vadd.f32 %v1258_v3, %v6721_v27  ;;  %v1259_v12 = vadd.f32 %v1252_v2, %v1154_v55  ;;  %v1346_v57 = vld [vmem:[#allocation9 + $0x218] sm:$0xff]  ;;  %v1343_v61 = vld [vmem:[#allocation9 + $0x200] sm:$0xff]  ;;  %v1344_v63 = vld [vmem:[#allocation9 + $0x208] sm:$0xff] }
 0x1bd   :  { %1662 = vmatpush1.msra.mxu0 %v1291_v56  ;;  %1739 = vmatpush1.msra.mxu1 %v1293_v54  ;;  %v1254_v15 = vpop.f32.mrf.mxu1  ;;  %v1342_v62 = vld [vmem:[#allocation9 + $0x1f8] sm:$0xff]  ;;  %v1340_v34 = vld [vmem:[#allocation9 + $0x1e8] sm:$0xff]  ;;  %v1339_v55 = vld [vmem:[#allocation9 + $0x1e0] sm:$0xff] }
 0x1be   :  { %1663 = vmatprep.subr.mxu0 %v1289_v7  ;;  %1740 = vmatprep.subr.mxu1 %v7869_v60  ;;  %1270 = vst [vmem:[#allocation2 + $0x20] sm:$0xff] %v1265_v10  ;;  %v1266_v19 = vmax.f32 %v1262_v11, 0.0  ;;  %v1263_v20 = vadd.f32 %v1259_v12, %v6718_v22  ;;  %v1260_v0 = vadd.f32 %v1254_v15, %v1155_v9  ;;  %v1279_v22 = vld [vmem:[#allocation9] sm:$0xff]  ;;  %v1341_v33 = vld [vmem:[#allocation9 + $0x1f0] sm:$0xff]  ;;  %v1336_v54 = vld [vmem:[#allocation9 + $0x1c8] sm:$0xff] }
 0x1bf   :  { %1664 = vmatpush1.msra.mxu0 %v1288_v6  ;;  %1741 = vmatpush1.msra.mxu1 %v1290_v8  ;;  %v1337_v56 = vld [vmem:[#allocation9 + $0x1d0] sm:$0xff]  ;;  %v1338_v1 = vld [vmem:[#allocation9 + $0x1d8] sm:$0xff]  ;;  %v1335_v7 = vld [vmem:[#allocation9 + $0x1c0] sm:$0xff] }
 0x1c0   :  { %1665 = vmatprep.subr.mxu0 %v1286_v14  ;;  %1742 = vmatprep.subr.mxu1 %v7869_v60  ;;  %1271 = vst.msk [vmem:[#allocation2 + $0x28] sm:$0xff] %vm738_vm1, %v1266_v19  ;;  %v1267_v25 = vmax.f32 %v1263_v20, 0.0  ;;  %v1264_v26 = vadd.f32 %v1260_v0, %v6721_v27  ;;  %v1364_v27 = vld [vmem:[#allocation9 + $0x2a8] sm:$0xff]  ;;  %v1334_v3 = vld [vmem:[#allocation9 + $0x1b8] sm:$0xff]  ;;  %v1333_v5 = vld [vmem:[#allocation9 + $0x1b0] sm:$0xff] }
 0x1c1   :  { %1666 = vmatpush1.msra.mxu0 %v1285_v16  ;;  %1743 = vmatpush1.msra.mxu1 %v1287_v18  ;;  %v1331_v9 = vld [vmem:[#allocation9 + $0x1a0] sm:$0xff]  ;;  %v1330_v2 = vld [vmem:[#allocation9 + $0x198] sm:$0xff]  ;;  %v1332_v6 = vld [vmem:[#allocation9 + $0x1a8] sm:$0xff] }
 0x1c2   :  { %1667 = vmatprep.subr.mxu0 %v1283_v21  ;;  %1744 = vmatprep.subr.mxu1 %v7869_v60  ;;  %1272 = vst [vmem:[#allocation2 + $0x30] sm:$0xf] %v1267_v25  ;;  %v1268_v30 = vmax.f32 %v1264_v26, 0.0  ;;  %v1328_v8 = vld [vmem:[#allocation9 + $0x188] sm:$0xff]  ;;  %v1327_v10 = vld [vmem:[#allocation9 + $0x180] sm:$0xff]  ;;  %v1329_v11 = vld [vmem:[#allocation9 + $0x190] sm:$0xff] }
 0x1c3   :  { %1668 = vmatpush1.msra.mxu0 %v1282_v23  ;;  %1745 = vmatpush1.msra.mxu1 %v1284_v24  ;;  %v1842_v12 = vld [vmem:[#allocation9 + $0x710] sm:$0xff]  ;;  %v1841_v14 = vld [vmem:[#allocation9 + $0x708] sm:$0xff]  ;;  %v1843_v15 = vld [vmem:[#allocation9 + $0x718] sm:$0xff] }
 0x1c4   :  { %1669 = vmatprep.subr.mxu0 %v1280_v28  ;;  %1746 = vmatprep.subr.mxu1 %v7869_v60  ;;  %1273 = vst.msk [vmem:[#allocation2 + $0x38] sm:$0xf] %vm741_vm2, %v1268_v30  ;;  %v1794_v16 = vld [vmem:[#allocation2 + $0x18] sm:$0xf]  ;;  %v1840_v0 = vld [vmem:[#allocation9 + $0x700] sm:$0xff]  ;;  %v1837_v28 = vld [vmem:[#allocation9 + $0x6e8] sm:$0xff] }
 0x1c5   :  { %1670 = vmatpush1.msra.mxu0 %v1279_v22  ;;  %1747 = vmatpush1.msra.mxu1 %v1281_v29  ;;  %v1278_v18 = vld [vmem:[#allocation2 + $0x18] sm:$0x3]  ;;  %v1839_v19 = vld [vmem:[#allocation9 + $0x6f8] sm:$0xff]  ;;  %v1792_v21 = vld [vmem:[#allocation2 + $0x8] sm:$0xfc]  ;;  %v6780_v23 = vrot.slane %v1794_v16, 2 }
 0x1c6   :  { %1675 = vmatprep.subr.mxu0 %v1367_v31  ;;  %1752 = vmatprep.subr.mxu1 %v7869_v60  ;;  %v1838_v20 = vld [vmem:[#allocation9 + $0x6f0] sm:$0xff]  ;;  %v1277_v24 = vld [vmem:[#allocation2 + $0x10] sm:$0x3]  ;;  %v1835_v25 = vld [vmem:[#allocation9 + $0x6d8] sm:$0xff]  ;;  %v1894_v26 = vrot.slane %v1792_v21, 2 }
 0x1c7   :  { %1676 = vmatpush2.msra.mxu0 %v1366_v32  ;;  %1753 = vmatpush2.msra.mxu1 %v1368_v35  ;;  %v1833_v29 = vld [vmem:[#allocation9 + $0x6c8] sm:$0xff]  ;;  %v1832_v30 = vld [vmem:[#allocation9 + $0x6c0] sm:$0xff]  ;;  %v1834_v31 = vld [vmem:[#allocation9 + $0x6d0] sm:$0xff] }
 0x1c8   :  { %1677 = vmatprep.subr.mxu0 %v1364_v27  ;;  %1754 = vmatprep.subr.mxu1 %v7869_v60  ;;  %v1896_v22 = vsel %vm1890_vm4, %v1894_v26, %v6780_v23  ;;  %v1830_v32 = vld [vmem:[#allocation9 + $0x6b0] sm:$0xff]  ;;  %v1829_v35 = vld [vmem:[#allocation9 + $0x6a8] sm:$0xff]  ;;  %v1831_v27 = vld [vmem:[#allocation9 + $0x6b8] sm:$0xff] }
 0x1c9   :  { %1678 = vmatpush2.msra.mxu0 %v1363_v36  ;;  %1755 = vmatpush2.msra.mxu1 %v1365_v38  ;;  %v1827_v36 = vld [vmem:[#allocation9 + $0x698] sm:$0xff]  ;;  %v1826_v38 = vld [vmem:[#allocation9 + $0x690] sm:$0xff] }
 0x1ca   :  { %1679 = vmatprep.subr.mxu0 %v1361_v39  ;;  %1756 = vmatprep.subr.mxu1 %v7869_v60  ;;  %v1828_v39 = vld [vmem:[#allocation9 + $0x6a0] sm:$0xff]  ;;  %v1879_v16 = vld [vmem:[#allocation9 + $0x838] sm:$0xff]  ;;  %v1870_v26 = vld [vmem:[#allocation9 + $0x7f0] sm:$0xff] }
 0x1cb   :  { %1680 = vmatpush2.msra.mxu0 %v1360_v40  ;;  %1757 = vmatpush2.msra.mxu1 %v1362_v41  ;;  %v1824_v40 = vld [vmem:[#allocation9 + $0x680] sm:$0xff]  ;;  %v1823_v41 = vld [vmem:[#allocation9 + $0x678] sm:$0xff] }
 0x1cc   :  { %1681 = vmatprep.subr.mxu0 %v1358_v42  ;;  %1758 = vmatprep.subr.mxu1 %v7869_v60  ;;  %v1825_v42 = vld [vmem:[#allocation9 + $0x688] sm:$0xff]  ;;  %v1871_v21 = vld [vmem:[#allocation9 + $0x7f8] sm:$0xff] }
 0x1cd   :  { %1682 = vmatpush2.msra.mxu0 %v1357_v43  ;;  %1759 = vmatpush2.msra.mxu1 %v1359_v44  ;;  %v1821_v43 = vld [vmem:[#allocation9 + $0x668] sm:$0xff]  ;;  %v1820_v44 = vld [vmem:[#allocation9 + $0x660] sm:$0xff] }
 0x1ce   :  { %1683 = vmatprep.subr.mxu0 %v1355_v45  ;;  %1760 = vmatprep.subr.mxu1 %v7869_v60  ;;  %v1822_v45 = vld [vmem:[#allocation9 + $0x670] sm:$0xff] }
 0x1cf   :  { %1684 = vmatpush2.msra.mxu0 %v1354_v46  ;;  %1761 = vmatpush2.msra.mxu1 %v1356_v47  ;;  %v1818_v46 = vld [vmem:[#allocation9 + $0x650] sm:$0xff]  ;;  %v1817_v47 = vld [vmem:[#allocation9 + $0x648] sm:$0xff] }
 0x1d0   :  { %1685 = vmatprep.subr.mxu0 %v1352_v48  ;;  %1762 = vmatprep.subr.mxu1 %v7869_v60  ;;  %v1819_v48 = vld [vmem:[#allocation9 + $0x658] sm:$0xff] }
 0x1d1   :  { %1686 = vmatpush2.msra.mxu0 %v1351_v49  ;;  %1763 = vmatpush2.msra.mxu1 %v1353_v50  ;;  %v1815_v49 = vld [vmem:[#allocation9 + $0x638] sm:$0xff]  ;;  %v1814_v50 = vld [vmem:[#allocation9 + $0x630] sm:$0xff] }
 0x1d2   :  { %1687 = vmatprep.subr.mxu0 %v1349_v51  ;;  %1764 = vmatprep.subr.mxu1 %v7869_v60  ;;  %v1816_v51 = vld [vmem:[#allocation9 + $0x640] sm:$0xff] }
 0x1d3   :  { %1688 = vmatpush2.msra.mxu0 %v1348_v52  ;;  %1765 = vmatpush2.msra.mxu1 %v1350_v53  ;;  %v1812_v52 = vld [vmem:[#allocation9 + $0x620] sm:$0xff]  ;;  %v1811_v53 = vld [vmem:[#allocation9 + $0x618] sm:$0xff] }
 0x1d4   :  { %1689 = vmatprep.subr.mxu0 %v1346_v57  ;;  %1766 = vmatprep.subr.mxu1 %v7869_v60  ;;  %v1813_v57 = vld [vmem:[#allocation9 + $0x628] sm:$0xff] }
 0x1d5   :  { %1690 = vmatpush2.msra.mxu0 %v1345_v58  ;;  %1767 = vmatpush2.msra.mxu1 %v1347_v59  ;;  %v1809_v58 = vld [vmem:[#allocation9 + $0x608] sm:$0xff]  ;;  %v1808_v59 = vld [vmem:[#allocation9 + $0x600] sm:$0xff] }
 0x1d6   :  { %1691 = vmatprep.subr.mxu0 %v1343_v61  ;;  %1768 = vmatprep.subr.mxu1 %v7869_v60  ;;  %v1810_v61 = vld [vmem:[#allocation9 + $0x610] sm:$0xff] }
 0x1d7   :  { %1692 = vmatpush2.msra.mxu0 %v1342_v62  ;;  %1769 = vmatpush2.msra.mxu1 %v1344_v63  ;;  %v1806_v62 = vld [vmem:[#allocation9 + $0x5f0] sm:$0xff]  ;;  %v1805_v63 = vld [vmem:[#allocation9 + $0x5e8] sm:$0xff] }
 0x1d8   :  { %1693 = vmatprep.subr.mxu0 %v1340_v34  ;;  %1770 = vmatprep.subr.mxu1 %v7869_v60  ;;  %v1807_v34 = vld [vmem:[#allocation9 + $0x5f8] sm:$0xff] }
 0x1d9   :  { %1694 = vmatpush2.msra.mxu0 %v1339_v55  ;;  %1771 = vmatpush2.msra.mxu1 %v1341_v33  ;;  %v1803_v55 = vld [vmem:[#allocation9 + $0x5d8] sm:$0xff]  ;;  %v1802_v33 = vld [vmem:[#allocation9 + $0x5d0] sm:$0xff] }
 0x1da   :  { %1695 = vmatprep.subr.mxu0 %v1337_v56  ;;  %1772 = vmatprep.subr.mxu1 %v7869_v60  ;;  %v1804_v56 = vld [vmem:[#allocation9 + $0x5e0] sm:$0xff] }
 0x1db   :  { %1696 = vmatpush2.msra.mxu0 %v1336_v54  ;;  %1773 = vmatpush2.msra.mxu1 %v1338_v1  ;;  %v1800_v54 = vld [vmem:[#allocation9 + $0x5c0] sm:$0xff]  ;;  %v1799_v1 = vld [vmem:[#allocation9 + $0x5b8] sm:$0xff] }
 0x1dc   :  { %1697 = vmatprep.subr.mxu0 %v1334_v3  ;;  %1774 = vmatprep.subr.mxu1 %v7869_v60  ;;  %v1801_v3 = vld [vmem:[#allocation9 + $0x5c8] sm:$0xff] }
 0x1dd   :  { %1698 = vmatpush2.msra.mxu0 %v1333_v5  ;;  %1775 = vmatpush2.msra.mxu1 %v1335_v7  ;;  %v1797_v5 = vld [vmem:[#allocation9 + $0x5a8] sm:$0xff]  ;;  %v1796_v7 = vld [vmem:[#allocation9 + $0x5a0] sm:$0xff] }
 0x1de   :  { %1699 = vmatprep.subr.mxu0 %v1331_v9  ;;  %1776 = vmatprep.subr.mxu1 %v7869_v60  ;;  %v1798_v9 = vld [vmem:[#allocation9 + $0x5b0] sm:$0xff] }
 0x1df   :  { %1700 = vmatpush2.msra.mxu0 %v1330_v2  ;;  %1777 = vmatpush2.msra.mxu1 %v1332_v6  ;;  %v1884_v2 = vld [vmem:[#allocation9 + $0x860] sm:$0xff]  ;;  %v1883_v6 = vld [vmem:[#allocation9 + $0x858] sm:$0xff] }
 0x1e0   :  { %1701 = vmatprep.subr.mxu0 %v1328_v8  ;;  %1778 = vmatprep.subr.mxu1 %v7869_v60  ;;  %v1885_v8 = vld [vmem:[#allocation9 + $0x868] sm:$0xff] }
 0x1e1   :  { %1702 = vmatpush2.msra.mxu0 %v1327_v10  ;;  %1779 = vmatpush2.msra.mxu1 %v1329_v11  ;;  %v1881_v10 = vld [vmem:[#allocation9 + $0x848] sm:$0xff]  ;;  %v1880_v11 = vld [vmem:[#allocation9 + $0x840] sm:$0xff] }
 0x1e2   :  { %1704 = vmatmul.mubr.f32.vlgmr.msra.gmra.mxu0 %v6724_v37  ;;  %1781 = vmatmul.mubr.f32.vlgmr.msra.gmra.mxu1 %v6724_v37  ;;  %v1836_v37 = vld [vmem:[#allocation9 + $0x6e0] sm:$0xff] }
 0x1e3   :  { %1903 = vmatprep.subr.mxu0 %v1842_v12  ;;  %1980 = vmatprep.subr.mxu1 %v7869_v60  ;;  %v1882_v12 = vld [vmem:[#allocation9 + $0x850] sm:$0xff] }
 0x1e4   :  { %5702 = vmatprep.mubr.msk.f32.mxu0 %vm738_vm1, %v1278_v18  ;;  %5704 = vmatprep.mubr.msk.f32.mxu1 %vm738_vm1, %v1278_v18  ;;  %v1875_v18 = vld [vmem:[#allocation9 + $0x818] sm:$0xff] }
 0x1e5   :  { %1904 = vmatpush1.msra.mxu0 %v1841_v14  ;;  %1981 = vmatpush1.msra.mxu1 %v1843_v15  ;;  %v1878_v14 = vld [vmem:[#allocation9 + $0x830] sm:$0xff]  ;;  %v1877_v15 = vld [vmem:[#allocation9 + $0x828] sm:$0xff] }
 0x1e6   :  { %1905 = vmatprep.subr.mxu0 %v1839_v19  ;;  %1982 = vmatprep.subr.mxu1 %v7869_v60  ;;  %v1874_v19 = vld [vmem:[#allocation9 + $0x810] sm:$0xff] }
 0x1e7   :  { %1906 = vmatpush1.msra.mxu0 %v1838_v20  ;;  %1983 = vmatpush1.msra.mxu1 %v1840_v0  ;;  %v1876_v20 = vld [vmem:[#allocation9 + $0x820] sm:$0xff] }
 0x1e8   :  { %1710 = vmatmul.mubr.f32.gmra.mxu0 %v1277_v24  ;;  %1786 = vmatmul.mubr.f32.gmra.mxu1 %v1277_v24  ;;  %v1872_v0 = vld [vmem:[#allocation9 + $0x800] sm:$0xff]  ;;  %v1869_v24 = vld [vmem:[#allocation9 + $0x7e8] sm:$0xff] }
 0x1e9   :  { %1907 = vmatprep.subr.mxu0 %v1836_v37  ;;  %1984 = vmatprep.subr.mxu1 %v7869_v60  ;;  %v1873_v37 = vld [vmem:[#allocation9 + $0x808] sm:$0xff] }
 0x1ea   :  { %1908 = vmatpush1.msra.mxu0 %v1835_v25  ;;  %5705 = vmatprep.mubr.msk.f32.mxu0 %vm738_vm1, %v1896_v22  ;;  %v1868_v25 = vld [vmem:[#allocation9 + $0x7e0] sm:$0xff] }
 0x1eb   :  { %1985 = vmatpush1.msra.mxu1 %v1837_v28  ;;  %5707 = vmatprep.mubr.msk.f32.mxu1 %vm738_vm1, %v1896_v22  ;;  %v1866_v28 = vld [vmem:[#allocation9 + $0x7d0] sm:$0xff]  ;;  %v1865_v22 = vld [vmem:[#allocation9 + $0x7c8] sm:$0xff] }
 0x1ec   :  { %1909 = vmatprep.subr.mxu0 %v1833_v29  ;;  %1986 = vmatprep.subr.mxu1 %v7869_v60  ;;  %v1867_v29 = vld [vmem:[#allocation9 + $0x7d8] sm:$0xff] }
 0x1ed   :  { %1910 = vmatpush1.msra.mxu0 %v1832_v30  ;;  %1987 = vmatpush1.msra.mxu1 %v1834_v31  ;;  %v1863_v30 = vld [vmem:[#allocation9 + $0x7b8] sm:$0xff]  ;;  %v1862_v31 = vld [vmem:[#allocation9 + $0x7b0] sm:$0xff] }
 0x1ee   :  { %1911 = vmatprep.subr.mxu0 %v1830_v32  ;;  %1988 = vmatprep.subr.mxu1 %v7869_v60  ;;  %v1864_v32 = vld [vmem:[#allocation9 + $0x7c0] sm:$0xff] }
 0x1ef   :  { %1912 = vmatpush1.msra.mxu0 %v1829_v35  ;;  %1989 = vmatpush1.msra.mxu1 %v1831_v27  ;;  %v1860_v35 = vld [vmem:[#allocation9 + $0x7a0] sm:$0xff]  ;;  %v1859_v27 = vld [vmem:[#allocation9 + $0x798] sm:$0xff] }
 0x1f0   :  { %1913 = vmatprep.subr.mxu0 %v1827_v36  ;;  %1990 = vmatprep.subr.mxu1 %v7869_v60  ;;  %v1861_v36 = vld [vmem:[#allocation9 + $0x7a8] sm:$0xff] }
 0x1f1   :  { %1914 = vmatpush1.msra.mxu0 %v1826_v38  ;;  %1991 = vmatpush1.msra.mxu1 %v1828_v39  ;;  %v1857_v38 = vld [vmem:[#allocation9 + $0x788] sm:$0xff]  ;;  %v1856_v39 = vld [vmem:[#allocation9 + $0x780] sm:$0xff] }
 0x1f2   :  { %1915 = vmatprep.subr.mxu0 %v1824_v40  ;;  %1992 = vmatprep.subr.mxu1 %v7869_v60  ;;  %v1858_v40 = vld [vmem:[#allocation9 + $0x790] sm:$0xff] }
 0x1f3   :  { %1916 = vmatpush1.msra.mxu0 %v1823_v41  ;;  %1993 = vmatpush1.msra.mxu1 %v1825_v42  ;;  %v1854_v41 = vld [vmem:[#allocation9 + $0x770] sm:$0xff]  ;;  %v1853_v42 = vld [vmem:[#allocation9 + $0x768] sm:$0xff] }
 0x1f4   :  { %1917 = vmatprep.subr.mxu0 %v1821_v43  ;;  %1994 = vmatprep.subr.mxu1 %v7869_v60  ;;  %v1855_v43 = vld [vmem:[#allocation9 + $0x778] sm:$0xff] }
 0x1f5   :  { %1918 = vmatpush1.msra.mxu0 %v1820_v44  ;;  %1995 = vmatpush1.msra.mxu1 %v1822_v45  ;;  %v1851_v44 = vld [vmem:[#allocation9 + $0x758] sm:$0xff]  ;;  %v1850_v45 = vld [vmem:[#allocation9 + $0x750] sm:$0xff] }
 0x1f6   :  { %1919 = vmatprep.subr.mxu0 %v1818_v46  ;;  %1996 = vmatprep.subr.mxu1 %v7869_v60  ;;  %v1852_v46 = vld [vmem:[#allocation9 + $0x760] sm:$0xff] }
 0x1f7   :  { %1920 = vmatpush1.msra.mxu0 %v1817_v47  ;;  %1997 = vmatpush1.msra.mxu1 %v1819_v48  ;;  %v1793_v47 = vld [vmem:[#allocation2 + $0x10] sm:$0xf]  ;;  %v1848_v48 = vld [vmem:[#allocation9 + $0x740] sm:$0xff] }
 0x1f8   :  { %1921 = vmatprep.subr.mxu0 %v1815_v49  ;;  %1998 = vmatprep.subr.mxu1 %v7869_v60  ;;  %v1847_v49 = vld [vmem:[#allocation9 + $0x738] sm:$0xff] }
 0x1f9   :  { %1922 = vmatpush1.msra.mxu0 %v1814_v50  ;;  %1999 = vmatpush1.msra.mxu1 %v1816_v51  ;;  %v1849_v50 = vld [vmem:[#allocation9 + $0x748] sm:$0xff]  ;;  %v1791_v51 = vld [vmem:[#allocation2] sm:$0xfc] }
 0x1fa   :  { %1923 = vmatprep.subr.mxu0 %v1812_v52  ;;  %2000 = vmatprep.subr.mxu1 %v7869_v60  ;;  %v1845_v52 = vld [vmem:[#allocation9 + $0x728] sm:$0xff] }
 0x1fb   :  { %1924 = vmatpush1.msra.mxu0 %v1811_v53  ;;  %2001 = vmatpush1.msra.mxu1 %v1813_v57  ;;  %v1892_v53 = vrot.slane %v1793_v47, 2  ;;  %v1844_v57 = vld [vmem:[#allocation9 + $0x720] sm:$0xff]  ;;  %v2200_v47 = vld [vmem:[#allocation9 + $0x2f8] sm:$0xff] }
 0x1fc   :  { %1925 = vmatprep.subr.mxu0 %v1809_v58  ;;  %2002 = vmatprep.subr.mxu1 %v7869_v60  ;;  %v1846_v58 = vld [vmem:[#allocation9 + $0x730] sm:$0xff] }
 0x1fd   :  { %1926 = vmatpush1.msra.mxu0 %v1808_v59  ;;  %2003 = vmatpush1.msra.mxu1 %v1810_v61  ;;  %v1891_v59 = vrot.slane %v1791_v51, 2  ;;  %v2241_v61 = vld [vmem:[#allocation9 + $0x440] sm:$0xff]  ;;  %v2283_v51 = vld [vmem:[#allocation9 + $0x590] sm:$0xff] }
 0x1fe   :  { %1927 = vmatprep.subr.mxu0 %v1806_v62  ;;  %2004 = vmatprep.subr.mxu1 %v7869_v60 }
 0x1ff   :  { %1928 = vmatpush1.msra.mxu0 %v1805_v63  ;;  %2005 = vmatpush1.msra.mxu1 %v1807_v34  ;;  %v1893_v62 = vsel %vm1890_vm4, %v1891_v59, %v1892_v53  ;;  %v2240_v63 = vld [vmem:[#allocation9 + $0x438] sm:$0xff]  ;;  %v2242_v34 = vld [vmem:[#allocation9 + $0x448] sm:$0xff]  ;;  %v2281_v59 = vld [vmem:[#allocation9 + $0x580] sm:$0xff] }
 0x200   :  { %1929 = vmatprep.subr.mxu0 %v1803_v55  ;;  %2006 = vmatprep.subr.mxu1 %v7869_v60  ;;  %v2238_v55 = vld [vmem:[#allocation9 + $0x428] sm:$0xff] }
 0x201   :  { %1930 = vmatpush1.msra.mxu0 %v1802_v33  ;;  %2007 = vmatpush1.msra.mxu1 %v1804_v56  ;;  %v2192_v33 = vld [vmem:[#allocation2 + $0x28] sm:$0xfe]  ;;  %v2194_v56 = vld [vmem:[#allocation2 + $0x38] sm:$0x7] }
 0x202   :  { %1931 = vmatprep.subr.mxu0 %v1800_v54  ;;  %2008 = vmatprep.subr.mxu1 %v7869_v60  ;;  %v2237_v54 = vld [vmem:[#allocation9 + $0x420] sm:$0xff] }
 0x203   :  { %1932 = vmatpush1.msra.mxu0 %v1799_v1  ;;  %2009 = vmatpush1.msra.mxu1 %v1801_v3  ;;  %v2239_v1 = vld [vmem:[#allocation9 + $0x430] sm:$0xff] }
 0x204   :  { %1933 = vmatprep.subr.mxu0 %v1797_v5  ;;  %2010 = vmatprep.subr.mxu1 %v7869_v60  ;;  %v2235_v3 = vld [vmem:[#allocation9 + $0x410] sm:$0xff]  ;;  %v2292_v5 = vrot.slane %v2192_v33, 1 }
 0x205   :  { %1934 = vmatpush1.msra.mxu0 %v1796_v7  ;;  %2011 = vmatpush1.msra.mxu1 %v1798_v9  ;;  %v6822_v7 = vrot.slane %v2194_v56, 1  ;;  %v2234_v9 = vld [vmem:[#allocation9 + $0x408] sm:$0xff]  ;;  %v2275_v33 = vld [vmem:[#allocation9 + $0x550] sm:$0xff] }
 0x206   :  { %1939 = vmatprep.subr.mxu0 %v1884_v2  ;;  %2016 = vmatprep.subr.mxu1 %v7869_v60  ;;  %v2236_v2 = vld [vmem:[#allocation9 + $0x418] sm:$0xff]  ;;  %v2271_v56 = vld [vmem:[#allocation9 + $0x530] sm:$0xff] }
 0x207   :  { %1940 = vmatpush2.msra.mxu0 %v1883_v6  ;;  %2017 = vmatpush2.msra.mxu1 %v1885_v8  ;;  %v2232_v6 = vld [vmem:[#allocation9 + $0x3f8] sm:$0xff]  ;;  %v2233_v8 = vld [vmem:[#allocation9 + $0x400] sm:$0xff] }
 0x208   :  { %1941 = vmatprep.subr.mxu0 %v1881_v10  ;;  %2018 = vmatprep.subr.mxu1 %v7869_v60  ;;  %v2229_v10 = vld [vmem:[#allocation9 + $0x3e0] sm:$0xff] }
 0x209   :  { %1942 = vmatpush2.msra.mxu0 %v1880_v11  ;;  %2019 = vmatpush2.msra.mxu1 %v1882_v12  ;;  %v2294_v11 = vsel %vm1468_vm3, %v2292_v5, %v6822_v7  ;;  %v2228_v12 = vld [vmem:[#allocation9 + $0x3d8] sm:$0xff]  ;;  %v2267_v5 = vld [vmem:[#allocation9 + $0x510] sm:$0xff] }
 0x20a   :  { %1943 = vmatprep.subr.mxu0 %v1878_v14  ;;  %2020 = vmatprep.subr.mxu1 %v7869_v60  ;;  %v2230_v14 = vld [vmem:[#allocation9 + $0x3e8] sm:$0xff] }
 0x20b   :  { %1944 = vmatpush2.msra.mxu0 %v1877_v15  ;;  %2021 = vmatpush2.msra.mxu1 %v1879_v16  ;;  %v2226_v15 = vld [vmem:[#allocation9 + $0x3c8] sm:$0xff]  ;;  %v2225_v16 = vld [vmem:[#allocation9 + $0x3c0] sm:$0xff] }
 0x20c   :  { %1945 = vmatprep.subr.mxu0 %v1875_v18  ;;  %2022 = vmatprep.subr.mxu1 %v7869_v60  ;;  %v2227_v18 = vld [vmem:[#allocation9 + $0x3d0] sm:$0xff] }
 0x20d   :  { %1946 = vmatpush2.msra.mxu0 %v1874_v19  ;;  %2023 = vmatpush2.msra.mxu1 %v1876_v20  ;;  %v2223_v19 = vld [vmem:[#allocation9 + $0x3b0] sm:$0xff]  ;;  %v2222_v20 = vld [vmem:[#allocation9 + $0x3a8] sm:$0xff] }
 0x20e   :  { %1947 = vmatprep.subr.mxu0 %v1872_v0  ;;  %2024 = vmatprep.subr.mxu1 %v7869_v60  ;;  %v2224_v0 = vld [vmem:[#allocation9 + $0x3b8] sm:$0xff] }
 0x20f   :  { %1948 = vmatpush2.msra.mxu0 %v1871_v21  ;;  %2025 = vmatpush2.msra.mxu1 %v1873_v37  ;;  %v2220_v21 = vld [vmem:[#allocation9 + $0x398] sm:$0xff]  ;;  %v2219_v37 = vld [vmem:[#allocation9 + $0x390] sm:$0xff] }
 0x210   :  { %1949 = vmatprep.subr.mxu0 %v1869_v24  ;;  %2026 = vmatprep.subr.mxu1 %v7869_v60  ;;  %v2221_v24 = vld [vmem:[#allocation9 + $0x3a0] sm:$0xff] }
 0x211   :  { %1950 = vmatpush2.msra.mxu0 %v1868_v25  ;;  %2027 = vmatpush2.msra.mxu1 %v1870_v26  ;;  %v2217_v25 = vld [vmem:[#allocation9 + $0x380] sm:$0xff]  ;;  %v2216_v26 = vld [vmem:[#allocation9 + $0x378] sm:$0xff] }
 0x212   :  { %1951 = vmatprep.subr.mxu0 %v1866_v28  ;;  %2028 = vmatprep.subr.mxu1 %v7869_v60  ;;  %v2218_v28 = vld [vmem:[#allocation9 + $0x388] sm:$0xff] }
 0x213   :  { %1952 = vmatpush2.msra.mxu0 %v1865_v22  ;;  %2029 = vmatpush2.msra.mxu1 %v1867_v29  ;;  %v2214_v22 = vld [vmem:[#allocation9 + $0x368] sm:$0xff]  ;;  %v2213_v29 = vld [vmem:[#allocation9 + $0x360] sm:$0xff] }
 0x214   :  { %1953 = vmatprep.subr.mxu0 %v1863_v30  ;;  %2030 = vmatprep.subr.mxu1 %v7869_v60  ;;  %v2215_v30 = vld [vmem:[#allocation9 + $0x370] sm:$0xff] }
 0x215   :  { %1954 = vmatpush2.msra.mxu0 %v1862_v31  ;;  %2031 = vmatpush2.msra.mxu1 %v1864_v32  ;;  %v2211_v31 = vld [vmem:[#allocation9 + $0x350] sm:$0xff]  ;;  %v2210_v32 = vld [vmem:[#allocation9 + $0x348] sm:$0xff] }
 0x216   :  { %1955 = vmatprep.subr.mxu0 %v1860_v35  ;;  %2032 = vmatprep.subr.mxu1 %v7869_v60  ;;  %v2212_v35 = vld [vmem:[#allocation9 + $0x358] sm:$0xff] }
 0x217   :  { %1956 = vmatpush2.msra.mxu0 %v1859_v27  ;;  %2033 = vmatpush2.msra.mxu1 %v1861_v36  ;;  %v2208_v27 = vld [vmem:[#allocation9 + $0x338] sm:$0xff]  ;;  %v2207_v36 = vld [vmem:[#allocation9 + $0x330] sm:$0xff] }
 0x218   :  { %1957 = vmatprep.subr.mxu0 %v1857_v38  ;;  %2034 = vmatprep.subr.mxu1 %v7869_v60  ;;  %v2209_v38 = vld [vmem:[#allocation9 + $0x340] sm:$0xff] }
 0x219   :  { %1958 = vmatpush2.msra.mxu0 %v1856_v39  ;;  %2035 = vmatpush2.msra.mxu1 %v1858_v40  ;;  %v2205_v39 = vld [vmem:[#allocation9 + $0x320] sm:$0xff]  ;;  %v2204_v40 = vld [vmem:[#allocation9 + $0x318] sm:$0xff] }
 0x21a   :  { %1959 = vmatprep.subr.mxu0 %v1854_v41  ;;  %2036 = vmatprep.subr.mxu1 %v7869_v60  ;;  %v2206_v41 = vld [vmem:[#allocation9 + $0x328] sm:$0xff] }
 0x21b   :  { %1960 = vmatpush2.msra.mxu0 %v1853_v42  ;;  %2037 = vmatpush2.msra.mxu1 %v1855_v43  ;;  %v2202_v42 = vld [vmem:[#allocation9 + $0x308] sm:$0xff]  ;;  %v2201_v43 = vld [vmem:[#allocation9 + $0x300] sm:$0xff] }
 0x21c   :  { %1961 = vmatprep.subr.mxu0 %v1851_v44  ;;  %2038 = vmatprep.subr.mxu1 %v7869_v60  ;;  %v2203_v44 = vld [vmem:[#allocation9 + $0x310] sm:$0xff] }
 0x21d   :  { %1962 = vmatpush2.msra.mxu0 %v1850_v45  ;;  %2039 = vmatpush2.msra.mxu1 %v1852_v46  ;;  %v2199_v45 = vld [vmem:[#allocation9 + $0x2f0] sm:$0xff]  ;;  %v2198_v46 = vld [vmem:[#allocation9 + $0x2e8] sm:$0xff] }
 0x21e   :  { %1963 = vmatprep.subr.mxu0 %v1848_v48  ;;  %2040 = vmatprep.subr.mxu1 %v7869_v60  ;;  %v2196_v48 = vld [vmem:[#allocation9 + $0x2d8] sm:$0xff] }
 0x21f   :  { %1964 = vmatpush2.msra.mxu0 %v1847_v49  ;;  %2041 = vmatpush2.msra.mxu1 %v1849_v50  ;;  %v2195_v49 = vld [vmem:[#allocation9 + $0x2d0] sm:$0xff]  ;;  %v2197_v50 = vld [vmem:[#allocation9 + $0x2e0] sm:$0xff] }
 0x220   :  { %1965 = vmatprep.subr.mxu0 %v1845_v52  ;;  %2042 = vmatprep.subr.mxu1 %v7869_v60  ;;  %v2282_v52 = vld [vmem:[#allocation9 + $0x588] sm:$0xff] }
 0x221   :  { %1966 = vmatpush2.msra.mxu0 %v1844_v57  ;;  %2043 = vmatpush2.msra.mxu1 %v1846_v58  ;;  %v2280_v57 = vld [vmem:[#allocation9 + $0x578] sm:$0xff]  ;;  %v2279_v58 = vld [vmem:[#allocation9 + $0x570] sm:$0xff] }
 0x222   :  { %1968 = vmatmul.mubr.f32.vlgmr.msra.gmra.mxu0 %v1893_v62  ;;  %2045 = vmatmul.mubr.f32.vlgmr.msra.gmra.mxu1 %v1893_v62  ;;  %v2276_v62 = vld [vmem:[#allocation9 + $0x558] sm:$0xff] }
 0x223   :  { %2301 = vmatprep.subr.mxu0 %v2241_v61  ;;  %2378 = vmatprep.subr.mxu1 %v7869_v60  ;;  %v2277_v61 = vld [vmem:[#allocation9 + $0x560] sm:$0xff] }
 0x224   :  { %5706 = vmatprep.mubr.msk.f32.mxu0 %vm738_vm1, %v6780_v23  ;;  %5708 = vmatprep.mubr.msk.f32.mxu1 %vm738_vm1, %v6780_v23  ;;  %v2231_v23 = vld [vmem:[#allocation9 + $0x3f0] sm:$0xff] }
 0x225   :  { %2302 = vmatpush1.msra.mxu0 %v2240_v63  ;;  %2379 = vmatpush1.msra.mxu1 %v2242_v34  ;;  %v2278_v63 = vld [vmem:[#allocation9 + $0x568] sm:$0xff] }
 0x226   :  { %2303 = vmatprep.subr.mxu0 %v2238_v55  ;;  %2380 = vmatprep.subr.mxu1 %v7869_v60  ;;  %v2274_v34 = vld [vmem:[#allocation9 + $0x548] sm:$0xff]  ;;  %v2273_v55 = vld [vmem:[#allocation9 + $0x540] sm:$0xff] }
 0x227   :  { %2304 = vmatpush1.msra.mxu0 %v2237_v54  ;;  %2381 = vmatpush1.msra.mxu1 %v2239_v1  ;;  %v2270_v54 = vld [vmem:[#allocation9 + $0x528] sm:$0xff]  ;;  %v2272_v1 = vld [vmem:[#allocation9 + $0x538] sm:$0xff] }
 0x228   :  { %1974 = vmatmul.mubr.f32.gmra.mxu0 %v1892_v53  ;;  %2050 = vmatmul.mubr.f32.gmra.mxu1 %v1892_v53  ;;  %v2284_v53 = vld [vmem:[#allocation9 + $0x598] sm:$0xff] }
 0x229   :  { %2305 = vmatprep.subr.mxu0 %v2235_v3  ;;  %2382 = vmatprep.subr.mxu1 %v7869_v60  ;;  %v2268_v3 = vld [vmem:[#allocation9 + $0x518] sm:$0xff] }
 0x22a   :  { %2306 = vmatpush1.msra.mxu0 %v2234_v9  ;;  %2383 = vmatpush1.msra.mxu1 %v2236_v2  ;;  %v2269_v9 = vld [vmem:[#allocation9 + $0x520] sm:$0xff] }
 0x22b   :  { %2307 = vmatprep.subr.mxu0 %v2232_v6  ;;  %2384 = vmatprep.subr.mxu1 %v7869_v60  ;;  %v2265_v2 = vld [vmem:[#allocation9 + $0x500] sm:$0xff]  ;;  %v2264_v6 = vld [vmem:[#allocation9 + $0x4f8] sm:$0xff] }
 0x22c   :  { %2308 = vmatpush1.msra.mxu0 %v2231_v23  ;;  %2385 = vmatpush1.msra.mxu1 %v2233_v8  ;;  %v2266_v23 = vld [vmem:[#allocation9 + $0x508] sm:$0xff] }
 0x22d   :  { %2309 = vmatprep.subr.mxu0 %v2229_v10  ;;  %5709 = vmatprep.mubr.msk.f32.mxu0 %vm738_vm1, %v2294_v11  ;;  %v2262_v8 = vld [vmem:[#allocation9 + $0x4e8] sm:$0xff]  ;;  %v2261_v10 = vld [vmem:[#allocation9 + $0x4e0] sm:$0xff] }
 0x22e   :  { %2386 = vmatprep.subr.mxu1 %v7869_v60  ;;  %5711 = vmatprep.mubr.msk.f32.mxu1 %vm738_vm1, %v2294_v11  ;;  %v2263_v11 = vld [vmem:[#allocation9 + $0x4f0] sm:$0xff] }
 0x22f   :  { %2310 = vmatpush1.msra.mxu0 %v2228_v12  ;;  %2387 = vmatpush1.msra.mxu1 %v2230_v14  ;;  %v2259_v12 = vld [vmem:[#allocation9 + $0x4d0] sm:$0xff]  ;;  %v2258_v14 = vld [vmem:[#allocation9 + $0x4c8] sm:$0xff] }
 0x230   :  { %2311 = vmatprep.subr.mxu0 %v2226_v15  ;;  %2388 = vmatprep.subr.mxu1 %v7869_v60  ;;  %v2260_v15 = vld [vmem:[#allocation9 + $0x4d8] sm:$0xff] }
 0x231   :  { %2312 = vmatpush1.msra.mxu0 %v2225_v16  ;;  %2389 = vmatpush1.msra.mxu1 %v2227_v18  ;;  %v2256_v16 = vld [vmem:[#allocation9 + $0x4b8] sm:$0xff]  ;;  %v2255_v18 = vld [vmem:[#allocation9 + $0x4b0] sm:$0xff] }
 0x232   :  { %2313 = vmatprep.subr.mxu0 %v2223_v19  ;;  %2390 = vmatprep.subr.mxu1 %v7869_v60  ;;  %v2257_v19 = vld [vmem:[#allocation9 + $0x4c0] sm:$0xff] }
 0x233   :  { %2314 = vmatpush1.msra.mxu0 %v2222_v20  ;;  %2391 = vmatpush1.msra.mxu1 %v2224_v0  ;;  %v2253_v20 = vld [vmem:[#allocation9 + $0x4a0] sm:$0xff]  ;;  %v2252_v0 = vld [vmem:[#allocation9 + $0x498] sm:$0xff] }
 0x234   :  { %2315 = vmatprep.subr.mxu0 %v2220_v21  ;;  %2392 = vmatprep.subr.mxu1 %v7869_v60  ;;  %v2254_v21 = vld [vmem:[#allocation9 + $0x4a8] sm:$0xff] }
 0x235   :  { %2316 = vmatpush1.msra.mxu0 %v2219_v37  ;;  %2393 = vmatpush1.msra.mxu1 %v2221_v24  ;;  %v2250_v37 = vld [vmem:[#allocation9 + $0x488] sm:$0xff]  ;;  %v2191_v24 = vld [vmem:[#allocation2 + $0x20] sm:$0xfe] }
 0x236   :  { %2317 = vmatprep.subr.mxu0 %v2217_v25  ;;  %2394 = vmatprep.subr.mxu1 %v7869_v60  ;;  %v2249_v25 = vld [vmem:[#allocation9 + $0x480] sm:$0xff] }
 0x237   :  { %2318 = vmatpush1.msra.mxu0 %v2216_v26  ;;  %2395 = vmatpush1.msra.mxu1 %v2218_v28  ;;  %v2251_v26 = vld [vmem:[#allocation9 + $0x490] sm:$0xff] }
 0x238   :  { %2319 = vmatprep.subr.mxu0 %v2214_v22  ;;  %2396 = vmatprep.subr.mxu1 %v7869_v60  ;;  %v2193_v28 = vld [vmem:[#allocation2 + $0x30] sm:$0x7] }
 0x239   :  { %2320 = vmatpush1.msra.mxu0 %v2213_v29  ;;  %2397 = vmatpush1.msra.mxu1 %v2215_v30  ;;  %v2247_v22 = vld [vmem:[#allocation9 + $0x470] sm:$0xff]  ;;  %v2246_v29 = vld [vmem:[#allocation9 + $0x468] sm:$0xff]  ;;  %v2248_v30 = vld [vmem:[#allocation9 + $0x478] sm:$0xff] }
 0x23a   :  { %2321 = vmatprep.subr.mxu0 %v2211_v31  ;;  %2398 = vmatprep.subr.mxu1 %v7869_v60  ;;  %v2244_v31 = vld [vmem:[#allocation9 + $0x458] sm:$0xff] }
 0x23b   :  { %2322 = vmatpush1.msra.mxu0 %v2210_v32  ;;  %2399 = vmatpush1.msra.mxu1 %v2212_v35  ;;  %v2289_v32 = vrot.slane %v2191_v24, 1  ;;  %v2290_v35 = vrot.slane %v2193_v28, 1  ;;  %v2105_v24 = vld [vmem:[#allocation9 + $0x20] sm:$0xff]  ;;  %v2102_v28 = vld [vmem:[#allocation9 + $0x8] sm:$0xff] }
 0x23c   :  { %2323 = vmatprep.subr.mxu0 %v2208_v27  ;;  %2400 = vmatprep.subr.mxu1 %v7869_v60  ;;  %v2243_v27 = vld [vmem:[#allocation9 + $0x450] sm:$0xff] }
 0x23d   :  { %2324 = vmatpush1.msra.mxu0 %v2207_v36  ;;  %2401 = vmatpush1.msra.mxu1 %v2209_v38  ;;  %v2245_v36 = vld [vmem:[#allocation9 + $0x460] sm:$0xff]  ;;  %v2147_v38 = vld [vmem:[#allocation9 + $0x170] sm:$0xff] }
 0x23e   :  { %2325 = vmatprep.subr.mxu0 %v2205_v39  ;;  %2402 = vmatprep.subr.mxu1 %v7869_v60  ;;  %v2291_v39 = vsel %vm1468_vm3, %v2289_v32, %v2290_v35  ;;  %v2190_v32 = vld [vmem:[#allocation9 + $0x2c8] sm:$0xff] }
 0x23f   :  { %2326 = vmatpush1.msra.mxu0 %v2204_v40  ;;  %2403 = vmatpush1.msra.mxu1 %v2206_v41  ;;  %v2146_v40 = vld [vmem:[#allocation9 + $0x168] sm:$0xff]  ;;  %v2148_v41 = vld [vmem:[#allocation9 + $0x178] sm:$0xff] }
 0x240   :  { %2327 = vmatprep.subr.mxu0 %v2202_v42  ;;  %2404 = vmatprep.subr.mxu1 %v7869_v60  ;;  %v2144_v42 = vld [vmem:[#allocation9 + $0x158] sm:$0xff] }
 0x241   :  { %2328 = vmatpush1.msra.mxu0 %v2201_v43  ;;  %2405 = vmatpush1.msra.mxu1 %v2203_v44  ;;  %v2143_v44 = vld [vmem:[#allocation9 + $0x150] sm:$0xff] }
 0x242   :  { %2329 = vmatprep.subr.mxu0 %v2199_v45  ;;  %2406 = vmatprep.subr.mxu1 %v7869_v60  ;;  %v2145_v45 = vld [vmem:[#allocation9 + $0x160] sm:$0xff] }
 0x243   :  { %2330 = vmatpush1.msra.mxu0 %v2198_v46  ;;  %2407 = vmatpush1.msra.mxu1 %v2200_v47  ;;  %v2141_v47 = vld [vmem:[#allocation9 + $0x140] sm:$0xff] }
 0x244   :  { %2331 = vmatprep.subr.mxu0 %v2196_v48  ;;  %2408 = vmatprep.subr.mxu1 %v7869_v60  ;;  %v2140_v48 = vld [vmem:[#allocation9 + $0x138] sm:$0xff] }
 0x245   :  { %2332 = vmatpush1.msra.mxu0 %v2195_v49  ;;  %2409 = vmatpush1.msra.mxu1 %v2197_v50  ;;  %v2142_v49 = vld [vmem:[#allocation9 + $0x148] sm:$0xff] }
 0x246   :  { %2337 = vmatprep.subr.mxu0 %v2283_v51  ;;  %2414 = vmatprep.subr.mxu1 %v7869_v60  ;;  %v2098_v50 = vld [vmem:[#allocation2 + $0x28] sm:$0xff] }
 0x247   :  { %2338 = vmatpush2.msra.mxu0 %v2282_v52  ;;  %2415 = vmatpush2.msra.mxu1 %v2284_v53  ;;  %v2137_v52 = vld [vmem:[#allocation9 + $0x120] sm:$0xff]  ;;  %v2139_v53 = vld [vmem:[#allocation9 + $0x130] sm:$0xff] }
 0x248   :  { %2339 = vmatprep.subr.mxu0 %v2280_v57  ;;  %2416 = vmatprep.subr.mxu1 %v7869_v60  ;;  %v2135_v57 = vld [vmem:[#allocation9 + $0x110] sm:$0xff] }
 0x249   :  { %2340 = vmatpush2.msra.mxu0 %v2279_v58  ;;  %2417 = vmatpush2.msra.mxu1 %v2281_v59  ;;  %v2134_v59 = vld [vmem:[#allocation9 + $0x108] sm:$0xff] }
 0x24a   :  { %2341 = vmatprep.subr.mxu0 %v2277_v61  ;;  %2418 = vmatprep.subr.mxu1 %v7869_v60  ;;  %v2136_v61 = vld [vmem:[#allocation9 + $0x118] sm:$0xff] }
 0x24b   :  { %2342 = vmatpush2.msra.mxu0 %v2276_v62  ;;  %2419 = vmatpush2.msra.mxu1 %v2278_v63  ;;  %v2132_v62 = vld [vmem:[#allocation9 + $0xf8] sm:$0xff]  ;;  %v2131_v63 = vld [vmem:[#allocation9 + $0xf0] sm:$0xff] }
 0x24c   :  { %2343 = vmatprep.subr.mxu0 %v2274_v34  ;;  %2420 = vmatprep.subr.mxu1 %v7869_v60  ;;  %v2133_v34 = vld [vmem:[#allocation9 + $0x100] sm:$0xff] }
 0x24d   :  { %2344 = vmatpush2.msra.mxu0 %v2273_v55  ;;  %2421 = vmatpush2.msra.mxu1 %v2275_v33  ;;  %v2129_v55 = vld [vmem:[#allocation9 + $0xe0] sm:$0xff]  ;;  %v2128_v33 = vld [vmem:[#allocation9 + $0xd8] sm:$0xff] }
 0x24e   :  { %2345 = vmatprep.subr.mxu0 %v2271_v56  ;;  %2422 = vmatprep.subr.mxu1 %v7869_v60  ;;  %v2130_v56 = vld [vmem:[#allocation9 + $0xe8] sm:$0xff] }
 0x24f   :  { %2346 = vmatpush2.msra.mxu0 %v2270_v54  ;;  %2423 = vmatpush2.msra.mxu1 %v2272_v1  ;;  %v2126_v54 = vld [vmem:[#allocation9 + $0xc8] sm:$0xff]  ;;  %v2125_v1 = vld [vmem:[#allocation9 + $0xc0] sm:$0xff] }
 0x250   :  { %2347 = vmatprep.subr.mxu0 %v2268_v3  ;;  %2424 = vmatprep.subr.mxu1 %v7869_v60  ;;  %v2127_v3 = vld [vmem:[#allocation9 + $0xd0] sm:$0xff] }
 0x251   :  { %2348 = vmatpush2.msra.mxu0 %v2267_v5  ;;  %2425 = vmatpush2.msra.mxu1 %v2269_v9  ;;  %v2123_v5 = vld [vmem:[#allocation9 + $0xb0] sm:$0xff]  ;;  %v2122_v9 = vld [vmem:[#allocation9 + $0xa8] sm:$0xff] }
 0x252   :  { %2349 = vmatprep.subr.mxu0 %v2265_v2  ;;  %2426 = vmatprep.subr.mxu1 %v7869_v60  ;;  %v2124_v2 = vld [vmem:[#allocation9 + $0xb8] sm:$0xff] }
 0x253   :  { %2350 = vmatpush2.msra.mxu0 %v2264_v6  ;;  %2427 = vmatpush2.msra.mxu1 %v2266_v23  ;;  %v2120_v6 = vld [vmem:[#allocation9 + $0x98] sm:$0xff]  ;;  %v2119_v23 = vld [vmem:[#allocation9 + $0x90] sm:$0xff] }
 0x254   :  { %2351 = vmatprep.subr.mxu0 %v2262_v8  ;;  %2428 = vmatprep.subr.mxu1 %v7869_v60  ;;  %v2121_v8 = vld [vmem:[#allocation9 + $0xa0] sm:$0xff] }
 0x255   :  { %2352 = vmatpush2.msra.mxu0 %v2261_v10  ;;  %2429 = vmatpush2.msra.mxu1 %v2263_v11  ;;  %v2117_v10 = vld [vmem:[#allocation9 + $0x80] sm:$0xff]  ;;  %v2116_v11 = vld [vmem:[#allocation9 + $0x78] sm:$0xff] }
 0x256   :  { %2353 = vmatprep.subr.mxu0 %v2259_v12  ;;  %2430 = vmatprep.subr.mxu1 %v7869_v60  ;;  %v2118_v12 = vld [vmem:[#allocation9 + $0x88] sm:$0xff] }
 0x257   :  { %2354 = vmatpush2.msra.mxu0 %v2258_v14  ;;  %2431 = vmatpush2.msra.mxu1 %v2260_v15  ;;  %v2114_v14 = vld [vmem:[#allocation9 + $0x68] sm:$0xff]  ;;  %v2113_v15 = vld [vmem:[#allocation9 + $0x60] sm:$0xff] }
 0x258   :  { %2355 = vmatprep.subr.mxu0 %v2256_v16  ;;  %2432 = vmatprep.subr.mxu1 %v7869_v60  ;;  %v2115_v16 = vld [vmem:[#allocation9 + $0x70] sm:$0xff] }
 0x259   :  { %2356 = vmatpush2.msra.mxu0 %v2255_v18  ;;  %2433 = vmatpush2.msra.mxu1 %v2257_v19  ;;  %v2111_v18 = vld [vmem:[#allocation9 + $0x50] sm:$0xff]  ;;  %v2110_v19 = vld [vmem:[#allocation9 + $0x48] sm:$0xff] }
 0x25a   :  { %2357 = vmatprep.subr.mxu0 %v2253_v20  ;;  %2434 = vmatprep.subr.mxu1 %v7869_v60  ;;  %v2112_v20 = vld [vmem:[#allocation9 + $0x58] sm:$0xff] }
 0x25b   :  { %2358 = vmatpush2.msra.mxu0 %v2252_v0  ;;  %2435 = vmatpush2.msra.mxu1 %v2254_v21  ;;  %v2108_v0 = vld [vmem:[#allocation9 + $0x38] sm:$0xff]  ;;  %v2107_v21 = vld [vmem:[#allocation9 + $0x30] sm:$0xff] }
 0x25c   :  { %2359 = vmatprep.subr.mxu0 %v2250_v37  ;;  %2436 = vmatprep.subr.mxu1 %v7869_v60  ;;  %v2109_v37 = vld [vmem:[#allocation9 + $0x40] sm:$0xff] }
 0x25d   :  { %2360 = vmatpush2.msra.mxu0 %v2249_v25  ;;  %2437 = vmatpush2.msra.mxu1 %v2251_v26  ;;  %v2104_v25 = vld [vmem:[#allocation9 + $0x18] sm:$0xff]  ;;  %v2106_v26 = vld [vmem:[#allocation9 + $0x28] sm:$0xff] }
 0x25e   :  { %2361 = vmatprep.subr.mxu0 %v2247_v22  ;;  %2438 = vmatprep.subr.mxu1 %v7869_v60  ;;  %v2101_v22 = vld [vmem:[#allocation9] sm:$0xff] }
 0x25f   :  { %2362 = vmatpush2.msra.mxu0 %v2246_v29  ;;  %2439 = vmatpush2.msra.mxu1 %v2248_v30  ;;  %v2103_v29 = vld [vmem:[#allocation9 + $0x10] sm:$0xff]  ;;  %v2189_v30 = vld [vmem:[#allocation9 + $0x2c0] sm:$0xff] }
 0x260   :  { %2363 = vmatprep.subr.mxu0 %v2244_v31  ;;  %2440 = vmatprep.subr.mxu1 %v7869_v60  ;;  %v2188_v31 = vld [vmem:[#allocation9 + $0x2b8] sm:$0xff] }
 0x261   :  { %2364 = vmatpush2.msra.mxu0 %v2243_v27  ;;  %2441 = vmatpush2.msra.mxu1 %v2245_v36  ;;  %v2185_v27 = vld [vmem:[#allocation9 + $0x2a0] sm:$0xff]  ;;  %v2187_v36 = vld [vmem:[#allocation9 + $0x2b0] sm:$0xff] }
 0x262   :  { %2366 = vmatmul.mubr.f32.vlgmr.msra.gmra.mxu0 %v2291_v39  ;;  %2443 = vmatmul.mubr.f32.vlgmr.msra.gmra.mxu1 %v2291_v39  ;;  %v2182_v39 = vld [vmem:[#allocation9 + $0x288] sm:$0xff] }
 0x263   :  { %2459 = vmatprep.subr.mxu0 %v2147_v38  ;;  %2536 = vmatprep.subr.mxu1 %v7869_v60  ;;  %v6858_v43 = vpop.f32.mrf.mxu1  ;;  %v2183_v38 = vld [vmem:[#allocation9 + $0x290] sm:$0xff] }
 0x264   :  { %5710 = vmatprep.mubr.msk.f32.mxu0 %vm738_vm1, %v6822_v7  ;;  %5712 = vmatprep.mubr.msk.f32.mxu1 %vm738_vm1, %v6822_v7  ;;  %v2138_v7 = vld [vmem:[#allocation9 + $0x128] sm:$0xff] }
 0x265   :  { %2460 = vmatpush1.msra.mxu0 %v2146_v40  ;;  %2537 = vmatpush1.msra.mxu1 %v2148_v41  ;;  %v1626_v46 = vpop.f32.mrf.mxu1  ;;  %v2184_v40 = vld [vmem:[#allocation9 + $0x298] sm:$0xff] }
 0x266   :  { %2461 = vmatprep.subr.mxu0 %v2144_v42  ;;  %2538 = vmatprep.subr.mxu1 %v7869_v60  ;;  %v2180_v41 = vld [vmem:[#allocation9 + $0x278] sm:$0xff]  ;;  %v2179_v42 = vld [vmem:[#allocation9 + $0x270] sm:$0xff] }
 0x267   :  { %2462 = vmatpush1.msra.mxu0 %v2143_v44  ;;  %2539 = vmatpush1.msra.mxu1 %v2145_v45  ;;  %v2181_v44 = vld [vmem:[#allocation9 + $0x280] sm:$0xff]  ;;  %v2176_v46 = vld [vmem:[#allocation9 + $0x258] sm:$0xff] }
 0x268   :  { %2372 = vmatmul.mubr.f32.gmra.mxu0 %v2290_v35  ;;  %2448 = vmatmul.mubr.f32.gmra.mxu1 %v2290_v35  ;;  %v2186_v35 = vld [vmem:[#allocation9 + $0x2a8] sm:$0xff]  ;;  %v2177_v45 = vld [vmem:[#allocation9 + $0x260] sm:$0xff] }
 0x269   :  { %2463 = vmatprep.subr.mxu0 %v2141_v47  ;;  %2540 = vmatprep.subr.mxu1 %v7869_v60  ;;  %v6866_v51 = vpop.f32.mrf.mxu1  ;;  %v2178_v47 = vld [vmem:[#allocation9 + $0x268] sm:$0xff] }
 0x26a   :  { %2464 = vmatpush1.msra.mxu0 %v2140_v48  ;;  %5713 = vmatprep.mubr.msk.f32.mxu0 %vm738_vm1, %v2098_v50  ;;  %v2174_v48 = vld [vmem:[#allocation9 + $0x248] sm:$0xff] }
 0x26b   :  { %2541 = vmatpush1.msra.mxu1 %v2142_v49  ;;  %5715 = vmatprep.mubr.msk.f32.mxu1 %vm738_vm1, %v2098_v50  ;;  %v1631_v58 = vpop.f32.mrf.mxu1  ;;  %v2173_v49 = vld [vmem:[#allocation9 + $0x240] sm:$0xff]  ;;  %v2175_v50 = vld [vmem:[#allocation9 + $0x250] sm:$0xff] }
 0x26c   :  { %2465 = vmatprep.subr.mxu0 %v2138_v7  ;;  %2542 = vmatprep.subr.mxu1 %v7869_v60  ;;  %v2171_v7 = vld [vmem:[#allocation9 + $0x230] sm:$0xff] }
 0x26d   :  { %2466 = vmatpush1.msra.mxu0 %v2137_v52  ;;  %2543 = vmatpush1.msra.mxu1 %v2139_v53  ;;  %v2170_v52 = vld [vmem:[#allocation9 + $0x228] sm:$0xff]  ;;  %v2172_v53 = vld [vmem:[#allocation9 + $0x238] sm:$0xff]  ;;  %v2167_v58 = vld [vmem:[#allocation9 + $0x210] sm:$0xff] }
 0x26e   :  { %2467 = vmatprep.subr.mxu0 %v2135_v57  ;;  %2544 = vmatprep.subr.mxu1 %v7869_v60  ;;  %v2168_v57 = vld [vmem:[#allocation9 + $0x218] sm:$0xff] }
 0x26f   :  { %2468 = vmatpush1.msra.mxu0 %v2134_v59  ;;  %2545 = vmatpush1.msra.mxu1 %v2136_v61  ;;  %v2169_v59 = vld [vmem:[#allocation9 + $0x220] sm:$0xff] }
 0x270   :  { %2469 = vmatprep.subr.mxu0 %v2132_v62  ;;  %2546 = vmatprep.subr.mxu1 %v7869_v60  ;;  %v2165_v61 = vld [vmem:[#allocation9 + $0x200] sm:$0xff]  ;;  %v2164_v62 = vld [vmem:[#allocation9 + $0x1f8] sm:$0xff] }
 0x271   :  { %2470 = vmatpush1.msra.mxu0 %v2131_v63  ;;  %2547 = vmatpush1.msra.mxu1 %v2133_v34  ;;  %v2166_v63 = vld [vmem:[#allocation9 + $0x208] sm:$0xff] }
 0x272   :  { %2471 = vmatprep.subr.mxu0 %v2129_v55  ;;  %2548 = vmatprep.subr.mxu1 %v7869_v60  ;;  %v2162_v34 = vld [vmem:[#allocation9 + $0x1e8] sm:$0xff]  ;;  %v2161_v55 = vld [vmem:[#allocation9 + $0x1e0] sm:$0xff] }
 0x273   :  { %2472 = vmatpush1.msra.mxu0 %v2128_v33  ;;  %2549 = vmatpush1.msra.mxu1 %v2130_v56  ;;  %v2163_v33 = vld [vmem:[#allocation9 + $0x1f0] sm:$0xff] }
 0x274   :  { %2473 = vmatprep.subr.mxu0 %v2126_v54  ;;  %2550 = vmatprep.subr.mxu1 %v7869_v60  ;;  %v2159_v56 = vld [vmem:[#allocation9 + $0x1d0] sm:$0xff]  ;;  %v2158_v54 = vld [vmem:[#allocation9 + $0x1c8] sm:$0xff] }
 0x275   :  { %2474 = vmatpush1.msra.mxu0 %v2125_v1  ;;  %2551 = vmatpush1.msra.mxu1 %v2127_v3  ;;  %v2160_v1 = vld [vmem:[#allocation9 + $0x1d8] sm:$0xff] }
 0x276   :  { %2475 = vmatprep.subr.mxu0 %v2123_v5  ;;  %2552 = vmatprep.subr.mxu1 %v7869_v60  ;;  %v2156_v3 = vld [vmem:[#allocation9 + $0x1b8] sm:$0xff]  ;;  %v2155_v5 = vld [vmem:[#allocation9 + $0x1b0] sm:$0xff] }
 0x277   :  { %2476 = vmatpush1.msra.mxu0 %v2122_v9  ;;  %2553 = vmatpush1.msra.mxu1 %v2124_v2  ;;  %v2157_v9 = vld [vmem:[#allocation9 + $0x1c0] sm:$0xff] }
 0x278   :  { %2477 = vmatprep.subr.mxu0 %v2120_v6  ;;  %2554 = vmatprep.subr.mxu1 %v7869_v60  ;;  %v2153_v2 = vld [vmem:[#allocation9 + $0x1a0] sm:$0xff]  ;;  %v2152_v6 = vld [vmem:[#allocation9 + $0x198] sm:$0xff] }
 0x279   :  { %2478 = vmatpush1.msra.mxu0 %v2119_v23  ;;  %2555 = vmatpush1.msra.mxu1 %v2121_v8  ;;  %v2154_v23 = vld [vmem:[#allocation9 + $0x1a8] sm:$0xff] }
 0x27a   :  { %2479 = vmatprep.subr.mxu0 %v2117_v10  ;;  %2556 = vmatprep.subr.mxu1 %v7869_v60  ;;  %v2150_v8 = vld [vmem:[#allocation9 + $0x188] sm:$0xff]  ;;  %v2149_v10 = vld [vmem:[#allocation9 + $0x180] sm:$0xff] }
 0x27b   :  { %2480 = vmatpush1.msra.mxu0 %v2116_v11  ;;  %2557 = vmatpush1.msra.mxu1 %v2118_v12  ;;  %v2151_v11 = vld [vmem:[#allocation9 + $0x190] sm:$0xff] }
 0x27c   :  { %2481 = vmatprep.subr.mxu0 %v2114_v14  ;;  %2558 = vmatprep.subr.mxu1 %v7869_v60  ;;  %v2661_v12 = vld [vmem:[#allocation9 + $0x710] sm:$0xff]  ;;  %v2097_v14 = vld [vmem:[#allocation2 + $0x20] sm:$0xff] }
 0x27d   :  { %2482 = vmatpush1.msra.mxu0 %v2113_v15  ;;  %2559 = vmatpush1.msra.mxu1 %v2115_v16  ;;  %v2612_v15 = vld [vmem:[#allocation2 + $0x28] sm:$0xfc] }
 0x27e   :  { %2483 = vmatprep.subr.mxu0 %v2111_v18  ;;  %2560 = vmatprep.subr.mxu1 %v7869_v60  ;;  %v2660_v16 = vld [vmem:[#allocation9 + $0x708] sm:$0xff]  ;;  %v2662_v18 = vld [vmem:[#allocation9 + $0x718] sm:$0xff] }
 0x27f   :  { %2484 = vmatpush1.msra.mxu0 %v2110_v19  ;;  %2561 = vmatpush1.msra.mxu1 %v2112_v20  ;;  %v2614_v19 = vld [vmem:[#allocation2 + $0x38] sm:$0xf] }
 0x280   :  { %2485 = vmatprep.subr.mxu0 %v2108_v0  ;;  %2562 = vmatprep.subr.mxu1 %v7869_v60  ;;  %v2100_v0 = vld [vmem:[#allocation2 + $0x38] sm:$0x3] }
 0x281   :  { %2486 = vmatpush1.msra.mxu0 %v2107_v21  ;;  %2563 = vmatpush1.msra.mxu1 %v2109_v37  ;;  %v2658_v21 = vld [vmem:[#allocation9 + $0x6f8] sm:$0xff]  ;;  %v2657_v37 = vld [vmem:[#allocation9 + $0x6f0] sm:$0xff] }
 0x282   :  { %2487 = vmatprep.subr.mxu0 %v2105_v24  ;;  %2564 = vmatprep.subr.mxu1 %v7869_v60  ;;  %v2659_v24 = vld [vmem:[#allocation9 + $0x700] sm:$0xff] }
 0x283   :  { %2488 = vmatpush1.msra.mxu0 %v2104_v25  ;;  %2565 = vmatpush1.msra.mxu1 %v2106_v26  ;;  %v2712_v26 = vrot.slane %v2612_v15, 2  ;;  %v2703_v15 = vld [vmem:[#allocation9 + $0x860] sm:$0xff] }
 0x284   :  { %2489 = vmatprep.subr.mxu0 %v2102_v28  ;;  %2566 = vmatprep.subr.mxu1 %v7869_v60  ;;  %v6902_v28 = vrot.slane %v2614_v19, 2  ;;  %v2700_v19 = vld [vmem:[#allocation9 + $0x848] sm:$0xff] }
 0x285   :  { %2490 = vmatpush1.msra.mxu0 %v2101_v22  ;;  %2567 = vmatpush1.msra.mxu1 %v2103_v29  ;;  %v2655_v22 = vld [vmem:[#allocation9 + $0x6e0] sm:$0xff]  ;;  %v2099_v29 = vld [vmem:[#allocation2 + $0x30] sm:$0x3] }
 0x286   :  { %2495 = vmatprep.subr.mxu0 %v2189_v30  ;;  %2572 = vmatprep.subr.mxu1 %v7869_v60  ;;  %v2654_v30 = vld [vmem:[#allocation9 + $0x6d8] sm:$0xff] }
 0x287   :  { %2496 = vmatpush2.msra.mxu0 %v2188_v31  ;;  %2573 = vmatpush2.msra.mxu1 %v2190_v32  ;;  %v2656_v31 = vld [vmem:[#allocation9 + $0x6e8] sm:$0xff] }
 0x288   :  { %2497 = vmatprep.subr.mxu0 %v2186_v35  ;;  %2574 = vmatprep.subr.mxu1 %v7869_v60  ;;  %v2714_v35 = vsel %vm1890_vm4, %v2712_v26, %v6902_v28  ;;  %v2698_v26 = vld [vmem:[#allocation9 + $0x838] sm:$0xff] }
 0x289   :  { %2498 = vmatpush2.msra.mxu0 %v2185_v27  ;;  %2575 = vmatpush2.msra.mxu1 %v2187_v36  ;;  %v2652_v27 = vld [vmem:[#allocation9 + $0x6c8] sm:$0xff]  ;;  %v2651_v36 = vld [vmem:[#allocation9 + $0x6c0] sm:$0xff] }
 0x28a   :  { %2499 = vmatprep.subr.mxu0 %v2183_v38  ;;  %2576 = vmatprep.subr.mxu1 %v7869_v60  ;;  %v2653_v38 = vld [vmem:[#allocation9 + $0x6d0] sm:$0xff] }
 0x28b   :  { %2500 = vmatpush2.msra.mxu0 %v2182_v39  ;;  %2577 = vmatpush2.msra.mxu1 %v2184_v40  ;;  %v2649_v40 = vld [vmem:[#allocation9 + $0x6b0] sm:$0xff] }
 0x28c   :  { %2501 = vmatprep.subr.mxu0 %v2180_v41  ;;  %2578 = vmatprep.subr.mxu1 %v7869_v60  ;;  %v2648_v41 = vld [vmem:[#allocation9 + $0x6a8] sm:$0xff] }
 0x28d   :  { %2502 = vmatpush2.msra.mxu0 %v2179_v42  ;;  %2579 = vmatpush2.msra.mxu1 %v2181_v44  ;;  %v2650_v42 = vld [vmem:[#allocation9 + $0x6b8] sm:$0xff] }
 0x28e   :  { %2503 = vmatprep.subr.mxu0 %v2177_v45  ;;  %2580 = vmatprep.subr.mxu1 %v7869_v60  ;;  %v2646_v44 = vld [vmem:[#allocation9 + $0x698] sm:$0xff]  ;;  %v2645_v45 = vld [vmem:[#allocation9 + $0x690] sm:$0xff] }
 0x28f   :  { %2504 = vmatpush2.msra.mxu0 %v2176_v46  ;;  %2581 = vmatpush2.msra.mxu1 %v2178_v47  ;;  %v2647_v46 = vld [vmem:[#allocation9 + $0x6a0] sm:$0xff] }
 0x290   :  { %2505 = vmatprep.subr.mxu0 %v2174_v48  ;;  %2582 = vmatprep.subr.mxu1 %v7869_v60  ;;  %v2643_v47 = vld [vmem:[#allocation9 + $0x680] sm:$0xff]  ;;  %v2642_v48 = vld [vmem:[#allocation9 + $0x678] sm:$0xff] }
 0x291   :  { %2506 = vmatpush2.msra.mxu0 %v2173_v49  ;;  %2583 = vmatpush2.msra.mxu1 %v2175_v50  ;;  %v2644_v49 = vld [vmem:[#allocation9 + $0x688] sm:$0xff] }
 0x292   :  { %2507 = vmatprep.subr.mxu0 %v2171_v7  ;;  %2584 = vmatprep.subr.mxu1 %v7869_v60  ;;  %v2640_v50 = vld [vmem:[#allocation9 + $0x668] sm:$0xff]  ;;  %v2639_v7 = vld [vmem:[#allocation9 + $0x660] sm:$0xff] }
 0x293   :  { %2508 = vmatpush2.msra.mxu0 %v2170_v52  ;;  %2585 = vmatpush2.msra.mxu1 %v2172_v53  ;;  %v2641_v52 = vld [vmem:[#allocation9 + $0x670] sm:$0xff] }
 0x294   :  { %2509 = vmatprep.subr.mxu0 %v2168_v57  ;;  %2586 = vmatprep.subr.mxu1 %v7869_v60  ;;  %v2637_v53 = vld [vmem:[#allocation9 + $0x650] sm:$0xff]  ;;  %v2636_v57 = vld [vmem:[#allocation9 + $0x648] sm:$0xff] }
 0x295   :  { %2510 = vmatpush2.msra.mxu0 %v2167_v58  ;;  %2587 = vmatpush2.msra.mxu1 %v2169_v59  ;;  %v2638_v58 = vld [vmem:[#allocation9 + $0x658] sm:$0xff] }
 0x296   :  { %2511 = vmatprep.subr.mxu0 %v2165_v61  ;;  %2588 = vmatprep.subr.mxu1 %v7869_v60  ;;  %v2634_v59 = vld [vmem:[#allocation9 + $0x638] sm:$0xff]  ;;  %v2633_v61 = vld [vmem:[#allocation9 + $0x630] sm:$0xff] }
 0x297   :  { %2512 = vmatpush2.msra.mxu0 %v2164_v62  ;;  %2589 = vmatpush2.msra.mxu1 %v2166_v63  ;;  %v2635_v62 = vld [vmem:[#allocation9 + $0x640] sm:$0xff] }
 0x298   :  { %2513 = vmatprep.subr.mxu0 %v2162_v34  ;;  %2590 = vmatprep.subr.mxu1 %v7869_v60  ;;  %v2631_v63 = vld [vmem:[#allocation9 + $0x620] sm:$0xff]  ;;  %v2630_v34 = vld [vmem:[#allocation9 + $0x618] sm:$0xff] }
 0x299   :  { %2514 = vmatpush2.msra.mxu0 %v2161_v55  ;;  %2591 = vmatpush2.msra.mxu1 %v2163_v33  ;;  %v2632_v55 = vld [vmem:[#allocation9 + $0x628] sm:$0xff] }
 0x29a   :  { %2515 = vmatprep.subr.mxu0 %v2159_v56  ;;  %2592 = vmatprep.subr.mxu1 %v7869_v60  ;;  %v2628_v33 = vld [vmem:[#allocation9 + $0x608] sm:$0xff]  ;;  %v2627_v56 = vld [vmem:[#allocation9 + $0x600] sm:$0xff] }
 0x29b   :  { %2516 = vmatpush2.msra.mxu0 %v2158_v54  ;;  %2593 = vmatpush2.msra.mxu1 %v2160_v1  ;;  %v2629_v54 = vld [vmem:[#allocation9 + $0x610] sm:$0xff] }
 0x29c   :  { %2517 = vmatprep.subr.mxu0 %v2156_v3  ;;  %2594 = vmatprep.subr.mxu1 %v7869_v60  ;;  %v2625_v1 = vld [vmem:[#allocation9 + $0x5f0] sm:$0xff]  ;;  %v2624_v3 = vld [vmem:[#allocation9 + $0x5e8] sm:$0xff] }
 0x29d   :  { %2518 = vmatpush2.msra.mxu0 %v2155_v5  ;;  %2595 = vmatpush2.msra.mxu1 %v2157_v9  ;;  %v2626_v5 = vld [vmem:[#allocation9 + $0x5f8] sm:$0xff] }
 0x29e   :  { %2519 = vmatprep.subr.mxu0 %v2153_v2  ;;  %2596 = vmatprep.subr.mxu1 %v7869_v60  ;;  %v2622_v9 = vld [vmem:[#allocation9 + $0x5d8] sm:$0xff]  ;;  %v2621_v2 = vld [vmem:[#allocation9 + $0x5d0] sm:$0xff] }
 0x29f   :  { %2520 = vmatpush2.msra.mxu0 %v2152_v6  ;;  %2597 = vmatpush2.msra.mxu1 %v2154_v23  ;;  %v2623_v6 = vld [vmem:[#allocation9 + $0x5e0] sm:$0xff] }
 0x2a0   :  { %2521 = vmatprep.subr.mxu0 %v2150_v8  ;;  %2598 = vmatprep.subr.mxu1 %v7869_v60  ;;  %v2619_v23 = vld [vmem:[#allocation9 + $0x5c0] sm:$0xff]  ;;  %v2618_v8 = vld [vmem:[#allocation9 + $0x5b8] sm:$0xff] }
 0x2a1   :  { %2522 = vmatpush2.msra.mxu0 %v2149_v10  ;;  %2599 = vmatpush2.msra.mxu1 %v2151_v11  ;;  %v2620_v10 = vld [vmem:[#allocation9 + $0x5c8] sm:$0xff] }
 0x2a2   :  { %2524 = vmatmul.mubr.f32.vlgmr.msra.gmra.mxu0 %v2097_v14  ;;  %2601 = vmatmul.mubr.f32.vlgmr.msra.gmra.mxu1 %v2097_v14  ;;  %v6897_v20 = vpop.f32.mrf.mxu1  ;;  %v2616_v11 = vld [vmem:[#allocation9 + $0x5a8] sm:$0xff]  ;;  %v2617_v14 = vld [vmem:[#allocation9 + $0x5b0] sm:$0xff] }
 0x2a3   :  { %2721 = vmatprep.subr.mxu0 %v2661_v12  ;;  %2798 = vmatprep.subr.mxu1 %v7869_v60  ;;  %v2615_v12 = vld [vmem:[#allocation9 + $0x5a0] sm:$0xff] }
 0x2a4   :  { %5714 = vmatprep.mubr.msk.f32.mxu0 %vm738_vm1, %v2100_v0  ;;  %5716 = vmatprep.mubr.msk.f32.mxu1 %vm738_vm1, %v2100_v0  ;;  %v1784_v25 = vpop.f32.mrf.mxu1  ;;  %v6925_v0 = vpop.f32.mrf.mxu0 }
 0x2a5   :  { %2722 = vmatpush1.msra.mxu0 %v2660_v16  ;;  %2799 = vmatpush1.msra.mxu1 %v2662_v18  ;;  %v2702_v16 = vld [vmem:[#allocation9 + $0x858] sm:$0xff]  ;;  %v2704_v18 = vld [vmem:[#allocation9 + $0x868] sm:$0xff] }
 0x2a6   :  { %2723 = vmatprep.subr.mxu0 %v2658_v21  ;;  %2800 = vmatprep.subr.mxu1 %v7869_v60  ;;  %v2699_v21 = vld [vmem:[#allocation9 + $0x840] sm:$0xff]  ;;  %v2696_v25 = vld [vmem:[#allocation9 + $0x828] sm:$0xff] }
 0x2a7   :  { %2724 = vmatpush1.msra.mxu0 %v2657_v37  ;;  %2801 = vmatpush1.msra.mxu1 %v2659_v24  ;;  %v2701_v37 = vld [vmem:[#allocation9 + $0x850] sm:$0xff] }
 0x2a8   :  { %2530 = vmatmul.mubr.f32.gmra.mxu0 %v2099_v29  ;;  %2606 = vmatmul.mubr.f32.gmra.mxu1 %v2099_v29  ;;  %v6905_v32 = vpop.f32.mrf.mxu1  ;;  %v2697_v24 = vld [vmem:[#allocation9 + $0x830] sm:$0xff]  ;;  %v6929_v29 = vpop.f32.mrf.mxu0 }
 0x2a9   :  { %2725 = vmatprep.subr.mxu0 %v2655_v22  ;;  %2802 = vmatprep.subr.mxu1 %v7869_v60  ;;  %v2694_v22 = vld [vmem:[#allocation9 + $0x818] sm:$0xff] }
 0x2aa   :  { %2726 = vmatpush1.msra.mxu0 %v2654_v30  ;;  %5717 = vmatprep.mubr.msk.f32.mxu0 %vm738_vm1, %v2714_v35  ;;  %v1789_v39 = vpop.f32.mrf.mxu1  ;;  %v2693_v30 = vld [vmem:[#allocation9 + $0x810] sm:$0xff] }
 0x2ab   :  { %2803 = vmatpush1.msra.mxu1 %v2656_v31  ;;  %5719 = vmatprep.mubr.msk.f32.mxu1 %vm738_vm1, %v2714_v35  ;;  %v2695_v31 = vld [vmem:[#allocation9 + $0x820] sm:$0xff]  ;;  %v6933_v39 = vpop.f32.mrf.mxu0 }
 0x2ac   :  { %2727 = vmatprep.subr.mxu0 %v2652_v27  ;;  %2804 = vmatprep.subr.mxu1 %v7869_v60  ;;  %v2691_v35 = vld [vmem:[#allocation9 + $0x800] sm:$0xff]  ;;  %v2690_v27 = vld [vmem:[#allocation9 + $0x7f8] sm:$0xff] }
 0x2ad   :  { %2728 = vmatpush1.msra.mxu0 %v2651_v36  ;;  %2805 = vmatpush1.msra.mxu1 %v2653_v38  ;;  %v2692_v36 = vld [vmem:[#allocation9 + $0x808] sm:$0xff] }
 0x2ae   :  { %2729 = vmatprep.subr.mxu0 %v2649_v40  ;;  %2806 = vmatprep.subr.mxu1 %v7869_v60  ;;  %v2688_v38 = vld [vmem:[#allocation9 + $0x7e8] sm:$0xff]  ;;  %v2687_v40 = vld [vmem:[#allocation9 + $0x7e0] sm:$0xff] }
 0x2af   :  { %2730 = vmatpush1.msra.mxu0 %v2648_v41  ;;  %2807 = vmatpush1.msra.mxu1 %v2650_v42  ;;  %v2689_v41 = vld [vmem:[#allocation9 + $0x7f0] sm:$0xff] }
 0x2b0   :  { %2731 = vmatprep.subr.mxu0 %v2646_v44  ;;  %2808 = vmatprep.subr.mxu1 %v7869_v60  ;;  %v2685_v42 = vld [vmem:[#allocation9 + $0x7d0] sm:$0xff]  ;;  %v2684_v44 = vld [vmem:[#allocation9 + $0x7c8] sm:$0xff] }
 0x2b1   :  { %2732 = vmatpush1.msra.mxu0 %v2645_v45  ;;  %2809 = vmatpush1.msra.mxu1 %v2647_v46  ;;  %v2686_v45 = vld [vmem:[#allocation9 + $0x7d8] sm:$0xff] }
 0x2b2   :  { %2733 = vmatprep.subr.mxu0 %v2643_v47  ;;  %2810 = vmatprep.subr.mxu1 %v7869_v60  ;;  %v2682_v46 = vld [vmem:[#allocation9 + $0x7b8] sm:$0xff]  ;;  %v6937_v47 = vpop.f32.mrf.mxu0 }
 0x2b3   :  { %2734 = vmatpush1.msra.mxu0 %v2642_v48  ;;  %2811 = vmatpush1.msra.mxu1 %v2644_v49  ;;  %v2681_v48 = vld [vmem:[#allocation9 + $0x7b0] sm:$0xff]  ;;  %v2683_v49 = vld [vmem:[#allocation9 + $0x7c0] sm:$0xff] }
 0x2b4   :  { %2735 = vmatprep.subr.mxu0 %v2640_v50  ;;  %2812 = vmatprep.subr.mxu1 %v7869_v60  ;;  %v2679_v50 = vld [vmem:[#allocation9 + $0x7a0] sm:$0xff] }
 0x2b5   :  { %2736 = vmatpush1.msra.mxu0 %v2639_v7  ;;  %2813 = vmatpush1.msra.mxu1 %v2641_v52  ;;  %v1705_v7 = vpop.f32.mrf.mxu0  ;;  %v2678_v52 = vld [vmem:[#allocation9 + $0x798] sm:$0xff] }
 0x2b6   :  { %2737 = vmatprep.subr.mxu0 %v2637_v53  ;;  %2814 = vmatprep.subr.mxu1 %v7869_v60  ;;  %v2680_v53 = vld [vmem:[#allocation9 + $0x7a8] sm:$0xff] }
 0x2b7   :  { %2738 = vmatpush1.msra.mxu0 %v2636_v57  ;;  %2815 = vmatpush1.msra.mxu1 %v2638_v58  ;;  %v2676_v57 = vld [vmem:[#allocation9 + $0x788] sm:$0xff]  ;;  %v2675_v58 = vld [vmem:[#allocation9 + $0x780] sm:$0xff] }
 0x2b8   :  { %2739 = vmatprep.subr.mxu0 %v2634_v59  ;;  %2816 = vmatprep.subr.mxu1 %v7869_v60  ;;  %v2677_v59 = vld [vmem:[#allocation9 + $0x790] sm:$0xff] }
 0x2b9   :  { %2740 = vmatpush1.msra.mxu0 %v2633_v61  ;;  %2817 = vmatpush1.msra.mxu1 %v2635_v62  ;;  %v2673_v61 = vld [vmem:[#allocation9 + $0x770] sm:$0xff]  ;;  %v1707_v62 = vpop.f32.mrf.mxu0 }
 0x2ba   :  { %2741 = vmatprep.subr.mxu0 %v2631_v63  ;;  %2818 = vmatprep.subr.mxu1 %v7869_v60  ;;  %v2672_v63 = vld [vmem:[#allocation9 + $0x768] sm:$0xff] }
 0x2bb   :  { %2742 = vmatpush1.msra.mxu0 %v2630_v34  ;;  %2819 = vmatpush1.msra.mxu1 %v2632_v55  ;;  %v2674_v34 = vld [vmem:[#allocation9 + $0x778] sm:$0xff] }
 0x2bc   :  { %2743 = vmatprep.subr.mxu0 %v2628_v33  ;;  %2820 = vmatprep.subr.mxu1 %v7869_v60  ;;  %v2670_v55 = vld [vmem:[#allocation9 + $0x758] sm:$0xff]  ;;  %v2611_v33 = vld [vmem:[#allocation2 + $0x20] sm:$0xfc] }
 0x2bd   :  { %2744 = vmatpush1.msra.mxu0 %v2627_v56  ;;  %2821 = vmatpush1.msra.mxu1 %v2629_v54  ;;  %v2613_v56 = vld [vmem:[#allocation2 + $0x30] sm:$0xf] }
 0x2be   :  { %2745 = vmatprep.subr.mxu0 %v2625_v1  ;;  %2822 = vmatprep.subr.mxu1 %v7869_v60  ;;  %v2669_v54 = vld [vmem:[#allocation9 + $0x750] sm:$0xff]  ;;  %v2671_v1 = vld [vmem:[#allocation9 + $0x760] sm:$0xff] }
 0x2bf   :  { %2746 = vmatpush1.msra.mxu0 %v2624_v3  ;;  %2823 = vmatpush1.msra.mxu1 %v2626_v5  ;;  %v2667_v3 = vld [vmem:[#allocation9 + $0x740] sm:$0xff]  ;;  %v1711_v5 = vpop.f32.mrf.mxu0 }
 0x2c0   :  { %2747 = vmatprep.subr.mxu0 %v2622_v9  ;;  %2824 = vmatprep.subr.mxu1 %v7869_v60  ;;  %v2666_v9 = vld [vmem:[#allocation9 + $0x738] sm:$0xff] }
 0x2c1   :  { %2748 = vmatpush1.msra.mxu0 %v2621_v2  ;;  %2825 = vmatpush1.msra.mxu1 %v2623_v6  ;;  %v2668_v2 = vld [vmem:[#allocation9 + $0x748] sm:$0xff]  ;;  %v2709_v6 = vrot.slane %v2611_v33, 2  ;;  %v3006_v33 = vld [vmem:[#allocation12 + $0x308] sm:$0xff] }
 0x2c2   :  { %2749 = vmatprep.subr.mxu0 %v2619_v23  ;;  %2826 = vmatprep.subr.mxu1 %v7869_v60  ;;  %v2710_v23 = vrot.slane %v2613_v56, 2 }
 0x2c3   :  { %2750 = vmatpush1.msra.mxu0 %v2618_v8  ;;  %2827 = vmatpush1.msra.mxu1 %v2620_v10  ;;  %v2664_v8 = vld [vmem:[#allocation9 + $0x728] sm:$0xff]  ;;  %v1274_v10 = vld [vmem:[#allocation10] sm:$0x7] }
 0x2c4   :  { %2751 = vmatprep.subr.mxu0 %v2616_v11  ;;  %2828 = vmatprep.subr.mxu1 %v7869_v60  ;;  %v2072_v11 = vsub.s32 2, %v6709_v4  ;;  %v7139_v4 = vld [vmem:[#allocation12 + $0x200] sm:$0xff] }
 0x2c5   :  { %2752 = vmatpush1.msra.mxu0 %v2615_v12  ;;  %2829 = vmatpush1.msra.mxu1 %v2617_v14  ;;  %v2663_v12 = vld [vmem:[#allocation9 + $0x720] sm:$0xff]  ;;  %v2665_v14 = vld [vmem:[#allocation9 + $0x730] sm:$0xff]  ;;  %7898 = vst [vmem:[#allocation37_spill] sm:$0xff] %v7139_v4 }
 0x2c6   :  { %2757 = vmatprep.subr.mxu0 %v2703_v15  ;;  %2834 = vmatprep.subr.mxu1 %v7869_v60  ;;  %v1713_v15 = vpop.f32.mrf.mxu0 }
 0x2c7   :  { %2758 = vmatpush2.msra.mxu0 %v2702_v16  ;;  %2835 = vmatpush2.msra.mxu1 %v2704_v18  ;;  %v2711_v16 = vsel %vm1890_vm4, %v2709_v6, %v2710_v23  ;;  %v3016_v18 = vld [vmem:[#allocation12 + $0x358] sm:$0xff] }
 0x2c8   :  { %2759 = vmatprep.subr.mxu0 %v2700_v19  ;;  %2836 = vmatprep.subr.mxu1 %v7869_v60  ;;  %v6950_v19 = vrot.slane %v1274_v10, %v6712_v13  ;;  %v3004_v6 = vld [vmem:[#allocation12 + $0x2f8] sm:$0xff] }
 0x2c9   :  { %2760 = vmatpush2.msra.mxu0 %v2699_v21  ;;  %2837 = vmatpush2.msra.mxu1 %v2701_v37  ;;  %v1706_v21 = vadd.f32 %v1705_v7, %v6925_v0  ;;  %v1783_v37 = vadd.f32 %v6897_v20, %v6858_v43  ;;  %v1708_v0 = vadd.f32 %v1707_v62, %v6929_v29  ;;  %v3013_v43 = vld [vmem:[#allocation12 + $0x340] sm:$0xff]  ;;  %v2949_v13 = vld [vmem:[#allocation12 + $0x178] sm:$0xff] }
 0x2ca   :  { %2761 = vmatprep.subr.mxu0 %v2697_v24  ;;  %2838 = vmatprep.subr.mxu1 %v7869_v60  ;;  %v3015_v24 = vld [vmem:[#allocation12 + $0x350] sm:$0xff]  ;;  %v1714_v62 = vadd.f32 %v1713_v15, %v6937_v47  ;;  %v3005_v47 = vld [vmem:[#allocation12 + $0x300] sm:$0xff]  ;;  %v3002_v15 = vld [vmem:[#allocation12 + $0x2e8] sm:$0xff] }
 0x2cb   :  { %2762 = vmatpush2.msra.mxu0 %v2696_v25  ;;  %2839 = vmatpush2.msra.mxu1 %v2698_v26  ;;  %v6955_v25 = vrot.slane %v1274_v10, %v2072_v11  ;;  %v3014_v26 = vld [vmem:[#allocation12 + $0x348] sm:$0xff] }
 0x2cc   :  { %2763 = vmatprep.subr.mxu0 %v2694_v22  ;;  %2840 = vmatprep.subr.mxu1 %v7869_v60 }
 0x2cd   :  { %2764 = vmatpush2.msra.mxu0 %v2693_v30  ;;  %2841 = vmatpush2.msra.mxu1 %v2695_v31  ;;  %v6958_v31 = vrot.slane %v1274_v10, %v6715_v17 }
 0x2ce   :  { %2765 = vmatprep.subr.mxu0 %v2691_v35  ;;  %2842 = vmatprep.subr.mxu1 %v7869_v60  ;;  %v3060_v35 = vld [vmem:[#allocation12 + $0x4b8] sm:$0xf] }
 0x2cf   :  { %2766 = vmatpush2.msra.mxu0 %v2690_v27  ;;  %2843 = vmatpush2.msra.mxu1 %v2692_v36  ;;  %v3012_v36 = vld [vmem:[#allocation12 + $0x338] sm:$0xff] }
 0x2d0   :  { %2767 = vmatprep.subr.mxu0 %v2688_v38  ;;  %2844 = vmatprep.subr.mxu1 %v7869_v60 }
 0x2d1   :  { %2768 = vmatpush2.msra.mxu0 %v2687_v40  ;;  %2845 = vmatpush2.msra.mxu1 %v2689_v41  ;;  %v3011_v41 = vld [vmem:[#allocation12 + $0x330] sm:$0xff] }
 0x2d2   :  { %2769 = vmatprep.subr.mxu0 %v2685_v42  ;;  %2846 = vmatprep.subr.mxu1 %v7869_v60 }
 0x2d3   :  { %2770 = vmatpush2.msra.mxu0 %v2684_v44  ;;  %2847 = vmatpush2.msra.mxu1 %v2686_v45  ;;  %v3059_v45 = vld [vmem:[#allocation12 + $0x4b0] sm:$0xf] }
 0x2d4   :  { %2771 = vmatprep.subr.mxu0 %v2682_v46  ;;  %2848 = vmatprep.subr.mxu1 %v7869_v60  ;;  %v1712_v46 = vadd.f32 %v1711_v5, %v6933_v39  ;;  %v3008_v39 = vld [vmem:[#allocation12 + $0x318] sm:$0xff] }
 0x2d5   :  { %2772 = vmatpush2.msra.mxu0 %v2681_v48  ;;  %2849 = vmatpush2.msra.mxu1 %v2683_v49  ;;  %v3058_v48 = vld [vmem:[#allocation12 + $0x4a8] sm:$0xff]  ;;  %v1788_v49 = vadd.f32 %v6905_v32, %v6866_v51  ;;  %v3007_v51 = vld [vmem:[#allocation12 + $0x310] sm:$0xff] }
 0x2d6   :  { %2773 = vmatprep.subr.mxu0 %v2679_v50  ;;  %2850 = vmatprep.subr.mxu1 %v7869_v60  ;;  %v3009_v50 = vld [vmem:[#allocation12 + $0x320] sm:$0xff] }
 0x2d7   :  { %2774 = vmatpush2.msra.mxu0 %v2678_v52  ;;  %2851 = vmatpush2.msra.mxu1 %v2680_v53 }
 0x2d8   :  { %2775 = vmatprep.subr.mxu0 %v2676_v57  ;;  %2852 = vmatprep.subr.mxu1 %v7869_v60  ;;  %v3057_v57 = vld [vmem:[#allocation12 + $0x4a0] sm:$0xff] }
 0x2d9   :  { %2776 = vmatpush2.msra.mxu0 %v2675_v58  ;;  %2853 = vmatpush2.msra.mxu1 %v2677_v59 }
 0x2da   :  { %2777 = vmatprep.subr.mxu0 %v2673_v61  ;;  %2854 = vmatprep.subr.mxu1 %v7869_v60  ;;  %v3056_v61 = vld [vmem:[#allocation12 + $0x498] sm:$0xff] }
 0x2db   :  { %2778 = vmatpush2.msra.mxu0 %v2672_v63  ;;  %2855 = vmatpush2.msra.mxu1 %v2674_v34 }
 0x2dc   :  { %2779 = vmatprep.subr.mxu0 %v2670_v55  ;;  %2856 = vmatprep.subr.mxu1 %v7869_v60  ;;  %v3055_v55 = vld [vmem:[#allocation12 + $0x490] sm:$0xff] }
 0x2dd   :  { %2780 = vmatpush2.msra.mxu0 %v2669_v54  ;;  %2857 = vmatpush2.msra.mxu1 %v2671_v1  ;;  %v3054_v1 = vld [vmem:[#allocation12 + $0x488] sm:$0xff] }
 0x2de   :  { %2781 = vmatprep.subr.mxu0 %v2667_v3  ;;  %2858 = vmatprep.subr.mxu1 %v7869_v60 }
 0x2df   :  { %2782 = vmatpush2.msra.mxu0 %v2666_v9  ;;  %2859 = vmatpush2.msra.mxu1 %v2668_v2  ;;  %v3053_v2 = vld [vmem:[#allocation12 + $0x480] sm:$0xff] }
 0x2e0   :  { %2783 = vmatprep.subr.mxu0 %v2664_v8  ;;  %2860 = vmatprep.subr.mxu1 %v7869_v60  ;;  %v3003_v8 = vld [vmem:[#allocation12 + $0x2f0] sm:$0xff] }
 0x2e1   :  { %2784 = vmatpush2.msra.mxu0 %v2663_v12  ;;  %2861 = vmatpush2.msra.mxu1 %v2665_v14  ;;  %v3051_v14 = vld [vmem:[#allocation12 + $0x470] sm:$0xff] }
 0x2e2   :  { %2786 = vmatmul.mubr.f32.vlgmr.msra.gmra.mxu0 %v2711_v16  ;;  %2863 = vmatmul.mubr.f32.vlgmr.msra.gmra.mxu1 %v2711_v16  ;;  %v1969_v22 = vpop.f32.mrf.mxu0  ;;  %v2046_v30 = vpop.f32.mrf.mxu1  ;;  %v3050_v16 = vld [vmem:[#allocation12 + $0x468] sm:$0xff] }
 0x2e3   :  { %3087 = vmatprep.subr.mxu0 %v3016_v18  ;;  %5718 = vmatprep.mubr.msk.f32.mxu0 %vm738_vm1, %v6902_v28  ;;  %v2055_v20 = vadd.f32 %v1969_v22, %v1706_v21  ;;  %v2057_v27 = vadd.f32 %v2046_v30, %v1783_v37  ;;  %v3001_v18 = vld [vmem:[#allocation12 + $0x2e0] sm:$0xff]  ;;  %v2933_v22 = vld [vmem:[#allocation12 + $0xf8] sm:$0xff]  ;;  %v2998_v30 = vld [vmem:[#allocation12 + $0x2c8] sm:$0xff] }
 0x2e4   :  { %5720 = vmatprep.mubr.msk.f32.mxu1 %vm738_vm1, %v6902_v28  ;;  %3088 = vmatpush1.msra.mxu0 %v3015_v24  ;;  %v1971_v38 = vpop.f32.mrf.mxu0  ;;  %v2048_v40 = vpop.f32.mrf.mxu1  ;;  %v3010_v28 = vld [vmem:[#allocation12 + $0x328] sm:$0xff]  ;;  %v3049_v37 = vld [vmem:[#allocation12 + $0x460] sm:$0xff]  ;;  %v3000_v24 = vld [vmem:[#allocation12 + $0x2d8] sm:$0xff] }
 0x2e5   :  { %3089 = vmatprep.subr.mxu0 %v3014_v26  ;;  %v6966_v42 = vadd.f32 %v6950_v19, %v2055_v20  ;;  %v2079_v29 = vadd.f32 %v6955_v25, %v2057_v27  ;;  %v2056_v44 = vadd.f32 %v1971_v38, %v1708_v0  ;;  %5721 = vmatprep.subr.msk.mxu1 %vm3080_vm5, %v3060_v35  ;;  %v2999_v26 = vld [vmem:[#allocation12 + $0x2d0] sm:$0xff]  ;;  %v2997_v35 = vld [vmem:[#allocation12 + $0x2c0] sm:$0xff]  ;;  %v2996_v0 = vld [vmem:[#allocation12 + $0x2b8] sm:$0xff] }
 0x2e6   :  { %3090 = vmatpush1.msra.mxu0 %v3013_v43  ;;  %2868 = vmatmul.mubr.f32.gmra.mxu1 %v2710_v23  ;;  %v2995_v20 = vld [vmem:[#allocation12 + $0x2b0] sm:$0xff]  ;;  %v2994_v27 = vld [vmem:[#allocation12 + $0x2a8] sm:$0xff]  ;;  %v2993_v40 = vld [vmem:[#allocation12 + $0x2a0] sm:$0xff] }
 0x2e7   :  { %2792 = vmatmul.mubr.f32.gmra.mxu0 %v2710_v23  ;;  %3091 = vmatprep.subr.mxu0 %v3012_v36  ;;  %v7803_v7 = vmax.f32 %v6966_v42, 0.0  ;;  %v2085_v52 = vmax.f32 %v2079_v29, 0.0  ;;  %v6975_v53 = vadd.f32 %v6958_v31, %v2056_v44  ;;  %v3052_v23 = vld [vmem:[#allocation12 + $0x478] sm:$0xff] }
 0x2e8   :  { %3092 = vmatpush1.msra.mxu0 %v3011_v41  ;;  %v1975_v58 = vpop.f32.mrf.mxu0  ;;  %v2051_v59 = vpop.f32.mrf.mxu1  ;;  %5722 = vmatpush1.msk.msra.mxu1 %vm3080_vm5, %v3059_v45  ;;  %v2992_v44 = vld [vmem:[#allocation12 + $0x298] sm:$0xff]  ;;  %v2932_v45 = vld [vmem:[#allocation12 + $0xf0] sm:$0xff] }
 0x2e9   :  { %3093 = vmatprep.subr.mxu0 %v3010_v28  ;;  %2089 = vst [vmem:[#allocation3] sm:$0xff] %v7803_v7  ;;  %2092 = vst.msk [vmem:[#allocation3 + $0x10] sm:$0xff] %vm2091_vm6, %v2085_v52  ;;  %v2084_v32 = vmax.f32 %v6975_v53, 0.0  ;;  %v2058_v63 = vadd.f32 %v1975_v58, %v1712_v46  ;;  %v2060_v34 = vadd.f32 %v2051_v59, %v1788_v49  ;;  %3180 = vmatprep.subr.mxu1 %v3058_v48  ;;  %v2991_v28 = vld [vmem:[#allocation12 + $0x290] sm:$0xff]  ;;  %v2931_v49 = vld [vmem:[#allocation12 + $0xe8] sm:$0xff] }
 0x2ea   :  { %3094 = vmatpush1.msra.mxu0 %v3009_v50  ;;  %v1977_v56 = vpop.f32.mrf.mxu0  ;;  %v2053_v54 = vpop.f32.mrf.mxu1  ;;  %3181 = vmatpush1.msra.mxu1 %v3057_v57  ;;  %v2990_v57 = vld [vmem:[#allocation12 + $0x288] sm:$0xff]  ;;  %v6995_v59 = vld [vmem:[#allocation12 + $0x278] sm:$0xff]  ;;  %v2926_v53 = vld [vmem:[#allocation12 + $0xc0] sm:$0xff] }
 0x2eb   :  { %3095 = vmatprep.subr.mxu0 %v3008_v39  ;;  %2090 = vst [vmem:[#allocation3 + $0x8] sm:$0xff] %v2084_v32  ;;  %v2080_v3 = vadd.f32 %v6950_v19, %v2058_v63  ;;  %v2082_v5 = vadd.f32 %v6955_v25, %v2060_v34  ;;  %v2059_v9 = vadd.f32 %v1977_v56, %v1714_v62  ;;  %v6992_v39 = vld [vmem:[#allocation12 + $0x280] sm:$0xff]  ;;  %v6997_v62 = vld [vmem:[#allocation12 + $0x270] sm:$0xff]  ;;  %v7002_v63 = vld [vmem:[#allocation12 + $0x268] sm:$0xff] }
 0x2ec   :  { %3182 = vmatprep.subr.mxu1 %v3056_v61  ;;  %3096 = vmatpush1.msra.mxu0 %v3007_v51  ;;  %v2930_v61 = vld [vmem:[#allocation12 + $0xe0] sm:$0xff]  ;;  %v2929_v51 = vld [vmem:[#allocation12 + $0xd8] sm:$0xff]  ;;  %v2928_v34 = vld [vmem:[#allocation12 + $0xd0] sm:$0xff] }
 0x2ed   :  { %3183 = vmatpush1.msra.mxu1 %v3055_v55  ;;  %3097 = vmatprep.subr.mxu0 %v3006_v33  ;;  %v2086_v10 = vmax.f32 %v2080_v3, 0.0  ;;  %v2088_v11 = vmax.f32 %v2082_v5, 0.0  ;;  %v2081_v12 = vadd.f32 %v6958_v31, %v2059_v9  ;;  %v7005_v55 = vld [vmem:[#allocation12 + $0x260] sm:$0xff]  ;;  %v2927_v33 = vld [vmem:[#allocation12 + $0xc8] sm:$0xff]  ;;  %v7008_v56 = vld [vmem:[#allocation12 + $0x458] sm:$0xff] }
 0x2ee   :  { %3184 = vmatprep.subr.mxu1 %v3054_v1  ;;  %3098 = vmatpush1.msra.mxu0 %v3005_v47  ;;  %v2925_v54 = vld [vmem:[#allocation12 + $0xb8] sm:$0xff]  ;;  %v7014_v1 = vld [vmem:[#allocation12 + $0x448] sm:$0xff]  ;;  %v2924_v47 = vld [vmem:[#allocation12 + $0xb0] sm:$0xff] }
 0x2ef   :  { %3185 = vmatpush1.msra.mxu1 %v3053_v2  ;;  %3099 = vmatprep.subr.mxu0 %v3004_v6  ;;  %2093 = vst [vmem:[#allocation3 + $0x18] sm:$0x3] %v2086_v10  ;;  %2096 = vst.msk [vmem:[#allocation3 + $0x28] sm:$0x3] %vm2095_vm7, %v2088_v11  ;;  %v2087_v21 = vmax.f32 %v2081_v12, 0.0  ;;  %v7017_v3 = vld [vmem:[#allocation12 + $0x440] sm:$0xff] }
 0x2f0   :  { %3186 = vmatprep.subr.mxu1 %v3052_v23  ;;  %3100 = vmatpush1.msra.mxu0 %v3003_v8  ;;  %v2980_v43 = vld [vmem:[#allocation3 + $0x10] sm:$0xfe]  ;;  %v2923_v5 = vld [vmem:[#allocation12 + $0xa8] sm:$0xff]  ;;  %v7023_v6 = vld [vmem:[#allocation12 + $0x430] sm:$0xff] }
 0x2f1   :  { %3187 = vmatpush1.msra.mxu1 %v3051_v14  ;;  %3101 = vmatprep.subr.mxu0 %v3002_v15  ;;  %2094 = vst [vmem:[#allocation3 + $0x20] sm:$0x3] %v2087_v21  ;;  %v3073_v41 = vrot.slane %v2980_v43, 1  ;;  %v7020_v9 = vld [vmem:[#allocation12 + $0x438] sm:$0xff]  ;;  %v2922_v2 = vld [vmem:[#allocation12 + $0xa0] sm:$0xff]  ;;  %v7026_v8 = vld [vmem:[#allocation12 + $0x428] sm:$0xff] }
 0x2f2   :  { %3188 = vmatprep.subr.mxu1 %v3050_v16  ;;  %3102 = vmatpush1.msra.mxu0 %v3001_v18  ;;  %v2979_v38 = vld [vmem:[#allocation3 + $0x8] sm:$0xfe]  ;;  %v7029_v11 = vld [vmem:[#allocation12 + $0x420] sm:$0xff]  ;;  %v2919_v12 = vld [vmem:[#allocation12 + $0x88] sm:$0xff] }
 0x2f3   :  { %3189 = vmatpush1.msra.mxu1 %v3049_v37  ;;  %3103 = vmatprep.subr.mxu0 %v3000_v24  ;;  %v3070_v50 = vrot.slane %v2979_v38, 1  ;;  %v2921_v23 = vld [vmem:[#allocation12 + $0x98] sm:$0xff]  ;;  %v2920_v10 = vld [vmem:[#allocation12 + $0x90] sm:$0xff]  ;;  %v2918_v15 = vld [vmem:[#allocation12 + $0x80] sm:$0xff] }
 0x2f4   :  { %3222 = vmatprep.mubr.f32.mxu1 %v7869_v60  ;;  %3104 = vmatpush1.msra.mxu0 %v2999_v26  ;;  %v7032_v14 = vld [vmem:[#allocation12 + $0x418] sm:$0xff]  ;;  %v7035_v16 = vld [vmem:[#allocation12 + $0x410] sm:$0xff]  ;;  %v7038_v21 = vld [vmem:[#allocation12 + $0x408] sm:$0xff] }
 0x2f5   :  { %3238 = vmatprep.subr.mxu1 %v2933_v22  ;;  %3105 = vmatprep.subr.mxu0 %v2998_v30  ;;  %v2917_v18 = vld [vmem:[#allocation12 + $0x78] sm:$0xff]  ;;  %v2916_v37 = vld [vmem:[#allocation12 + $0x70] sm:$0xff]  ;;  %v7041_v24 = vld [vmem:[#allocation12 + $0x400] sm:$0xff] }
 0x2f6   :  { %3106 = vmatpush1.msra.mxu0 %v2997_v35  ;;  %v2983_v36 = vld [vmem:[#allocation3 + $0x28] sm:$0x1]  ;;  %v2915_v26 = vld [vmem:[#allocation12 + $0x68] sm:$0xff]  ;;  %v7044_v22 = vld [vmem:[#allocation12 + $0x3f8] sm:$0xff] }
 0x2f7   :  { %3107 = vmatprep.subr.mxu0 %v2996_v0  ;;  %v3074_v29 = vrot.slane %v2983_v36, 1  ;;  %v2914_v30 = vld [vmem:[#allocation12 + $0x60] sm:$0xff]  ;;  %v7047_v35 = vld [vmem:[#allocation12 + $0x3f0] sm:$0xff]  ;;  %v2913_v0 = vld [vmem:[#allocation12 + $0x58] sm:$0xff] }
 0x2f8   :  { %3108 = vmatpush1.msra.mxu0 %v2995_v20  ;;  %v2982_v46 = vld [vmem:[#allocation3 + $0x20] sm:$0x1]  ;;  %v2912_v20 = vld [vmem:[#allocation12 + $0x50] sm:$0xff]  ;;  %v7056_v38 = vld [vmem:[#allocation12 + $0x3d8] sm:$0xff] }
 0x2f9   :  { %3109 = vmatprep.subr.mxu0 %v2994_v27  ;;  %v3075_v48 = vsel %vm1468_vm3, %v3073_v41, %v3074_v29  ;;  %v3071_v52 = vrot.slane %v2982_v46, 1  ;;  %v7050_v43 = vld [vmem:[#allocation12 + $0x3e8] sm:$0xff]  ;;  %v7053_v27 = vld [vmem:[#allocation12 + $0x3e0] sm:$0xff]  ;;  %v7059_v41 = vld [vmem:[#allocation12 + $0x3d0] sm:$0xff] }
 0x2fa   :  { %3110 = vmatpush1.msra.mxu0 %v2993_v40  ;;  %5723 = vmatmul.mubr.msk.f32.vlgmr.msra.gmra.mxu1 %vm2091_vm6, %v3075_v48  ;;  %v2911_v36 = vld [vmem:[#allocation12 + $0x48] sm:$0xff]  ;;  %v2910_v40 = vld [vmem:[#allocation12 + $0x40] sm:$0xff]  ;;  %v2909_v29 = vld [vmem:[#allocation12 + $0x38] sm:$0xff] }
 0x2fb   :  { %3111 = vmatprep.subr.mxu0 %v2992_v44  ;;  %3239 = vmatpush1.msra.mxu1 %v2932_v45  ;;  %v3072_v58 = vsel %vm1468_vm3, %v3070_v50, %v3071_v52  ;;  %v7062_v44 = vld [vmem:[#allocation12 + $0x3c8] sm:$0xff]  ;;  %v2908_v45 = vld [vmem:[#allocation12 + $0x30] sm:$0xff]  ;;  %v7065_v46 = vld [vmem:[#allocation12 + $0x3c0] sm:$0xff] }
 0x2fc   :  { %3112 = vmatpush1.msra.mxu0 %v2991_v28  ;;  %3240 = vmatprep.subr.mxu1 %v2931_v49  ;;  %v2907_v28 = vld [vmem:[#allocation12 + $0x28] sm:$0xff]  ;;  %v7068_v48 = vld [vmem:[#allocation12 + $0x3b8] sm:$0xff]  ;;  %v2906_v49 = vld [vmem:[#allocation12 + $0x20] sm:$0xff] }
 0x2fd   :  { %3113 = vmatprep.subr.mxu0 %v2990_v57  ;;  %3302 = vmatprep.mubr.f32.mxu1 %v2084_v32  ;;  %v7011_v32 = vld [vmem:[#allocation12 + $0x450] sm:$0xff]  ;;  %v2905_v52 = vld [vmem:[#allocation12 + $0x18] sm:$0xff]  ;;  %v7074_v57 = vld [vmem:[#allocation12 + $0x3a8] sm:$0xff] }
 0x2fe   :  { %3114 = vmatpush1.msra.mxu0 %v6992_v39  ;;  %3151 = vmatprep.mubr.f32.mxu0 %v3072_v58  ;;  %v7071_v50 = vld [vmem:[#allocation12 + $0x3b0] sm:$0xff]  ;;  %v2950_v7 = vld [vmem:[#allocation12 + $0x180] sm:$0xff] }
 0x2ff   :  { %3115 = vmatprep.subr.mxu0 %v6995_v59  ;;  %3241 = vmatpush1.msra.mxu1 %v2930_v61  ;;  %v2904_v58 = vld [vmem:[#allocation12 + $0x10] sm:$0xff]  ;;  %v7077_v61 = vld [vmem:[#allocation12 + $0x3a0] sm:$0xff] }
 0x300   :  { %3116 = vmatpush1.msra.mxu0 %v6997_v62  ;;  %3242 = vmatprep.subr.mxu1 %v2929_v51  ;;  %v2903_v51 = vld [vmem:[#allocation12 + $0x8] sm:$0xff] }
 0x301   :  { %3117 = vmatprep.subr.mxu0 %v7002_v63  ;;  %3243 = vmatpush1.msra.mxu1 %v2928_v34  ;;  %v7080_v34 = vld [vmem:[#allocation12 + $0x398] sm:$0xff] }
 0x302   :  { %3118 = vmatpush1.msra.mxu0 %v7005_v55  ;;  %3244 = vmatprep.subr.mxu1 %v2927_v33  ;;  %v2902_v33 = vld [vmem:[#allocation12] sm:$0xff] }
 0x303   :  { %3119 = vmatprep.subr.mxu0 %v7008_v56  ;;  %3245 = vmatpush1.msra.mxu1 %v2926_v53  ;;  %v7083_v53 = vld [vmem:[#allocation12 + $0x390] sm:$0xff] }
 0x304   :  { %3120 = vmatpush2.msra.mxu0 %v7011_v32  ;;  %3246 = vmatprep.subr.mxu1 %v2925_v54  ;;  %v2965_v54 = vld [vmem:[#allocation12 + $0x1f8] sm:$0xff] }
 0x305   :  { %3121 = vmatprep.subr.mxu0 %v7014_v1  ;;  %3247 = vmatpush1.msra.mxu1 %v2924_v47  ;;  %v7086_v47 = vld [vmem:[#allocation12 + $0x388] sm:$0xff] }
 0x306   :  { %3122 = vmatpush2.msra.mxu0 %v7017_v3  ;;  %3248 = vmatprep.subr.mxu1 %v2923_v5  ;;  %v2964_v5 = vld [vmem:[#allocation12 + $0x1f0] sm:$0xff] }
 0x307   :  { %3123 = vmatprep.subr.mxu0 %v7020_v9  ;;  %3249 = vmatpush1.msra.mxu1 %v2922_v2  ;;  %v7089_v2 = vld [vmem:[#allocation12 + $0x380] sm:$0xff] }
 0x308   :  { %3124 = vmatpush2.msra.mxu0 %v7023_v6  ;;  %3250 = vmatprep.subr.mxu1 %v2921_v23  ;;  %v2981_v23 = vld [vmem:[#allocation3 + $0x18] sm:$0x1] }
 0x309   :  { %3125 = vmatprep.subr.mxu0 %v7026_v8  ;;  %3251 = vmatpush1.msra.mxu1 %v2920_v10  ;;  %v2963_v10 = vld [vmem:[#allocation12 + $0x1e8] sm:$0xff] }
 0x30a   :  { %3126 = vmatpush2.msra.mxu0 %v7029_v11  ;;  %3252 = vmatprep.subr.mxu1 %v2919_v12  ;;  %v7092_v12 = vld [vmem:[#allocation12 + $0x378] sm:$0xff] }
 0x30b   :  { %3127 = vmatprep.subr.mxu0 %v7032_v14  ;;  %3253 = vmatpush1.msra.mxu1 %v2918_v15  ;;  %v2962_v15 = vld [vmem:[#allocation12 + $0x1e0] sm:$0xff] }
 0x30c   :  { %3128 = vmatpush2.msra.mxu0 %v7035_v16  ;;  %3254 = vmatprep.subr.mxu1 %v2917_v18  ;;  %v7095_v18 = vld [vmem:[#allocation12 + $0x370] sm:$0xff] }
 0x30d   :  { %3129 = vmatprep.subr.mxu0 %v7038_v21  ;;  %3255 = vmatpush1.msra.mxu1 %v2916_v37  ;;  %v2978_v37 = vld [vmem:[#allocation3] sm:$0xfe] }
 0x30e   :  { %3130 = vmatpush2.msra.mxu0 %v7041_v24  ;;  %3256 = vmatprep.subr.mxu1 %v2915_v26  ;;  %v2961_v26 = vld [vmem:[#allocation12 + $0x1d8] sm:$0xff] }
 0x30f   :  { %3131 = vmatprep.subr.mxu0 %v7044_v22  ;;  %3257 = vmatpush1.msra.mxu1 %v2914_v30  ;;  %v7098_v30 = vld [vmem:[#allocation12 + $0x368] sm:$0xff] }
 0x310   :  { %3132 = vmatpush2.msra.mxu0 %v7047_v35  ;;  %3258 = vmatprep.subr.mxu1 %v2913_v0  ;;  %v3068_v0 = vrot.slane %v2981_v23, 1  ;;  %v7115_v23 = vld [vmem:[#allocation12 + $0x238] sm:$0xff] }
 0x311   :  { %3133 = vmatprep.subr.mxu0 %v7050_v43  ;;  %3259 = vmatpush1.msra.mxu1 %v2912_v20  ;;  %v2960_v20 = vld [vmem:[#allocation12 + $0x1d0] sm:$0xff] }
 0x312   :  { %3134 = vmatpush2.msra.mxu0 %v7053_v27  ;;  %3260 = vmatprep.subr.mxu1 %v2911_v36  ;;  %v7101_v36 = vld [vmem:[#allocation12 + $0x360] sm:$0xff] }
 0x313   :  { %3135 = vmatprep.subr.mxu0 %v7056_v38  ;;  %3261 = vmatpush1.msra.mxu1 %v2910_v40  ;;  %v2959_v40 = vld [vmem:[#allocation12 + $0x1c8] sm:$0xff] }
 0x314   :  { %3136 = vmatpush2.msra.mxu0 %v7059_v41  ;;  %3262 = vmatprep.subr.mxu1 %v2909_v29  ;;  %v3067_v29 = vrot.slane %v2978_v37, 1  ;;  %v7118_v37 = vld [vmem:[#allocation12 + $0x230] sm:$0xff] }
 0x315   :  { %3137 = vmatprep.subr.mxu0 %v7062_v44  ;;  %3263 = vmatpush1.msra.mxu1 %v2908_v45  ;;  %v2977_v45 = vld [vmem:[#allocation12 + $0x258] sm:$0xf]  ;;  %7892 = vst [vmem:[#allocation44_spill] sm:$0xff] %v7118_v37 }
 0x316   :  { %3138 = vmatpush2.msra.mxu0 %v7065_v46  ;;  %3264 = vmatprep.subr.mxu1 %v2907_v28  ;;  %v2976_v28 = vld [vmem:[#allocation12 + $0x250] sm:$0xf] }
 0x317   :  { %3139 = vmatprep.subr.mxu0 %v7068_v48  ;;  %3265 = vmatpush1.msra.mxu1 %v2906_v49  ;;  %v2958_v49 = vld [vmem:[#allocation12 + $0x1c0] sm:$0xff] }
 0x318   :  { %3140 = vmatpush2.msra.mxu0 %v7071_v50  ;;  %3266 = vmatprep.subr.mxu1 %v2905_v52  ;;  %v3069_v52 = vsel %vm1468_vm3, %v3067_v29, %v3068_v0  ;;  %v2954_v0 = vld [vmem:[#allocation12 + $0x1a0] sm:$0xff]  ;;  %v7127_v29 = vld [vmem:[#allocation12 + $0x218] sm:$0xff] }
 0x319   :  { %3141 = vmatprep.subr.mxu0 %v7074_v57  ;;  %3267 = vmatpush1.msra.mxu1 %v2904_v58  ;;  %v7107_v58 = vld [vmem:[#allocation12 + $0x248] sm:$0xff]  ;;  %7895 = vst [vmem:[#allocation35_spill] sm:$0xff] %v7127_v29 }
 0x31a   :  { %3142 = vmatpush2.msra.mxu0 %v7077_v61  ;;  %3268 = vmatprep.subr.mxu1 %v2903_v51 }
 0x31b   :  { %3143 = vmatprep.subr.mxu0 %v7080_v34  ;;  %3269 = vmatpush1.msra.mxu1 %v2902_v33  ;;  %v2957_v33 = vld [vmem:[#allocation12 + $0x1b8] sm:$0xff] }
 0x31c   :  { %3144 = vmatpush2.msra.mxu0 %v7083_v53  ;;  %3270 = vmatprep.subr.mxu1 %v2965_v54  ;;  %v7112_v54 = vld [vmem:[#allocation12 + $0x240] sm:$0xff] }
 0x31d   :  { %3145 = vmatprep.subr.mxu0 %v7086_v47  ;;  %3271 = vmatpush2.msra.mxu1 %v2964_v5  ;;  %v2956_v5 = vld [vmem:[#allocation12 + $0x1b0] sm:$0xff] }
 0x31e   :  { %3146 = vmatpush2.msra.mxu0 %v7089_v2  ;;  %3272 = vmatprep.subr.mxu1 %v2963_v10 }
 0x31f   :  { %3147 = vmatprep.subr.mxu0 %v7092_v12  ;;  %3273 = vmatpush2.msra.mxu1 %v2962_v15  ;;  %v2955_v15 = vld [vmem:[#allocation12 + $0x1a8] sm:$0xff] }
 0x320   :  { %3148 = vmatpush2.msra.mxu0 %v7095_v18  ;;  %3274 = vmatprep.subr.mxu1 %v2961_v26  ;;  %v7121_v26 = vld [vmem:[#allocation12 + $0x228] sm:$0xff] }
 0x321   :  { %3149 = vmatprep.subr.mxu0 %v7098_v30  ;;  %3275 = vmatpush2.msra.mxu1 %v2960_v20  ;;  %7893 = vst [vmem:[#allocation33_spill] sm:$0xff] %v7121_v26  ;;  %v7124_v20 = vld [vmem:[#allocation12 + $0x220] sm:$0xff] }
 0x322   :  { %3150 = vmatpush2.msra.mxu0 %v7101_v36  ;;  %3276 = vmatprep.subr.mxu1 %v2959_v40  ;;  %v7109_v51 = vpop.f32.mrf.mxu1  ;;  %7894 = vst [vmem:[#allocation34_spill] sm:$0xff] %v7124_v20  ;;  %v2953_v40 = vld [vmem:[#allocation12 + $0x198] sm:$0xff] }
 0x323   :  { %3152 = vmatmul.mubr.f32.vlgmr.msra.gmra.mxu0 %v3069_v52  ;;  %5724 = vmatprep.subr.msk.mxu0 %vm3080_vm5, %v2977_v45  ;;  %v7133_v52 = vld [vmem:[#allocation12 + $0x210] sm:$0xff] }
 0x324   :  { %5725 = vmatpush1.msk.msra.mxu0 %vm3080_vm5, %v2976_v28  ;;  %3277 = vmatpush2.msra.mxu1 %v2958_v49  ;;  %v2446_v10 = vpop.f32.mrf.mxu1  ;;  %v3384_v28 = vld [vmem:[#allocation3 + $0x20] sm:$0x3]  ;;  %v2952_v49 = vld [vmem:[#allocation12 + $0x190] sm:$0xff]  ;;  %7896 = vst [vmem:[#allocation45_spill] sm:$0xff] %v7133_v52 }
 0x325   :  { %3331 = vmatprep.subr.mxu0 %v7107_v58  ;;  %3278 = vmatprep.subr.mxu1 %v2957_v33  ;;  %v2951_v33 = vld [vmem:[#allocation12 + $0x188] sm:$0xff]  ;;  %v3381_v10 = vld [vmem:[#allocation3 + $0x8] sm:$0xfc]  ;;  %v3473_v17 = vrot.slane %v3384_v28, 2 }
 0x326   :  { %3332 = vmatpush1.msra.mxu0 %v7112_v54  ;;  %3279 = vmatpush2.msra.mxu1 %v2956_v5  ;;  %v7136_v5 = vld [vmem:[#allocation12 + $0x208] sm:$0xff]  ;;  %v2948_v28 = vld [vmem:[#allocation12 + $0x170] sm:$0xff] }
 0x327   :  { %3333 = vmatprep.subr.mxu0 %v7115_v23  ;;  %3280 = vmatprep.subr.mxu1 %v2955_v15  ;;  %7897 = vst [vmem:[#allocation36_spill] sm:$0xff] %v7136_v5 }
 0x328   :  { %3334 = vmatpush1.msra.mxu0 %v7118_v37  ;;  %3373 = vmatprep.mubr.f32.mxu0 %v7869_v60  ;;  %v7130_v45 = vpop.f32.mrf.mxu1  ;;  %v3383_v37 = vld [vmem:[#allocation3 + $0x18] sm:$0x3] }
 0x329   :  { %3335 = vmatprep.subr.mxu0 %v7121_v26  ;;  %3281 = vmatpush2.msra.mxu1 %v2954_v0  ;;  %v7142_v26 = vld [vmem:[#allocation12 + $0x5b8] sm:$0xff]  ;;  %v7145_v0 = vld [vmem:[#allocation12 + $0x5b0] sm:$0xff] }
 0x32a   :  { %3336 = vmatpush1.msra.mxu0 %v7124_v20  ;;  %3282 = vmatprep.subr.mxu1 %v2953_v40  ;;  %v2451_v15 = vpop.f32.mrf.mxu1  ;;  %7899 = vst [vmem:[#allocation38_spill] sm:$0xff] %v7142_v26  ;;  %7900 = vst [vmem:[#allocation39_spill] sm:$0xff] %v7145_v0  ;;  %v3472_v40 = vrot.slane %v3381_v10, 2  ;;  %v2946_v10 = vld [vmem:[#allocation12 + $0x160] sm:$0xff]  ;;  %v3739_v20 = vld [vmem:[#allocation12 + $0x288] sm:$0xff] }
 0x32b   :  { %3337 = vmatprep.subr.mxu0 %v7127_v29  ;;  %3283 = vmatpush2.msra.mxu1 %v2952_v49  ;;  %v2901_v15 = vld [vmem:[#allocation3 + $0x10] sm:$0xff]  ;;  %v7148_v29 = vld [vmem:[#allocation12 + $0x5a8] sm:$0xff] }
 0x32c   :  { %3338 = vmatpush1.msra.mxu0 %v7133_v52  ;;  %3284 = vmatprep.subr.mxu1 %v2951_v33  ;;  %7901 = vst [vmem:[#allocation40_spill] sm:$0xff] %v7148_v29  ;;  %v3474_v49 = vsel %vm1890_vm4, %v3472_v40, %v3473_v17  ;;  %v7153_v33 = vld [vmem:[#allocation12 + $0x5a0] sm:$0xff]  ;;  %v2944_v17 = vld [vmem:[#allocation12 + $0x150] sm:$0xff]  ;;  %v3747_v52 = vld [vmem:[#allocation12 + $0x2c8] sm:$0xff] }
 0x32d   :  { %3339 = vmatprep.subr.mxu0 %v7136_v5  ;;  %3285 = vmatpush2.msra.mxu1 %v2950_v7  ;;  %7902 = vst [vmem:[#allocation41_spill] sm:$0xff] %v7153_v33  ;;  %v2947_v5 = vld [vmem:[#allocation12 + $0x168] sm:$0xff]  ;;  %v7156_v7 = vld [vmem:[#allocation12 + $0x598] sm:$0xff]  ;;  %v7165_v40 = vld [vmem:[#allocation12 + $0x580] sm:$0xff] }
 0x32e   :  { %3340 = vmatpush1.msra.mxu0 %v7139_v4  ;;  %3286 = vmatprep.subr.mxu1 %v2949_v13  ;;  %7903 = vst [vmem:[#allocation42_spill] sm:$0xff] %v7156_v7  ;;  %v7159_v4 = vld [vmem:[#allocation12 + $0x590] sm:$0xff]  ;;  %v2945_v13 = vld [vmem:[#allocation12 + $0x158] sm:$0xff]  ;;  %7906 = vst [vmem:[#allocation48_spill] sm:$0xff] %v7165_v40 }
 0x32f   :  { %5726 = vmatmul.mubr.msk.f32.vlgmr.msra.gmra.mxu0 %vm2091_vm6, %v2901_v15  ;;  %3488 = vmatprep.subr.mxu0 %v7142_v26  ;;  %7904 = vst [vmem:[#allocation46_spill] sm:$0xff] %v7159_v4  ;;  %v7162_v15 = vld [vmem:[#allocation12 + $0x588] sm:$0xff] }
 0x330   :  { %3489 = vmatpush1.msra.mxu0 %v7145_v0  ;;  %3552 = vmatprep.mubr.f32.mxu0 %v3474_v49  ;;  %7905 = vst [vmem:[#allocation47_spill] sm:$0xff] %v7162_v15  ;;  %v2943_v49 = vld [vmem:[#allocation12 + $0x148] sm:$0xff]  ;;  %v7168_v0 = vld [vmem:[#allocation12 + $0x578] sm:$0xff] }
 0x331   :  { %3490 = vmatprep.subr.mxu0 %v7148_v29  ;;  %3287 = vmatpush2.msra.mxu1 %v2948_v28  ;;  %7907 = vst [vmem:[#allocation49_spill] sm:$0xff] %v7168_v0  ;;  %v2942_v29 = vld [vmem:[#allocation12 + $0x140] sm:$0xff]  ;;  %v7171_v28 = vld [vmem:[#allocation12 + $0x570] sm:$0xff] }
 0x332   :  { %3491 = vmatpush1.msra.mxu0 %v7153_v33  ;;  %3288 = vmatprep.subr.mxu1 %v2947_v5  ;;  %7908 = vst [vmem:[#allocation50_spill] sm:$0xff] %v7171_v28  ;;  %v2941_v33 = vld [vmem:[#allocation12 + $0x138] sm:$0xff]  ;;  %v7174_v5 = vld [vmem:[#allocation12 + $0x568] sm:$0xff] }
 0x333   :  { %3492 = vmatprep.subr.mxu0 %v7156_v7  ;;  %3289 = vmatpush2.msra.mxu1 %v2946_v10  ;;  %7909 = vst [vmem:[#allocation51_spill] sm:$0xff] %v7174_v5  ;;  %v2940_v7 = vld [vmem:[#allocation12 + $0x130] sm:$0xff]  ;;  %v7177_v10 = vld [vmem:[#allocation12 + $0x560] sm:$0xff] }
 0x334   :  { %3493 = vmatpush1.msra.mxu0 %v7159_v4  ;;  %3290 = vmatprep.subr.mxu1 %v2945_v13  ;;  %7910 = vst [vmem:[#allocation52_spill] sm:$0xff] %v7177_v10  ;;  %v2939_v4 = vld [vmem:[#allocation12 + $0x128] sm:$0xff]  ;;  %v7180_v13 = vld [vmem:[#allocation12 + $0x558] sm:$0xff] }
 0x335   :  { %3494 = vmatprep.subr.mxu0 %v7162_v15  ;;  %3291 = vmatpush2.msra.mxu1 %v2944_v17  ;;  %7911 = vst [vmem:[#allocation53_spill] sm:$0xff] %v7180_v13  ;;  %v2938_v15 = vld [vmem:[#allocation12 + $0x120] sm:$0xff]  ;;  %v7183_v17 = vld [vmem:[#allocation12 + $0x550] sm:$0xff] }
 0x336   :  { %3495 = vmatpush1.msra.mxu0 %v7165_v40  ;;  %3292 = vmatprep.subr.mxu1 %v2943_v49  ;;  %7912 = vst [vmem:[#allocation54_spill] sm:$0xff] %v7183_v17  ;;  %v2937_v40 = vld [vmem:[#allocation12 + $0x118] sm:$0xff]  ;;  %v7186_v49 = vld [vmem:[#allocation12 + $0x548] sm:$0xff] }
 0x337   :  { %3496 = vmatprep.subr.mxu0 %v7168_v0  ;;  %3293 = vmatpush2.msra.mxu1 %v2942_v29  ;;  %7913 = vst [vmem:[#allocation55_spill] sm:$0xff] %v7186_v49  ;;  %v2936_v0 = vld [vmem:[#allocation12 + $0x110] sm:$0xff]  ;;  %v7189_v29 = vld [vmem:[#allocation12 + $0x540] sm:$0xff] }
 0x338   :  { %3497 = vmatpush1.msra.mxu0 %v7171_v28  ;;  %3294 = vmatprep.subr.mxu1 %v2941_v33  ;;  %7914 = vst [vmem:[#allocation56_spill] sm:$0xff] %v7189_v29  ;;  %v2935_v28 = vld [vmem:[#allocation12 + $0x108] sm:$0xff]  ;;  %v7192_v33 = vld [vmem:[#allocation12 + $0x538] sm:$0xff] }
 0x339   :  { %3498 = vmatprep.subr.mxu0 %v7174_v5  ;;  %3295 = vmatpush2.msra.mxu1 %v2940_v7  ;;  %7915 = vst [vmem:[#allocation57_spill] sm:$0xff] %v7192_v33  ;;  %v2934_v5 = vld [vmem:[#allocation12 + $0x100] sm:$0xff]  ;;  %v7195_v7 = vld [vmem:[#allocation12 + $0x530] sm:$0xff] }
 0x33a   :  { %3499 = vmatpush1.msra.mxu0 %v7177_v10  ;;  %3296 = vmatprep.subr.mxu1 %v2939_v4  ;;  %7916 = vst [vmem:[#allocation58_spill] sm:$0xff] %v7195_v7  ;;  %v7198_v4 = vld [vmem:[#allocation12 + $0x528] sm:$0xff]  ;;  %v3382_v10 = vld [vmem:[#allocation3 + $0x10] sm:$0xfc] }
 0x33b   :  { %3500 = vmatprep.subr.mxu0 %v7180_v13  ;;  %3297 = vmatpush2.msra.mxu1 %v2938_v15  ;;  %7917 = vst [vmem:[#allocation59_spill] sm:$0xff] %v7198_v4  ;;  %v3462_v13 = vld [vmem:[#allocation12 + $0x718] sm:$0xf]  ;;  %v7201_v15 = vld [vmem:[#allocation12 + $0x520] sm:$0xff] }
 0x33c   :  { %3501 = vmatpush1.msra.mxu0 %v7183_v17  ;;  %3298 = vmatprep.subr.mxu1 %v2937_v40  ;;  %7918 = vst [vmem:[#allocation60_spill] sm:$0xff] %v7201_v15  ;;  %v3461_v17 = vld [vmem:[#allocation12 + $0x710] sm:$0xf]  ;;  %v7204_v40 = vld [vmem:[#allocation12 + $0x518] sm:$0xff] }
 0x33d   :  { %3502 = vmatprep.subr.mxu0 %v7186_v49  ;;  %3299 = vmatpush2.msra.mxu1 %v2936_v0  ;;  %7919 = vst [vmem:[#allocation61_spill] sm:$0xff] %v7204_v40  ;;  %v7920_v49 = vmax.f32 %v6966_v42, 0.0  ;;  %v3460_v0 = vld [vmem:[#allocation12 + $0x708] sm:$0xff]  ;;  %v3457_v42 = vld [vmem:[#allocation12 + $0x6f0] sm:$0xff] }
 0x33e   :  { %3503 = vmatpush1.msra.mxu0 %v7189_v29  ;;  %3300 = vmatprep.subr.mxu1 %v2935_v28  ;;  %v7209_v29 = vld [vmem:[#allocation12 + $0x510] sm:$0xff]  ;;  %v3459_v28 = vld [vmem:[#allocation12 + $0x700] sm:$0xff] }
 0x33f   :  { %3504 = vmatprep.subr.mxu0 %v7192_v33  ;;  %3301 = vmatpush2.msra.mxu1 %v2934_v5  ;;  %7921 = vst [vmem:[#allocation62_spill] sm:$0xff] %v7209_v29  ;;  %v7213_v33 = vld [vmem:[#allocation12 + $0x508] sm:$0xff]  ;;  %v3458_v5 = vld [vmem:[#allocation12 + $0x6f8] sm:$0xff] }
 0x340   :  { %3505 = vmatpush1.msra.mxu0 %v7195_v7  ;;  %3303 = vmatmul.mubr.f32.vlgmr.msra.gmra.mxu1 %v7920_v49  ;;  %7922 = vst [vmem:[#allocation63_spill] sm:$0xff] %v7213_v33  ;;  %v7217_v7 = vld [vmem:[#allocation12 + $0x500] sm:$0xff]  ;;  %v7220_v49 = vld [vmem:[#allocation12 + $0x4f8] sm:$0xff] }
 0x341   :  { %3506 = vmatprep.subr.mxu0 %v7198_v4  ;;  %5727 = vmatprep.subr.msk.mxu1 %vm3080_vm5, %v3462_v13  ;;  %7923 = vst [vmem:[#allocation64_spill] sm:$0xff] %v7217_v7  ;;  %7924 = vst [vmem:[#allocation65_spill] sm:$0xff] %v7220_v49  ;;  %v3456_v13 = vld [vmem:[#allocation12 + $0x6e8] sm:$0xff]  ;;  %v3455_v4 = vld [vmem:[#allocation12 + $0x6e0] sm:$0xff] }
 0x342   :  { %3507 = vmatpush1.msra.mxu0 %v7201_v15  ;;  %5728 = vmatpush1.msk.msra.mxu1 %vm3080_vm5, %v3461_v17  ;;  %v7223_v15 = vld [vmem:[#allocation12 + $0x4f0] sm:$0xff]  ;;  %v7226_v17 = vld [vmem:[#allocation12 + $0x4e8] sm:$0xff] }
 0x343   :  { %3508 = vmatprep.subr.mxu0 %v7204_v40  ;;  %3581 = vmatprep.subr.mxu1 %v3460_v0  ;;  %7925 = vst [vmem:[#allocation66_spill] sm:$0xff] %v7223_v15  ;;  %7926 = vst [vmem:[#allocation67_spill] sm:$0xff] %v7226_v17  ;;  %v3454_v40 = vld [vmem:[#allocation12 + $0x6d8] sm:$0xff]  ;;  %v3385_v0 = vld [vmem:[#allocation3 + $0x28] sm:$0x3] }
 0x344   :  { %3509 = vmatpush1.msra.mxu0 %v7209_v29  ;;  %3582 = vmatpush1.msra.mxu1 %v3459_v28  ;;  %v7229_v29 = vld [vmem:[#allocation12 + $0x4e0] sm:$0xff]  ;;  %v3453_v28 = vld [vmem:[#allocation12 + $0x6d0] sm:$0xff]  ;;  %v3476_v26 = vrot.slane %v3385_v0, 2 }
 0x345   :  { %3510 = vmatprep.subr.mxu0 %v7213_v33  ;;  %3583 = vmatprep.subr.mxu1 %v3458_v5  ;;  %7927 = vst [vmem:[#allocation68_spill] sm:$0xff] %v7229_v29  ;;  %v7232_v33 = vld [vmem:[#allocation12 + $0x4d8] sm:$0xff]  ;;  %v3452_v5 = vld [vmem:[#allocation12 + $0x6c8] sm:$0xff] }
 0x346   :  { %3511 = vmatpush1.msra.mxu0 %v7217_v7  ;;  %3584 = vmatpush1.msra.mxu1 %v3457_v42  ;;  %7928 = vst [vmem:[#allocation69_spill] sm:$0xff] %v7232_v33  ;;  %v7235_v7 = vld [vmem:[#allocation12 + $0x4d0] sm:$0xff]  ;;  %v3451_v42 = vld [vmem:[#allocation12 + $0x6c0] sm:$0xff] }
 0x347   :  { %3512 = vmatprep.subr.mxu0 %v7220_v49  ;;  %3585 = vmatprep.subr.mxu1 %v3456_v13  ;;  %7929 = vst [vmem:[#allocation70_spill] sm:$0xff] %v7235_v7  ;;  %v7238_v49 = vld [vmem:[#allocation12 + $0x4c8] sm:$0xff]  ;;  %v7241_v13 = vld [vmem:[#allocation12 + $0x4c0] sm:$0xff] }
 0x348   :  { %3513 = vmatpush1.msra.mxu0 %v7223_v15  ;;  %3586 = vmatpush1.msra.mxu1 %v3455_v4  ;;  %7930 = vst [vmem:[#allocation71_spill] sm:$0xff] %v7238_v49  ;;  %7931 = vst [vmem:[#allocation72_spill] sm:$0xff] %v7241_v13  ;;  %v3475_v4 = vrot.slane %v3382_v10, 2  ;;  %v7244_v15 = vld [vmem:[#allocation12 + $0x6b8] sm:$0xff]  ;;  %v7253_v10 = vld [vmem:[#allocation12 + $0x6a8] sm:$0xff] }
 0x349   :  { %3514 = vmatprep.subr.mxu0 %v7226_v17  ;;  %3587 = vmatprep.subr.mxu1 %v3454_v40  ;;  %7932 = vst [vmem:[#allocation73_spill] sm:$0xff] %v7244_v15  ;;  %v3765_v17 = vld [vmem:[#allocation12 + $0x358] sm:$0xff]  ;;  %v7248_v40 = vld [vmem:[#allocation12 + $0x6b0] sm:$0xff]  ;;  %7934 = vst [vmem:[#allocation75_spill] sm:$0xff] %v7253_v10 }
 0x34a   :  { %3515 = vmatpush1.msra.mxu0 %v7229_v29  ;;  %3588 = vmatpush1.msra.mxu1 %v3453_v28  ;;  %7933 = vst [vmem:[#allocation74_spill] sm:$0xff] %v7248_v40  ;;  %v3477_v0 = vsel %vm1890_vm4, %v3475_v4, %v3476_v26  ;;  %v3764_v28 = vld [vmem:[#allocation12 + $0x350] sm:$0xff]  ;;  %v3761_v26 = vld [vmem:[#allocation12 + $0x338] sm:$0xff] }
 0x34b   :  { %3516 = vmatprep.subr.mxu0 %v7232_v33  ;;  %3589 = vmatprep.subr.mxu1 %v3452_v5  ;;  %v3763_v5 = vld [vmem:[#allocation12 + $0x348] sm:$0xff]  ;;  %v7262_v4 = vld [vmem:[#allocation12 + $0x690] sm:$0xff]  ;;  %v3434_v29 = vld [vmem:[#allocation12 + $0x638] sm:$0xff] }
 0x34c   :  { %3517 = vmatpush1.msra.mxu0 %v7235_v7  ;;  %3590 = vmatpush1.msra.mxu1 %v3451_v42  ;;  %v7256_v42 = vld [vmem:[#allocation12 + $0x6a0] sm:$0xff]  ;;  %v7259_v7 = vld [vmem:[#allocation12 + $0x698] sm:$0xff]  ;;  %7937 = vst [vmem:[#allocation78_spill] sm:$0xff] %v7262_v4  ;;  %v3751_v33 = vld [vmem:[#allocation12 + $0x2e8] sm:$0xff] }
 0x34d   :  { %3518 = vmatprep.subr.mxu0 %v7238_v49  ;;  %3623 = vmatprep.mubr.f32.mxu1 %v7869_v60  ;;  %7935 = vst [vmem:[#allocation76_spill] sm:$0xff] %v7256_v42  ;;  %v3762_v49 = vld [vmem:[#allocation12 + $0x340] sm:$0xff]  ;;  %7936 = vst [vmem:[#allocation77_spill] sm:$0xff] %v7259_v7 }
 0x34e   :  { %3519 = vmatpush1.msra.mxu0 %v7241_v13  ;;  %5729 = vmatmul.mubr.msk.f32.vlgmr.msra.gmra.mxu1 %vm2091_vm6, %v3477_v0  ;;  %v3760_v0 = vld [vmem:[#allocation12 + $0x330] sm:$0xff]  ;;  %v7265_v13 = vld [vmem:[#allocation12 + $0x688] sm:$0xff] }
 0x34f   :  { %3520 = vmatprep.subr.mxu0 %v7244_v15  ;;  %3835 = vmatprep.subr.mxu1 %v3765_v17  ;;  %7938 = vst [vmem:[#allocation79_spill] sm:$0xff] %v7265_v13  ;;  %v3759_v15 = vld [vmem:[#allocation12 + $0x328] sm:$0xff]  ;;  %v7268_v17 = vld [vmem:[#allocation12 + $0x680] sm:$0xff] }
 0x350   :  { %3521 = vmatpush2.msra.mxu0 %v7248_v40  ;;  %3836 = vmatpush1.msra.mxu1 %v3764_v28  ;;  %7939 = vst [vmem:[#allocation80_spill] sm:$0xff] %v7268_v17  ;;  %v3758_v40 = vld [vmem:[#allocation12 + $0x320] sm:$0xff]  ;;  %v7271_v28 = vld [vmem:[#allocation12 + $0x678] sm:$0xff] }
 0x351   :  { %3522 = vmatprep.subr.mxu0 %v7253_v10  ;;  %3837 = vmatprep.subr.mxu1 %v3763_v5  ;;  %7940 = vst [vmem:[#allocation81_spill] sm:$0xff] %v7271_v28  ;;  %v3757_v10 = vld [vmem:[#allocation12 + $0x318] sm:$0xff]  ;;  %v7274_v5 = vld [vmem:[#allocation12 + $0x670] sm:$0xff] }
 0x352   :  { %3523 = vmatpush2.msra.mxu0 %v7256_v42  ;;  %3838 = vmatpush1.msra.mxu1 %v3762_v49  ;;  %7941 = vst [vmem:[#allocation82_spill] sm:$0xff] %v7274_v5  ;;  %v3756_v42 = vld [vmem:[#allocation12 + $0x310] sm:$0xff]  ;;  %v7277_v49 = vld [vmem:[#allocation12 + $0x668] sm:$0xff] }
 0x353   :  { %3524 = vmatprep.subr.mxu0 %v7259_v7  ;;  %3839 = vmatprep.subr.mxu1 %v3761_v26  ;;  %7942 = vst [vmem:[#allocation83_spill] sm:$0xff] %v7277_v49  ;;  %v3755_v7 = vld [vmem:[#allocation12 + $0x308] sm:$0xff]  ;;  %v7280_v26 = vld [vmem:[#allocation12 + $0x660] sm:$0xff] }
 0x354   :  { %3525 = vmatpush2.msra.mxu0 %v7262_v4  ;;  %3840 = vmatpush1.msra.mxu1 %v3760_v0  ;;  %7943 = vst [vmem:[#allocation84_spill] sm:$0xff] %v7280_v26  ;;  %v3754_v4 = vld [vmem:[#allocation12 + $0x300] sm:$0xff]  ;;  %v3438_v0 = vld [vmem:[#allocation12 + $0x658] sm:$0xff] }
 0x355   :  { %3526 = vmatprep.subr.mxu0 %v7265_v13  ;;  %3841 = vmatprep.subr.mxu1 %v3759_v15  ;;  %v3753_v13 = vld [vmem:[#allocation12 + $0x2f8] sm:$0xff]  ;;  %v3437_v15 = vld [vmem:[#allocation12 + $0x650] sm:$0xff] }
 0x356   :  { %3527 = vmatpush2.msra.mxu0 %v7268_v17  ;;  %3842 = vmatpush1.msra.mxu1 %v3758_v40  ;;  %v3752_v17 = vld [vmem:[#allocation12 + $0x2f0] sm:$0xff]  ;;  %v3436_v40 = vld [vmem:[#allocation12 + $0x648] sm:$0xff] }
 0x357   :  { %3528 = vmatprep.subr.mxu0 %v7271_v28  ;;  %3843 = vmatprep.subr.mxu1 %v3757_v10  ;;  %v3435_v28 = vld [vmem:[#allocation12 + $0x640] sm:$0xff] }
 0x358   :  { %3529 = vmatpush2.msra.mxu0 %v7274_v5  ;;  %3844 = vmatpush1.msra.mxu1 %v3756_v42  ;;  %v3750_v10 = vld [vmem:[#allocation12 + $0x2e0] sm:$0xff]  ;;  %v3749_v5 = vld [vmem:[#allocation12 + $0x2d8] sm:$0xff]  ;;  %v3433_v42 = vld [vmem:[#allocation12 + $0x630] sm:$0xff] }
 0x359   :  { %3530 = vmatprep.subr.mxu0 %v7277_v49  ;;  %3845 = vmatprep.subr.mxu1 %v3755_v7  ;;  %v3748_v49 = vld [vmem:[#allocation12 + $0x2d0] sm:$0xff]  ;;  %v3432_v7 = vld [vmem:[#allocation12 + $0x628] sm:$0xff] }
 0x35a   :  { %3531 = vmatpush2.msra.mxu0 %v7280_v26  ;;  %3846 = vmatpush1.msra.mxu1 %v3754_v4  ;;  %v3431_v26 = vld [vmem:[#allocation12 + $0x620] sm:$0xff] }
 0x35b   :  { %3532 = vmatprep.subr.mxu0 %v3438_v0  ;;  %3847 = vmatprep.subr.mxu1 %v3753_v13  ;;  %v3746_v4 = vld [vmem:[#allocation12 + $0x2c0] sm:$0xff]  ;;  %v3430_v0 = vld [vmem:[#allocation12 + $0x618] sm:$0xff] }
 0x35c   :  { %3533 = vmatpush2.msra.mxu0 %v3437_v15  ;;  %3848 = vmatpush1.msra.mxu1 %v3752_v17  ;;  %v3745_v13 = vld [vmem:[#allocation12 + $0x2b8] sm:$0xff]  ;;  %v3429_v15 = vld [vmem:[#allocation12 + $0x610] sm:$0xff] }
 0x35d   :  { %3534 = vmatprep.subr.mxu0 %v3436_v40  ;;  %3849 = vmatprep.subr.mxu1 %v3751_v33  ;;  %v3744_v17 = vld [vmem:[#allocation12 + $0x2b0] sm:$0xff]  ;;  %v3428_v40 = vld [vmem:[#allocation12 + $0x608] sm:$0xff] }
 0x35e   :  { %3535 = vmatpush2.msra.mxu0 %v3435_v28  ;;  %3850 = vmatpush1.msra.mxu1 %v3750_v10  ;;  %v3743_v28 = vld [vmem:[#allocation12 + $0x2a8] sm:$0xff]  ;;  %v3427_v10 = vld [vmem:[#allocation12 + $0x600] sm:$0xff] }
 0x35f   :  { %3536 = vmatprep.subr.mxu0 %v3434_v29  ;;  %3851 = vmatprep.subr.mxu1 %v3749_v5  ;;  %v3742_v29 = vld [vmem:[#allocation12 + $0x2a0] sm:$0xff]  ;;  %v3426_v5 = vld [vmem:[#allocation12 + $0x5f8] sm:$0xff] }
 0x360   :  { %3537 = vmatpush2.msra.mxu0 %v3433_v42  ;;  %3852 = vmatpush1.msra.mxu1 %v3748_v49  ;;  %v3741_v49 = vld [vmem:[#allocation12 + $0x298] sm:$0xff] }
 0x361   :  { %3538 = vmatprep.subr.mxu0 %v3432_v7  ;;  %3853 = vmatprep.subr.mxu1 %v3747_v52  ;;  %v3425_v7 = vld [vmem:[#allocation12 + $0x5f0] sm:$0xff] }
 0x362   :  { %3539 = vmatpush2.msra.mxu0 %v3431_v26  ;;  %v7285_v33 = vpop.f32.mrf.mxu1  ;;  %3854 = vmatpush1.msra.mxu1 %v3746_v4  ;;  %v3740_v52 = vld [vmem:[#allocation12 + $0x290] sm:$0xff]  ;;  %v3424_v26 = vld [vmem:[#allocation12 + $0x5e8] sm:$0xff]  ;;  %v3423_v4 = vld [vmem:[#allocation12 + $0x5e0] sm:$0xff] }
 0x363   :  { %3540 = vmatprep.subr.mxu0 %v3430_v0  ;;  %3855 = vmatprep.subr.mxu1 %v3745_v13  ;;  %v3422_v13 = vld [vmem:[#allocation12 + $0x5d8] sm:$0xff] }
 0x364   :  { %3541 = vmatpush2.msra.mxu0 %v3429_v15  ;;  %v2604_v42 = vpop.f32.mrf.mxu1  ;;  %3856 = vmatpush1.msra.mxu1 %v3744_v17  ;;  %v3421_v15 = vld [vmem:[#allocation12 + $0x5d0] sm:$0xff] }
 0x365   :  { %3542 = vmatprep.subr.mxu0 %v3428_v40  ;;  %3857 = vmatprep.subr.mxu1 %v3743_v28  ;;  %v3380_v17 = vld [vmem:[#allocation3] sm:$0xfc]  ;;  %v3809_v42 = vld [vmem:[#allocation12 + $0x4b8] sm:$0xf] }
 0x366   :  { %3543 = vmatpush2.msra.mxu0 %v3427_v10  ;;  %3858 = vmatpush1.msra.mxu1 %v3742_v29  ;;  %v3420_v28 = vld [vmem:[#allocation12 + $0x5c8] sm:$0xff]  ;;  %v3470_v10 = vrot.slane %v3383_v37, 2  ;;  %v3419_v29 = vld [vmem:[#allocation12 + $0x5c0] sm:$0xff]  ;;  %v3808_v37 = vld [vmem:[#allocation12 + $0x4b0] sm:$0xf] }
 0x367   :  { %3544 = vmatprep.subr.mxu0 %v3426_v5  ;;  %3859 = vmatprep.subr.mxu1 %v3741_v49  ;;  %v3469_v5 = vrot.slane %v3380_v17, 2 }
 0x368   :  { %3545 = vmatpush2.msra.mxu0 %v3425_v7  ;;  %v7287_v0 = vpop.f32.mrf.mxu1  ;;  %3860 = vmatpush1.msra.mxu1 %v3740_v52 }
 0x369   :  { %3546 = vmatprep.subr.mxu0 %v3424_v26  ;;  %3861 = vmatprep.subr.mxu1 %v3739_v20  ;;  %v3471_v20 = vsel %vm1890_vm4, %v3469_v5, %v3470_v10 }
 0x36a   :  { %3547 = vmatpush2.msra.mxu0 %v3423_v4  ;;  %v2609_v40 = vpop.f32.mrf.mxu1  ;;  %3862 = vmatpush1.msra.mxu1 %v6992_v39  ;;  %v3807_v39 = vld [vmem:[#allocation12 + $0x4a8] sm:$0xff] }
 0x36b   :  { %3548 = vmatprep.subr.mxu0 %v3422_v13  ;;  %3863 = vmatprep.subr.mxu1 %v6995_v59  ;;  %v3806_v59 = vld [vmem:[#allocation12 + $0x4a0] sm:$0xff] }
 0x36c   :  { %3549 = vmatpush2.msra.mxu0 %v3421_v15  ;;  %3864 = vmatpush1.msra.mxu1 %v6997_v62  ;;  %v3805_v62 = vld [vmem:[#allocation12 + $0x498] sm:$0xff] }
 0x36d   :  { %3550 = vmatprep.subr.mxu0 %v3420_v28  ;;  %3865 = vmatprep.subr.mxu1 %v7002_v63  ;;  %v3804_v63 = vld [vmem:[#allocation12 + $0x490] sm:$0xff] }
 0x36e   :  { %3551 = vmatpush2.msra.mxu0 %v3419_v29  ;;  %3866 = vmatpush1.msra.mxu1 %v7005_v55  ;;  %v3803_v55 = vld [vmem:[#allocation12 + $0x488] sm:$0xff] }
 0x36f   :  { %3553 = vmatmul.mubr.f32.vlgmr.msra.gmra.mxu0 %v3471_v20  ;;  %3867 = vmatprep.subr.mxu1 %v7008_v56  ;;  %v3802_v56 = vld [vmem:[#allocation12 + $0x480] sm:$0xff] }
 0x370   :  { %3868 = vmatpush2.msra.mxu1 %v7011_v32  ;;  %5730 = vmatprep.subr.msk.mxu0 %vm3080_vm5, %v3809_v42  ;;  %v3801_v32 = vld [vmem:[#allocation12 + $0x478] sm:$0xff] }
 0x371   :  { %3869 = vmatprep.subr.mxu1 %v7014_v1  ;;  %5731 = vmatpush1.msk.msra.mxu0 %vm3080_vm5, %v3808_v37  ;;  %v3800_v1 = vld [vmem:[#allocation12 + $0x470] sm:$0xff] }
 0x372   :  { %3870 = vmatpush2.msra.mxu1 %v7017_v3  ;;  %3928 = vmatprep.subr.mxu0 %v3807_v39  ;;  %v3799_v3 = vld [vmem:[#allocation12 + $0x468] sm:$0xff]  ;;  %v3682_v39 = vld [vmem:[#allocation12 + $0xf0] sm:$0xff] }
 0x373   :  { %3871 = vmatprep.subr.mxu1 %v7020_v9  ;;  %3929 = vmatpush1.msra.mxu0 %v3806_v59  ;;  %v3798_v9 = vld [vmem:[#allocation12 + $0x460] sm:$0xff] }
 0x374   :  { %3872 = vmatpush2.msra.mxu1 %v7023_v6  ;;  %3930 = vmatprep.subr.mxu0 %v3805_v62  ;;  %v3683_v6 = vld [vmem:[#allocation12 + $0xf8] sm:$0xff]  ;;  %v3681_v62 = vld [vmem:[#allocation12 + $0xe8] sm:$0xff] }
 0x375   :  { %3873 = vmatprep.subr.mxu1 %v7026_v8  ;;  %3931 = vmatpush1.msra.mxu0 %v3804_v63  ;;  %v2367_v8 = vpop.f32.mrf.mxu0 }
 0x376   :  { %3874 = vmatpush2.msra.mxu1 %v7029_v11  ;;  %3932 = vmatprep.subr.mxu0 %v3803_v55 }
 0x377   :  { %3875 = vmatprep.subr.mxu1 %v7032_v14  ;;  %3933 = vmatpush1.msra.mxu0 %v3802_v56  ;;  %v2369_v11 = vpop.f32.mrf.mxu0  ;;  %v3727_v14 = vld [vmem:[#allocation12 + $0x258] sm:$0xf] }
 0x378   :  { %3876 = vmatpush2.msra.mxu1 %v7035_v16  ;;  %3934 = vmatprep.subr.mxu0 %v3801_v32  ;;  %v3680_v32 = vld [vmem:[#allocation12 + $0xe0] sm:$0xff] }
 0x379   :  { %3877 = vmatprep.subr.mxu1 %v7038_v21  ;;  %3935 = vmatpush1.msra.mxu0 %v3800_v1  ;;  %v2373_v16 = vpop.f32.mrf.mxu0 }
 0x37a   :  { %3878 = vmatpush2.msra.mxu1 %v7041_v24  ;;  %3936 = vmatprep.subr.mxu0 %v3799_v3  ;;  %v3679_v3 = vld [vmem:[#allocation12 + $0xd8] sm:$0xff] }
 0x37b   :  { %3879 = vmatprep.subr.mxu1 %v7044_v22  ;;  %3937 = vmatpush1.msra.mxu0 %v3798_v9  ;;  %v2375_v21 = vpop.f32.mrf.mxu0 }
 0x37c   :  { %3880 = vmatpush2.msra.mxu1 %v7047_v35  ;;  %3970 = vmatprep.mubr.f32.mxu0 %v7869_v60 }
 0x37d   :  { %3881 = vmatprep.subr.mxu1 %v7050_v43  ;;  %3986 = vmatprep.subr.mxu0 %v3683_v6  ;;  %v2525_v24 = vpop.f32.mrf.mxu0  ;;  %v3726_v6 = vld [vmem:[#allocation12 + $0x250] sm:$0xf] }
 0x37e   :  { %3882 = vmatpush2.msra.mxu1 %v7053_v27  ;;  %v2526_v27 = vadd.f32 %v2525_v24, %v2367_v8  ;;  %v3678_v8 = vld [vmem:[#allocation12 + $0xd0] sm:$0xff] }
 0x37f   :  { %3883 = vmatprep.subr.mxu1 %v7056_v38  ;;  %v2527_v22 = vpop.f32.mrf.mxu0  ;;  %v2603_v38 = vadd.f32 %v7285_v33, %v7109_v51  ;;  %v3674_v24 = vld [vmem:[#allocation12 + $0xb0] sm:$0xff] }
 0x380   :  { %3884 = vmatpush2.msra.mxu1 %v7059_v41 }
 0x381   :  { %3885 = vmatprep.subr.mxu1 %v7062_v44  ;;  %v2531_v35 = vpop.f32.mrf.mxu0 }
 0x382   :  { %3886 = vmatpush2.msra.mxu1 %v7065_v46  ;;  %v2528_v46 = vadd.f32 %v2527_v22, %v2369_v11  ;;  %v3673_v22 = vld [vmem:[#allocation12 + $0xa8] sm:$0xff] }
 0x383   :  { %3887 = vmatprep.subr.mxu1 %v7068_v48  ;;  %v2533_v43 = vpop.f32.mrf.mxu0 }
 0x384   :  { %3888 = vmatpush2.msra.mxu1 %v7071_v50  ;;  %v2534_v7 = vadd.f32 %v2533_v43, %v2375_v21  ;;  %v3675_v21 = vld [vmem:[#allocation12 + $0xb8] sm:$0xff]  ;;  %v7944_v43 = vld [vmem:[#allocation44_spill] sm:$0xff] }
 0x385   :  { %3889 = vmatprep.subr.mxu1 %v7074_v57 }
 0x386   :  { %3890 = vmatpush2.msra.mxu1 %v7077_v61 }
 0x387   :  { %3891 = vmatprep.subr.mxu1 %v7080_v34  ;;  %v2608_v34 = vadd.f32 %v7287_v0, %v7130_v45 }
 0x388   :  { %3892 = vmatpush2.msra.mxu1 %v7083_v53 }
 0x389   :  { %3893 = vmatprep.subr.mxu1 %v7086_v47 }
 0x38a   :  { %3894 = vmatpush2.msra.mxu1 %v7089_v2 }
 0x38b   :  { %3895 = vmatprep.subr.mxu1 %v7092_v12  ;;  %v2532_v12 = vadd.f32 %v2531_v35, %v2373_v16  ;;  %v3676_v16 = vld [vmem:[#allocation12 + $0xc0] sm:$0xff] }
 0x38c   :  { %3896 = vmatpush2.msra.mxu1 %v7095_v18  ;;  %v3672_v35 = vld [vmem:[#allocation12 + $0xa0] sm:$0xff] }
 0x38d   :  { %3897 = vmatprep.subr.mxu1 %v7098_v30 }
 0x38e   :  { %3898 = vmatpush2.msra.mxu1 %v7101_v36 }
 0x38f   :  { %5733 = vmatprep.subr.msk.mxu1 %vm3080_vm5, %v3727_v14  ;;  %v3677_v14 = vld [vmem:[#allocation12 + $0xc8] sm:$0xff] }
 0x3a2   :  { %v2787_v41 = vpop.f32.mrf.mxu0  ;;  %v2864_v44 = vpop.f32.mrf.mxu1 }
 0x3a3   :  { %v2873_v48 = vadd.f32 %v2787_v41, %v2526_v27  ;;  %v2875_v50 = vadd.f32 %v2864_v44, %v2603_v38  ;;  %v3671_v27 = vld [vmem:[#allocation12 + $0x98] sm:$0xff]  ;;  %v7945_v38 = vld [vmem:[#allocation33_spill] sm:$0xff]  ;;  %v3670_v41 = vld [vmem:[#allocation12 + $0x90] sm:$0xff] }
 0x3a4   :  { %v2789_v57 = vpop.f32.mrf.mxu0  ;;  %v2866_v61 = vpop.f32.mrf.mxu1 }
 0x3a5   :  { %v7336_v53 = vadd.f32 %v2873_v48, %v6950_v19  ;;  %v2881_v47 = vadd.f32 %v2875_v50, %v6955_v25  ;;  %v2874_v2 = vadd.f32 %v2789_v57, %v2528_v46  ;;  %v3669_v46 = vld [vmem:[#allocation12 + $0x88] sm:$0xff]  ;;  %v3668_v50 = vld [vmem:[#allocation12 + $0x80] sm:$0xff] }
 0x3a6   :  { %v2869_v18 = vpop.f32.mrf.mxu1  ;;  %v7949_v61 = vld [vmem:[#allocation36_spill] sm:$0xff] }
 0x3a7   :  { %v2885_v30 = vmax.f32 %v7336_v53, 0.0  ;;  %v2887_v36 = vmax.f32 %v2881_v47, 0.0  ;;  %v2880_v51 = vadd.f32 %v2874_v2, %v6958_v31  ;;  %v2793_v33 = vpop.f32.mrf.mxu0  ;;  %v2878_v49 = vadd.f32 %v2869_v18, %v2608_v34  ;;  %v3667_v34 = vld [vmem:[#allocation12 + $0x78] sm:$0xff]  ;;  %v7950_v47 = vld [vmem:[#allocation37_spill] sm:$0xff]  ;;  %v3666_v18 = vld [vmem:[#allocation12 + $0x70] sm:$0xff] }
 0x3a8   :  { %v2876_v52 = vadd.f32 %v2793_v33, %v2532_v12  ;;  %v2871_v26 = vpop.f32.mrf.mxu1  ;;  %v3665_v33 = vld [vmem:[#allocation12 + $0x68] sm:$0xff] }
 0x3a9   :  { %2892 = vst [vmem:[#allocation3 + $0x30] sm:$0xff] %v2885_v30  ;;  %2894 = vst.msk [vmem:[#allocation3 + $0x40] sm:$0xff] %vm2091_vm6, %v2887_v36  ;;  %v2886_v45 = vmax.f32 %v2880_v51, 0.0  ;;  %v2884_v4 = vadd.f32 %v2878_v49, %v6955_v25  ;;  %v2795_v0 = vpop.f32.mrf.mxu0  ;;  %v7951_v36 = vld [vmem:[#allocation38_spill] sm:$0xff]  ;;  %v7952_v49 = vld [vmem:[#allocation39_spill] sm:$0xff] }
 0x3aa   :  { %v2882_v13 = vadd.f32 %v2876_v52, %v6950_v19  ;;  %v2877_v15 = vadd.f32 %v2795_v0, %v2534_v7  ;;  %v3664_v7 = vld [vmem:[#allocation12 + $0x60] sm:$0xff]  ;;  %v3663_v26 = vld [vmem:[#allocation12 + $0x58] sm:$0xff]  ;;  %v7955_v0 = vld [vmem:[#allocation42_spill] sm:$0xff] }
 0x3ab   :  { %2893 = vst [vmem:[#allocation3 + $0x38] sm:$0xff] %v2886_v45  ;;  %v2890_v17 = vmax.f32 %v2884_v4, 0.0  ;;  %v7953_v52 = vld [vmem:[#allocation40_spill] sm:$0xff]  ;;  %v3662_v4 = vld [vmem:[#allocation12 + $0x50] sm:$0xff]  ;;  %v4203_v53 = vld [vmem:[#allocation12 + $0x6e8] sm:$0xff] }
 0x3ac   :  { %v2888_v40 = vmax.f32 %v2882_v13, 0.0  ;;  %v2883_v28 = vadd.f32 %v2877_v15, %v6958_v31  ;;  %v3661_v13 = vld [vmem:[#allocation12 + $0x48] sm:$0xff]  ;;  %v7956_v15 = vld [vmem:[#allocation46_spill] sm:$0xff] }
 0x3ad   :  { %2897 = vst.msk [vmem:[#allocation3 + $0x58] sm:$0x3] %vm2095_vm7, %v2890_v17  ;;  %v3660_v17 = vld [vmem:[#allocation12 + $0x40] sm:$0xff] }
 0x3ae   :  { %2895 = vst [vmem:[#allocation3 + $0x48] sm:$0x3] %v2888_v40  ;;  %v2889_v10 = vmax.f32 %v2883_v28, 0.0  ;;  %v7957_v40 = vld [vmem:[#allocation47_spill] sm:$0xff] }
 0x3af   :  { %v3659_v28 = vld [vmem:[#allocation12 + $0x38] sm:$0xff] }
 0x3b0   :  { %2896 = vst [vmem:[#allocation3 + $0x50] sm:$0x3] %v2889_v10  ;;  %v3730_v29 = vld [vmem:[#allocation3 + $0x40] sm:$0xfe]  ;;  %v3728_v59 = vld [vmem:[#allocation3 + $0x30] sm:$0xfe] }
 0x3b1   :  { %v3822_v42 = vrot.slane %v3730_v29, 1  ;;  %v3816_v1 = vrot.slane %v3728_v59, 1  ;;  %v3651_v2 = vld [vmem:[#allocation3 + $0x40] sm:$0xff]  ;;  %v7958_v10 = vld [vmem:[#allocation48_spill] sm:$0xff] }
 0x3b2   :  { %v3729_v37 = vld [vmem:[#allocation3 + $0x38] sm:$0xfe]  ;;  %v3658_v29 = vld [vmem:[#allocation12 + $0x30] sm:$0xff] }
 0x3b3   :  { %v3819_v31 = vrot.slane %v3729_v37, 1  ;;  %v4129_v48 = vld [vmem:[#allocation3 + $0x38] sm:$0xfc] }
 0x3b4   :  { %v3733_v5 = vld [vmem:[#allocation3 + $0x58] sm:$0x1]  ;;  %v4219_v12 = vrot.slane %v4129_v48, 2  ;;  %v7976_v48 = vld [vmem:[#allocation66_spill] sm:$0xff] }
 0x3b5   :  { %v3823_v20 = vrot.slane %v3733_v5, 1  ;;  %v3731_v25 = vld [vmem:[#allocation3 + $0x48] sm:$0x1]  ;;  %v7959_v5 = vld [vmem:[#allocation49_spill] sm:$0xff]  ;;  %v3656_v37 = vld [vmem:[#allocation12 + $0x20] sm:$0xff] }
 0x3b6   :  { %v3817_v55 = vrot.slane %v3731_v25, 1  ;;  %v7961_v25 = vld [vmem:[#allocation51_spill] sm:$0xff]  ;;  %v7962_v59 = vld [vmem:[#allocation52_spill] sm:$0xff] }
 0x3b7   :  { %v3824_v19 = vsel %vm1468_vm3, %v3822_v42, %v3823_v20  ;;  %v3732_v63 = vld [vmem:[#allocation3 + $0x50] sm:$0x1]  ;;  %v3657_v42 = vld [vmem:[#allocation12 + $0x28] sm:$0xff]  ;;  %v7960_v20 = vld [vmem:[#allocation50_spill] sm:$0xff] }
 0x3b8   :  { %5732 = vmatmul.mubr.msk.f32.vlgmr.msra.gmra.mxu0 %vm2091_vm6, %v3824_v19  ;;  %v3820_v56 = vrot.slane %v3732_v63, 1  ;;  %v3818_v11 = vsel %vm1468_vm3, %v3816_v1, %v3817_v55  ;;  %v4132_v44 = vld [vmem:[#allocation3 + $0x50] sm:$0x3]  ;;  %v3654_v19 = vld [vmem:[#allocation12 + $0x10] sm:$0xff]  ;;  %v3653_v63 = vld [vmem:[#allocation12 + $0x8] sm:$0xff] }
 0x3b9   :  { %3987 = vmatpush1.msra.mxu0 %v3682_v39  ;;  %4050 = vmatprep.mubr.f32.mxu0 %v2886_v45  ;;  %v4220_v57 = vrot.slane %v4132_v44, 2  ;;  %v7954_v45 = vld [vmem:[#allocation41_spill] sm:$0xff]  ;;  %v3655_v39 = vld [vmem:[#allocation12 + $0x18] sm:$0xff]  ;;  %v7964_v55 = vld [vmem:[#allocation54_spill] sm:$0xff] }
 0x3ba   :  { %3988 = vmatprep.subr.mxu0 %v3681_v62  ;;  %v3821_v9 = vsel %vm1468_vm3, %v3819_v31, %v3820_v56  ;;  %v7963_v62 = vld [vmem:[#allocation53_spill] sm:$0xff]  ;;  %v3652_v31 = vld [vmem:[#allocation12] sm:$0xff]  ;;  %v7965_v56 = vld [vmem:[#allocation55_spill] sm:$0xff] }
 0x3bb   :  { %3899 = vmatprep.mubr.f32.mxu1 %v3821_v9  ;;  %3989 = vmatpush1.msra.mxu0 %v3680_v32  ;;  %v4221_v51 = vsel %vm1890_vm4, %v4219_v12, %v4220_v57  ;;  %v3715_v32 = vld [vmem:[#allocation12 + $0x1f8] sm:$0xff]  ;;  %v7966_v1 = vld [vmem:[#allocation56_spill] sm:$0xff]  ;;  %v7967_v9 = vld [vmem:[#allocation57_spill] sm:$0xff] }
 0x3bc   :  { %3900 = vmatmul.mubr.f32.vlgmr.msra.gmra.mxu1 %v3818_v11  ;;  %3990 = vmatprep.subr.mxu0 %v3679_v3  ;;  %v3714_v3 = vld [vmem:[#allocation12 + $0x1f0] sm:$0xff]  ;;  %v3712_v11 = vld [vmem:[#allocation12 + $0x1e0] sm:$0xff]  ;;  %v3703_v57 = vld [vmem:[#allocation12 + $0x198] sm:$0xff] }
 0x3bd   :  { %5734 = vmatpush1.msk.msra.mxu1 %vm3080_vm5, %v3726_v6  ;;  %3991 = vmatpush1.msra.mxu0 %v3678_v8  ;;  %v3713_v6 = vld [vmem:[#allocation12 + $0x1e8] sm:$0xff]  ;;  %v7968_v8 = vld [vmem:[#allocation58_spill] sm:$0xff]  ;;  %v7974_v44 = vld [vmem:[#allocation64_spill] sm:$0xff] }
 0x3be   :  { %4079 = vmatprep.subr.mxu1 %v7107_v58  ;;  %3992 = vmatprep.subr.mxu0 %v3677_v14  ;;  %v7946_v58 = vld [vmem:[#allocation34_spill] sm:$0xff]  ;;  %v7969_v14 = vld [vmem:[#allocation59_spill] sm:$0xff] }
 0x3bf   :  { %4080 = vmatpush1.msra.mxu1 %v7112_v54  ;;  %3993 = vmatpush1.msra.mxu0 %v3676_v16  ;;  %v7947_v54 = vld [vmem:[#allocation35_spill] sm:$0xff]  ;;  %v7980_v12 = vld [vmem:[#allocation70_spill] sm:$0xff] }
 0x3c0   :  { %4081 = vmatprep.subr.mxu1 %v7115_v23  ;;  %3994 = vmatprep.subr.mxu0 %v3675_v21  ;;  %v7948_v23 = vld [vmem:[#allocation45_spill] sm:$0xff]  ;;  %v3711_v16 = vld [vmem:[#allocation12 + $0x1d8] sm:$0xff]  ;;  %v7970_v21 = vld [vmem:[#allocation60_spill] sm:$0xff] }
 0x3c1   :  { %4082 = vmatpush1.msra.mxu1 %v7944_v43  ;;  %3995 = vmatpush1.msra.mxu0 %v3674_v24  ;;  %v3710_v24 = vld [vmem:[#allocation12 + $0x1d0] sm:$0xff] }
 0x3c2   :  { %4083 = vmatprep.subr.mxu1 %v7945_v38  ;;  %3996 = vmatprep.subr.mxu0 %v3673_v22  ;;  %v7971_v22 = vld [vmem:[#allocation61_spill] sm:$0xff]  ;;  %v7972_v43 = vld [vmem:[#allocation62_spill] sm:$0xff]  ;;  %v7973_v38 = vld [vmem:[#allocation63_spill] sm:$0xff] }
 0x3c3   :  { %4084 = vmatpush1.msra.mxu1 %v7946_v58  ;;  %3997 = vmatpush1.msra.mxu0 %v3672_v35  ;;  %v3709_v35 = vld [vmem:[#allocation12 + $0x1c8] sm:$0xff]  ;;  %v3706_v58 = vld [vmem:[#allocation12 + $0x1b0] sm:$0xff] }
 0x3c4   :  { %4085 = vmatprep.subr.mxu1 %v7947_v54  ;;  %3998 = vmatprep.subr.mxu0 %v3671_v27  ;;  %v3708_v27 = vld [vmem:[#allocation12 + $0x1c0] sm:$0xff]  ;;  %v3705_v54 = vld [vmem:[#allocation12 + $0x1a8] sm:$0xff] }
 0x3c5   :  { %4086 = vmatpush1.msra.mxu1 %v7948_v23  ;;  %3999 = vmatpush1.msra.mxu0 %v3670_v41  ;;  %v3707_v41 = vld [vmem:[#allocation12 + $0x1b8] sm:$0xff]  ;;  %v3704_v23 = vld [vmem:[#allocation12 + $0x1a0] sm:$0xff] }
 0x3c6   :  { %4087 = vmatprep.subr.mxu1 %v7949_v61  ;;  %4000 = vmatprep.subr.mxu0 %v3669_v46  ;;  %v7975_v46 = vld [vmem:[#allocation65_spill] sm:$0xff]  ;;  %v7978_v61 = vld [vmem:[#allocation68_spill] sm:$0xff] }
 0x3c7   :  { %4088 = vmatpush1.msra.mxu1 %v7950_v47  ;;  %4121 = vmatprep.mubr.f32.mxu1 %v7869_v60  ;;  %v7979_v47 = vld [vmem:[#allocation69_spill] sm:$0xff] }
 0x3c8   :  { %4001 = vmatpush1.msra.mxu0 %v3668_v50  ;;  %5735 = vmatmul.mubr.msk.f32.vlgmr.msra.gmra.mxu1 %vm2091_vm6, %v3651_v2  ;;  %v7977_v50 = vld [vmem:[#allocation67_spill] sm:$0xff]  ;;  %v3701_v2 = vld [vmem:[#allocation12 + $0x188] sm:$0xff] }
 0x3c9   :  { %4235 = vmatprep.subr.mxu1 %v7951_v36  ;;  %4002 = vmatprep.subr.mxu0 %v3667_v34  ;;  %v3702_v34 = vld [vmem:[#allocation12 + $0x190] sm:$0xff]  ;;  %v7981_v36 = vld [vmem:[#allocation71_spill] sm:$0xff] }
 0x3ca   :  { %4236 = vmatpush1.msra.mxu1 %v7952_v49  ;;  %4299 = vmatprep.mubr.f32.mxu1 %v4221_v51  ;;  %v3699_v51 = vld [vmem:[#allocation12 + $0x178] sm:$0xff]  ;;  %v3698_v49 = vld [vmem:[#allocation12 + $0x170] sm:$0xff] }
 0x3cb   :  { %4003 = vmatpush1.msra.mxu0 %v3666_v18  ;;  %4237 = vmatprep.subr.mxu1 %v7953_v52  ;;  %v3700_v18 = vld [vmem:[#allocation12 + $0x180] sm:$0xff]  ;;  %v3697_v52 = vld [vmem:[#allocation12 + $0x168] sm:$0xff] }
 0x3cc   :  { %4004 = vmatprep.subr.mxu0 %v3665_v33  ;;  %4238 = vmatpush1.msra.mxu1 %v7954_v45  ;;  %v7982_v33 = vld [vmem:[#allocation72_spill] sm:$0xff] }
 0x3cd   :  { %4005 = vmatpush1.msra.mxu0 %v3664_v7  ;;  %4239 = vmatprep.subr.mxu1 %v7955_v0  ;;  %v7983_v7 = vld [vmem:[#allocation73_spill] sm:$0xff]  ;;  %v3696_v45 = vld [vmem:[#allocation12 + $0x160] sm:$0xff]  ;;  %v3695_v0 = vld [vmem:[#allocation12 + $0x158] sm:$0xff] }
 0x3ce   :  { %4006 = vmatprep.subr.mxu0 %v3663_v26  ;;  %4240 = vmatpush1.msra.mxu1 %v7956_v15  ;;  %v7984_v26 = vld [vmem:[#allocation74_spill] sm:$0xff] }
 0x3cf   :  { %4007 = vmatpush1.msra.mxu0 %v3662_v4  ;;  %4241 = vmatprep.subr.mxu1 %v7957_v40  ;;  %v7985_v4 = vld [vmem:[#allocation75_spill] sm:$0xff]  ;;  %v3694_v15 = vld [vmem:[#allocation12 + $0x150] sm:$0xff]  ;;  %v3693_v40 = vld [vmem:[#allocation12 + $0x148] sm:$0xff] }
 0x3d0   :  { %4008 = vmatprep.subr.mxu0 %v3661_v13  ;;  %4242 = vmatpush1.msra.mxu1 %v7958_v10  ;;  %v7986_v13 = vld [vmem:[#allocation76_spill] sm:$0xff] }
 0x3d1   :  { %4009 = vmatpush1.msra.mxu0 %v3660_v17  ;;  %4243 = vmatprep.subr.mxu1 %v7959_v5  ;;  %v7987_v17 = vld [vmem:[#allocation77_spill] sm:$0xff]  ;;  %v3692_v10 = vld [vmem:[#allocation12 + $0x140] sm:$0xff]  ;;  %v3691_v5 = vld [vmem:[#allocation12 + $0x138] sm:$0xff] }
 0x3d2   :  { %4010 = vmatprep.subr.mxu0 %v3659_v28  ;;  %4244 = vmatpush1.msra.mxu1 %v7960_v20  ;;  %v7988_v28 = vld [vmem:[#allocation78_spill] sm:$0xff] }
 0x3d3   :  { %4011 = vmatpush1.msra.mxu0 %v3658_v29  ;;  %4245 = vmatprep.subr.mxu1 %v7961_v25  ;;  %v7989_v29 = vld [vmem:[#allocation79_spill] sm:$0xff]  ;;  %v3690_v20 = vld [vmem:[#allocation12 + $0x130] sm:$0xff]  ;;  %v3689_v25 = vld [vmem:[#allocation12 + $0x128] sm:$0xff] }
 0x3d4   :  { %4012 = vmatprep.subr.mxu0 %v3657_v42  ;;  %4246 = vmatpush1.msra.mxu1 %v7962_v59  ;;  %v7990_v42 = vld [vmem:[#allocation80_spill] sm:$0xff] }
 0x3d5   :  { %4013 = vmatpush1.msra.mxu0 %v3656_v37  ;;  %4247 = vmatprep.subr.mxu1 %v7963_v62  ;;  %v7991_v37 = vld [vmem:[#allocation81_spill] sm:$0xff]  ;;  %v3688_v59 = vld [vmem:[#allocation12 + $0x120] sm:$0xff]  ;;  %v7993_v62 = vld [vmem:[#allocation83_spill] sm:$0xff] }
 0x3d6   :  { %4014 = vmatprep.subr.mxu0 %v3655_v39  ;;  %4248 = vmatpush1.msra.mxu1 %v7964_v55  ;;  %v7992_v39 = vld [vmem:[#allocation82_spill] sm:$0xff] }
 0x3d7   :  { %4015 = vmatpush1.msra.mxu0 %v3654_v19  ;;  %4249 = vmatprep.subr.mxu1 %v7965_v56  ;;  %v4185_v19 = vld [vmem:[#allocation12 + $0x658] sm:$0xff]  ;;  %v4184_v55 = vld [vmem:[#allocation12 + $0x650] sm:$0xff] }
 0x3d8   :  { %4016 = vmatprep.subr.mxu0 %v3653_v63  ;;  %4250 = vmatpush1.msra.mxu1 %v7966_v1  ;;  %v3687_v63 = vld [vmem:[#allocation12 + $0x118] sm:$0xff]  ;;  %v3686_v56 = vld [vmem:[#allocation12 + $0x110] sm:$0xff]  ;;  %v3685_v1 = vld [vmem:[#allocation12 + $0x108] sm:$0xff] }
 0x3d9   :  { %4017 = vmatpush1.msra.mxu0 %v3652_v31  ;;  %4251 = vmatprep.subr.mxu1 %v7967_v9  ;;  %v7994_v31 = vld [vmem:[#allocation84_spill] sm:$0xff] }
 0x3da   :  { %4018 = vmatprep.subr.mxu0 %v3715_v32  ;;  %4252 = vmatpush1.msra.mxu1 %v7968_v8  ;;  %v4183_v32 = vld [vmem:[#allocation12 + $0x648] sm:$0xff]  ;;  %v3684_v9 = vld [vmem:[#allocation12 + $0x100] sm:$0xff]  ;;  %v4180_v8 = vld [vmem:[#allocation12 + $0x630] sm:$0xff] }
 0x3db   :  { %4019 = vmatpush2.msra.mxu0 %v3714_v3  ;;  %4253 = vmatprep.subr.mxu1 %v7969_v14  ;;  %v4182_v3 = vld [vmem:[#allocation12 + $0x640] sm:$0xff]  ;;  %v4179_v14 = vld [vmem:[#allocation12 + $0x628] sm:$0xff] }
 0x3dc   :  { %4020 = vmatprep.subr.mxu0 %v3713_v6  ;;  %4254 = vmatpush1.msra.mxu1 %v7970_v21  ;;  %v4181_v6 = vld [vmem:[#allocation12 + $0x638] sm:$0xff]  ;;  %v4178_v21 = vld [vmem:[#allocation12 + $0x620] sm:$0xff] }
 0x3dd   :  { %4021 = vmatpush2.msra.mxu0 %v3712_v11  ;;  %4255 = vmatprep.subr.mxu1 %v7971_v22  ;;  %v4209_v11 = vld [vmem:[#allocation12 + $0x718] sm:$0xf] }
 0x3de   :  { %4022 = vmatprep.subr.mxu0 %v3711_v16  ;;  %4256 = vmatpush1.msra.mxu1 %v7972_v43  ;;  %v4208_v16 = vld [vmem:[#allocation12 + $0x710] sm:$0xf]  ;;  %v4177_v22 = vld [vmem:[#allocation12 + $0x618] sm:$0xff] }
 0x3df   :  { %4023 = vmatpush2.msra.mxu0 %v3710_v24  ;;  %4257 = vmatprep.subr.mxu1 %v7973_v38  ;;  %v4207_v24 = vld [vmem:[#allocation12 + $0x708] sm:$0xff]  ;;  %v4176_v43 = vld [vmem:[#allocation12 + $0x610] sm:$0xff] }
 0x3e0   :  { %4024 = vmatprep.subr.mxu0 %v3709_v35  ;;  %4258 = vmatpush1.msra.mxu1 %v7974_v44  ;;  %v4206_v35 = vld [vmem:[#allocation12 + $0x700] sm:$0xff]  ;;  %v4175_v38 = vld [vmem:[#allocation12 + $0x608] sm:$0xff] }
 0x3e1   :  { %4025 = vmatpush2.msra.mxu0 %v3708_v27  ;;  %4259 = vmatprep.subr.mxu1 %v7975_v46  ;;  %v4205_v27 = vld [vmem:[#allocation12 + $0x6f8] sm:$0xff]  ;;  %v4174_v44 = vld [vmem:[#allocation12 + $0x600] sm:$0xff]  ;;  %v4172_v46 = vld [vmem:[#allocation12 + $0x5f0] sm:$0xff] }
 0x3e2   :  { %4026 = vmatprep.subr.mxu0 %v3707_v41  ;;  %4260 = vmatpush1.msra.mxu1 %v7976_v48  ;;  %v4204_v41 = vld [vmem:[#allocation12 + $0x6f0] sm:$0xff]  ;;  %v4201_v48 = vld [vmem:[#allocation12 + $0x6d8] sm:$0xff] }
 0x3e3   :  { %4027 = vmatpush2.msra.mxu0 %v3706_v58  ;;  %4261 = vmatprep.subr.mxu1 %v7977_v50  ;;  %v4202_v58 = vld [vmem:[#allocation12 + $0x6e0] sm:$0xff]  ;;  %v4200_v50 = vld [vmem:[#allocation12 + $0x6d0] sm:$0xff] }
 0x3e4   :  { %4028 = vmatprep.subr.mxu0 %v3705_v54  ;;  %4262 = vmatpush1.msra.mxu1 %v7978_v61  ;;  %v4133_v54 = vld [vmem:[#allocation3 + $0x58] sm:$0x3]  ;;  %v4130_v61 = vld [vmem:[#allocation3 + $0x40] sm:$0xfc] }
 0x3e5   :  { %4029 = vmatpush2.msra.mxu0 %v3704_v23  ;;  %4263 = vmatprep.subr.mxu1 %v7979_v47  ;;  %v4171_v23 = vld [vmem:[#allocation12 + $0x5e8] sm:$0xff]  ;;  %v4169_v47 = vld [vmem:[#allocation12 + $0x5d8] sm:$0xff] }
 0x3e6   :  { %4030 = vmatprep.subr.mxu0 %v3703_v57  ;;  %4264 = vmatpush1.msra.mxu1 %v7980_v12  ;;  %v4170_v57 = vld [vmem:[#allocation12 + $0x5e0] sm:$0xff]  ;;  %v4131_v12 = vld [vmem:[#allocation3 + $0x48] sm:$0x3] }
 0x3e7   :  { %4031 = vmatpush2.msra.mxu0 %v3702_v34  ;;  %4265 = vmatprep.subr.mxu1 %v7981_v36  ;;  %v4199_v34 = vld [vmem:[#allocation12 + $0x6c8] sm:$0xff]  ;;  %v4168_v36 = vld [vmem:[#allocation12 + $0x5d0] sm:$0xff] }
 0x3e8   :  { %4032 = vmatprep.subr.mxu0 %v3701_v2  ;;  %4266 = vmatpush1.msra.mxu1 %v7982_v33  ;;  %v4223_v2 = vrot.slane %v4133_v54, 2  ;;  %v4128_v33 = vld [vmem:[#allocation3 + $0x30] sm:$0xfc] }
 0x3e9   :  { %4033 = vmatpush2.msra.mxu0 %v3700_v18  ;;  %4267 = vmatprep.subr.mxu1 %v7983_v7  ;;  %v4198_v18 = vld [vmem:[#allocation12 + $0x6c0] sm:$0xff]  ;;  %v4217_v7 = vrot.slane %v4131_v12, 2  ;;  %v4394_v12 = vld [vmem:[#allocation15 + $0x28] sm:$0xff] }
 0x3ea   :  { %4034 = vmatprep.subr.mxu0 %v3699_v51  ;;  %4268 = vmatpush2.msra.mxu1 %v7984_v26  ;;  %v4222_v51 = vrot.slane %v4130_v61, 2  ;;  %v4166_v26 = vld [vmem:[#allocation12 + $0x5c0] sm:$0xff] }
 0x3eb   :  { %4035 = vmatpush2.msra.mxu0 %v3698_v49  ;;  %4269 = vmatprep.subr.mxu1 %v7985_v4  ;;  %v4167_v49 = vld [vmem:[#allocation12 + $0x5c8] sm:$0xff] }
 0x3ec   :  { %4036 = vmatprep.subr.mxu0 %v3697_v52  ;;  %4270 = vmatpush2.msra.mxu1 %v7986_v13  ;;  %v4224_v52 = vsel %vm1890_vm4, %v4222_v51, %v4223_v2  ;;  %v4404_v13 = vld [vmem:[#allocation15 + $0x78] sm:$0xff]  ;;  %v4427_v51 = vld [vmem:[#allocation15 + $0x108] sm:$0xff] }
 0x3ed   :  { %4037 = vmatpush2.msra.mxu0 %v3696_v45  ;;  %4271 = vmatprep.subr.mxu1 %v7987_v17  ;;  %v4216_v45 = vrot.slane %v4128_v33, 2  ;;  %v4403_v17 = vld [vmem:[#allocation15 + $0x70] sm:$0xff]  ;;  %v4429_v2 = vld [vmem:[#allocation15 + $0x118] sm:$0xff] }
 0x3ee   :  { %4038 = vmatprep.subr.mxu0 %v3695_v0  ;;  %4272 = vmatpush2.msra.mxu1 %v7988_v28  ;;  %v4439_v0 = vld [vmem:[#allocation15 + $0x168] sm:$0xff]  ;;  %v4392_v33 = vld [vmem:[#allocation15 + $0x18] sm:$0xff] }
 0x3ef   :  { %4039 = vmatpush2.msra.mxu0 %v3694_v15  ;;  %4273 = vmatprep.subr.mxu1 %v7989_v29  ;;  %v4218_v4 = vsel %vm1890_vm4, %v4216_v45, %v4217_v7  ;;  %v4438_v15 = vld [vmem:[#allocation15 + $0x160] sm:$0xff]  ;;  %v4402_v28 = vld [vmem:[#allocation15 + $0x68] sm:$0xff]  ;;  %v4391_v7 = vld [vmem:[#allocation15 + $0x10] sm:$0xff] }
 0x3f0   :  { %4040 = vmatprep.subr.mxu0 %v3693_v40  ;;  %4274 = vmatpush2.msra.mxu1 %v7990_v42  ;;  %v4437_v40 = vld [vmem:[#allocation15 + $0x158] sm:$0xff]  ;;  %v4401_v29 = vld [vmem:[#allocation15 + $0x60] sm:$0xff]  ;;  %v4424_v45 = vld [vmem:[#allocation15 + $0xf0] sm:$0xff] }
 0x3f1   :  { %4041 = vmatpush2.msra.mxu0 %v3692_v10  ;;  %4275 = vmatprep.subr.mxu1 %v7991_v37  ;;  %v4436_v10 = vld [vmem:[#allocation15 + $0x150] sm:$0xff]  ;;  %v4400_v42 = vld [vmem:[#allocation15 + $0x58] sm:$0xff] }
 0x3f2   :  { %4042 = vmatprep.subr.mxu0 %v3691_v5  ;;  %4276 = vmatpush2.msra.mxu1 %v7992_v39  ;;  %v4435_v5 = vld [vmem:[#allocation15 + $0x148] sm:$0xff]  ;;  %v4399_v37 = vld [vmem:[#allocation15 + $0x50] sm:$0xff] }
 0x3f3   :  { %4043 = vmatpush2.msra.mxu0 %v3690_v20  ;;  %4277 = vmatprep.subr.mxu1 %v7993_v62  ;;  %v4434_v20 = vld [vmem:[#allocation15 + $0x140] sm:$0xff]  ;;  %v4398_v39 = vld [vmem:[#allocation15 + $0x48] sm:$0xff] }
 0x3f4   :  { %4044 = vmatprep.subr.mxu0 %v3689_v25  ;;  %4278 = vmatpush2.msra.mxu1 %v7994_v31  ;;  %v4433_v25 = vld [vmem:[#allocation15 + $0x138] sm:$0xff]  ;;  %v4431_v62 = vld [vmem:[#allocation15 + $0x128] sm:$0xff]  ;;  %v3153_v31 = vpop.f32.mrf.mxu0 }
 0x3f5   :  { %4045 = vmatpush2.msra.mxu0 %v3688_v59  ;;  %4279 = vmatprep.subr.mxu1 %v4185_v19  ;;  %v4432_v59 = vld [vmem:[#allocation15 + $0x130] sm:$0xff]  ;;  %v4397_v19 = vld [vmem:[#allocation15 + $0x40] sm:$0xff] }
 0x3f6   :  { %4046 = vmatprep.subr.mxu0 %v3687_v63  ;;  %4280 = vmatpush2.msra.mxu1 %v4184_v55  ;;  %v4396_v63 = vld [vmem:[#allocation15 + $0x38] sm:$0xff]  ;;  %v3224_v55 = vpop.f32.mrf.mxu1 }
 0x3f7   :  { %4047 = vmatpush2.msra.mxu0 %v3686_v56  ;;  %4281 = vmatprep.subr.mxu1 %v4183_v32  ;;  %v3155_v32 = vpop.f32.mrf.mxu0 }
 0x3f8   :  { %4048 = vmatprep.subr.mxu0 %v3685_v1  ;;  %4282 = vmatpush2.msra.mxu1 %v4182_v3  ;;  %v3226_v56 = vpop.f32.mrf.mxu1 }
 0x3f9   :  { %4049 = vmatpush2.msra.mxu0 %v3684_v9  ;;  %4283 = vmatprep.subr.mxu1 %v4181_v6  ;;  %v3375_v3 = vpop.f32.mrf.mxu0  ;;  %v3225_v9 = vadd.f32 %v3224_v55, %v3153_v31  ;;  %v4444_v55 = vld [vmem:[#allocation15 + $0x190] sm:$0xff]  ;;  %v4409_v31 = vld [vmem:[#allocation15 + $0xa0] sm:$0xff] }
 0x3fa   :  { %4051 = vmatmul.mubr.f32.vlgmr.msra.gmra.mxu0 %v2885_v30  ;;  %4284 = vmatpush2.msra.mxu1 %v4180_v8  ;;  %v4173_v30 = vld [vmem:[#allocation12 + $0x5f8] sm:$0xff]  ;;  %v3227_v8 = vadd.f32 %v3226_v56, %v3155_v32  ;;  %v4443_v56 = vld [vmem:[#allocation15 + $0x188] sm:$0xff] }
 0x3fb   :  { %5736 = vmatprep.subr.msk.mxu0 %vm3080_vm5, %v4209_v11  ;;  %4285 = vmatprep.subr.mxu1 %v4179_v14  ;;  %v3377_v14 = vpop.f32.mrf.mxu0  ;;  %v4408_v32 = vld [vmem:[#allocation15 + $0x98] sm:$0xff] }
 0x3fc   :  { %5737 = vmatpush1.msk.msra.mxu0 %vm3080_vm5, %v4208_v16  ;;  %4286 = vmatpush2.msra.mxu1 %v4178_v21  ;;  %v2898_v21 = vld [vmem:[#allocation13] sm:$0x3] }
 0x3fd   :  { %4328 = vmatprep.subr.mxu0 %v4207_v24  ;;  %4287 = vmatprep.subr.mxu1 %v4177_v22 }
 0x3fe   :  { %4329 = vmatpush1.msra.mxu0 %v4206_v35  ;;  %4288 = vmatpush2.msra.mxu1 %v4176_v43 }
 0x3ff   :  { %4330 = vmatprep.subr.mxu0 %v4205_v27  ;;  %4289 = vmatprep.subr.mxu1 %v4175_v38  ;;  %v7995_v27 = vld [vmem:[#allocation43_spill] sm:$0xff] }
 0x400   :  { %4331 = vmatpush1.msra.mxu0 %v4204_v41  ;;  %4290 = vmatpush2.msra.mxu1 %v4174_v44  ;;  %v3304_v1 = vpop.f32.mrf.mxu1  ;;  %v7439_v38 = vrot.slane %v2898_v21, %v7995_v27 }
 0x401   :  { %4332 = vmatprep.subr.mxu0 %v4203_v53  ;;  %4291 = vmatprep.subr.mxu1 %v4173_v30  ;;  %v3305_v11 = vadd.f32 %v3304_v1, %v3225_v9  ;;  %v4442_v1 = vld [vmem:[#allocation15 + $0x180] sm:$0xff]  ;;  %v4441_v9 = vld [vmem:[#allocation15 + $0x178] sm:$0xff] }
 0x402   :  { %4333 = vmatpush1.msra.mxu0 %v4202_v58  ;;  %4292 = vmatpush2.msra.mxu1 %v4172_v46  ;;  %v3306_v6 = vpop.f32.mrf.mxu1  ;;  %v7996_v46 = vld [vmem:[#allocation32_spill] sm:$0xff] }
 0x403   :  { %4334 = vmatprep.subr.mxu0 %v4201_v48  ;;  %4293 = vmatprep.subr.mxu1 %v4171_v23  ;;  %v3307_v24 = vadd.f32 %v3306_v6, %v3227_v8  ;;  %v3376_v35 = vadd.f32 %v3375_v3, %v3305_v11  ;;  %v7442_v54 = vrot.slane %v2898_v21, %v7996_v46  ;;  %v4407_v3 = vld [vmem:[#allocation15 + $0x90] sm:$0xff]  ;;  %v4406_v6 = vld [vmem:[#allocation15 + $0x88] sm:$0xff]  ;;  %v4405_v11 = vld [vmem:[#allocation15 + $0x80] sm:$0xff] }
 0x404   :  { %4335 = vmatpush1.msra.mxu0 %v4200_v50  ;;  %4294 = vmatpush2.msra.mxu1 %v4170_v57  ;;  %v4440_v8 = vld [vmem:[#allocation15 + $0x170] sm:$0xff] }
 0x405   :  { %4336 = vmatprep.subr.mxu0 %v4199_v34  ;;  %4295 = vmatprep.subr.mxu1 %v4169_v47  ;;  %v3378_v53 = vadd.f32 %v3377_v14, %v3307_v24  ;;  %v4430_v34 = vld [vmem:[#allocation15 + $0x120] sm:$0xff]  ;;  %v4395_v47 = vld [vmem:[#allocation15 + $0x30] sm:$0xff] }
 0x406   :  { %4337 = vmatpush1.msra.mxu0 %v4198_v18  ;;  %4370 = vmatprep.mubr.f32.mxu0 %v7869_v60  ;;  %v4428_v18 = vld [vmem:[#allocation15 + $0x110] sm:$0xff] }
 0x407   :  { %4296 = vmatpush2.msra.mxu1 %v4168_v36  ;;  %5738 = vmatmul.mubr.msk.f32.vlgmr.msra.gmra.mxu0 %vm2091_vm6, %v4224_v52  ;;  %v4393_v36 = vld [vmem:[#allocation15 + $0x20] sm:$0xff]  ;;  %v4425_v52 = vld [vmem:[#allocation15 + $0xf8] sm:$0xff] }
 0x408   :  { %4297 = vmatprep.subr.mxu1 %v4167_v49  ;;  %4482 = vmatprep.subr.mxu0 %v7869_v60  ;;  %v4426_v49 = vld [vmem:[#allocation15 + $0x100] sm:$0xff] }
 0x409   :  { %4298 = vmatpush2.msra.mxu1 %v4166_v26  ;;  %4483 = vmatpush1.msra.mxu0 %v4439_v0  ;;  %v4390_v26 = vld [vmem:[#allocation15 + $0x8] sm:$0xff]  ;;  %v4453_v0 = vld [vmem:[#allocation15 + $0x1d8] sm:$0xff] }
 0x40a   :  { %4300 = vmatmul.mubr.f32.vlgmr.msra.gmra.mxu1 %v4218_v4  ;;  %4580 = vmatprep.subr.mxu1 %v7869_v60  ;;  %v4389_v4 = vld [vmem:[#allocation15] sm:$0xff] }
 0x40b   :  { %4581 = vmatpush1.msra.mxu1 %v4404_v13  ;;  %4484 = vmatprep.subr.mxu0 %v7869_v60  ;;  %v4418_v13 = vld [vmem:[#allocation15 + $0xe8] sm:$0xff] }
 0x40c   :  { %4582 = vmatprep.subr.mxu1 %v7869_v60  ;;  %4485 = vmatpush1.msra.mxu0 %v4438_v15  ;;  %v4452_v15 = vld [vmem:[#allocation15 + $0x1d0] sm:$0xff] }
 0x40d   :  { %4583 = vmatpush1.msra.mxu1 %v4403_v17  ;;  %4486 = vmatprep.subr.mxu0 %v7869_v60  ;;  %v4417_v17 = vld [vmem:[#allocation15 + $0xe0] sm:$0xff] }
 0x40e   :  { %4584 = vmatprep.subr.mxu1 %v7869_v60  ;;  %4487 = vmatpush1.msra.mxu0 %v4437_v40  ;;  %v3625_v16 = vpop.f32.mrf.mxu1  ;;  %v4451_v40 = vld [vmem:[#allocation15 + $0x1c8] sm:$0xff] }
 0x40f   :  { %4585 = vmatpush1.msra.mxu1 %v4402_v28  ;;  %4488 = vmatprep.subr.mxu0 %v7869_v60  ;;  %v4416_v28 = vld [vmem:[#allocation15 + $0xd8] sm:$0xff] }
 0x410   :  { %4586 = vmatprep.subr.mxu1 %v7869_v60  ;;  %4489 = vmatpush1.msra.mxu0 %v4436_v10  ;;  %v3627_v41 = vpop.f32.mrf.mxu1  ;;  %v4450_v10 = vld [vmem:[#allocation15 + $0x1c0] sm:$0xff] }
 0x411   :  { %4587 = vmatpush1.msra.mxu1 %v4401_v29  ;;  %4490 = vmatprep.subr.mxu0 %v7869_v60  ;;  %v4415_v29 = vld [vmem:[#allocation15 + $0xd0] sm:$0xff] }
 0x412   :  { %4588 = vmatprep.subr.mxu1 %v7869_v60  ;;  %4491 = vmatpush1.msra.mxu0 %v4435_v5  ;;  %v4449_v5 = vld [vmem:[#allocation15 + $0x1b8] sm:$0xff] }
 0x413   :  { %4589 = vmatpush1.msra.mxu1 %v4400_v42  ;;  %4492 = vmatprep.subr.mxu0 %v7869_v60  ;;  %v4414_v42 = vld [vmem:[#allocation15 + $0xc8] sm:$0xff] }
 0x414   :  { %4590 = vmatprep.subr.mxu1 %v7869_v60  ;;  %4493 = vmatpush1.msra.mxu0 %v4434_v20  ;;  %v4448_v20 = vld [vmem:[#allocation15 + $0x1b0] sm:$0xff] }
 0x415   :  { %4591 = vmatpush1.msra.mxu1 %v4399_v37  ;;  %4494 = vmatprep.subr.mxu0 %v7869_v60  ;;  %v4413_v37 = vld [vmem:[#allocation15 + $0xc0] sm:$0xff] }
 0x416   :  { %4592 = vmatprep.subr.mxu1 %v7869_v60  ;;  %4495 = vmatpush1.msra.mxu0 %v4433_v25  ;;  %v4447_v25 = vld [vmem:[#allocation15 + $0x1a8] sm:$0xff] }
 0x417   :  { %4593 = vmatpush1.msra.mxu1 %v4398_v39  ;;  %4496 = vmatprep.subr.mxu0 %v7869_v60  ;;  %v4412_v39 = vld [vmem:[#allocation15 + $0xb8] sm:$0xff] }
 0x418   :  { %4594 = vmatprep.subr.mxu1 %v7869_v60  ;;  %4497 = vmatpush1.msra.mxu0 %v4432_v59  ;;  %v4446_v59 = vld [vmem:[#allocation15 + $0x1a0] sm:$0xff] }
 0x419   :  { %4595 = vmatpush1.msra.mxu1 %v4397_v19  ;;  %4498 = vmatprep.subr.mxu0 %v7869_v60  ;;  %v4411_v19 = vld [vmem:[#allocation15 + $0xb0] sm:$0xff] }
 0x41a   :  { %4596 = vmatprep.subr.mxu1 %v7869_v60  ;;  %4499 = vmatpush1.msra.mxu0 %v4431_v62  ;;  %v4445_v62 = vld [vmem:[#allocation15 + $0x198] sm:$0xff] }
 0x41b   :  { %4597 = vmatpush1.msra.mxu1 %v4396_v63  ;;  %4500 = vmatprep.subr.mxu0 %v7869_v60  ;;  %v4410_v63 = vld [vmem:[#allocation15 + $0xa8] sm:$0xff] }
 0x41c   :  { %4598 = vmatprep.subr.mxu1 %v7869_v60  ;;  %4501 = vmatpush1.msra.mxu0 %v4430_v34 }
 0x41d   :  { %4599 = vmatpush1.msra.mxu1 %v4395_v47  ;;  %4502 = vmatprep.subr.mxu0 %v7869_v60 }
 0x41e   :  { %4600 = vmatprep.subr.mxu1 %v7869_v60  ;;  %4503 = vmatpush1.msra.mxu0 %v4429_v2 }
 0x41f   :  { %4601 = vmatpush1.msra.mxu1 %v4394_v12  ;;  %4504 = vmatprep.subr.mxu0 %v7869_v60 }
 0x420   :  { %4602 = vmatprep.subr.mxu1 %v7869_v60  ;;  %4505 = vmatpush1.msra.mxu0 %v4428_v18 }
 0x421   :  { %4603 = vmatpush1.msra.mxu1 %v4393_v36  ;;  %4506 = vmatprep.subr.mxu0 %v7869_v60 }
 0x422   :  { %4604 = vmatprep.subr.mxu1 %v7869_v60  ;;  %4507 = vmatpush1.msra.mxu0 %v4427_v51  ;;  %v6144_v51 = vmov 1966171168  }
 0x423   :  { %4605 = vmatpush1.msra.mxu1 %v4392_v33  ;;  %4508 = vmatprep.subr.mxu0 %v7869_v60  ;;  %v4458_v33 = vunpack.c.l.s4 %v6144_v51  ;;  %v4789_v51 = vld [vmem:[#allocation15 + $0x2d0] sm:$0xff] }
 0x424   :  { %4606 = vmatprep.subr.mxu1 %v7869_v60  ;;  %4509 = vmatpush1.msra.mxu0 %v4426_v49 }
 0x425   :  { %4607 = vmatpush1.msra.mxu1 %v4391_v7  ;;  %4510 = vmatprep.subr.mxu0 %v7869_v60  ;;  %v4459_v7 = vunpack.c.0.s8 %v4458_v33  ;;  %v4684_v33 = vld [vmem:[#allocation15 + $0x2c8] sm:$0xff] }
 0x426   :  { %4608 = vmatprep.subr.mxu1 %v7869_v60  ;;  %4511 = vmatpush1.msra.mxu0 %v4425_v52 }
 0x427   :  { %4609 = vmatpush1.msra.mxu1 %v4390_v26  ;;  %4512 = vmatprep.subr.mxu0 %v7869_v60 }
 0x428   :  { %4610 = vmatprep.subr.mxu1 %v7869_v60  ;;  %4513 = vmatpush1.msra.mxu0 %v4424_v45  ;;  %v7997_v45 = vld [vmem:[#allocation31_spill] sm:$0xff] }
 0x429   :  { %4611 = vmatpush1.msra.mxu1 %v4389_v4  ;;  %4518 = vmatprep.subr.mxu0 %v7869_v60  ;;  %v7493_v4 = vsub.s32 %v4459_v7, %v7997_v45  ;;  %v4683_v7 = vld [vmem:[#allocation15 + $0x2c0] sm:$0xff]  ;;  %v4816_v45 = vld [vmem:[#allocation15 + $0x3a8] sm:$0xff] }
 0x42a   :  { %4616 = vmatprep.subr.mxu1 %v7869_v60  ;;  %4519 = vmatpush2.msra.mxu0 %v4453_v0 }
 0x42b   :  { %4617 = vmatpush2.msra.mxu1 %v4418_v13  ;;  %4520 = vmatprep.subr.mxu0 %v7869_v60 }
 0x42c   :  { %4618 = vmatprep.subr.mxu1 %v7869_v60  ;;  %4521 = vmatpush2.msra.mxu0 %v4452_v15 }
 0x42d   :  { %4619 = vmatpush2.msra.mxu1 %v4417_v17  ;;  %4522 = vmatprep.subr.mxu0 %v7869_v60 }
 0x42e   :  { %4620 = vmatprep.subr.mxu1 %v7869_v60  ;;  %4523 = vmatpush2.msra.mxu0 %v4451_v40 }
 0x42f   :  { %v3554_v22 = vpop.f32.mrf.mxu0  ;;  %4621 = vmatpush2.msra.mxu1 %v4416_v28  ;;  %4524 = vmatprep.subr.mxu0 %v7869_v60 }
 0x430   :  { %v3626_v43 = vadd.f32 %v3625_v16, %v3554_v22  ;;  %4622 = vmatprep.subr.mxu1 %v7869_v60  ;;  %4525 = vmatpush2.msra.mxu0 %v4450_v10 }
 0x431   :  { %v3556_v44 = vpop.f32.mrf.mxu0  ;;  %4623 = vmatpush2.msra.mxu1 %v4415_v29  ;;  %4526 = vmatprep.subr.mxu0 %v7869_v60 }
 0x432   :  { %v3630_v30 = vadd.f32 %v3626_v43, %v3376_v35  ;;  %v3628_v58 = vadd.f32 %v3627_v41, %v3556_v44  ;;  %4624 = vmatprep.subr.mxu1 %v7869_v60  ;;  %4527 = vmatpush2.msra.mxu0 %v4449_v5 }
 0x433   :  { %4625 = vmatpush2.msra.mxu1 %v4414_v42  ;;  %4528 = vmatprep.subr.mxu0 %v7869_v60 }
 0x434   :  { %v3643_v48 = vadd.f32 %v7439_v38, %v3630_v30  ;;  %v3631_v23 = vadd.f32 %v3628_v58, %v3378_v53  ;;  %4626 = vmatprep.subr.mxu1 %v7869_v60  ;;  %4529 = vmatpush2.msra.mxu0 %v4448_v20 }
 0x435   :  { %4627 = vmatpush2.msra.mxu1 %v4413_v37  ;;  %4530 = vmatprep.subr.mxu0 %v7869_v60 }
 0x436   :  { %v3645_v50 = vmax.f32 %v3643_v48, 0.0  ;;  %v3644_v57 = vadd.f32 %v7442_v54, %v3631_v23  ;;  %4628 = vmatprep.subr.mxu1 %v7869_v60  ;;  %4531 = vmatpush2.msra.mxu0 %v4447_v25 }
 0x437   :  { %4629 = vmatpush2.msra.mxu1 %v4412_v39  ;;  %4532 = vmatprep.subr.mxu0 %v7869_v60 }
 0x438   :  { %3647 = vst [vmem:[#allocation4] sm:$0xff] %v3645_v50  ;;  %v3646_v61 = vmax.f32 %v3644_v57, 0.0  ;;  %4630 = vmatprep.subr.mxu1 %v7869_v60  ;;  %4533 = vmatpush2.msra.mxu0 %v4446_v59 }
 0x439   :  { %4631 = vmatpush2.msra.mxu1 %v4411_v19  ;;  %4534 = vmatprep.subr.mxu0 %v7869_v60 }
 0x43a   :  { %3648 = vst.msk [vmem:[#allocation4 + $0x8] sm:$0xff] %vm738_vm1, %v3646_v61  ;;  %4632 = vmatprep.subr.mxu1 %v7869_v60  ;;  %4535 = vmatpush2.msra.mxu0 %v4445_v62 }
 0x43b   :  { %4633 = vmatpush2.msra.mxu1 %v4410_v63  ;;  %4536 = vmatprep.subr.mxu0 %v7869_v60 }
 0x43c   :  { %4634 = vmatprep.subr.mxu1 %v7869_v60  ;;  %4537 = vmatpush2.msra.mxu0 %v4444_v55 }
 0x43d   :  { %4635 = vmatpush2.msra.mxu1 %v4409_v31  ;;  %4538 = vmatprep.subr.mxu0 %v7869_v60 }
 0x43e   :  { %4636 = vmatprep.subr.mxu1 %v7869_v60  ;;  %4539 = vmatpush2.msra.mxu0 %v4443_v56  ;;  %v4670_v56 = vld [vmem:[#allocation15 + $0x258] sm:$0xff] }
 0x43f   :  { %4637 = vmatpush2.msra.mxu1 %v4408_v32  ;;  %4540 = vmatprep.subr.mxu0 %v7869_v60  ;;  %v4804_v32 = vld [vmem:[#allocation15 + $0x348] sm:$0xff] }
 0x440   :  { %4638 = vmatprep.subr.mxu1 %v7869_v60  ;;  %4541 = vmatpush2.msra.mxu0 %v4442_v1 }
 0x441   :  { %4639 = vmatpush2.msra.mxu1 %v4407_v3  ;;  %4542 = vmatprep.subr.mxu0 %v7869_v60  ;;  %v4420_v52 = vld [vmem:[#allocation4 + $0x1] ss:$8 sm:$0x3]  ;;  %v4386_v26 = vld [vmem:[#allocation4] ss:$8 sm:$0x3] }
 0x442   :  { %4640 = vmatprep.subr.mxu1 %v7869_v60  ;;  %4543 = vmatpush2.msra.mxu0 %v4441_v9  ;;  %v4651_v0 = vld [vmem:[#allocation4 + $0x2] ss:$8 sm:$0x3]  ;;  %v4785_v13 = vld [vmem:[#allocation4 + $0x3] ss:$8 sm:$0x3] }
 0x443   :  { %4641 = vmatpush2.msra.mxu1 %v4406_v6  ;;  %4544 = vmatprep.subr.mxu0 %v7869_v60  ;;  %v4669_v9 = vld [vmem:[#allocation15 + $0x250] sm:$0xff]  ;;  %v4803_v6 = vld [vmem:[#allocation15 + $0x340] sm:$0xff] }
 0x444   :  { %4642 = vmatprep.subr.mxu1 %v7869_v60  ;;  %4545 = vmatpush2.msra.mxu0 %v4440_v8  ;;  %v4668_v8 = vld [vmem:[#allocation15 + $0x248] sm:$0xff] }
 0x445   :  { %4643 = vmatpush2.msra.mxu1 %v4405_v11  ;;  %4713 = vmatprep.subr.mxu0 %v7869_v60  ;;  %v4802_v11 = vld [vmem:[#allocation15 + $0x338] sm:$0xff] }
 0x446   :  { %4847 = vmatprep.subr.mxu1 %v7869_v60 }
 0x478   :  { %v3972_v14 = vpop.f32.mrf.mxu0 }
 0x47a   :  { %v3974_v21 = vpop.f32.mrf.mxu0 }
 0x47c   :  { %v3901_v16 = vpop.f32.mrf.mxu1 }
 0x47d   :  { %v3973_v43 = vadd.f32 %v3972_v14, %v3901_v16  ;;  %v4667_v14 = vld [vmem:[#allocation15 + $0x240] sm:$0xff]  ;;  %v4801_v16 = vld [vmem:[#allocation15 + $0x330] sm:$0xff] }
 0x47e   :  { %v3903_v24 = vpop.f32.mrf.mxu1 }
 0x47f   :  { %v3975_v41 = vadd.f32 %v3974_v21, %v3903_v24  ;;  %v4666_v21 = vld [vmem:[#allocation15 + $0x238] sm:$0xff]  ;;  %v4800_v24 = vld [vmem:[#allocation15 + $0x328] sm:$0xff] }
 0x488   :  { %v4123_v35 = vpop.f32.mrf.mxu1 }
 0x48a   :  { %v4125_v53 = vpop.f32.mrf.mxu1 }
 0x4ba   :  { %v4052_v22 = vpop.f32.mrf.mxu0 }
 0x4bb   :  { %v4053_v44 = vadd.f32 %v4052_v22, %v3973_v43  ;;  %v4665_v22 = vld [vmem:[#allocation15 + $0x230] sm:$0xff]  ;;  %v4664_v43 = vld [vmem:[#allocation15 + $0x228] sm:$0xff] }
 0x4bc   :  { %v4054_v27 = vpop.f32.mrf.mxu0 }
 0x4bd   :  { %v4055_v58 = vadd.f32 %v4054_v27, %v3975_v41  ;;  %v4124_v48 = vadd.f32 %v4123_v35, %v4053_v44  ;;  %v4799_v35 = vld [vmem:[#allocation15 + $0x320] sm:$0xff]  ;;  %v4798_v27 = vld [vmem:[#allocation15 + $0x318] sm:$0xff]  ;;  %v4797_v44 = vld [vmem:[#allocation15 + $0x310] sm:$0xff] }
 0x4be   :  { %v4663_v41 = vld [vmem:[#allocation15 + $0x220] sm:$0xff] }
 0x4bf   :  { %v4126_v61 = vadd.f32 %v4125_v53, %v4055_v58  ;;  %v4662_v53 = vld [vmem:[#allocation15 + $0x218] sm:$0xff]  ;;  %v4661_v58 = vld [vmem:[#allocation15 + $0x210] sm:$0xff] }
 0x4c7   :  { %v4372_v30 = vpop.f32.mrf.mxu0 }
 0x4c9   :  { %v4374_v50 = vpop.f32.mrf.mxu0 }
 0x4ca   :  { %v4301_v46 = vpop.f32.mrf.mxu1 }
 0x4cb   :  { %v4373_v23 = vadd.f32 %v4372_v30, %v4301_v46  ;;  %v4796_v30 = vld [vmem:[#allocation15 + $0x308] sm:$0xff]  ;;  %v4795_v46 = vld [vmem:[#allocation15 + $0x300] sm:$0xff] }
 0x4cc   :  { %v4303_v57 = vpop.f32.mrf.mxu1 }
 0x4cd   :  { %v4377_v34 = vadd.f32 %v4373_v23, %v4124_v48  ;;  %v4375_v47 = vadd.f32 %v4374_v50, %v4303_v57  ;;  %v4660_v48 = vld [vmem:[#allocation15 + $0x208] sm:$0xff]  ;;  %v4794_v23 = vld [vmem:[#allocation15 + $0x2f8] sm:$0xff]  ;;  %v4659_v50 = vld [vmem:[#allocation15 + $0x200] sm:$0xff] }
 0x4ce   :  { %v4793_v57 = vld [vmem:[#allocation15 + $0x2f0] sm:$0xff] }
 0x4cf   :  { %v4379_v2 = vadd.f32 %v4377_v34, %v7439_v38  ;;  %v4378_v12 = vadd.f32 %v4375_v47, %v4126_v61  ;;  %v4658_v61 = vld [vmem:[#allocation15 + $0x1f8] sm:$0xff]  ;;  %v4792_v34 = vld [vmem:[#allocation15 + $0x2e8] sm:$0xff]  ;;  %v4657_v47 = vld [vmem:[#allocation15 + $0x1f0] sm:$0xff] }
 0x4d1   :  { %v4381_v18 = vmax.f32 %v4379_v2, 0.0  ;;  %v4380_v36 = vadd.f32 %v4378_v12, %v7442_v54  ;;  %v4791_v2 = vld [vmem:[#allocation15 + $0x2e0] sm:$0xff]  ;;  %v4656_v12 = vld [vmem:[#allocation15 + $0x1e8] sm:$0xff] }
 0x4d3   :  { %4384 = vst [vmem:[#allocation4 + $0x10] sm:$0xff] %v4381_v18  ;;  %v4382_v49 = vmax.f32 %v4380_v36, 0.0  ;;  %v4790_v18 = vld [vmem:[#allocation15 + $0x2d8] sm:$0xff]  ;;  %v4655_v36 = vld [vmem:[#allocation15 + $0x1e0] sm:$0xff] }
 0x4d5   :  { %4385 = vst.msk [vmem:[#allocation4 + $0x18] sm:$0xff] %vm738_vm1, %v4382_v49  ;;  %v4818_v49 = vld [vmem:[#allocation15 + $0x3b8] sm:$0xff] }
 0x4dc   :  { %v4422_v15 = vld [vmem:[#allocation4 + $0x11] ss:$8 sm:$0x3]  ;;  %v4388_v38 = vld [vmem:[#allocation4 + $0x10] ss:$8 sm:$0x3] }
 0x4dd   :  { %v4456_v17 = vcombine.low %v4420_v52, %v4422_v15  ;;  %v4554_v40 = vcombine.low %v4386_v26, %v4388_v38  ;;  %v4653_v28 = vld [vmem:[#allocation4 + $0x12] ss:$8 sm:$0x3]  ;;  %v4787_v54 = vld [vmem:[#allocation4 + $0x13] ss:$8 sm:$0x3] }
 0x4de   :  { %v4687_v10 = vcombine.low %v4651_v0, %v4653_v28  ;;  %v4821_v29 = vcombine.low %v4785_v13, %v4787_v54  ;;  %v4817_v52 = vld [vmem:[#allocation15 + $0x3b0] sm:$0xff]  ;;  %v4682_v26 = vld [vmem:[#allocation15 + $0x2b8] sm:$0xff]  ;;  %v4815_v13 = vld [vmem:[#allocation15 + $0x3a0] sm:$0xff] }
 0x4df   :  { %v4463_v5 = vrot.slane %v4456_v17, %v7493_v4  ;;  %v4561_v42 = vrot.slane %v4554_v40, %v7493_v4  ;;  %v4681_v0 = vld [vmem:[#allocation15 + $0x2b0] sm:$0xff]  ;;  %v4680_v15 = vld [vmem:[#allocation15 + $0x2a8] sm:$0xff]  ;;  %v4814_v38 = vld [vmem:[#allocation15 + $0x398] sm:$0xff] }
 0x4e0   :  { %v7498_v20 = vrot.slane %v4687_v10, %v7493_v4  ;;  %v7501_v37 = vrot.slane %v4821_v29, %v7493_v4  ;;  %v4679_v17 = vld [vmem:[#allocation15 + $0x2a0] sm:$0xff]  ;;  %v4813_v40 = vld [vmem:[#allocation15 + $0x390] sm:$0xff]  ;;  %v4678_v28 = vld [vmem:[#allocation15 + $0x298] sm:$0xff] }
 0x4e1   :  { %v4464_v25 = vcombine.high %v4463_v5, %v4463_v5  ;;  %v4562_v39 = vcombine.high %v4561_v42, %v4561_v42  ;;  %v4471_v55 = vrot.slane %v4463_v5, %v7493_v4  ;;  %v4569_v31 = vrot.slane %v4561_v42, %v7493_v4  ;;  %v4812_v54 = vld [vmem:[#allocation15 + $0x388] sm:$0xff]  ;;  %v4677_v10 = vld [vmem:[#allocation15 + $0x290] sm:$0xff]  ;;  %v4811_v29 = vld [vmem:[#allocation15 + $0x380] sm:$0xff] }
 0x4e2   :  { %v4695_v59 = vcombine.high %v7498_v20, %v7498_v20  ;;  %v4829_v63 = vcombine.high %v7501_v37, %v7501_v37  ;;  %v4921_v5 = vld [vmem:[#allocation4 + $0x14] ss:$8 sm:$0x3]  ;;  %v4676_v42 = vld [vmem:[#allocation15 + $0x288] sm:$0xff] }
 0x4e3   :  { %v4478_v19 = vrot.slane %v4464_v25, %v7493_v4  ;;  %v4576_v62 = vrot.slane %v4562_v39, %v7493_v4  ;;  %v4810_v25 = vld [vmem:[#allocation15 + $0x378] sm:$0xff] }
 0x4e4   :  { %v4709_v1 = vrot.slane %v4695_v59, %v7493_v4  ;;  %v4843_v3 = vrot.slane %v4829_v63, %v7493_v4  ;;  %v5055_v39 = vld [vmem:[#allocation4 + $0x15] ss:$8 sm:$0x3]  ;;  %v4919_v59 = vld [vmem:[#allocation4 + $0x4] ss:$8 sm:$0x3] }
 0x4e5   :  { %5739 = vmatprep.mubr.msk.f32.mxu0 %vm738_vm1, %v4478_v19  ;;  %5740 = vmatprep.mubr.msk.f32.mxu1 %vm738_vm1, %v4576_v62  ;;  %v4675_v19 = vld [vmem:[#allocation15 + $0x280] sm:$0xff]  ;;  %v4809_v62 = vld [vmem:[#allocation15 + $0x370] sm:$0xff]  ;;  %v4955_v63 = vcombine.low %v4919_v59, %v4921_v5  ;;  %v4950_v5 = vld [vmem:[#allocation15 + $0x498] sm:$0xff] }
 0x4e6   :  { %4547 = vmatmul.mubr.f32.vlgmr.msra.gmra.mxu0 %v4471_v55  ;;  %4645 = vmatmul.mubr.f32.vlgmr.msra.gmra.mxu1 %v4569_v31  ;;  %v5053_v55 = vld [vmem:[#allocation4 + $0x5] ss:$8 sm:$0x3] }
 0x4e7   :  { %4714 = vmatpush1.msra.mxu0 %v4670_v56  ;;  %4848 = vmatpush1.msra.mxu1 %v4804_v32  ;;  %v5089_v31 = vcombine.low %v5053_v55, %v5055_v39  ;;  %v4674_v56 = vld [vmem:[#allocation15 + $0x278] sm:$0xff]  ;;  %v4808_v32 = vld [vmem:[#allocation15 + $0x368] sm:$0xff]  ;;  %v5083_v39 = vld [vmem:[#allocation15 + $0x580] sm:$0xff] }
 0x4e8   :  { %4715 = vmatprep.subr.mxu0 %v7869_v60  ;;  %5741 = vmatprep.mubr.msk.f32.mxu0 %vm738_vm1, %v4709_v1  ;;  %v4673_v1 = vld [vmem:[#allocation15 + $0x270] sm:$0xff]  ;;  %v4948_v59 = vld [vmem:[#allocation15 + $0x488] sm:$0xff]  ;;  %v4946_v55 = vld [vmem:[#allocation15 + $0x478] sm:$0xff] }
 0x4e9   :  { %4849 = vmatprep.subr.mxu1 %v7869_v60  ;;  %5742 = vmatprep.mubr.msk.f32.mxu1 %vm738_vm1, %v4843_v3  ;;  %v4807_v3 = vld [vmem:[#allocation15 + $0x360] sm:$0xff] }
 0x4ea   :  { %4716 = vmatpush1.msra.mxu0 %v4669_v9  ;;  %4850 = vmatpush1.msra.mxu1 %v4803_v6  ;;  %v7570_v9 = vrot.slane %v4955_v63, %v7493_v4  ;;  %v7573_v6 = vrot.slane %v5089_v31, %v7493_v4  ;;  %v5081_v63 = vld [vmem:[#allocation15 + $0x570] sm:$0xff]  ;;  %v5080_v31 = vld [vmem:[#allocation15 + $0x568] sm:$0xff] }
 0x4eb   :  { %4717 = vmatprep.subr.mxu0 %v7869_v60  ;;  %4851 = vmatprep.subr.mxu1 %v7869_v60 }
 0x4ec   :  { %4718 = vmatpush1.msra.mxu0 %v4668_v8  ;;  %4852 = vmatpush1.msra.mxu1 %v4802_v11  ;;  %v4672_v8 = vld [vmem:[#allocation15 + $0x268] sm:$0xff]  ;;  %v4806_v11 = vld [vmem:[#allocation15 + $0x358] sm:$0xff] }
 0x4ed   :  { %4719 = vmatprep.subr.mxu0 %v7869_v60  ;;  %4853 = vmatprep.subr.mxu1 %v7869_v60 }
 0x4ee   :  { %4720 = vmatpush1.msra.mxu0 %v4667_v14  ;;  %4854 = vmatpush1.msra.mxu1 %v4801_v16  ;;  %v4671_v14 = vld [vmem:[#allocation15 + $0x260] sm:$0xff]  ;;  %v4805_v16 = vld [vmem:[#allocation15 + $0x350] sm:$0xff] }
 0x4ef   :  { %4721 = vmatprep.subr.mxu0 %v7869_v60  ;;  %4855 = vmatprep.subr.mxu1 %v7869_v60 }
 0x4f0   :  { %4722 = vmatpush1.msra.mxu0 %v4666_v21  ;;  %4856 = vmatpush1.msra.mxu1 %v4800_v24  ;;  %v4963_v21 = vcombine.high %v7570_v9, %v7570_v9  ;;  %v5097_v24 = vcombine.high %v7573_v6, %v7573_v6 }
 0x4f1   :  { %4723 = vmatprep.subr.mxu0 %v7869_v60  ;;  %4857 = vmatprep.subr.mxu1 %v7869_v60 }
 0x4f2   :  { %4724 = vmatpush1.msra.mxu0 %v4665_v22  ;;  %4858 = vmatpush1.msra.mxu1 %v4799_v35  ;;  %v4702_v22 = vrot.slane %v7498_v20, %v7493_v4  ;;  %v4836_v35 = vrot.slane %v7501_v37, %v7493_v4  ;;  %v4937_v20 = vld [vmem:[#allocation15 + $0x430] sm:$0xff]  ;;  %v4936_v37 = vld [vmem:[#allocation15 + $0x428] sm:$0xff] }
 0x4f3   :  { %4725 = vmatprep.subr.mxu0 %v7869_v60  ;;  %4859 = vmatprep.subr.mxu1 %v7869_v60 }
 0x4f4   :  { %4726 = vmatpush1.msra.mxu0 %v4664_v43  ;;  %4860 = vmatpush1.msra.mxu1 %v4798_v27  ;;  %v4938_v43 = vld [vmem:[#allocation15 + $0x438] sm:$0xff]  ;;  %v4977_v27 = vrot.slane %v4963_v21, %v7493_v4  ;;  %v5077_v21 = vld [vmem:[#allocation15 + $0x550] sm:$0xff] }
 0x4f5   :  { %4727 = vmatprep.subr.mxu0 %v7869_v60  ;;  %4861 = vmatprep.subr.mxu1 %v7869_v60 }
 0x4f6   :  { %4728 = vmatpush1.msra.mxu0 %v4663_v41  ;;  %4862 = vmatpush1.msra.mxu1 %v4797_v44  ;;  %v5072_v41 = vld [vmem:[#allocation15 + $0x528] sm:$0xff]  ;;  %v5111_v44 = vrot.slane %v5097_v24, %v7493_v4 }
 0x4f7   :  { %4729 = vmatprep.subr.mxu0 %v7869_v60  ;;  %4863 = vmatprep.subr.mxu1 %v7869_v60 }
 0x4f8   :  { %4730 = vmatpush1.msra.mxu0 %v4662_v53  ;;  %4864 = vmatpush1.msra.mxu1 %v4796_v30  ;;  %v5071_v53 = vld [vmem:[#allocation15 + $0x520] sm:$0xff]  ;;  %v5070_v30 = vld [vmem:[#allocation15 + $0x518] sm:$0xff] }
 0x4f9   :  { %4731 = vmatprep.subr.mxu0 %v7869_v60  ;;  %4865 = vmatprep.subr.mxu1 %v7869_v60 }
 0x4fa   :  { %4732 = vmatpush1.msra.mxu0 %v4661_v58  ;;  %4866 = vmatpush1.msra.mxu1 %v4795_v46  ;;  %v4935_v58 = vld [vmem:[#allocation15 + $0x420] sm:$0xff]  ;;  %v5069_v46 = vld [vmem:[#allocation15 + $0x510] sm:$0xff] }
 0x4fb   :  { %4733 = vmatprep.subr.mxu0 %v7869_v60  ;;  %4867 = vmatprep.subr.mxu1 %v7869_v60 }
 0x4fc   :  { %4734 = vmatpush1.msra.mxu0 %v4660_v48  ;;  %4868 = vmatpush1.msra.mxu1 %v4794_v23  ;;  %v4934_v48 = vld [vmem:[#allocation15 + $0x418] sm:$0xff]  ;;  %v5068_v23 = vld [vmem:[#allocation15 + $0x508] sm:$0xff] }
 0x4fd   :  { %4735 = vmatprep.subr.mxu0 %v7869_v60  ;;  %4869 = vmatprep.subr.mxu1 %v7869_v60 }
 0x4fe   :  { %4736 = vmatpush1.msra.mxu0 %v4659_v50  ;;  %4870 = vmatpush1.msra.mxu1 %v4793_v57  ;;  %v4933_v50 = vld [vmem:[#allocation15 + $0x410] sm:$0xff]  ;;  %v5067_v57 = vld [vmem:[#allocation15 + $0x500] sm:$0xff] }
 0x4ff   :  { %4737 = vmatprep.subr.mxu0 %v7869_v60  ;;  %4871 = vmatprep.subr.mxu1 %v7869_v60 }
 0x500   :  { %4738 = vmatpush1.msra.mxu0 %v4658_v61  ;;  %4872 = vmatpush1.msra.mxu1 %v4792_v34  ;;  %v4932_v61 = vld [vmem:[#allocation15 + $0x408] sm:$0xff]  ;;  %v5066_v34 = vld [vmem:[#allocation15 + $0x4f8] sm:$0xff] }
 0x501   :  { %4739 = vmatprep.subr.mxu0 %v7869_v60  ;;  %4873 = vmatprep.subr.mxu1 %v7869_v60 }
 0x502   :  { %4740 = vmatpush1.msra.mxu0 %v4657_v47  ;;  %4874 = vmatpush1.msra.mxu1 %v4791_v2  ;;  %v4931_v47 = vld [vmem:[#allocation15 + $0x400] sm:$0xff]  ;;  %v5065_v2 = vld [vmem:[#allocation15 + $0x4f0] sm:$0xff] }
 0x503   :  { %4741 = vmatprep.subr.mxu0 %v7869_v60  ;;  %4875 = vmatprep.subr.mxu1 %v7869_v60 }
 0x504   :  { %4742 = vmatpush1.msra.mxu0 %v4656_v12  ;;  %4876 = vmatpush1.msra.mxu1 %v4790_v18  ;;  %v4930_v12 = vld [vmem:[#allocation15 + $0x3f8] sm:$0xff]  ;;  %v5064_v18 = vld [vmem:[#allocation15 + $0x4e8] sm:$0xff] }
 0x505   :  { %4743 = vmatprep.subr.mxu0 %v7869_v60  ;;  %4877 = vmatprep.subr.mxu1 %v7869_v60 }
 0x506   :  { %4744 = vmatpush1.msra.mxu0 %v4655_v36  ;;  %4878 = vmatpush1.msra.mxu1 %v4789_v51  ;;  %v4929_v36 = vld [vmem:[#allocation15 + $0x3f0] sm:$0xff]  ;;  %v5063_v51 = vld [vmem:[#allocation15 + $0x4e0] sm:$0xff] }
 0x507   :  { %4749 = vmatprep.subr.mxu0 %v7869_v60  ;;  %4883 = vmatprep.subr.mxu1 %v7869_v60 }
 0x508   :  { %4750 = vmatpush2.msra.mxu0 %v4684_v33  ;;  %4884 = vmatpush2.msra.mxu1 %v4818_v49  ;;  %v4928_v33 = vld [vmem:[#allocation15 + $0x3e8] sm:$0xff]  ;;  %v5062_v49 = vld [vmem:[#allocation15 + $0x4d8] sm:$0xff] }
 0x509   :  { %4751 = vmatprep.subr.mxu0 %v7869_v60  ;;  %4885 = vmatprep.subr.mxu1 %v7869_v60 }
 0x50a   :  { %4752 = vmatpush2.msra.mxu0 %v4683_v7  ;;  %4886 = vmatpush2.msra.mxu1 %v4817_v52  ;;  %v4927_v7 = vld [vmem:[#allocation15 + $0x3e0] sm:$0xff]  ;;  %v5061_v52 = vld [vmem:[#allocation15 + $0x4d0] sm:$0xff] }
 0x50b   :  { %4753 = vmatprep.subr.mxu0 %v7869_v60  ;;  %4887 = vmatprep.subr.mxu1 %v7869_v60 }
 0x50c   :  { %4754 = vmatpush2.msra.mxu0 %v4682_v26  ;;  %4888 = vmatpush2.msra.mxu1 %v4816_v45  ;;  %v4926_v26 = vld [vmem:[#allocation15 + $0x3d8] sm:$0xff]  ;;  %v5060_v45 = vld [vmem:[#allocation15 + $0x4c8] sm:$0xff] }
 0x50d   :  { %4755 = vmatprep.subr.mxu0 %v7869_v60  ;;  %4889 = vmatprep.subr.mxu1 %v7869_v60 }
 0x50e   :  { %4756 = vmatpush2.msra.mxu0 %v4681_v0  ;;  %4890 = vmatpush2.msra.mxu1 %v4815_v13  ;;  %v4925_v0 = vld [vmem:[#allocation15 + $0x3d0] sm:$0xff]  ;;  %v5059_v13 = vld [vmem:[#allocation15 + $0x4c0] sm:$0xff] }
 0x50f   :  { %4757 = vmatprep.subr.mxu0 %v7869_v60  ;;  %4891 = vmatprep.subr.mxu1 %v7869_v60 }
 0x510   :  { %4758 = vmatpush2.msra.mxu0 %v4680_v15  ;;  %4892 = vmatpush2.msra.mxu1 %v4814_v38  ;;  %v4924_v15 = vld [vmem:[#allocation15 + $0x3c8] sm:$0xff]  ;;  %v5058_v38 = vld [vmem:[#allocation15 + $0x4b8] sm:$0xff] }
 0x511   :  { %4759 = vmatprep.subr.mxu0 %v7869_v60  ;;  %4893 = vmatprep.subr.mxu1 %v7869_v60 }
 0x512   :  { %4760 = vmatpush2.msra.mxu0 %v4679_v17  ;;  %4894 = vmatpush2.msra.mxu1 %v4813_v40  ;;  %v4923_v17 = vld [vmem:[#allocation15 + $0x3c0] sm:$0xff]  ;;  %v5057_v40 = vld [vmem:[#allocation15 + $0x4b0] sm:$0xff] }
 0x513   :  { %4761 = vmatprep.subr.mxu0 %v7869_v60  ;;  %4895 = vmatprep.subr.mxu1 %v7869_v60 }
 0x514   :  { %4762 = vmatpush2.msra.mxu0 %v4678_v28  ;;  %4896 = vmatpush2.msra.mxu1 %v4812_v54  ;;  %v4952_v28 = vld [vmem:[#allocation15 + $0x4a8] sm:$0xff]  ;;  %v5086_v54 = vld [vmem:[#allocation15 + $0x598] sm:$0xff] }
 0x515   :  { %4763 = vmatprep.subr.mxu0 %v7869_v60  ;;  %4897 = vmatprep.subr.mxu1 %v7869_v60 }
 0x516   :  { %4764 = vmatpush2.msra.mxu0 %v4677_v10  ;;  %4898 = vmatpush2.msra.mxu1 %v4811_v29  ;;  %v4951_v10 = vld [vmem:[#allocation15 + $0x4a0] sm:$0xff]  ;;  %v5085_v29 = vld [vmem:[#allocation15 + $0x590] sm:$0xff] }
 0x517   :  { %4765 = vmatprep.subr.mxu0 %v7869_v60  ;;  %4899 = vmatprep.subr.mxu1 %v7869_v60 }
 0x518   :  { %4766 = vmatpush2.msra.mxu0 %v4676_v42  ;;  %4900 = vmatpush2.msra.mxu1 %v4810_v25  ;;  %v5084_v42 = vld [vmem:[#allocation15 + $0x588] sm:$0xff]  ;;  %v4949_v25 = vld [vmem:[#allocation15 + $0x490] sm:$0xff] }
 0x519   :  { %4767 = vmatprep.subr.mxu0 %v7869_v60  ;;  %4901 = vmatprep.subr.mxu1 %v7869_v60 }
 0x51a   :  { %4768 = vmatpush2.msra.mxu0 %v4675_v19  ;;  %4902 = vmatpush2.msra.mxu1 %v4809_v62  ;;  %v5082_v19 = vld [vmem:[#allocation15 + $0x578] sm:$0xff]  ;;  %v4947_v62 = vld [vmem:[#allocation15 + $0x480] sm:$0xff] }
 0x51b   :  { %4769 = vmatprep.subr.mxu0 %v7869_v60  ;;  %4903 = vmatprep.subr.mxu1 %v7869_v60 }
 0x51c   :  { %4770 = vmatpush2.msra.mxu0 %v4674_v56  ;;  %4904 = vmatpush2.msra.mxu1 %v4808_v32  ;;  %v4945_v56 = vld [vmem:[#allocation15 + $0x470] sm:$0xff]  ;;  %v5079_v32 = vld [vmem:[#allocation15 + $0x560] sm:$0xff] }
 0x51d   :  { %4771 = vmatprep.subr.mxu0 %v7869_v60  ;;  %4905 = vmatprep.subr.mxu1 %v7869_v60 }
 0x51e   :  { %4772 = vmatpush2.msra.mxu0 %v4673_v1  ;;  %4906 = vmatpush2.msra.mxu1 %v4807_v3  ;;  %v5189_v1 = vld [vmem:[#allocation4 + $0x16] ss:$8 sm:$0x3]  ;;  %v4944_v3 = vld [vmem:[#allocation15 + $0x468] sm:$0xff] }
 0x51f   :  { %4773 = vmatprep.subr.mxu0 %v7869_v60  ;;  %4907 = vmatprep.subr.mxu1 %v7869_v60 }
 0x520   :  { %4774 = vmatpush2.msra.mxu0 %v4672_v8  ;;  %4908 = vmatpush2.msra.mxu1 %v4806_v11  ;;  %v5078_v8 = vld [vmem:[#allocation15 + $0x558] sm:$0xff] }
 0x521   :  { %4775 = vmatprep.subr.mxu0 %v7869_v60  ;;  %4909 = vmatprep.subr.mxu1 %v7869_v60  ;;  %v5323_v11 = vld [vmem:[#allocation4 + $0x17] ss:$8 sm:$0x3] }
 0x522   :  { %4776 = vmatpush2.msra.mxu0 %v4671_v14  ;;  %4910 = vmatpush2.msra.mxu1 %v4805_v16  ;;  %v5187_v14 = vld [vmem:[#allocation4 + $0x6] ss:$8 sm:$0x3]  ;;  %v4943_v16 = vld [vmem:[#allocation15 + $0x460] sm:$0xff] }
 0x523   :  { %4778 = vmatmul.mubr.f32.vlgmr.msra.gmra.mxu0 %v4702_v22  ;;  %4912 = vmatmul.mubr.f32.vlgmr.msra.gmra.mxu1 %v4836_v35  ;;  %v5223_v24 = vcombine.low %v5187_v14, %v5189_v1  ;;  %v5321_v22 = vld [vmem:[#allocation4 + $0x7] ss:$8 sm:$0x3]  ;;  %v5218_v1 = vld [vmem:[#allocation15 + $0x678] sm:$0xff] }
 0x524   :  { %4981 = vmatprep.subr.mxu0 %v7869_v60  ;;  %5115 = vmatprep.subr.mxu1 %v7869_v60  ;;  %v5357_v35 = vcombine.low %v5321_v22, %v5323_v11  ;;  %v5351_v11 = vld [vmem:[#allocation15 + $0x760] sm:$0xff]  ;;  %v5216_v14 = vld [vmem:[#allocation15 + $0x668] sm:$0xff]  ;;  %v5214_v22 = vld [vmem:[#allocation15 + $0x658] sm:$0xff] }
 0x525   :  { %4982 = vmatpush1.msra.mxu0 %v4938_v43  ;;  %5743 = vmatprep.mubr.msk.f32.mxu0 %vm738_vm1, %v4977_v27  ;;  %v4942_v43 = vld [vmem:[#allocation15 + $0x458] sm:$0xff]  ;;  %v5076_v27 = vld [vmem:[#allocation15 + $0x548] sm:$0xff] }
 0x526   :  { %5116 = vmatpush1.msra.mxu1 %v5072_v41  ;;  %5744 = vmatprep.mubr.msk.f32.mxu1 %vm738_vm1, %v5111_v44  ;;  %v4941_v41 = vld [vmem:[#allocation15 + $0x450] sm:$0xff]  ;;  %v5075_v44 = vld [vmem:[#allocation15 + $0x540] sm:$0xff] }
 0x527   :  { %4983 = vmatprep.subr.mxu0 %v7869_v60  ;;  %5117 = vmatprep.subr.mxu1 %v7869_v60 }
 0x528   :  { %4984 = vmatpush1.msra.mxu0 %v4937_v20  ;;  %5118 = vmatpush1.msra.mxu1 %v5071_v53  ;;  %v7648_v20 = vrot.slane %v5223_v24, %v7493_v4  ;;  %v7651_v53 = vrot.slane %v5357_v35, %v7493_v4  ;;  %v5349_v24 = vld [vmem:[#allocation15 + $0x750] sm:$0xff]  ;;  %v5348_v35 = vld [vmem:[#allocation15 + $0x748] sm:$0xff] }
 0x529   :  { %4985 = vmatprep.subr.mxu0 %v7869_v60  ;;  %5119 = vmatprep.subr.mxu1 %v7869_v60 }
 0x52a   :  { %4986 = vmatpush1.msra.mxu0 %v4936_v37  ;;  %5120 = vmatpush1.msra.mxu1 %v5070_v30  ;;  %v4940_v37 = vld [vmem:[#allocation15 + $0x448] sm:$0xff]  ;;  %v5074_v30 = vld [vmem:[#allocation15 + $0x538] sm:$0xff] }
 0x52b   :  { %4987 = vmatprep.subr.mxu0 %v7869_v60  ;;  %5121 = vmatprep.subr.mxu1 %v7869_v60 }
 0x52c   :  { %4988 = vmatpush1.msra.mxu0 %v4935_v58  ;;  %5122 = vmatpush1.msra.mxu1 %v5069_v46  ;;  %v4939_v58 = vld [vmem:[#allocation15 + $0x440] sm:$0xff]  ;;  %v5073_v46 = vld [vmem:[#allocation15 + $0x530] sm:$0xff] }
 0x52d   :  { %4989 = vmatprep.subr.mxu0 %v7869_v60  ;;  %5123 = vmatprep.subr.mxu1 %v7869_v60 }
 0x52e   :  { %4990 = vmatpush1.msra.mxu0 %v4934_v48  ;;  %5124 = vmatpush1.msra.mxu1 %v5068_v23  ;;  %v5231_v48 = vcombine.high %v7648_v20, %v7648_v20  ;;  %v5365_v23 = vcombine.high %v7651_v53, %v7651_v53 }
 0x52f   :  { %4991 = vmatprep.subr.mxu0 %v7869_v60  ;;  %5125 = vmatprep.subr.mxu1 %v7869_v60 }
 0x530   :  { %4992 = vmatpush1.msra.mxu0 %v4933_v50  ;;  %5126 = vmatpush1.msra.mxu1 %v5067_v57  ;;  %v4970_v50 = vrot.slane %v7570_v9, %v7493_v4  ;;  %v5104_v57 = vrot.slane %v7573_v6, %v7493_v4  ;;  %v5205_v9 = vld [vmem:[#allocation15 + $0x610] sm:$0xff]  ;;  %v5204_v6 = vld [vmem:[#allocation15 + $0x608] sm:$0xff] }
 0x531   :  { %4993 = vmatprep.subr.mxu0 %v7869_v60  ;;  %5127 = vmatprep.subr.mxu1 %v7869_v60 }
 0x532   :  { %4994 = vmatpush1.msra.mxu0 %v4932_v61  ;;  %5128 = vmatpush1.msra.mxu1 %v5066_v34  ;;  %v5206_v61 = vld [vmem:[#allocation15 + $0x618] sm:$0xff]  ;;  %v5245_v34 = vrot.slane %v5231_v48, %v7493_v4  ;;  %v5209_v48 = vld [vmem:[#allocation15 + $0x630] sm:$0xff] }
 0x533   :  { %4995 = vmatprep.subr.mxu0 %v7869_v60  ;;  %5129 = vmatprep.subr.mxu1 %v7869_v60 }
 0x534   :  { %4996 = vmatpush1.msra.mxu0 %v4931_v47  ;;  %5130 = vmatpush1.msra.mxu1 %v5065_v2  ;;  %v5340_v47 = vld [vmem:[#allocation15 + $0x708] sm:$0xff]  ;;  %v5379_v2 = vrot.slane %v5365_v23, %v7493_v4  ;;  %v5343_v23 = vld [vmem:[#allocation15 + $0x720] sm:$0xff] }
 0x535   :  { %4997 = vmatprep.subr.mxu0 %v7869_v60  ;;  %5131 = vmatprep.subr.mxu1 %v7869_v60 }
 0x536   :  { %4998 = vmatpush1.msra.mxu0 %v4930_v12  ;;  %5132 = vmatpush1.msra.mxu1 %v5064_v18  ;;  %v5339_v12 = vld [vmem:[#allocation15 + $0x700] sm:$0xff]  ;;  %v5338_v18 = vld [vmem:[#allocation15 + $0x6f8] sm:$0xff] }
 0x537   :  { %4999 = vmatprep.subr.mxu0 %v7869_v60  ;;  %5133 = vmatprep.subr.mxu1 %v7869_v60 }
 0x538   :  { %5000 = vmatpush1.msra.mxu0 %v4929_v36  ;;  %5134 = vmatpush1.msra.mxu1 %v5063_v51  ;;  %v5203_v36 = vld [vmem:[#allocation15 + $0x600] sm:$0xff]  ;;  %v5337_v51 = vld [vmem:[#allocation15 + $0x6f0] sm:$0xff] }
 0x539   :  { %5001 = vmatprep.subr.mxu0 %v7869_v60  ;;  %5135 = vmatprep.subr.mxu1 %v7869_v60 }
 0x53a   :  { %5002 = vmatpush1.msra.mxu0 %v4928_v33  ;;  %5136 = vmatpush1.msra.mxu1 %v5062_v49  ;;  %v5202_v33 = vld [vmem:[#allocation15 + $0x5f8] sm:$0xff]  ;;  %v5336_v49 = vld [vmem:[#allocation15 + $0x6e8] sm:$0xff] }
 0x53b   :  { %5003 = vmatprep.subr.mxu0 %v7869_v60  ;;  %5137 = vmatprep.subr.mxu1 %v7869_v60 }
 0x53c   :  { %5004 = vmatpush1.msra.mxu0 %v4927_v7  ;;  %5138 = vmatpush1.msra.mxu1 %v5061_v52  ;;  %v5201_v7 = vld [vmem:[#allocation15 + $0x5f0] sm:$0xff]  ;;  %v5335_v52 = vld [vmem:[#allocation15 + $0x6e0] sm:$0xff] }
 0x53d   :  { %5005 = vmatprep.subr.mxu0 %v7869_v60  ;;  %5139 = vmatprep.subr.mxu1 %v7869_v60 }
 0x53e   :  { %5006 = vmatpush1.msra.mxu0 %v4926_v26  ;;  %5140 = vmatpush1.msra.mxu1 %v5060_v45  ;;  %v5200_v26 = vld [vmem:[#allocation15 + $0x5e8] sm:$0xff]  ;;  %v5334_v45 = vld [vmem:[#allocation15 + $0x6d8] sm:$0xff] }
 0x53f   :  { %5007 = vmatprep.subr.mxu0 %v7869_v60  ;;  %5141 = vmatprep.subr.mxu1 %v7869_v60 }
 0x540   :  { %5008 = vmatpush1.msra.mxu0 %v4925_v0  ;;  %5142 = vmatpush1.msra.mxu1 %v5059_v13  ;;  %v5199_v0 = vld [vmem:[#allocation15 + $0x5e0] sm:$0xff]  ;;  %v5333_v13 = vld [vmem:[#allocation15 + $0x6d0] sm:$0xff] }
 0x541   :  { %5009 = vmatprep.subr.mxu0 %v7869_v60  ;;  %5143 = vmatprep.subr.mxu1 %v7869_v60 }
 0x542   :  { %5010 = vmatpush1.msra.mxu0 %v4924_v15  ;;  %5144 = vmatpush1.msra.mxu1 %v5058_v38  ;;  %v5198_v15 = vld [vmem:[#allocation15 + $0x5d8] sm:$0xff]  ;;  %v5332_v38 = vld [vmem:[#allocation15 + $0x6c8] sm:$0xff] }
 0x543   :  { %5011 = vmatprep.subr.mxu0 %v7869_v60  ;;  %5145 = vmatprep.subr.mxu1 %v7869_v60 }
 0x544   :  { %5012 = vmatpush1.msra.mxu0 %v4923_v17  ;;  %5146 = vmatpush1.msra.mxu1 %v5057_v40  ;;  %v5197_v17 = vld [vmem:[#allocation15 + $0x5d0] sm:$0xff]  ;;  %v5331_v40 = vld [vmem:[#allocation15 + $0x6c0] sm:$0xff] }
 0x545   :  { %5017 = vmatprep.subr.mxu0 %v7869_v60  ;;  %5151 = vmatprep.subr.mxu1 %v7869_v60 }
 0x546   :  { %5018 = vmatpush2.msra.mxu0 %v4952_v28  ;;  %5152 = vmatpush2.msra.mxu1 %v5086_v54  ;;  %v5196_v28 = vld [vmem:[#allocation15 + $0x5c8] sm:$0xff]  ;;  %v5330_v54 = vld [vmem:[#allocation15 + $0x6b8] sm:$0xff] }
 0x547   :  { %5019 = vmatprep.subr.mxu0 %v7869_v60  ;;  %5153 = vmatprep.subr.mxu1 %v7869_v60 }
 0x548   :  { %5020 = vmatpush2.msra.mxu0 %v4951_v10  ;;  %5154 = vmatpush2.msra.mxu1 %v5085_v29  ;;  %v5195_v10 = vld [vmem:[#allocation15 + $0x5c0] sm:$0xff]  ;;  %v5329_v29 = vld [vmem:[#allocation15 + $0x6b0] sm:$0xff] }
 0x549   :  { %5021 = vmatprep.subr.mxu0 %v7869_v60  ;;  %5155 = vmatprep.subr.mxu1 %v7869_v60 }
 0x54a   :  { %5022 = vmatpush2.msra.mxu0 %v4950_v5  ;;  %5156 = vmatpush2.msra.mxu1 %v5084_v42  ;;  %v5194_v5 = vld [vmem:[#allocation15 + $0x5b8] sm:$0xff]  ;;  %v5328_v42 = vld [vmem:[#allocation15 + $0x6a8] sm:$0xff] }
 0x54b   :  { %5023 = vmatprep.subr.mxu0 %v7869_v60  ;;  %5157 = vmatprep.subr.mxu1 %v7869_v60 }
 0x54c   :  { %5024 = vmatpush2.msra.mxu0 %v4949_v25  ;;  %5158 = vmatpush2.msra.mxu1 %v5083_v39  ;;  %v5193_v25 = vld [vmem:[#allocation15 + $0x5b0] sm:$0xff]  ;;  %v5327_v39 = vld [vmem:[#allocation15 + $0x6a0] sm:$0xff] }
 0x54d   :  { %5025 = vmatprep.subr.mxu0 %v7869_v60  ;;  %5159 = vmatprep.subr.mxu1 %v7869_v60 }
 0x54e   :  { %5026 = vmatpush2.msra.mxu0 %v4948_v59  ;;  %5160 = vmatpush2.msra.mxu1 %v5082_v19  ;;  %v5192_v59 = vld [vmem:[#allocation15 + $0x5a8] sm:$0xff]  ;;  %v5326_v19 = vld [vmem:[#allocation15 + $0x698] sm:$0xff] }
 0x54f   :  { %5027 = vmatprep.subr.mxu0 %v7869_v60  ;;  %5161 = vmatprep.subr.mxu1 %v7869_v60 }
 0x550   :  { %5028 = vmatpush2.msra.mxu0 %v4947_v62  ;;  %5162 = vmatpush2.msra.mxu1 %v5081_v63  ;;  %v5191_v62 = vld [vmem:[#allocation15 + $0x5a0] sm:$0xff]  ;;  %v5325_v63 = vld [vmem:[#allocation15 + $0x690] sm:$0xff] }
 0x551   :  { %5029 = vmatprep.subr.mxu0 %v7869_v60  ;;  %5163 = vmatprep.subr.mxu1 %v7869_v60 }
 0x552   :  { %5030 = vmatpush2.msra.mxu0 %v4946_v55  ;;  %5164 = vmatpush2.msra.mxu1 %v5080_v31  ;;  %v5220_v55 = vld [vmem:[#allocation15 + $0x688] sm:$0xff]  ;;  %v5354_v31 = vld [vmem:[#allocation15 + $0x778] sm:$0xff] }
 0x553   :  { %5031 = vmatprep.subr.mxu0 %v7869_v60  ;;  %5165 = vmatprep.subr.mxu1 %v7869_v60 }
 0x554   :  { %5032 = vmatpush2.msra.mxu0 %v4945_v56  ;;  %5166 = vmatpush2.msra.mxu1 %v5079_v32  ;;  %v5219_v56 = vld [vmem:[#allocation15 + $0x680] sm:$0xff]  ;;  %v5353_v32 = vld [vmem:[#allocation15 + $0x770] sm:$0xff] }
 0x555   :  { %5033 = vmatprep.subr.mxu0 %v7869_v60  ;;  %5167 = vmatprep.subr.mxu1 %v7869_v60 }
 0x556   :  { %5034 = vmatpush2.msra.mxu0 %v4944_v3  ;;  %5168 = vmatpush2.msra.mxu1 %v5078_v8  ;;  %v5352_v3 = vld [vmem:[#allocation15 + $0x768] sm:$0xff]  ;;  %v5217_v8 = vld [vmem:[#allocation15 + $0x670] sm:$0xff] }
 0x557   :  { %5035 = vmatprep.subr.mxu0 %v7869_v60  ;;  %5169 = vmatprep.subr.mxu1 %v7869_v60 }
 0x558   :  { %5036 = vmatpush2.msra.mxu0 %v4943_v16  ;;  %5170 = vmatpush2.msra.mxu1 %v5077_v21  ;;  %v5350_v16 = vld [vmem:[#allocation15 + $0x758] sm:$0xff]  ;;  %v5215_v21 = vld [vmem:[#allocation15 + $0x660] sm:$0xff] }
 0x559   :  { %5037 = vmatprep.subr.mxu0 %v7869_v60  ;;  %5171 = vmatprep.subr.mxu1 %v7869_v60 }
 0x55a   :  { %5038 = vmatpush2.msra.mxu0 %v4942_v43  ;;  %5172 = vmatpush2.msra.mxu1 %v5076_v27  ;;  %v5213_v43 = vld [vmem:[#allocation15 + $0x650] sm:$0xff]  ;;  %v5347_v27 = vld [vmem:[#allocation15 + $0x740] sm:$0xff] }
 0x55b   :  { %5039 = vmatprep.subr.mxu0 %v7869_v60  ;;  %5173 = vmatprep.subr.mxu1 %v7869_v60 }
 0x55c   :  { %5040 = vmatpush2.msra.mxu0 %v4941_v41  ;;  %5174 = vmatpush2.msra.mxu1 %v5075_v44  ;;  %v5212_v41 = vld [vmem:[#allocation15 + $0x648] sm:$0xff]  ;;  %v5346_v44 = vld [vmem:[#allocation15 + $0x738] sm:$0xff] }
 0x55d   :  { %5041 = vmatprep.subr.mxu0 %v7869_v60  ;;  %5175 = vmatprep.subr.mxu1 %v7869_v60 }
 0x55e   :  { %5042 = vmatpush2.msra.mxu0 %v4940_v37  ;;  %5176 = vmatpush2.msra.mxu1 %v5074_v30  ;;  %v5211_v37 = vld [vmem:[#allocation15 + $0x640] sm:$0xff]  ;;  %v5345_v30 = vld [vmem:[#allocation15 + $0x730] sm:$0xff] }
 0x55f   :  { %5043 = vmatprep.subr.mxu0 %v7869_v60  ;;  %5177 = vmatprep.subr.mxu1 %v7869_v60 }
 0x560   :  { %5044 = vmatpush2.msra.mxu0 %v4939_v58  ;;  %5178 = vmatpush2.msra.mxu1 %v5073_v46  ;;  %v5210_v58 = vld [vmem:[#allocation15 + $0x638] sm:$0xff]  ;;  %v5344_v46 = vld [vmem:[#allocation15 + $0x728] sm:$0xff] }
 0x561   :  { %5046 = vmatmul.mubr.f32.vlgmr.msra.gmra.mxu0 %v4970_v50  ;;  %5180 = vmatmul.mubr.f32.vlgmr.msra.gmra.mxu1 %v5104_v57  ;;  %v5208_v50 = vld [vmem:[#allocation15 + $0x628] sm:$0xff]  ;;  %v5342_v57 = vld [vmem:[#allocation15 + $0x718] sm:$0xff] }
 0x562   :  { %5249 = vmatprep.subr.mxu0 %v7869_v60  ;;  %5383 = vmatprep.subr.mxu1 %v7869_v60 }
 0x563   :  { %5250 = vmatpush1.msra.mxu0 %v5206_v61  ;;  %5745 = vmatprep.mubr.msk.f32.mxu0 %vm738_vm1, %v5245_v34  ;;  %v5207_v61 = vld [vmem:[#allocation15 + $0x620] sm:$0xff]  ;;  %v5341_v34 = vld [vmem:[#allocation15 + $0x710] sm:$0xff] }
 0x564   :  { %5384 = vmatpush1.msra.mxu1 %v5340_v47  ;;  %5746 = vmatprep.mubr.msk.f32.mxu1 %vm738_vm1, %v5379_v2  ;;  %v5238_v47 = vrot.slane %v7648_v20, %v7493_v4  ;;  %v5372_v2 = vrot.slane %v7651_v53, %v7493_v4  ;;  %v5474_v53 = vld [vmem:[#allocation18 + $0x58] sm:$0xff] }
 0x565   :  { %5251 = vmatprep.subr.mxu0 %v7869_v60  ;;  %5385 = vmatprep.subr.mxu1 %v7869_v60 }
 0x566   :  { %5252 = vmatpush1.msra.mxu0 %v5205_v9  ;;  %5386 = vmatpush1.msra.mxu1 %v5339_v12  ;;  %v5477_v9 = vld [vmem:[#allocation18 + $0x70] sm:$0xff]  ;;  %v5476_v12 = vld [vmem:[#allocation18 + $0x68] sm:$0xff] }
 0x567   :  { %5253 = vmatprep.subr.mxu0 %v7869_v60  ;;  %5387 = vmatprep.subr.mxu1 %v7869_v60 }
 0x568   :  { %5254 = vmatpush1.msra.mxu0 %v5204_v6  ;;  %5388 = vmatpush1.msra.mxu1 %v5338_v18 }
 0x569   :  { %5255 = vmatprep.subr.mxu0 %v7869_v60  ;;  %5389 = vmatprep.subr.mxu1 %v7869_v60 }
 0x56a   :  { %5256 = vmatpush1.msra.mxu0 %v5203_v36  ;;  %5390 = vmatpush1.msra.mxu1 %v5337_v51  ;;  %v5475_v36 = vld [vmem:[#allocation18 + $0x60] sm:$0xff] }
 0x56b   :  { %5257 = vmatprep.subr.mxu0 %v7869_v60  ;;  %5391 = vmatprep.subr.mxu1 %v7869_v60 }
 0x56c   :  { %5258 = vmatpush1.msra.mxu0 %v5202_v33  ;;  %5392 = vmatpush1.msra.mxu1 %v5336_v49  ;;  %v5473_v33 = vld [vmem:[#allocation18 + $0x50] sm:$0xff]  ;;  %v5472_v49 = vld [vmem:[#allocation18 + $0x48] sm:$0xff] }
 0x56d   :  { %5259 = vmatprep.subr.mxu0 %v7869_v60  ;;  %5393 = vmatprep.subr.mxu1 %v7869_v60 }
 0x56e   :  { %5260 = vmatpush1.msra.mxu0 %v5201_v7  ;;  %5394 = vmatpush1.msra.mxu1 %v5335_v52  ;;  %v5471_v7 = vld [vmem:[#allocation18 + $0x40] sm:$0xff]  ;;  %v5470_v52 = vld [vmem:[#allocation18 + $0x38] sm:$0xff] }
 0x56f   :  { %5261 = vmatprep.subr.mxu0 %v7869_v60  ;;  %5395 = vmatprep.subr.mxu1 %v7869_v60 }
 0x570   :  { %5262 = vmatpush1.msra.mxu0 %v5200_v26  ;;  %5396 = vmatpush1.msra.mxu1 %v5334_v45  ;;  %v5469_v26 = vld [vmem:[#allocation18 + $0x30] sm:$0xff]  ;;  %v5468_v45 = vld [vmem:[#allocation18 + $0x28] sm:$0xff] }
 0x571   :  { %5263 = vmatprep.subr.mxu0 %v7869_v60  ;;  %5397 = vmatprep.subr.mxu1 %v7869_v60 }
 0x572   :  { %5264 = vmatpush1.msra.mxu0 %v5199_v0  ;;  %5398 = vmatpush1.msra.mxu1 %v5333_v13  ;;  %v5467_v0 = vld [vmem:[#allocation18 + $0x20] sm:$0xff]  ;;  %v5466_v13 = vld [vmem:[#allocation18 + $0x18] sm:$0xff] }
 0x573   :  { %5265 = vmatprep.subr.mxu0 %v7869_v60  ;;  %5399 = vmatprep.subr.mxu1 %v7869_v60 }
 0x574   :  { %5266 = vmatpush1.msra.mxu0 %v5198_v15  ;;  %5400 = vmatpush1.msra.mxu1 %v5332_v38 }
 0x575   :  { %5267 = vmatprep.subr.mxu0 %v7869_v60  ;;  %5401 = vmatprep.subr.mxu1 %v7869_v60 }
 0x576   :  { %5268 = vmatpush1.msra.mxu0 %v5197_v17  ;;  %5402 = vmatpush1.msra.mxu1 %v5331_v40  ;;  %v5465_v40 = vld [vmem:[#allocation18 + $0x10] sm:$0xff] }
 0x577   :  { %5269 = vmatprep.subr.mxu0 %v7869_v60  ;;  %5403 = vmatprep.subr.mxu1 %v7869_v60 }
 0x578   :  { %5270 = vmatpush1.msra.mxu0 %v5196_v28  ;;  %5404 = vmatpush1.msra.mxu1 %v5330_v54 }
 0x579   :  { %5271 = vmatprep.subr.mxu0 %v7869_v60  ;;  %5405 = vmatprep.subr.mxu1 %v7869_v60 }
 0x57a   :  { %5272 = vmatpush1.msra.mxu0 %v5195_v10  ;;  %5406 = vmatpush1.msra.mxu1 %v5329_v29  ;;  %v5464_v29 = vld [vmem:[#allocation18 + $0x8] sm:$0xff] }
 0x57b   :  { %5273 = vmatprep.subr.mxu0 %v7869_v60  ;;  %5407 = vmatprep.subr.mxu1 %v7869_v60 }
 0x57c   :  { %5274 = vmatpush1.msra.mxu0 %v5194_v5  ;;  %5408 = vmatpush1.msra.mxu1 %v5328_v42  ;;  %v5463_v5 = vld [vmem:[#allocation18] sm:$0xff]  ;;  %v5574_v42 = vld [vmem:[#allocation21 + $0x70] sm:$0xff] }
 0x57d   :  { %5275 = vmatprep.subr.mxu0 %v7869_v60  ;;  %5409 = vmatprep.subr.mxu1 %v7869_v60 }
 0x57e   :  { %5276 = vmatpush1.msra.mxu0 %v5193_v25  ;;  %5410 = vmatpush1.msra.mxu1 %v5327_v39  ;;  %v5573_v25 = vld [vmem:[#allocation21 + $0x68] sm:$0xff]  ;;  %v5572_v39 = vld [vmem:[#allocation21 + $0x60] sm:$0xff] }
 0x57f   :  { %5277 = vmatprep.subr.mxu0 %v7869_v60  ;;  %5411 = vmatprep.subr.mxu1 %v7869_v60 }
 0x580   :  { %5278 = vmatpush1.msra.mxu0 %v5192_v59  ;;  %5412 = vmatpush1.msra.mxu1 %v5326_v19  ;;  %v5571_v59 = vld [vmem:[#allocation21 + $0x58] sm:$0xff]  ;;  %v5570_v19 = vld [vmem:[#allocation21 + $0x50] sm:$0xff] }
 0x581   :  { %5279 = vmatprep.subr.mxu0 %v7869_v60  ;;  %5413 = vmatprep.subr.mxu1 %v7869_v60 }
 0x582   :  { %5280 = vmatpush1.msra.mxu0 %v5191_v62  ;;  %5414 = vmatpush1.msra.mxu1 %v5325_v63  ;;  %v5569_v62 = vld [vmem:[#allocation21 + $0x48] sm:$0xff]  ;;  %v5568_v63 = vld [vmem:[#allocation21 + $0x40] sm:$0xff] }
 0x583   :  { %5285 = vmatprep.subr.mxu0 %v7869_v60  ;;  %5419 = vmatprep.subr.mxu1 %v7869_v60 }
 0x584   :  { %5286 = vmatpush2.msra.mxu0 %v5220_v55  ;;  %5420 = vmatpush2.msra.mxu1 %v5354_v31  ;;  %v5567_v55 = vld [vmem:[#allocation21 + $0x38] sm:$0xff]  ;;  %v5566_v31 = vld [vmem:[#allocation21 + $0x30] sm:$0xff] }
 0x585   :  { %5287 = vmatprep.subr.mxu0 %v7869_v60  ;;  %5421 = vmatprep.subr.mxu1 %v7869_v60 }
 0x586   :  { %5288 = vmatpush2.msra.mxu0 %v5219_v56  ;;  %5422 = vmatpush2.msra.mxu1 %v5353_v32  ;;  %v5565_v56 = vld [vmem:[#allocation21 + $0x28] sm:$0xff]  ;;  %v5564_v32 = vld [vmem:[#allocation21 + $0x20] sm:$0xff] }
 0x587   :  { %5289 = vmatprep.subr.mxu0 %v7869_v60  ;;  %5423 = vmatprep.subr.mxu1 %v7869_v60 }
 0x588   :  { %5290 = vmatpush2.msra.mxu0 %v5218_v1  ;;  %5424 = vmatpush2.msra.mxu1 %v5352_v3  ;;  %v5563_v1 = vld [vmem:[#allocation21 + $0x18] sm:$0xff] }
 0x589   :  { %5291 = vmatprep.subr.mxu0 %v7869_v60  ;;  %5425 = vmatprep.subr.mxu1 %v7869_v60 }
 0x58a   :  { %5292 = vmatpush2.msra.mxu0 %v5217_v8  ;;  %5426 = vmatpush2.msra.mxu1 %v5351_v11 }
 0x58b   :  { %5293 = vmatprep.subr.mxu0 %v7869_v60  ;;  %5427 = vmatprep.subr.mxu1 %v7869_v60 }
 0x58c   :  { %5294 = vmatpush2.msra.mxu0 %v5216_v14  ;;  %5428 = vmatpush2.msra.mxu1 %v5350_v16 }
 0x58d   :  { %5295 = vmatprep.subr.mxu0 %v7869_v60  ;;  %5429 = vmatprep.subr.mxu1 %v7869_v60 }
 0x58e   :  { %5296 = vmatpush2.msra.mxu0 %v5215_v21  ;;  %5430 = vmatpush2.msra.mxu1 %v5349_v24 }
 0x58f   :  { %5297 = vmatprep.subr.mxu0 %v7869_v60  ;;  %5431 = vmatprep.subr.mxu1 %v7869_v60 }
 0x590   :  { %5298 = vmatpush2.msra.mxu0 %v5214_v22  ;;  %5432 = vmatpush2.msra.mxu1 %v5348_v35 }
 0x591   :  { %5299 = vmatprep.subr.mxu0 %v7869_v60  ;;  %5433 = vmatprep.subr.mxu1 %v7869_v60 }
 0x592   :  { %5300 = vmatpush2.msra.mxu0 %v5213_v43  ;;  %5434 = vmatpush2.msra.mxu1 %v5347_v27  ;;  %v5747_v43 = vld [vmem:[#allocation16] ss:$0 sm:$0xff] }
 0x593   :  { %5301 = vmatprep.subr.mxu0 %v7869_v60  ;;  %5435 = vmatprep.subr.mxu1 %v7869_v60 }
 0x594   :  { %5302 = vmatpush2.msra.mxu0 %v5212_v41  ;;  %5436 = vmatpush2.msra.mxu1 %v5346_v44 }
 0x595   :  { %5303 = vmatprep.subr.mxu0 %v7869_v60  ;;  %5437 = vmatprep.subr.mxu1 %v7869_v60 }
 0x596   :  { %5304 = vmatpush2.msra.mxu0 %v5211_v37  ;;  %5438 = vmatpush2.msra.mxu1 %v5345_v30 }
 0x597   :  { %5305 = vmatprep.subr.mxu0 %v7869_v60  ;;  %5439 = vmatprep.subr.mxu1 %v7869_v60 }
 0x598   :  { %5306 = vmatpush2.msra.mxu0 %v5210_v58  ;;  %5440 = vmatpush2.msra.mxu1 %v5344_v46  ;;  %v5562_v58 = vld [vmem:[#allocation21 + $0x10] sm:$0xff]  ;;  %v5561_v46 = vld [vmem:[#allocation21 + $0x8] sm:$0xff] }
 0x599   :  { %5307 = vmatprep.subr.mxu0 %v7869_v60  ;;  %5441 = vmatprep.subr.mxu1 %v7869_v60 }
 0x59a   :  { %5308 = vmatpush2.msra.mxu0 %v5209_v48  ;;  %5442 = vmatpush2.msra.mxu1 %v5343_v23  ;;  %v5560_v48 = vld [vmem:[#allocation21] sm:$0xff]  ;;  %v5748_v23 = vld [vmem:[#allocation19] ss:$0 sm:$0xff] }
 0x59b   :  { %5309 = vmatprep.subr.mxu0 %v7869_v60  ;;  %5443 = vmatprep.subr.mxu1 %v7869_v60 }
 0x59c   :  { %5310 = vmatpush2.msra.mxu0 %v5208_v50  ;;  %5444 = vmatpush2.msra.mxu1 %v5342_v57 }
 0x59d   :  { %5311 = vmatprep.subr.mxu0 %v7869_v60  ;;  %5445 = vmatprep.subr.mxu1 %v7869_v60 }
 0x59e   :  { %5312 = vmatpush2.msra.mxu0 %v5207_v61  ;;  %5446 = vmatpush2.msra.mxu1 %v5341_v34 }
 0x59f   :  { %5314 = vmatmul.mubr.f32.vlgmr.msra.gmra.mxu0 %v5238_v47  ;;  %5448 = vmatmul.mubr.f32.vlgmr.msra.gmra.mxu1 %v5372_v2  ;;  %v5750_v47 = vld [vmem:[#allocation22] ss:$0 sm:$0xff] }
 0x5a0   :  { %5784 = vmatprep.subr.mxu0 %v7869_v60  ;;  %5817 = vmatprep.subr.mxu1 %v7869_v60 }
 0x5a1   :  { %5785 = vmatpush3.msra.mxu0 %v5477_v9  ;;  %5814 = vmatprep.mubr.msk.f32.mxu0 %vm6145_vm8, %v7869_v60 }
 0x5a2   :  { %5786 = vmatprep.subr.mxu0 %v7869_v60  ;;  %5847 = vmatprep.mubr.msk.f32.mxu1 %vm6145_vm8, %v7869_v60 }
 0x5a3   :  { %5787 = vmatpush3.msra.mxu0 %v5476_v12  ;;  %5818 = vmatpush3.msra.mxu1 %v5574_v42 }
 0x5a4   :  { %5788 = vmatprep.subr.mxu0 %v7869_v60  ;;  %5819 = vmatprep.subr.mxu1 %v7869_v60 }
 0x5a5   :  { %5789 = vmatpush3.msra.mxu0 %v5475_v36  ;;  %5820 = vmatpush3.msra.mxu1 %v5573_v25 }
 0x5a6   :  { %v4548_v6 = vpop.f32.mrf.mxu0  ;;  %v4646_v18 = vpop.f32.mrf.mxu1  ;;  %5790 = vmatprep.subr.mxu0 %v7869_v60  ;;  %5821 = vmatprep.subr.mxu1 %v7869_v60 }
 0x5a7   :  { %v4647_v20 = vadd.f32 %v4646_v18, %v4548_v6  ;;  %5791 = vmatpush3.msra.mxu0 %v5474_v53  ;;  %5822 = vmatpush3.msra.mxu1 %v5572_v39 }
 0x5a8   :  { %v4550_v51 = vpop.f32.mrf.mxu0  ;;  %v4648_v4 = vpop.f32.mrf.mxu1  ;;  %5792 = vmatprep.subr.mxu0 %v7869_v60  ;;  %5823 = vmatprep.subr.mxu1 %v7869_v60 }
 0x5a9   :  { %5793 = vmatpush3.msra.mxu0 %v5473_v33  ;;  %5824 = vmatpush3.msra.mxu1 %v5571_v59 }
 0x5aa   :  { %5794 = vmatprep.subr.mxu0 %v7869_v60  ;;  %5825 = vmatprep.subr.mxu1 %v7869_v60 }
 0x5ab   :  { %5795 = vmatpush3.msra.mxu0 %v5472_v49  ;;  %5826 = vmatpush3.msra.mxu1 %v5570_v19 }
 0x5ac   :  { %5796 = vmatprep.subr.mxu0 %v7869_v60  ;;  %5827 = vmatprep.subr.mxu1 %v7869_v60 }
 0x5ad   :  { %5797 = vmatpush3.msra.mxu0 %v5471_v7  ;;  %5828 = vmatpush3.msra.mxu1 %v5569_v62 }
 0x5ae   :  { %5798 = vmatprep.subr.mxu0 %v7869_v60  ;;  %5829 = vmatprep.subr.mxu1 %v7869_v60 }
 0x5af   :  { %5799 = vmatpush3.msra.mxu0 %v5470_v52  ;;  %5830 = vmatpush3.msra.mxu1 %v5568_v63 }
 0x5b0   :  { %5800 = vmatprep.subr.mxu0 %v7869_v60  ;;  %5831 = vmatprep.subr.mxu1 %v7869_v60 }
 0x5b1   :  { %5801 = vmatpush3.msra.mxu0 %v5469_v26  ;;  %5832 = vmatpush3.msra.mxu1 %v5567_v55 }
 0x5b2   :  { %5802 = vmatprep.subr.mxu0 %v7869_v60  ;;  %5833 = vmatprep.subr.mxu1 %v7869_v60 }
 0x5b3   :  { %5803 = vmatpush3.msra.mxu0 %v5468_v45  ;;  %5834 = vmatpush3.msra.mxu1 %v5566_v31 }
 0x5b4   :  { %5804 = vmatprep.subr.mxu0 %v7869_v60  ;;  %5835 = vmatprep.subr.mxu1 %v7869_v60 }
 0x5b5   :  { %5805 = vmatpush3.msra.mxu0 %v5467_v0  ;;  %5836 = vmatpush3.msra.mxu1 %v5565_v56 }
 0x5b6   :  { %5806 = vmatprep.subr.mxu0 %v7869_v60  ;;  %5837 = vmatprep.subr.mxu1 %v7869_v60 }
 0x5b7   :  { %5807 = vmatpush3.msra.mxu0 %v5466_v13  ;;  %5838 = vmatpush3.msra.mxu1 %v5564_v32 }
 0x5b8   :  { %5808 = vmatprep.subr.mxu0 %v7869_v60  ;;  %5839 = vmatprep.subr.mxu1 %v7869_v60 }
 0x5b9   :  { %5809 = vmatpush3.msra.mxu0 %v5465_v40  ;;  %5840 = vmatpush3.msra.mxu1 %v5563_v1 }
 0x5ba   :  { %5810 = vmatprep.subr.mxu0 %v7869_v60  ;;  %5841 = vmatprep.subr.mxu1 %v7869_v60 }
 0x5bb   :  { %5811 = vmatpush3.msra.mxu0 %v5464_v29  ;;  %5842 = vmatpush3.msra.mxu1 %v5562_v58 }
 0x5bc   :  { %5812 = vmatprep.subr.mxu0 %v7869_v60  ;;  %5843 = vmatprep.subr.mxu1 %v7869_v60 }
 0x5bd   :  { %5813 = vmatpush3.msra.mxu0 %v5463_v5  ;;  %5844 = vmatpush3.msra.mxu1 %v5561_v46 }
 0x5be   :  { %5845 = vmatprep.subr.mxu1 %v7869_v60 }
 0x5bf   :  { %5846 = vmatpush3.msra.mxu1 %v5560_v48 }
 0x5e3   :  { %v4779_v15 = vpop.f32.mrf.mxu0  ;;  %v4913_v38 = vpop.f32.mrf.mxu1 }
 0x5e4   :  { %v4783_v17 = vadd.f32 %v4779_v15, %v4647_v20 }
 0x5e5   :  { %v4781_v28 = vpop.f32.mrf.mxu0  ;;  %v4915_v54 = vpop.f32.mrf.mxu1 }
 0x5e6   :  { %v4917_v10 = vadd.f32 %v4913_v38, %v4783_v17 }
 0x621   :  { %v5047_v3 = vpop.f32.mrf.mxu0  ;;  %v5181_v8 = vpop.f32.mrf.mxu1 }
 0x622   :  { %v5051_v16 = vadd.f32 %v5047_v3, %v4917_v10 }
 0x623   :  { %v5049_v11 = vpop.f32.mrf.mxu0  ;;  %v5183_v14 = vpop.f32.mrf.mxu1 }
 0x624   :  { %v5185_v21 = vadd.f32 %v5181_v8, %v5051_v16 }
 0x65f   :  { %v5315_v24 = vpop.f32.mrf.mxu0  ;;  %v5449_v22 = vpop.f32.mrf.mxu1 }
 0x660   :  { %v5319_v35 = vadd.f32 %v5315_v24, %v5185_v21 }
 0x661   :  { %v5317_v27 = vpop.f32.mrf.mxu0  ;;  %v5451_v41 = vpop.f32.mrf.mxu1 }
 0x662   :  { %v5453_v44 = vadd.f32 %v5449_v22, %v5319_v35 }
 0x664   :  { %v5461_v37 = vadd.f32 %v5747_v43, %v5453_v44 }
 0x666   :  { %v5462_v30 = vmax.f32 %v5461_v37, 0.0 }
 0x668   :  { %5815 = vmatmul.mubr.msk.f32.vlgmr.msra.gmra.mxu0 %vm5485_vm9, %v5462_v30 }
 0x728   :  { %v5555_v50 = vpop.f32.mrf.mxu0 }
 0x729   :  { %v5556_v57 = vadd.f32 %v5748_v23, %v5555_v50 }
 0x72a   :  { %v5816_v61 = vpop.f32.mrf.mxu0 }
 0x72b   :  { %v5559_v34 = vmax.f32 %v5556_v57, 0.0 }
 0x72d   :  { %5848 = vmatmul.mubr.msk.f32.vlgmr.msra.gmra.mxu1 %vm5485_vm9, %v5559_v34 }
 0x7ed   :  { %v5651_v2 = vpop.f32.mrf.mxu1 }
 0x7ee   :  { %v5652_v9 = vadd.f32 %v5750_v47, %v5651_v2 }
 0x7ef   :  { %v5849_v12 = vpop.f32.mrf.mxu1 }
 0x7f0   :  { %5655 = vst [vmem:[%s7785_s13] sm:$0x3] %v5652_v9 }
 0x7f1   :  { %5660 = vsyncpa [#allocation6], 1 }
 0x7f2   :  { %5661 = vsyncpa [#allocation8], 1 }
 0x7f3   :  { %5662 = vsyncpa [#allocation11], 1 }
 0x7f4   :  { %5663 = vsyncpa [#allocation14], 1 }
 0x7f5   :  { %5664 = vsyncpa [#allocation17], 1 }
 0x7f6   :  { %5665 = vsyncpa [#allocation20], 1 }
 0x7f7   :  { %5666 = vsyncpa [#allocation23], 1 }

</bundles_post_ra>
